<compile_context>
chip_gen: v6e
topology: v6e:2x2x1
jax: 0.10.0
libtpu: 0.0.40
codegen_flags: <defaults>
</compile_context>

<pallas_src>
import math

import jax
import jax.numpy as jnp
from jax.experimental import pallas as pl
from jax.experimental.pallas import tpu as pltpu


def _round_up(n: int, m: int) -> int:
    return (n + m - 1) // m * m


# ---------------------------------------------------------------------------
# Kernel
# ---------------------------------------------------------------------------
def binary_vae_kernel(
    x_ref, eps_ref,
    w1_ref, b1_ref,
    w2_ref, b2_ref,          # fused fc21 || fc22 -> (Hp, 2*Lp)
    w3_ref, b3_ref,
    w4_ref, b4_ref,
    recon_ref, zms_ref,      # recon: (TB, Dp) bf16; zms: (TB, 3*Lp) f32 = [z | mu | std]
):
    lp = eps_ref.shape[-1]

    x = x_ref[...]            # (TB, Dp) bf16 (only feeds the MXU)
    eps = eps_ref[...]        # (TB, Lp) f32

    # ---- encode ----
    h1 = jnp.maximum(
        jnp.dot(x, w1_ref[...], preferred_element_type=jnp.float32)
        + b1_ref[...],
        0.0,
    )                                                     # (TB, Hp) f32
    enc = (
        jnp.dot(h1.astype(jnp.bfloat16), w2_ref[...],
                preferred_element_type=jnp.float32)
        + b2_ref[...]
    )                                                     # (TB, 2*Lp) f32
    mu = enc[:, :lp]                                      # lane-aligned static slices
    std = jnp.exp(enc[:, lp:])                            # module: std = exp(fc22(h1))

    # ---- reparameterize (training mode: z = mu + eps * std) ----
    z = eps * std + mu

    # ---- decode ----
    h3 = jnp.maximum(
        jnp.dot(z.astype(jnp.bfloat16), w3_ref[...],
                preferred_element_type=jnp.float32)
        + b3_ref[...],
        0.0,
    )                                                     # (TB, Hp) f32
    logits = (
        jnp.dot(h3.astype(jnp.bfloat16), w4_ref[...],
                preferred_element_type=jnp.float32)
        + b4_ref[...]
    )                                                     # (TB, Dp) f32

    # bf16 writeback halves the dominant HBM stream on a mem-bound kernel.
    recon_ref[...] = jax.nn.sigmoid(logits).astype(recon_ref.dtype)
    # Single lane-dense (TB, 3*Lp) store instead of three 128-lane stores.
    zms_ref[...] = jnp.concatenate([z, mu, std], axis=-1)


# ---------------------------------------------------------------------------
# Parameter packing: pad to 128 multiples, fuse encoder heads, cast weights.
# ---------------------------------------------------------------------------
def pack_params(params):
    D, H = params["w1"].shape
    L = params["w21"].shape[1]
    Dp, Hp, Lp = _round_up(D, 128), _round_up(H, 128), _round_up(L, 128)

    def pad_w(w, rows, cols):
        return jnp.pad(w, ((0, rows - w.shape[0]), (0, cols - w.shape[1])))

    def pad_b(b, cols):
        return jnp.pad(b, ((0, 0), (0, cols - b.shape[1])))

    w2 = jnp.concatenate(
        [pad_w(params["w21"], Hp, Lp), pad_w(params["w22"], Hp, Lp)], axis=1)
    b2 = jnp.concatenate(
        [pad_b(params["b21"], Lp), pad_b(params["b22"], Lp)], axis=1)

    packed = dict(
        w1=pad_w(params["w1"], Dp, Hp).astype(jnp.bfloat16),
        b1=pad_b(params["b1"], Hp).astype(jnp.float32),
        w2=w2.astype(jnp.bfloat16),
        b2=b2.astype(jnp.float32),
        w3=pad_w(params["w3"], Lp, Hp).astype(jnp.bfloat16),
        b3=pad_b(params["b3"], Hp).astype(jnp.float32),
        w4=pad_w(params["w4"], Hp, Dp).astype(jnp.bfloat16),
        b4=pad_b(params["b4"], Dp).astype(jnp.float32),
    )
    dims = dict(D=D, H=H, L=L, Dp=Dp, Hp=Hp, Lp=Lp)
    return packed, dims


# ---------------------------------------------------------------------------
# Wrapper
# ---------------------------------------------------------------------------
def binary_vae_forward(x, eps, params, *, block_batch=512):
    """x: (B, data_size) f32, eps: (B, latent_dim) f32 -> (recon, z, mu, std).

    recon is returned in bfloat16 (sigmoid outputs tolerate bf16 and this
    halves the dominant HBM writeback stream); z/mu/std are float32.
    """
    packed, dims = pack_params(params)
    D, L = dims["D"], dims["L"]
    Dp, Hp, Lp = dims["Dp"], dims["Hp"], dims["Lp"]

    B = x.shape[0]

    # ---- batch-tile selection ----------------------------------------------
    # Big tiles amortize per-grid-step overhead (mem-bound kernel), but keep
    # at least 2 grid steps when the batch allows it so v7x's two TensorCores
    # (dimension_semantics=("parallel",)) both get work.
    TB = max(128, _round_up(int(block_batch), 128))
    Bp128 = _round_up(B, 128)
    if Bp128 >= 256:
        TB = min(TB, _round_up(Bp128 // 2, 128))
    else:
        TB = min(TB, Bp128)
    Bp = _round_up(B, TB)
    grid = (Bp // TB,)

    # Pad batch/features. x only feeds the MXU -> bf16; eps participates in
    # the f32 VPU reparameterization -> keep f32.
    x_p = jnp.pad(x, ((0, Bp - B), (0, Dp - D))).astype(jnp.bfloat16)
    eps_p = jnp.pad(eps, ((0, Bp - B), (0, Lp - L))).astype(jnp.float32)

    def batch_spec(feat):
        return pl.BlockSpec((TB, feat), lambda i: (i, 0))

    def resident(arr):   # weights/biases: same block every step => VMEM-resident
        return pl.BlockSpec(arr.shape, lambda i: (0, 0))

    args = (
        x_p, eps_p,
        packed["w1"], packed["b1"],
        packed["w2"], packed["b2"],
        packed["w3"], packed["b3"],
        packed["w4"], packed["b4"],
    )

    in_specs = [
        batch_spec(Dp),            # x
        batch_spec(Lp),            # eps
        resident(packed["w1"]), resident(packed["b1"]),
        resident(packed["w2"]), resident(packed["b2"]),
        resident(packed["w3"]), resident(packed["b3"]),
        resident(packed["w4"]), resident(packed["b4"]),
    ]
    out_specs = (
        batch_spec(Dp),            # recon (bf16)
        batch_spec(3 * Lp),        # fused [z | mu | std] slab (f32)
    )
    out_shapes = (
        jax.ShapeDtypeStruct((Bp, Dp), jnp.bfloat16),
        jax.ShapeDtypeStruct((Bp, 3 * Lp), jnp.float32),
    )

    def nbytes(shape, dtype):
        return math.prod(shape) * jnp.dtype(dtype).itemsize

    flops = 2 * Bp * (Dp * Hp + Hp * (2 * Lp) + Lp * Hp + Hp * Dp)
    transcendentals = Bp * (Lp + Dp)                       # exp + sigmoid
    bytes_accessed = (
        sum(nbytes(a.shape, a.dtype) for a in args)
        + sum(nbytes(s.shape, s.dtype) for s in out_shapes)
    )

    recon_p, zms_p = pl.pallas_call(
        binary_vae_kernel,
        out_shape=out_shapes,
        grid=grid,
        in_specs=in_specs,
        out_specs=out_specs,
        compiler_params=pltpu.CompilerParams(
            # Batch tiles are independent -> megacore (v7x) splits them.
            dimension_semantics=("parallel",),
            # Above the 16 MiB (v5e) / 32 MiB (v6e, v7x) scoped defaults,
            # below v7x's 64 MiB physical VMEM; ample for TB <= 1024 here.
            vmem_limit_bytes=48 * 1024 * 1024,
        ),
        cost_estimate=pl.CostEstimate(
            flops=flops,
            transcendentals=transcendentals,
            bytes_accessed=bytes_accessed,
        ),
    )(*args)

    # Strip batch / feature padding and split the fused slab.
    recon = recon_p[:B, :D]
    z = zms_p[:B, 0 * Lp:0 * Lp + L]
    mu = zms_p[:B, 1 * Lp:1 * Lp + L]
    std = zms_p[:B, 2 * Lp:2 * Lp + L]
    return recon, z, mu, std


# ---------------------------------------------------------------------------
# References (for verification only)
# ---------------------------------------------------------------------------
def binary_vae_reference_packed(x, eps, packed, dims):
    """Pure-JAX mirror of the kernel math (same bf16 weights, f32 accum)."""
    D, L, Dp, Lp = dims["D"], dims["L"], dims["Dp"], dims["Lp"]
    x_p = jnp.pad(x, ((0, 0), (0, Dp - D))).astype(jnp.bfloat16)
    eps_p = jnp.pad(eps, ((0, 0), (0, Lp - L))).astype(jnp.float32)

    h1 = jnp.maximum(
        jnp.dot(x_p, packed["w1"], preferred_element_type=jnp.float32)
        + packed["b1"], 0.0)
    enc = jnp.dot(h1.astype(jnp.bfloat16), packed["w2"],
                  preferred_element_type=jnp.float32) + packed["b2"]
    mu = enc[:, :Lp]
    std = jnp.exp(enc[:, Lp:])
    z = eps_p * std + mu
    h3 = jnp.maximum(
        jnp.dot(z.astype(jnp.bfloat16), packed["w3"],
                preferred_element_type=jnp.float32) + packed["b3"], 0.0)
    recon = jax.nn.sigmoid(
        jnp.dot(h3.astype(jnp.bfloat16), packed["w4"],
                preferred_element_type=jnp.float32) + packed["b4"])
    return recon[:, :D], z[:, :L], mu[:, :L], std[:, :L]


def binary_vae_reference_f32(x, eps, params):
    """Full-precision module semantics (for a loose sanity check)."""
    h1 = jnp.maximum(x @ params["w1"] + params["b1"], 0.0)
    mu = h1 @ params["w21"] + params["b21"]
    std = jnp.exp(h1 @ params["w22"] + params["b22"])
    z = eps * std + mu
    h3 = jnp.maximum(z @ params["w3"] + params["b3"], 0.0)
    recon = jax.nn.sigmoid(h3 @ params["w4"] + params["b4"])
    return recon, z, mu, std


def init_params(key, data_size, hidden_dim, latent_dim):
    """Deterministic synthetic init; weights stored as (in, out)."""
    ks = jax.random.split(key, 10)

    def lin(kw, kb, fan_in, fan_out):
        bound = 1.0 / jnp.sqrt(fan_in)
        w = jax.random.uniform(kw, (fan_in, fan_out), jnp.float32, -bound, bound)
        b = jax.random.uniform(kb, (1, fan_out), jnp.float32, -bound, bound)
        return w, b

    w1, b1 = lin(ks[0], ks[1], data_size, hidden_dim)
    w21, b21 = lin(ks[2], ks[3], hidden_dim, latent_dim)
    w22, b22 = lin(ks[4], ks[5], hidden_dim, latent_dim)
    w3, b3 = lin(ks[6], ks[7], latent_dim, hidden_dim)
    w4, b4 = lin(ks[8], ks[9], hidden_dim, data_size)
    return dict(
        w1=w1, b1=b1, w21=w21, b21=b21, w22=w22, b22=b22,
        w3=w3, b3=b3, w4=w4, b4=b4,
    )


if __name__ == "__main__":
    # Module-default feature shapes (data_size=784, hidden=100, latent=40),
    # batch large enough to exercise the default TB=512 tile with a 2-step
    # parallel grid.
    batch = 1024
    data_size = 784
    hidden_dim = 100
    latent_dim = 40

    key = jax.random.PRNGKey(0)
    k_x, k_eps, k_p = jax.random.split(key, 3)

    # Binary-ish input (Bernoulli-likelihood VAE), flattened as x.view(-1, D).
    x = (jax.random.uniform(k_x, (batch, data_size)) > 0.5).astype(jnp.float32)
    eps = jax.random.normal(k_eps, (batch, latent_dim), jnp.float32)

    params = init_params(k_p, data_size, hidden_dim, latent_dim)

    recon_x, z, mu, std = binary_vae_forward(x, eps, params, block_batch=512)
    jax.block_until_ready((recon_x, z, mu, std))
    recon_f32 = recon_x.astype(jnp.float32)

    # Tight check against a reference using the exact same bf16 weights and
    # f32 accumulation (differences: accumulation order / EUP; recon also
    # carries one extra bf16 rounding from the bf16 writeback).
    packed, dims = pack_params(params)
    r_ref, z_ref, mu_ref, std_ref = binary_vae_reference_packed(x, eps, packed, dims)
    assert jnp.allclose(recon_f32, r_ref, rtol=1e-2, atol=1e-2), "recon mismatch (bf16 ref)"
    assert jnp.allclose(z, z_ref, rtol=1e-3, atol=1e-3), "z mismatch (bf16 ref)"
    assert jnp.allclose(mu, mu_ref, rtol=1e-3, atol=1e-3), "mu mismatch (bf16 ref)"
    assert jnp.allclose(std, std_ref, rtol=1e-3, atol=1e-3), "std mismatch (bf16 ref)"

    # Loose sanity check against full-f32 module semantics (bf16 weight /
    # activation rounding is the only source of difference).
    r32, z32, mu32, std32 = binary_vae_reference_f32(x, eps, params)
    assert jnp.allclose(recon_f32, r32, rtol=5e-2, atol=5e-2), "recon mismatch (f32 ref)"
    assert jnp.allclose(z, z32, rtol=5e-2, atol=5e-2), "z mismatch (f32 ref)"
    assert jnp.allclose(mu, mu32, rtol=5e-2, atol=5e-2), "mu mismatch (f32 ref)"
    assert jnp.allclose(std, std32, rtol=5e-2, atol=5e-2), "std mismatch (f32 ref)"

    print("KERNEL_OK")
</pallas_src>

<mosaic_0001>
module attributes {stable_mosaic.version = 11 : i64} {
  func.func @binary_vae_kernel(%arg0: i32, %arg1: memref<512x896xbf16, #tpu.memory_space<vmem>>, %arg2: memref<512x128xf32, #tpu.memory_space<vmem>>, %arg3: memref<896x128xbf16, #tpu.memory_space<vmem>>, %arg4: memref<1x128xf32, #tpu.memory_space<vmem>>, %arg5: memref<128x256xbf16, #tpu.memory_space<vmem>>, %arg6: memref<1x256xf32, #tpu.memory_space<vmem>>, %arg7: memref<128x128xbf16, #tpu.memory_space<vmem>>, %arg8: memref<1x128xf32, #tpu.memory_space<vmem>>, %arg9: memref<128x896xbf16, #tpu.memory_space<vmem>>, %arg10: memref<1x896xf32, #tpu.memory_space<vmem>>, %arg11: memref<512x896xbf16, #tpu.memory_space<vmem>>, %arg12: memref<512x384xf32, #tpu.memory_space<vmem>>) attributes {dimension_semantics = [#tpu.dimension_semantics<parallel>], iteration_bounds = array<i64: 2>, scalar_prefetch = 0 : i64, scratch_operands = 0 : i64, tpu.core_type = #tpu.core_type<tc>, window_params = [{transform_indices = @transform_0, window_bounds = array<i64: 512, 896>}, {transform_indices = @transform_1, window_bounds = array<i64: 512, 128>}, {pipeline_mode = #tpu.pipeline_mode<synchronous>, transform_indices = @transform_2, window_bounds = array<i64: 896, 128>}, {pipeline_mode = #tpu.pipeline_mode<synchronous>, transform_indices = @transform_3, window_bounds = array<i64: 1, 128>}, {pipeline_mode = #tpu.pipeline_mode<synchronous>, transform_indices = @transform_4, window_bounds = array<i64: 128, 256>}, {pipeline_mode = #tpu.pipeline_mode<synchronous>, transform_indices = @transform_5, window_bounds = array<i64: 1, 256>}, {pipeline_mode = #tpu.pipeline_mode<synchronous>, transform_indices = @transform_6, window_bounds = array<i64: 128, 128>}, {pipeline_mode = #tpu.pipeline_mode<synchronous>, transform_indices = @transform_7, window_bounds = array<i64: 1, 128>}, {pipeline_mode = #tpu.pipeline_mode<synchronous>, transform_indices = @transform_8, window_bounds = array<i64: 128, 896>}, {pipeline_mode = #tpu.pipeline_mode<synchronous>, transform_indices = @transform_9, window_bounds = array<i64: 1, 896>}, {transform_indices = @transform_10, window_bounds = array<i64: 512, 896>}, {transform_indices = @transform_11, window_bounds = array<i64: 512, 384>}]} {
    %c0 = arith.constant 0 : index
    %c0_0 = arith.constant 0 : index
    %0 = vector.load %arg1[%c0, %c0_0] : memref<512x896xbf16, #tpu.memory_space<vmem>>, vector<512x896xbf16>
    %c0_1 = arith.constant 0 : index
    %c0_2 = arith.constant 0 : index
    %1 = vector.load %arg2[%c0_1, %c0_2] : memref<512x128xf32, #tpu.memory_space<vmem>>, vector<512x128xf32>
    %c0_3 = arith.constant 0 : index
    %c0_4 = arith.constant 0 : index
    %2 = vector.load %arg3[%c0_3, %c0_4] : memref<896x128xbf16, #tpu.memory_space<vmem>>, vector<896x128xbf16>
    %cst = arith.constant dense<0.000000e+00> : vector<512x128xf32>
    %3 = tpu.matmul %0, %2, %cst {dimension_numbers = #tpu.dot_dimension_numbers<[1], [0], [0], [1], [0, 0, 1, 1], [], []>} : vector<512x896xbf16>, vector<896x128xbf16>, vector<512x128xf32> -> vector<512x128xf32>
    %c0_5 = arith.constant 0 : index
    %c0_6 = arith.constant 0 : index
    %4 = vector.load %arg4[%c0_5, %c0_6] : memref<1x128xf32, #tpu.memory_space<vmem>>, vector<1x128xf32>
    %5 = vector.broadcast %4 : vector<1x128xf32> to vector<512x128xf32>
    %6 = arith.addf %3, %5 : vector<512x128xf32>
    %cst_7 = arith.constant 0.000000e+00 : f32
    %7 = vector.broadcast %cst_7 : f32 to vector<512x128xf32>
    %8 = arith.maximumf %6, %7 : vector<512x128xf32>
    %9 = arith.truncf %8 : vector<512x128xf32> to vector<512x128xbf16>
    %c0_8 = arith.constant 0 : index
    %c0_9 = arith.constant 0 : index
    %10 = vector.load %arg5[%c0_8, %c0_9] : memref<128x256xbf16, #tpu.memory_space<vmem>>, vector<128x256xbf16>
    %cst_10 = arith.constant dense<0.000000e+00> : vector<512x256xf32>
    %11 = tpu.matmul %9, %10, %cst_10 {dimension_numbers = #tpu.dot_dimension_numbers<[1], [0], [0], [1], [0, 0, 1, 1], [], []>} : vector<512x128xbf16>, vector<128x256xbf16>, vector<512x256xf32> -> vector<512x256xf32>
    %c0_11 = arith.constant 0 : index
    %c0_12 = arith.constant 0 : index
    %12 = vector.load %arg6[%c0_11, %c0_12] : memref<1x256xf32, #tpu.memory_space<vmem>>, vector<1x256xf32>
    %13 = vector.broadcast %12 : vector<1x256xf32> to vector<512x256xf32>
    %14 = arith.addf %11, %13 : vector<512x256xf32>
    %15 = vector.extract_strided_slice %14 {offsets = [0, 0], sizes = [512, 128], strides = [1, 1]} : vector<512x256xf32> to vector<512x128xf32>
    %16 = vector.extract_strided_slice %14 {offsets = [0, 128], sizes = [512, 128], strides = [1, 1]} : vector<512x256xf32> to vector<512x128xf32>
    %17 = math.exp %16 : vector<512x128xf32>
    %18 = arith.mulf %1, %17 : vector<512x128xf32>
    %19 = arith.addf %18, %15 : vector<512x128xf32>
    %20 = arith.truncf %19 : vector<512x128xf32> to vector<512x128xbf16>
    %c0_13 = arith.constant 0 : index
    %c0_14 = arith.constant 0 : index
    %21 = vector.load %arg7[%c0_13, %c0_14] : memref<128x128xbf16, #tpu.memory_space<vmem>>, vector<128x128xbf16>
    %cst_15 = arith.constant dense<0.000000e+00> : vector<512x128xf32>
    %22 = tpu.matmul %20, %21, %cst_15 {dimension_numbers = #tpu.dot_dimension_numbers<[1], [0], [0], [1], [0, 0, 1, 1], [], []>} : vector<512x128xbf16>, vector<128x128xbf16>, vector<512x128xf32> -> vector<512x128xf32>
    %c0_16 = arith.constant 0 : index
    %c0_17 = arith.constant 0 : index
    %23 = vector.load %arg8[%c0_16, %c0_17] : memref<1x128xf32, #tpu.memory_space<vmem>>, vector<1x128xf32>
    %24 = vector.broadcast %23 : vector<1x128xf32> to vector<512x128xf32>
    %25 = arith.addf %22, %24 : vector<512x128xf32>
    %cst_18 = arith.constant 0.000000e+00 : f32
    %26 = vector.broadcast %cst_18 : f32 to vector<512x128xf32>
    %27 = arith.maximumf %25, %26 : vector<512x128xf32>
    %28 = arith.truncf %27 : vector<512x128xf32> to vector<512x128xbf16>
    %c0_19 = arith.constant 0 : index
    %c0_20 = arith.constant 0 : index
    %29 = vector.load %arg9[%c0_19, %c0_20] : memref<128x896xbf16, #tpu.memory_space<vmem>>, vector<128x896xbf16>
    %cst_21 = arith.constant dense<0.000000e+00> : vector<512x896xf32>
    %30 = tpu.matmul %28, %29, %cst_21 {dimension_numbers = #tpu.dot_dimension_numbers<[1], [0], [0], [1], [0, 0, 1, 1], [], []>} : vector<512x128xbf16>, vector<128x896xbf16>, vector<512x896xf32> -> vector<512x896xf32>
    %c0_22 = arith.constant 0 : index
    %c0_23 = arith.constant 0 : index
    %31 = vector.load %arg10[%c0_22, %c0_23] : memref<1x896xf32, #tpu.memory_space<vmem>>, vector<1x896xf32>
    %32 = vector.broadcast %31 : vector<1x896xf32> to vector<512x896xf32>
    %33 = arith.addf %30, %32 : vector<512x896xf32>
    %34 = arith.negf %33 : vector<512x896xf32>
    %35 = math.exp %34 : vector<512x896xf32>
    %cst_24 = arith.constant 1.000000e+00 : f32
    %36 = vector.broadcast %cst_24 : f32 to vector<512x896xf32>
    %37 = arith.addf %36, %35 : vector<512x896xf32>
    %38 = arith.divf %36, %37 : vector<512x896xf32>
    %39 = arith.truncf %38 : vector<512x896xf32> to vector<512x896xbf16>
    %c0_25 = arith.constant 0 : index
    %c0_26 = arith.constant 0 : index
    %40 = vector.load %arg11[%c0_25, %c0_26] : memref<512x896xbf16, #tpu.memory_space<vmem>>, vector<512x896xbf16>
    tpu.vector_store %arg11[%c0_25, %c0_26], %39 {strides = array<i32>} : memref<512x896xbf16, #tpu.memory_space<vmem>>, vector<512x896xbf16>,
    %41 = tpu.concatenate %19, %15, %17 in 1 : vector<512x128xf32>, vector<512x128xf32>, vector<512x128xf32> -> vector<512x384xf32>
    %c0_27 = arith.constant 0 : index
    %c0_28 = arith.constant 0 : index
    %42 = vector.load %arg12[%c0_27, %c0_28] : memref<512x384xf32, #tpu.memory_space<vmem>>, vector<512x384xf32>
    tpu.vector_store %arg12[%c0_27, %c0_28], %41 {strides = array<i32>} : memref<512x384xf32, #tpu.memory_space<vmem>>, vector<512x384xf32>,
    return
  }
  func.func @transform_0(%arg0: i32) -> (i32, i32) {
    %c0_i32 = arith.constant 0 : i32
    %c0_i32_0 = arith.constant 0 : i32
    return %arg0, %c0_i32 : i32, i32
  }
  func.func @transform_1(%arg0: i32) -> (i32, i32) {
    %c0_i32 = arith.constant 0 : i32
    %c0_i32_0 = arith.constant 0 : i32
    return %arg0, %c0_i32 : i32, i32
  }
  func.func @transform_2(%arg0: i32) -> (i32, i32) {
    %c0_i32 = arith.constant 0 : i32
    %c0_i32_0 = arith.constant 0 : i32
    %c0_i32_1 = arith.constant 0 : i32
    return %c0_i32, %c0_i32_0 : i32, i32
  }
  func.func @transform_3(%arg0: i32) -> (i32, i32) {
    %c0_i32 = arith.constant 0 : i32
    %c0_i32_0 = arith.constant 0 : i32
    %c0_i32_1 = arith.constant 0 : i32
    return %c0_i32, %c0_i32_0 : i32, i32
  }
  func.func @transform_4(%arg0: i32) -> (i32, i32) {
    %c0_i32 = arith.constant 0 : i32
    %c0_i32_0 = arith.constant 0 : i32
    %c0_i32_1 = arith.constant 0 : i32
    return %c0_i32, %c0_i32_0 : i32, i32
  }
  func.func @transform_5(%arg0: i32) -> (i32, i32) {
    %c0_i32 = arith.constant 0 : i32
    %c0_i32_0 = arith.constant 0 : i32
    %c0_i32_1 = arith.constant 0 : i32
    return %c0_i32, %c0_i32_0 : i32, i32
  }
  func.func @transform_6(%arg0: i32) -> (i32, i32) {
    %c0_i32 = arith.constant 0 : i32
    %c0_i32_0 = arith.constant 0 : i32
    %c0_i32_1 = arith.constant 0 : i32
    return %c0_i32, %c0_i32_0 : i32, i32
  }
  func.func @transform_7(%arg0: i32) -> (i32, i32) {
    %c0_i32 = arith.constant 0 : i32
    %c0_i32_0 = arith.constant 0 : i32
    %c0_i32_1 = arith.constant 0 : i32
    return %c0_i32, %c0_i32_0 : i32, i32
  }
  func.func @transform_8(%arg0: i32) -> (i32, i32) {
    %c0_i32 = arith.constant 0 : i32
    %c0_i32_0 = arith.constant 0 : i32
    %c0_i32_1 = arith.constant 0 : i32
    return %c0_i32, %c0_i32_0 : i32, i32
  }
  func.func @transform_9(%arg0: i32) -> (i32, i32) {
    %c0_i32 = arith.constant 0 : i32
    %c0_i32_0 = arith.constant 0 : i32
    %c0_i32_1 = arith.constant 0 : i32
    return %c0_i32, %c0_i32_0 : i32, i32
  }
  func.func @transform_10(%arg0: i32) -> (i32, i32) {
    %c0_i32 = arith.constant 0 : i32
    %c0_i32_0 = arith.constant 0 : i32
    return %arg0, %c0_i32 : i32, i32
  }
  func.func @transform_11(%arg0: i32) -> (i32, i32) {
    %c0_i32 = arith.constant 0 : i32
    %c0_i32_0 = arith.constant 0 : i32
    return %arg0, %c0_i32 : i32, i32
  }
}

</mosaic_0001>

<bundles_post_ra>
// kernel: tpu_custom_call.1
= control target key start
LH: loop header
LB: loop body
LE: loop exit
PB: predicated region body
PF: predicated region fallthrough
CT: control target
= control target key end

     0   :  { %s20255_s0 = inlined_call_operand.hbm [shape: bf16[1024,896], index: 0, kind: input, shape index: {}]   ;;  %s20256_s1 = inlined_call_operand.hbm [shape: f32[1024,128], index: 1, kind: input, shape index: {}]   ;;  %s20257_s2 = inlined_call_operand.hbm [shape: bf16[896,128], index: 2, kind: input, shape index: {}]   ;;  %s20258_s3 = inlined_call_operand.hbm [shape: f32[1,128], index: 3, kind: input, shape index: {}]   ;;  %s20259_s4 = inlined_call_operand.hbm [shape: bf16[128,256], index: 4, kind: input, shape index: {}]   ;;  %s20260_s5 = inlined_call_operand.hbm [shape: f32[1,256], index: 5, kind: input, shape index: {}]   ;;  %s20261_s6 = inlined_call_operand.hbm [shape: bf16[128,128], index: 6, kind: input, shape index: {}]   ;;  %s20262_s7 = inlined_call_operand.hbm [shape: f32[1,128], index: 7, kind: input, shape index: {}]   ;;  %s20263_s8 = inlined_call_operand.hbm [shape: bf16[128,896], index: 8, kind: input, shape index: {}]   ;;  %s20264_s9 = inlined_call_operand.hbm [shape: f32[1,896], index: 9, kind: input, shape index: {}]   ;;  %s20265_s10 = inlined_call_operand.hbm [shape: bf16[1024,896], index: 10, kind: output, shape index: {0}]   ;;  %s20266_s11 = inlined_call_operand.hbm [shape: f32[1024,384], index: 11, kind: output, shape index: {1}]  }
   0x1   :  { %20319 = sst [smem:[#allocation70_spill]] %s20255_s0 }
   0x2   :  { %20320 = sst [smem:[#allocation71_spill]] %s20257_s2 }
   0x3   :  { %20321 = sst [smem:[#allocation72_spill]] %s20258_s3 }
   0x4   :  { %20322 = sst [smem:[#allocation73_spill]] %s20259_s4 }
   0x5   :  { %20323 = sst [smem:[#allocation74_spill]] %s20260_s5 }
   0x6   :  { %20324 = sst [smem:[#allocation75_spill]] %s20261_s6 }
   0x7   :  { %20325 = sst [smem:[#allocation76_spill]] %s20262_s7 }
   0x8   :  { %20326 = sst [smem:[#allocation77_spill]] %s20263_s8 }
   0x9   :  { %20327 = sst [smem:[#allocation78_spill]] %s20264_s9 }
   0xa   :  { %17 = vsyncpa [#allocation3], 0 }
   0xb   :  { %19 = vsyncpa [#allocation3 + $0x1], 0 }
   0xc   :  { %20 = vsyncpa [#allocation6], 0 }
   0xd   :  { %22 = vsyncpa [#allocation6 + $0x1], 0 }
   0xe   :  { %23 = vsyncpa [#allocation9], 0 }
   0xf   :  { %24 = vsyncpa [#allocation12], 0 }
  0x10   :  { %25 = vsyncpa [#allocation15], 0 }
  0x11   :  { %26 = vsyncpa [#allocation18], 0 }
  0x12   :  { %27 = vsyncpa [#allocation4], 0 }
  0x13   :  { %29 = vsyncpa [#allocation4 + $0x1], 0 }
  0x14   :  { %30 = vsyncpa [#allocation21], 0 }
  0x15   :  { %32 = vsyncpa [#allocation21 + $0x1], 0  ;;  %s16258_s17 = smov 0   ;;  %s16260_s18 = smov 0  }
  0x16   :  { %s16262_s19 = smov 0   ;;  %s16264_s20 = smov 0  }
  0x17 LB: > { %s16175_s21 = smov [#allocation7]   ;;  %s16279_s23 = sadd.s32 4294967295, %s16173_s20   ;;  %s16173_s20 = sphi %s16264_s20, %s20553_s20   ;;  %s16169_s19 = sphi %s16262_s19, %s20552_s19   ;;  %s16165_s18 = sphi %s16260_s18, %s20551_s18   ;;  %s16161_s17 = sphi %s16258_s17, %s20550_s17  }
  0x18   : > { %s327_s22 = sshll.u32 %s16175_s21, 4  ;;  %p11477_p0 = scmp.ge.s32.totalorder %s16173_s20, 1  ;;  %s328_s22 = int_to_ptr.vmem [resolvable:$true] %s327_s22 }
  0x19   : > { %p20267_p1 = scmp.eq.s32.totalorder %s16279_s23, 0  ;;  %p315_p2 = scmp.lt.s32.totalorder %s16173_s20, 3 }
  0x1a   : > { %s16176_s25 = smov [#allocation8]   ;;  %s16177_s28 = smov [#allocation11]  }
  0x1b   : > { %p16284_p3 = pnand %p11477_p0, %p315_p2  ;;  %s341_s26 = sshll.u32 %s16176_s25, 4  ;;  %s342_s26 = int_to_ptr.vmem [resolvable:$true] %s341_s26 }
  0x1c   : > { %s365_s29 = sshll.u32 %s16177_s28, 4  ;;  %s15802_s12 = scalar_lea.vmem %s328_s22, 7168  ;;  %s16297_s29 = int_to_ptr.vmem [resolvable:$true] %s365_s29 }
  0x1d   : > { %s20328_s24 = scalar_select %p16284_p3, 1, 0 }
  0x1e   : > { %p13272_p5 = pneg %p16284_p3  ;;  %p15803_p8 = scmp.ne.s32.totalorder %s328_s22, %s15802_s12 }
  0x1f   : > { %p15810_p11 = scmp.lt.s32.totalorder %s328_s22, %s328_s22  ;;  %p15811_p12 = scmp.lt.s32.totalorder %s15802_s12, %s15802_s12 }
  0x20   : > { %p16293_p6 = pnand %p13272_p5, %p20267_p1 }
  0x21   : > { %p15812_p13 = por %p15811_p12, %p15810_p11 }
  0x22   : > { %p16301_p7 = pneg %p16293_p6 }
  0x24   : > { %p15805_p9 = pnand %p15803_p8, %p16301_p7 }
  0x26   : > { %p15806_p10 = pneg %p15805_p9 }
  0x28   : > { %p15813_p0 = pnand %p15812_p13, %p15806_p10 }
  0x2a   : > { %15816 = shalt.err (!%p15813_p0)
}
  0x2b   : > { %s20269_s13 = smov 64   ;;  %s16179_s14 = smov 4  }
  0x2c   : > { %s20331_s2 = sld [smem:[#allocation71_spill]]  ;;  %s15828_s21 = scalar_lea.vmem %s342_s26, 16 }
  0x2d   : > { %p15829_p2 = scmp.ne.s32.totalorder %s342_s26, %s15828_s21  ;;  %s15835_s25 = scalar_lea.vmem %s342_s26, 32 }
  0x2e   : > { %p15836_p9 = scmp.lt.s32.totalorder %s342_s26, %s342_s26  ;;  %p15837_p10 = scmp.lt.s32.totalorder %s15835_s25, %s15828_s21 }
  0x2f   : > { %p15831_p5 = pnand %p15829_p2, %p16301_p7 }
  0x30   : > { %p15838_p11 = por %p15837_p10, %p15836_p9 }
  0x31   : > { %p15832_p8 = pneg %p15831_p5 }
  0x32   : > { %13275 = dma.hbm_to_vmem [thread:$0]  (!%p16293_p6), %s20331_s2, 7168, %s328_s22, [#allocation6], %s20269_s13, %s20269_s13, %s16179_s14  }
  0x33   : > { %p15839_p12 = pnand %p15838_p11, %p15832_p8 }
  0x35   : > { %15842 = shalt.err (!%p15839_p12)
}
  0x36   : > { %s20332_s3 = sld [smem:[#allocation72_spill]]  ;;  %s15854_s22 = scalar_lea.vmem %s16297_s29, 32 }
  0x37   : > { %p15855_p13 = scmp.ne.s32.totalorder %s16297_s29, %s15854_s22  ;;  %p15862_p5 = scmp.lt.s32.totalorder %s16297_s29, %s16297_s29 }
  0x38   : > { %p15863_p9 = scmp.lt.s32.totalorder %s15854_s22, %s15854_s22 }
  0x39   : > { %p15857_p0 = pnand %p15855_p13, %p16301_p7 }
  0x3a   : > { %p15864_p8 = por %p15863_p9, %p15862_p5 }
  0x3b   : > { %p15858_p2 = pneg %p15857_p0 }
  0x3c   : > { %13278 = dma.hbm_to_vmem [thread:$0]  (!%p16293_p6), %s20332_s3, 16, %s342_s26, [#allocation9]  }
  0x3d   : > { %p15865_p10 = pnand %p15864_p8, %p15858_p2 }
  0x3f   : > { %15868 = shalt.err (!%p15865_p10)
}
  0x40   : > { %s20333_s5 = sld [smem:[#allocation74_spill]]  ;;  %s16180_s26 = smov [#allocation14]  }
  0x41   : > { %s389_s21 = sshll.u32 %s16180_s26, 4  ;;  %s16181_s25 = smov [#allocation10]   ;;  %s390_s21 = int_to_ptr.vmem [resolvable:$true] %s389_s21 }
  0x42   : > { %s351_s28 = sshll.u32 %s16181_s25, 4  ;;  %s15880_s12 = scalar_lea.vmem %s390_s21, 16  ;;  %s352_s28 = int_to_ptr.vmem [resolvable:$true] %s351_s28 }
  0x43   : > { %p15881_p11 = scmp.ne.s32.totalorder %s390_s21, %s15880_s12  ;;  %s15887_s22 = scalar_lea.vmem %s390_s21, 32 }
  0x44   : > { %p15888_p0 = scmp.lt.s32.totalorder %s390_s21, %s390_s21  ;;  %p15889_p2 = scmp.lt.s32.totalorder %s15887_s22, %s15880_s12 }
  0x45   : > { %p15883_p12 = pnand %p15881_p11, %p16301_p7 }
  0x46   : > { %13284 = dma.hbm_to_vmem [thread:$0]  (!%p16293_p6), %s20333_s5, 32, %s16297_s29, [#allocation12]  }
  0x47   : > { %p15884_p13 = pneg %p15883_p12  ;;  %p15890_p5 = por %p15889_p2, %p15888_p0 }
  0x49   : > { %p15891_p9 = pnand %p15890_p5, %p15884_p13 }
  0x4b   : > { %15894 = shalt.err (!%p15891_p9)
}
  0x4c   : > { %s20334_s7 = sld [smem:[#allocation76_spill]]  ;;  %s15906_s16 = scalar_lea.vmem %s352_s28, 2048 }
  0x4d   : > { %p15907_p8 = scmp.ne.s32.totalorder %s352_s28, %s15906_s16  ;;  %p15914_p12 = scmp.lt.s32.totalorder %s352_s28, %s352_s28 }
  0x4e   : > { %p15915_p4 = scmp.lt.s32.totalorder %s15906_s16, %s15906_s16 }
  0x4f   : > { %p15909_p10 = pnand %p15907_p8, %p16301_p7 }
  0x50   : > { %p15916_p1 = por %p15915_p4, %p15914_p12 }
  0x51   : > { %p15910_p11 = pneg %p15909_p10 }
  0x52   : > { %13290 = dma.hbm_to_vmem [thread:$0]  (!%p16293_p6), %s20334_s7, 16, %s390_s21, [#allocation15]  }
  0x53   : > { %p15917_p3 = pnand %p15916_p1, %p15910_p11 }
  0x55   : > { %15920 = shalt.err (!%p15917_p3)
}
  0x56   : > { %s20270_s26 = smov 128   ;;  %s20271_s25 = smov 8  }
  0x57   : > { %s20335_s4 = sld [smem:[#allocation73_spill]]  ;;  %s16184_s22 = smov [#allocation13]  }
  0x58   : > { %s375_s15 = sshll.u32 %s16184_s22, 4  ;;  %s16185_s29 = smov [#allocation16]   ;;  %s376_s15 = int_to_ptr.vmem [resolvable:$true] %s375_s15 }
  0x59   : > { %s399_s16 = sshll.u32 %s16185_s29, 4  ;;  %s15932_s13 = scalar_lea.vmem %s376_s15, 1024  ;;  %s400_s16 = int_to_ptr.vmem [resolvable:$true] %s399_s16 }
  0x5a   : > { %p15933_p1 = scmp.ne.s32.totalorder %s376_s15, %s15932_s13  ;;  %p15940_p13 = scmp.lt.s32.totalorder %s376_s15, %s376_s15 }
  0x5b   : > { %p15941_p0 = scmp.lt.s32.totalorder %s15932_s13, %s15932_s13 }
  0x5c   : > { %p15935_p3 = pnand %p15933_p1, %p16301_p7 }
  0x5d   : > { %13281 = dma.hbm_to_vmem [thread:$0]  (!%p16293_p6), %s20335_s4, 2048, %s352_s28, [#allocation9], %s20270_s26, %s20270_s26, %s20271_s25  }
  0x5e   : > { %p15936_p4 = pneg %p15935_p3  ;;  %p15942_p2 = por %p15941_p0, %p15940_p13 }
  0x60   : > { %p15943_p5 = pnand %p15942_p2, %p15936_p4 }
  0x62   : > { %15946 = shalt.err (!%p15943_p5)
}
  0x63   : > { %s20336_s21 = smov 64   ;;  %s20337_s6 = sld [smem:[#allocation75_spill]] }
  0x64   : > { %s15958_s22 = scalar_lea.vmem %s400_s16, 7168  ;;  %p15966_p11 = scmp.lt.s32.totalorder %s400_s16, %s400_s16 }
  0x65   : > { %p15959_p9 = scmp.ne.s32.totalorder %s400_s16, %s15958_s22  ;;  %p15967_p12 = scmp.lt.s32.totalorder %s15958_s22, %s15958_s22 }
  0x67   : > { %p15961_p8 = pnand %p15959_p9, %p16301_p7  ;;  %p15968_p1 = por %p15967_p12, %p15966_p11 }
  0x69   : > { %13287 = dma.hbm_to_vmem [thread:$0]  (!%p16293_p6), %s20337_s6, 1024, %s376_s15, [#allocation12], %s20336_s21, %s20336_s21, %s16179_s14  }
  0x6a   : > { %p15962_p10 = pneg %p15961_p8 }
  0x6c   : > { %p15969_p3 = pnand %p15968_p1, %p15962_p10 }
  0x6e   : > { %15972 = shalt.err (!%p15969_p3)
}
  0x6f   : > { %s20272_s13 = smov 448   ;;  %s20273_s29 = smov 28  }
  0x70   : > { %s20338_s8 = sld [smem:[#allocation77_spill]]  ;;  %s16188_s21 = smov [#allocation17]  }
  0x71   : > { %s413_s28 = sshll.u32 %s16188_s21, 4  ;;  %s414_s28 = int_to_ptr.vmem [resolvable:$true] %s413_s28 }
  0x72   : > { %s15984_s12 = scalar_lea.vmem %s414_s28, 112  ;;  %s15991_s22 = scalar_lea.vmem %s414_s28, 128 }
  0x73   : > { %p15985_p4 = scmp.ne.s32.totalorder %s414_s28, %s15984_s12  ;;  %p15992_p2 = scmp.lt.s32.totalorder %s414_s28, %s414_s28 }
  0x74   : > { %p15993_p5 = scmp.lt.s32.totalorder %s15991_s22, %s15984_s12 }
  0x75   : > { %p15987_p13 = pnand %p15985_p4, %p16301_p7 }
  0x76   : > { %13293 = dma.hbm_to_vmem [thread:$0]  (!%p16293_p6), %s20338_s8, 7168, %s400_s16, [#allocation15], %s20272_s13, %s20272_s13, %s20273_s29  }
  0x77   : > { %p15988_p0 = pneg %p15987_p13  ;;  %p15994_p9 = por %p15993_p5, %p15992_p2 }
  0x79   : > { %p15995_p8 = pnand %p15994_p9, %p15988_p0 }
  0x7b   : > { %15998 = shalt.err (!%p15995_p8)
}
  0x7c   : > { %s20339_s9 = sld [smem:[#allocation78_spill]]  ;;  %s11476_s30 = sadd.s32 4294967294, %s16173_s20  }
  0x7d   : > { %s16380_s27 = sadd.s32 1, %s16173_s20   ;;  %s45_s25 = sadd.s32 1, %s16169_s19 }
  0x7e   : > { %s42_s26 = ssub.s32 %s16173_s20, %s16380_s27  ;;  %p52_p10 = scmp.ne.s32.totalorder %s16169_s19, %s16165_s18 }
  0x7f   : > { %p43_p7 = scmp.eq.s32.totalorder %s42_s26, 0  ;;  %p53_p11 = scmp.eq.s32.totalorder %s16173_s20, 0 }
  0x80   : > { %p58_p12 = scmp.ne.s32.totalorder %s16165_s18, %s16161_s17  ;;  %p20340_p3 = scmp.eq.s32.totalorder %s16279_s23, 0 }
  0x81   : > { %s16391_s16 = scalar_select %p43_p7, %s16169_s19, %s45_s25  }
  0x82   : > { %13296 = dma.hbm_to_vmem [thread:$0]  (!%p16293_p6), %s20339_s9, 112, %s414_s28, [#allocation18]  }
  0x83   : > { %p54_p1 = por %p53_p11, %p52_p10  ;;  %p16395_p4 = por %p20340_p3, %p58_p12 }
  0x84   : > { %p276_p6 = scmp.eq.s32.totalorder %s16279_s23, 1  ;;  %p282_p13 = scmp.eq.s32.totalorder %s11476_s30, 1 }
  0x85   : > { %p13319_p0 = scmp.lt.s32.totalorder %s16173_s20, 2  ;;  %s16402_s15 = sand.u32 1, %s16169_s19  }
  0x86   : > { %p16404_p2 = por %p276_p6, %p52_p10  ;;  %p16408_p5 = por %p282_p13, %p58_p12 }
  0x87   : > { %s13226_s12 = smul.u32 1792, %s16402_s15  ;;  %p16414_p9 = pnand %p13319_p0, %p54_p1 }
  0x88   : > { %s20342_s21 = scalar_select %p16404_p2, 1, 0 }
  0x89   : > { %s20343_s28 = scalar_select %p16408_p5, 1, 0 }
  0x8a   : > { %s13227_s22 = smul.u32 28672, %s16173_s20  ;;  %s20345_s0 = sld [smem:[#allocation70_spill]] }
  0x8b   : > { %s428_s2 = scalar_lea.vmem [#allocation2], %s13226_s12  ;;  %s425_s4 = scalar_lea.sflag [#allocation3], %s16402_s15 }
  0x8c   : > { %s436_s3 = sshll.u32 %s428_s2, 4  ;;  %p16001_p7 = pneg %p16414_p9  ;;  %s16424_s3 = int_to_ptr.vmem [resolvable:$true] %s436_s3 }
  0x90   : > { %s16422_s29 = scalar_lea.hbm %s20345_s0, %s13227_s22  ;;  %s16004_s22 = scalar_lea.hbm %s20345_s0, 57344 }
  0x91   : > { %s15999_s5 = scalar_lea.hbm %s16422_s29, 28672  ;;  %p16005_p12 = scmp.lt.s32.totalorder %s16422_s29, %s20345_s0 }
  0x92   : > { %p16000_p8 = scmp.ne.s32.totalorder %s16422_s29, %s15999_s5  ;;  %p16006_p1 = scmp.lt.s32.totalorder %s16004_s22, %s15999_s5 }
  0x94   : > { %p16002_p10 = pnand %p16001_p7, %p16000_p8  ;;  %p16007_p3 = por %p16006_p1, %p16005_p12 }
  0x96   : > { %p16003_p11 = pneg %p16002_p10 }
  0x98   : > { %p16008_p6 = pnand %p16007_p3, %p16003_p11 }
  0x9a   : > { %16011 = shalt.err (!%p16008_p6)
}
  0x9b   : > { %s16012_s2 = scalar_lea.vmem %s16424_s3, 28672  ;;  %s16189_s12 = smov [#allocation2]  }
  0x9c   : > { %p16013_p13 = scmp.ne.s32.totalorder %s16424_s3, %s16012_s2  ;;  %s16017_s30 = sshll.u32 %s16189_s12, 4  ;;  %s16018_s30 = int_to_ptr.vmem [resolvable:$false] %s16017_s30 }
  0x9d   : > { %s16019_s13 = scalar_lea.vmem %s16018_s30, 57344  ;;  %p16020_p10 = scmp.lt.s32.totalorder %s16424_s3, %s16018_s30 }
  0x9e   : > { %p16015_p0 = pnand %p16013_p13, %p16001_p7  ;;  %p16021_p5 = scmp.lt.s32.totalorder %s16019_s13, %s16012_s2 }
  0xa0   : > { %p16016_p8 = pneg %p16015_p0  ;;  %p16022_p2 = por %p16021_p5, %p16020_p10 }
  0xa2   : > { %p16023_p12 = pnand %p16022_p2, %p16016_p8 }
  0xa4   : > { %16026 = shalt.err (!%p16023_p12)
}
  0xa5   : > { %s20346_s5 = smov 28   ;;  %s20347_s6 = smov 448  }
  0xa6   : > { %13300 = dma.hbm_to_vmem [thread:$0]  (!%p16414_p9), %s16422_s29, 28672, %s16424_s3, %s425_s4, %s20347_s6, %s20347_s6, %s20346_s5  }
  0xa7   : > { %s11490_s22 = sshll.u32 %s16402_s15, 9  ;;  %s12577_s25 = sshll.u32 %s16173_s20, 13 }
  0xa8   : > { %s16461_s30 = scalar_lea.hbm %s20256_s1, %s12577_s25  ;;  %s450_s13 = scalar_lea.vmem [#allocation5], %s11490_s22 }
  0xa9   : > { %s457_s0 = sshll.u32 %s450_s13, 4  ;;  %s20348_s7 = sand.u32 1, %s16173_s20   ;;  %s16463_s0 = int_to_ptr.vmem [resolvable:$true] %s457_s0 }
  0xaa   : > { %s447_s8 = scalar_lea.sflag [#allocation6], %s20348_s7  ;;  %s16027_s9 = scalar_lea.hbm %s16461_s30, 8192 }
  0xab   : > { %p16028_p2 = scmp.ne.s32.totalorder %s16461_s30, %s16027_s9  ;;  %s16032_s29 = scalar_lea.hbm %s20256_s1, 16384 }
  0xac   : > { %p16033_p1 = scmp.lt.s32.totalorder %s16461_s30, %s20256_s1  ;;  %p16034_p3 = scmp.lt.s32.totalorder %s16032_s29, %s16027_s9 }
  0xad   : > { %p16030_p5 = pnand %p16028_p2, %p16001_p7 }
  0xae   : > { %p16035_p6 = por %p16034_p3, %p16033_p1 }
  0xaf   : > { %p16031_p11 = pneg %p16030_p5 }
  0xb1   : > { %p16036_p13 = pnand %p16035_p6, %p16031_p11 }
  0xb3   : > { %16039 = shalt.err (!%p16036_p13)
}
  0xb4   : > { %s16040_s7 = scalar_lea.vmem %s16463_s0, 8192  ;;  %s16190_s6 = smov [#allocation5]  }
  0xb5   : > { %p16041_p0 = scmp.ne.s32.totalorder %s16463_s0, %s16040_s7  ;;  %s16045_s22 = sshll.u32 %s16190_s6, 4  ;;  %s16046_s22 = int_to_ptr.vmem [resolvable:$false] %s16045_s22 }
  0xb6   : > { %s16047_s25 = scalar_lea.vmem %s16046_s22, 16384  ;;  %p16048_p12 = scmp.lt.s32.totalorder %s16463_s0, %s16046_s22 }
  0xb7   : > { %p16043_p8 = pnand %p16041_p0, %p16001_p7  ;;  %p16049_p2 = scmp.lt.s32.totalorder %s16047_s25, %s16040_s7 }
  0xb9   : > { %p16044_p10 = pneg %p16043_p8  ;;  %p16050_p5 = por %p16049_p2, %p16048_p12 }
  0xbb   : > { %p16051_p1 = pnand %p16050_p5, %p16044_p10 }
  0xbd   : > { %16054 = shalt.err (!%p16051_p1)
}
  0xbe   : > { %s20349_s9 = smov 8   ;;  %s20350_s2 = smov 128  }
  0xbf   : > { %13303 = dma.hbm_to_vmem [thread:$0]  (!%p16414_p9), %s16461_s30, 8192, %s16463_s0, %s447_s8, %s20350_s2, %s20350_s2, %s20349_s9  }
  0xc0   : > { %p20351_p7 = scmp.ne.s32.totalorder %s20328_s24, 0 }
  0xc2   : > { %469 = sbr.rel (%p20351_p7) target bundleno = 2398 (0x95e), region = 60 }
  0xc7   : > { %s16495_s12 = sand.u32 1, %s16165_s18  }
  0xc8   : > { %s13228_s13 = smul.u32 1792, %s16495_s12  ;;  %s472_s3 = scalar_lea.sflag [#allocation3], %s16495_s12 }
  0xca   : > { %s16501_s26 = scalar_lea.vmem [#allocation2], %s13228_s13 }
  0xcb   : > { %16124 = dma.done.wait (%p16395_p4), %s472_s3, 28672  }
  0xcc   : > { %16126 = vsyncadd (%p16395_p4), %s472_s3, 4294938624  ;;  %s480_s0 = sand.u32 1, %s16279_s23   ;;  %s11494_s8 = sshll.u32 %s16495_s12, 9 }
  0xcd   : > { %s481_s24 = scalar_lea.sflag [#allocation6], %s480_s0  ;;  %s16509_s30 = scalar_lea.vmem [#allocation5], %s11494_s8 }
  0xce   : > { %16128 = dma.done.wait (%p16395_p4), %s481_s24, 8192  }
  0xcf   : > { %16130 = vsyncadd (%p16395_p4), %s481_s24, 4294959104  ;;  %p20352_p9 = scmp.eq.s32.totalorder %s16279_s23, 0 }
  0xd1   : > { %16132 = dma.done.wait (%p20352_p9), [#allocation6], 7168   ;;  %p20353_p11 = pmov %p20352_p9 }
  0xd2   : > { %p20354_p3 = pmov %p20352_p9 }
  0xd3   : > { %16134 = vsyncadd (%p20353_p11), [#allocation6], 4294960128 }
  0xd4   : > { %16136 = dma.done.wait (%p20354_p3), [#allocation9], 2064   ;;  %p20355_p6 = pmov %p20354_p3 }
  0xd5   : > { %p20356_p13 = pmov %p20354_p3 }
  0xd6   : > { %16138 = vsyncadd (%p20355_p6), [#allocation9], 4294965232 }
  0xd7   : > { %16140 = dma.done.wait (%p20356_p13), [#allocation12], 1056   ;;  %p20357_p0 = pmov %p20354_p3 }
  0xd9   : > { %16142 = vsyncadd (%p20357_p0), [#allocation12], 4294966240  ;;  %p20358_p4 = pmov %p20357_p0 }
  0xda   : > { %p20359_p8 = pmov %p20357_p0 }
  0xdb   : > { %16144 = dma.done.wait (%p20358_p4), [#allocation15], 7184  }
  0xdc   : > { %16146 = vsyncadd (%p20359_p8), [#allocation15], 4294960112  ;;  %p20360_p10 = pmov %p20357_p0 }
  0xdd   : > { %p20361_p12 = pmov %p20357_p0 }
  0xde   : > { %16148 = dma.done.wait (%p20360_p10), [#allocation18], 112  }
  0xdf   : > { %16150 = vsyncadd (%p20361_p12), [#allocation18], 4294967184  ;;  %v20275_v0 = vmov 0   ;;  %v13380_v1 = vld [vmem:[#allocation7 + $0x38] sm:$0xff]   ;;  %v13381_v2 = vld [vmem:[#allocation7 + $0x30] sm:$0xff]   ;;  %s13229_s14 = smul.u32 1536, %s16495_s12 }
  0xe0   : > { %2497 = vmatprep.subr.bf16.mxu0 %v20275_v0  ;;  %13194 = vmatprep.subr.bf16.mxu1 %v20275_v0  ;;  %v13382_v3 = vld [vmem:[#allocation7 + $0x28] sm:$0xff]   ;;  %v13383_v4 = vld [vmem:[#allocation7 + $0x20] sm:$0xff]   ;;  %v13384_v5 = vld [vmem:[#allocation7 + $0x18] sm:$0xff]   ;;  %s18458_s29 = scalar_lea.vmem [#allocation19], %s13228_s13  ;;  %s13231_s15 = smul.u32 24576, %s16279_s23 }
  0xe1   : > { %2498 = vmatpush1.bf16.msra.mxu0 %v13380_v1  ;;  %13210 = vmatpush1.bf16.msra.mxu1 %v13380_v1  ;;  %v13398_v6 = vld [vmem:[%s16501_s26 + $0x4] ss:$28 sps:$4 sm:$0xff]   ;;  %v13385_v7 = vld [vmem:[#allocation7 + $0x10] sm:$0xff]   ;;  %v13386_v9 = vld [vmem:[#allocation7 + $0x8] sm:$0xff]   ;;  %s17551_s4 = scalar_lea.vmem [#allocation20], %s13229_s14  ;;  %s11241_s25 = scalar_lea.sflag [#allocation21], %s16495_s12 }
  0xe2   : > { %2499 = vmatprep.subr.bf16.mxu0 %v20275_v0  ;;  %13195 = vmatprep.subr.bf16.mxu1 %v20275_v0  ;;  %v13401_v8 = vld [vmem:[%s16501_s26 + $0x544] ss:$28 sps:$4 sm:$0xff]   ;;  %v13388_v11 = vld [vmem:[#allocation7 + $0x78] sm:$0xff]   ;;  %v13389_v12 = vld [vmem:[#allocation7 + $0x70] sm:$0xff]   ;;  %s20041_s6 = scalar_lea.hbm %s20266_s11, %s13231_s15  ;;  %s11272_s22 = sshll.u32 %s17551_s4, 4  ;;  %s20044_s22 = int_to_ptr.vmem [resolvable:$true] %s11272_s22 }
  0xe3   : > { %2529 = vmatprep.mubr.bf16.mxu0 %v13398_v6  ;;  %2721 = vmatprep.mubr.bf16.mxu1 %v13401_v8  ;;  %v13387_v10 = vld [vmem:[#allocation7] sm:$0xff]   ;;  %v13390_v13 = vld [vmem:[#allocation7 + $0x68] sm:$0xff]   ;;  %v13392_v15 = vld [vmem:[#allocation7 + $0x58] sm:$0xff]   ;;  %s16055_s9 = scalar_lea.vmem %s20044_s22, 24576  ;;  %p20547_p5 = scmp.ne.s32.totalorder %s20342_s21, 0 }
  0xe4   : > { %v13391_v14 = vld [vmem:[#allocation7 + $0x60] sm:$0xff]   ;;  %v13393_v16 = vld [vmem:[#allocation7 + $0x50] sm:$0xff]   ;;  %v13394_v17 = vld [vmem:[#allocation7 + $0x48] sm:$0xff]   ;;  %p16056_p2 = scmp.ne.s32.totalorder %s20044_s22, %s16055_s9  ;;  %s16192_s2 = smov [#allocation20]  }
  0xe5   : > { %2500 = vmatpush1.bf16.msra.mxu0 %v13381_v2  ;;  %13211 = vmatpush1.bf16.msra.mxu1 %v13381_v2  ;;  %v13395_v18 = vld [vmem:[#allocation7 + $0x40] sm:$0xff]   ;;  %v13402_v21 = vld [vmem:[#allocation7 + $0xb8] sm:$0xff]   ;;  %v13403_v24 = vld [vmem:[#allocation7 + $0xb0] sm:$0xff]   ;;  %s16059_s13 = sshll.u32 %s16192_s2, 4  ;;  %s16060_s13 = int_to_ptr.vmem [resolvable:$false] %s16059_s13 }
  0xe6   : > { %2501 = vmatprep.subr.bf16.mxu0 %v20275_v0  ;;  %13196 = vmatprep.subr.bf16.mxu1 %v20275_v0  ;;  %v13396_v19 = vld [vmem:[%s16501_s26] ss:$28 sps:$4 sm:$0xff]   ;;  %v13408_v25 = vld [vmem:[%s16501_s26 + $0x38] ss:$28 sps:$4 sm:$0xff]   ;;  %v13410_v27 = vld [vmem:[#allocation7 + $0xa8] sm:$0xff]   ;;  %p16057_p1 = pnand %p16056_p2, %p20547_p5  ;;  %s16061_s3 = scalar_lea.vmem %s16060_s13, 49152 }
  0xe7   : > { %v13399_v20 = vld [vmem:[%s16501_s26 + $0x540] ss:$28 sps:$4 sm:$0xff]   ;;  %v13409_v26 = vld [vmem:[%s16501_s26 + $0x578] ss:$28 sps:$4 sm:$0xff]   ;;  %v13416_v31 = vld [vmem:[%s16501_s26 + $0x70] ss:$28 sps:$4 sm:$0xff]   ;;  %p16062_p9 = scmp.lt.s32.totalorder %s20044_s22, %s16060_s13  ;;  %p16063_p11 = scmp.lt.s32.totalorder %s16061_s3, %s16055_s9 }
  0xe8   : > { %v13404_v22 = vld [vmem:[%s16501_s26 + $0x3c] ss:$28 sps:$4 sm:$0xff]   ;;  %v13412_v28 = vld [vmem:[%s16501_s26 + $0x74] ss:$28 sps:$4 sm:$0xff]   ;;  %v13411_v30 = vld [vmem:[#allocation7 + $0xa0] sm:$0xff]   ;;  %p16058_p7 = pneg %p16057_p1 }
  0xe9   : > { %2502 = vmatpush1.bf16.msra.mxu0 %v13382_v3  ;;  %13212 = vmatpush1.bf16.msra.mxu1 %v13382_v3  ;;  %v13406_v23 = vld [vmem:[%s16501_s26 + $0x57c] ss:$28 sps:$4 sm:$0xff]   ;;  %v13414_v29 = vld [vmem:[%s16501_s26 + $0x5b4] ss:$28 sps:$4 sm:$0xff]   ;;  %v13420_v34 = vld [vmem:[%s16501_s26 + $0xac] ss:$28 sps:$4 sm:$0xff]   ;;  %p16064_p3 = por %p16063_p11, %p16062_p9 }
  0xea   : > { %2503 = vmatprep.subr.bf16.mxu0 %v20275_v0  ;;  %13197 = vmatprep.subr.bf16.mxu1 %v20275_v0  ;;  %v13417_v32 = vld [vmem:[%s16501_s26 + $0x5b0] ss:$28 sps:$4 sm:$0xff]   ;;  %v13418_v33 = vld [vmem:[#allocation7 + $0x98] sm:$0xff]   ;;  %v13424_v38 = vld [vmem:[%s16501_s26 + $0xa8] ss:$28 sps:$4 sm:$0xff]  }
  0xeb   : > { %v13422_v35 = vld [vmem:[%s16501_s26 + $0x5ec] ss:$28 sps:$4 sm:$0xff]   ;;  %v13517_v36 = vld [vmem:[#allocation7 + $0x138] sm:$0xff]   ;;  %v13419_v37 = vld [vmem:[#allocation7 + $0x90] sm:$0xff]   ;;  %p16065_p6 = pnand %p16064_p3, %p16058_p7 }
  0xec   : > { %v13425_v39 = vld [vmem:[%s16501_s26 + $0x5e8] ss:$28 sps:$4 sm:$0xff]   ;;  %v13518_v40 = vld [vmem:[#allocation7 + $0x130] sm:$0xff]   ;;  %v13432_v46 = vld [vmem:[%s16501_s26 + $0xe0] ss:$28 sps:$4 sm:$0xff]  }
  0xed   : > { %2504 = vmatpush1.bf16.msra.mxu0 %v13383_v4  ;;  %13213 = vmatpush1.bf16.msra.mxu1 %v13383_v4  ;;  %v13426_v41 = vld [vmem:[#allocation7 + $0x88] sm:$0xff]   ;;  %v13428_v42 = vld [vmem:[%s16501_s26 + $0xe4] ss:$28 sps:$4 sm:$0xff]   ;;  %v13434_v48 = vld [vmem:[#allocation7 + $0xf8] sm:$0xff]  }
  0xee   : > { %2505 = vmatprep.subr.bf16.mxu0 %v20275_v0  ;;  %13198 = vmatprep.subr.bf16.mxu1 %v20275_v0  ;;  %v13430_v43 = vld [vmem:[%s16501_s26 + $0x624] ss:$28 sps:$4 sm:$0xff]   ;;  %v13525_v44 = vld [vmem:[#allocation7 + $0x128] sm:$0xff]   ;;  %v13436_v49 = vld [vmem:[%s16501_s26 + $0x11c] ss:$28 sps:$4 sm:$0xff]  }
  0xef   : > { %v13427_v45 = vld [vmem:[#allocation7 + $0x80] sm:$0xff]   ;;  %v13438_v50 = vld [vmem:[%s16501_s26 + $0x65c] ss:$28 sps:$4 sm:$0xff]   ;;  %v13435_v52 = vld [vmem:[#allocation7 + $0xf0] sm:$0xff]  }
  0xf0   : > { %v13433_v47 = vld [vmem:[%s16501_s26 + $0x620] ss:$28 sps:$4 sm:$0xff]   ;;  %v13440_v53 = vld [vmem:[%s16501_s26 + $0x118] ss:$28 sps:$4 sm:$0xff]   ;;  %v13442_v56 = vld [vmem:[#allocation7 + $0xe8] sm:$0xff]  }
  0xf1   : > { %2506 = vmatpush1.bf16.msra.mxu0 %v13384_v5  ;;  %13214 = vmatpush1.bf16.msra.mxu1 %v13384_v5  ;;  %v13526_v51 = vld [vmem:[#allocation7 + $0x120] sm:$0xff]   ;;  %v13441_v54 = vld [vmem:[%s16501_s26 + $0x658] ss:$28 sps:$4 sm:$0xff]   ;;  %v13448_v61 = vld [vmem:[%s16501_s26 + $0x150] ss:$28 sps:$4 sm:$0xff]  }
  0xf2   : > { %2507 = vmatprep.subr.bf16.mxu0 %v20275_v0  ;;  %13199 = vmatprep.subr.bf16.mxu1 %v20275_v0  ;;  %v13533_v55 = vld [vmem:[#allocation7 + $0x118] sm:$0xff]   ;;  %v13444_v57 = vld [vmem:[%s16501_s26 + $0x154] ss:$28 sps:$4 sm:$0xff]   ;;  %v13443_v60 = vld [vmem:[#allocation7 + $0xe0] sm:$0xff]  }
  0xf3   : > { %v13446_v58 = vld [vmem:[%s16501_s26 + $0x694] ss:$28 sps:$4 sm:$0xff]   ;;  %v13450_v63 = vld [vmem:[#allocation7 + $0xd8] sm:$0xff]   ;;  %v13452_v1 = vld [vmem:[%s16501_s26 + $0x18c] ss:$28 sps:$4 sm:$0xff]  }
  0xf4   : > { %v13534_v59 = vld [vmem:[#allocation7 + $0x110] sm:$0xff]   ;;  %v13454_v2 = vld [vmem:[%s16501_s26 + $0x6cc] ss:$28 sps:$4 sm:$0xff]   ;;  %v13542_v5 = vld [vmem:[#allocation7 + $0x100] sm:$0xff]  }
  0xf5   : > { %2508 = vmatpush1.bf16.msra.mxu0 %v13385_v7  ;;  %13215 = vmatpush1.bf16.msra.mxu1 %v13385_v7  ;;  %v13449_v62 = vld [vmem:[%s16501_s26 + $0x690] ss:$28 sps:$4 sm:$0xff]   ;;  %v13456_v6 = vld [vmem:[%s16501_s26 + $0x188] ss:$28 sps:$4 sm:$0xff]  }
  0xf6   : > { %2509 = vmatprep.subr.bf16.mxu0 %v20275_v0  ;;  %13200 = vmatprep.subr.bf16.mxu1 %v20275_v0  ;;  %v13541_v3 = vld [vmem:[#allocation7 + $0x108] sm:$0xff]   ;;  %v13451_v4 = vld [vmem:[#allocation7 + $0xd0] sm:$0xff]  }
  0xf7   : > { %v13457_v7 = vld [vmem:[%s16501_s26 + $0x6c8] ss:$28 sps:$4 sm:$0xff]  }
  0xf8   : > { %v13458_v8 = vld [vmem:[#allocation7 + $0xc8] sm:$0xff]  }
  0xf9   : > { %2510 = vmatpush1.bf16.msra.mxu0 %v13386_v9  ;;  %13216 = vmatpush1.bf16.msra.mxu1 %v13386_v9  ;;  %v13460_v9 = vld [vmem:[%s16501_s26 + $0x1c4] ss:$28 sps:$4 sm:$0xff]  }
  0xfa   : > { %2511 = vmatprep.subr.bf16.mxu0 %v20275_v0  ;;  %13201 = vmatprep.subr.bf16.mxu1 %v20275_v0 }
  0xfd   : > { %2512 = vmatpush1.bf16.msra.mxu0 %v13387_v10  ;;  %13217 = vmatpush1.bf16.msra.mxu1 %v13387_v10  ;;  %v13464_v10 = vld [vmem:[%s16501_s26 + $0xc] ss:$28 sps:$4 sm:$0xff]  }
  0xfe   : > { %2513 = vmatprep.subr.bf16.mxu0 %v20275_v0  ;;  %13202 = vmatprep.subr.bf16.mxu1 %v20275_v0 }
 0x101   : > { %2514 = vmatpush2.bf16.msra.mxu0 %v13388_v11  ;;  %13218 = vmatpush2.bf16.msra.mxu1 %v13388_v11  ;;  %v13550_v11 = vld [vmem:[#allocation7 + $0x178] sm:$0xff]  }
 0x102   : > { %2515 = vmatprep.subr.bf16.mxu0 %v20275_v0  ;;  %13203 = vmatprep.subr.bf16.mxu1 %v20275_v0 }
 0x105   : > { %2516 = vmatpush2.bf16.msra.mxu0 %v13389_v12  ;;  %13219 = vmatpush2.bf16.msra.mxu1 %v13389_v12  ;;  %v13459_v12 = vld [vmem:[#allocation7 + $0xc0] sm:$0xff]  }
 0x106   : > { %2517 = vmatprep.subr.bf16.mxu0 %v20275_v0  ;;  %13204 = vmatprep.subr.bf16.mxu1 %v20275_v0 }
 0x109   : > { %2518 = vmatpush2.bf16.msra.mxu0 %v13390_v13  ;;  %13220 = vmatpush2.bf16.msra.mxu1 %v13390_v13  ;;  %v13466_v13 = vld [vmem:[#allocation7 + $0x1b8] sm:$0xff]  }
 0x10a   : > { %2519 = vmatprep.subr.bf16.mxu0 %v20275_v0  ;;  %13205 = vmatprep.subr.bf16.mxu1 %v20275_v0 }
 0x10d   : > { %2520 = vmatpush2.bf16.msra.mxu0 %v13391_v14  ;;  %13221 = vmatpush2.bf16.msra.mxu1 %v13391_v14  ;;  %v13462_v14 = vld [vmem:[%s16501_s26 + $0x8] ss:$28 sps:$4 sm:$0xff]  }
 0x10e   : > { %2521 = vmatprep.subr.bf16.mxu0 %v20275_v0  ;;  %13206 = vmatprep.subr.bf16.mxu1 %v20275_v0 }
 0x111   : > { %2522 = vmatpush2.bf16.msra.mxu0 %v13392_v15  ;;  %13222 = vmatpush2.bf16.msra.mxu1 %v13392_v15  ;;  %v13465_v15 = vld [vmem:[%s16501_s26 + $0x1c0] ss:$28 sps:$4 sm:$0xff]  }
 0x112   : > { %2523 = vmatprep.subr.bf16.mxu0 %v20275_v0  ;;  %13207 = vmatprep.subr.bf16.mxu1 %v20275_v0 }
 0x115   : > { %2524 = vmatpush2.bf16.msra.mxu0 %v13393_v16  ;;  %13223 = vmatpush2.bf16.msra.mxu1 %v13393_v16  ;;  %v13467_v16 = vld [vmem:[%s16501_s26 + $0x1fc] ss:$28 sps:$4 sm:$0xff]  }
 0x116   : > { %2525 = vmatprep.subr.bf16.mxu0 %v20275_v0  ;;  %13208 = vmatprep.subr.bf16.mxu1 %v20275_v0 }
 0x119   : > { %2526 = vmatpush2.bf16.msra.mxu0 %v13394_v17  ;;  %13224 = vmatpush2.bf16.msra.mxu1 %v13394_v17  ;;  %v13469_v17 = vld [vmem:[%s16501_s26 + $0x44] ss:$28 sps:$4 sm:$0xff]  }
 0x11a   : > { %2527 = vmatprep.subr.bf16.mxu0 %v20275_v0  ;;  %13209 = vmatprep.subr.bf16.mxu1 %v20275_v0 }
 0x11d   : > { %2528 = vmatpush2.bf16.msra.mxu0 %v13395_v18  ;;  %13225 = vmatpush2.bf16.msra.mxu1 %v13395_v18  ;;  %v13491_v18 = vld [vmem:[#allocation7 + $0x1b0] sm:$0xff]  }
 0x11e   : > { %2786 = vmatprep.subr.bf16.mxu1 %v20275_v0  ;;  %3075 = vmatprep.subr.bf16.mxu0 %v20275_v0 }
 0x120   : > { %2530 = vmatmul.mubr.bf16.vlgmr.msra.gmra.mxu0 %v13396_v19  ;;  %2722 = vmatmul.mubr.bf16.vlgmr.msra.gmra.mxu1 %v13399_v20  ;;  %v13551_v19 = vld [vmem:[#allocation7 + $0x170] sm:$0xff]   ;;  %v13516_v20 = vld [vmem:[#allocation7 + $0x1a8] sm:$0xff]  }
 0x121   : > { %2787 = vmatpush1.bf16.msra.mxu1 %v13402_v21  ;;  %2537 = vmatprep.mubr.bf16.mxu0 %v13404_v22  ;;  %v13558_v21 = vld [vmem:[#allocation7 + $0x168] sm:$0xff]   ;;  %v13471_v22 = vld [vmem:[%s16501_s26 + $0x1f8] ss:$28 sps:$4 sm:$0xff]  }
 0x122   : > { %2788 = vmatprep.subr.bf16.mxu1 %v20275_v0  ;;  %2729 = vmatprep.mubr.bf16.mxu1 %v13406_v23  ;;  %v13472_v23 = vld [vmem:[%s16501_s26 + $0x40] ss:$28 sps:$4 sm:$0xff]  }
 0x123   : > { %3076 = vmatpush1.bf16.msra.mxu0 %v13517_v36  ;;  %v13483_v36 = vld [vmem:[%s16501_s26 + $0x268] ss:$28 sps:$4 sm:$0xff]  }
 0x124   : > { %3077 = vmatprep.subr.bf16.mxu0 %v20275_v0 }
 0x125   : > { %2789 = vmatpush1.bf16.msra.mxu1 %v13403_v24  ;;  %v13473_v24 = vld [vmem:[%s16501_s26 + $0x234] ss:$28 sps:$4 sm:$0xff]  }
 0x126   : > { %2790 = vmatprep.subr.bf16.mxu1 %v20275_v0 }
 0x127   : > { %3078 = vmatpush1.bf16.msra.mxu0 %v13518_v40  ;;  %v13575_v40 = vld [vmem:[#allocation7 + $0x140] sm:$0xff]  }
 0x128   : > { %2538 = vmatmul.mubr.bf16.gmra.mxu0 %v13408_v25  ;;  %2730 = vmatmul.mubr.bf16.gmra.mxu1 %v13409_v26  ;;  %v13475_v25 = vld [vmem:[%s16501_s26 + $0x7c] ss:$28 sps:$4 sm:$0xff]   ;;  %v13549_v26 = vld [vmem:[#allocation7 + $0x1a0] sm:$0xff]  }
 0x129   : > { %2791 = vmatpush1.bf16.msra.mxu1 %v13410_v27  ;;  %2545 = vmatprep.mubr.bf16.mxu0 %v13412_v28  ;;  %v13559_v27 = vld [vmem:[#allocation7 + $0x160] sm:$0xff]   ;;  %v13566_v28 = vld [vmem:[#allocation7 + $0x158] sm:$0xff]  }
 0x12a   : > { %2792 = vmatprep.subr.bf16.mxu1 %v20275_v0  ;;  %2737 = vmatprep.mubr.bf16.mxu1 %v13414_v29  ;;  %v13582_v29 = vld [vmem:[#allocation7 + $0x198] sm:$0xff]  }
 0x12b   : > { %3079 = vmatprep.subr.bf16.mxu0 %v20275_v0 }
 0x12c   : > { %3080 = vmatpush1.bf16.msra.mxu0 %v13525_v44  ;;  %v13494_v44 = vld [vmem:[%s16501_s26 + $0x124] ss:$28 sps:$4 sm:$0xff]  }
 0x12d   : > { %2793 = vmatpush1.bf16.msra.mxu1 %v13411_v30  ;;  %3081 = vmatprep.subr.bf16.mxu0 %v20275_v0  ;;  %v13477_v30 = vld [vmem:[%s16501_s26 + $0x230] ss:$28 sps:$4 sm:$0xff]  }
 0x12e   : > { %2794 = vmatprep.subr.bf16.mxu1 %v20275_v0 }
 0x130   : > { %2546 = vmatmul.mubr.bf16.gmra.mxu0 %v13416_v31  ;;  %2738 = vmatmul.mubr.bf16.gmra.mxu1 %v13417_v32  ;;  %v13478_v31 = vld [vmem:[%s16501_s26 + $0x78] ss:$28 sps:$4 sm:$0xff]   ;;  %v13479_v32 = vld [vmem:[%s16501_s26 + $0x26c] ss:$28 sps:$4 sm:$0xff]  }
 0x131   : > { %2795 = vmatpush1.bf16.msra.mxu1 %v13418_v33  ;;  %2553 = vmatprep.mubr.bf16.mxu0 %v13420_v34  ;;  %v13481_v33 = vld [vmem:[%s16501_s26 + $0xb4] ss:$28 sps:$4 sm:$0xff]  }
 0x132   : > { %2796 = vmatprep.subr.bf16.mxu1 %v20275_v0  ;;  %2745 = vmatprep.mubr.bf16.mxu1 %v13422_v35  ;;  %v13567_v34 = vld [vmem:[#allocation7 + $0x150] sm:$0xff]   ;;  %v13574_v35 = vld [vmem:[#allocation7 + $0x148] sm:$0xff]  }
 0x133   : > { %3082 = vmatpush1.bf16.msra.mxu0 %v13526_v51  ;;  %v13503_v51 = vld [vmem:[%s16501_s26 + $0x158] ss:$28 sps:$4 sm:$0xff]  }
 0x134   : > { %3083 = vmatprep.subr.bf16.mxu0 %v20275_v0 }
 0x135   : > { %2797 = vmatpush1.bf16.msra.mxu1 %v13419_v37  ;;  %v13484_v37 = vld [vmem:[%s16501_s26 + $0xb0] ss:$28 sps:$4 sm:$0xff]  }
 0x136   : > { %2798 = vmatprep.subr.bf16.mxu1 %v20275_v0 }
 0x137   : > { %3084 = vmatpush1.bf16.msra.mxu0 %v13533_v55  ;;  %v13509_v55 = vld [vmem:[%s16501_s26 + $0x190] ss:$28 sps:$4 sm:$0xff]  }
 0x138   : > { %2554 = vmatmul.mubr.bf16.gmra.mxu0 %v13424_v38  ;;  %2746 = vmatmul.mubr.bf16.gmra.mxu1 %v13425_v39  ;;  %v13485_v38 = vld [vmem:[%s16501_s26 + $0x2a4] ss:$28 sps:$4 sm:$0xff]   ;;  %v13487_v39 = vld [vmem:[%s16501_s26 + $0xec] ss:$28 sps:$4 sm:$0xff]  }
 0x139   : > { %2799 = vmatpush1.bf16.msra.mxu1 %v13426_v41  ;;  %2561 = vmatprep.mubr.bf16.mxu0 %v13428_v42  ;;  %v13489_v41 = vld [vmem:[%s16501_s26 + $0x2a0] ss:$28 sps:$4 sm:$0xff]   ;;  %v13490_v42 = vld [vmem:[%s16501_s26 + $0xe8] ss:$28 sps:$4 sm:$0xff]  }
 0x13a   : > { %2800 = vmatprep.subr.bf16.mxu1 %v20275_v0  ;;  %2753 = vmatprep.mubr.bf16.mxu1 %v13430_v43  ;;  %v13492_v43 = vld [vmem:[%s16501_s26 + $0x2dc] ss:$28 sps:$4 sm:$0xff]  }
 0x13b   : > { %3085 = vmatprep.subr.bf16.mxu0 %v20275_v0 }
 0x13c   : > { %3086 = vmatpush1.bf16.msra.mxu0 %v13534_v59  ;;  %v13515_v59 = vld [vmem:[%s16501_s26 + $0x1c8] ss:$28 sps:$4 sm:$0xff]  }
 0x13d   : > { %2801 = vmatpush1.bf16.msra.mxu1 %v13427_v45  ;;  %3087 = vmatprep.subr.bf16.mxu0 %v20275_v0  ;;  %v13607_v45 = vld [vmem:[#allocation7 + $0x190] sm:$0xff]  }
 0x13e   : > { %2802 = vmatprep.subr.bf16.mxu1 %v20275_v0 }
 0x140   : > { %2562 = vmatmul.mubr.bf16.gmra.mxu0 %v13432_v46  ;;  %2754 = vmatmul.mubr.bf16.gmra.mxu1 %v13433_v47  ;;  %v13496_v46 = vld [vmem:[%s16501_s26 + $0x2d8] ss:$28 sps:$4 sm:$0xff]   ;;  %v13497_v47 = vld [vmem:[%s16501_s26 + $0x120] ss:$28 sps:$4 sm:$0xff]  }
 0x141   : > { %2803 = vmatpush2.bf16.msra.mxu1 %v13434_v48  ;;  %2569 = vmatprep.mubr.bf16.mxu0 %v13436_v49  ;;  %v13498_v48 = vld [vmem:[%s16501_s26 + $0x314] ss:$28 sps:$4 sm:$0xff]   ;;  %v13500_v49 = vld [vmem:[%s16501_s26 + $0x15c] ss:$28 sps:$4 sm:$0xff]  }
 0x142   : > { %2804 = vmatprep.subr.bf16.mxu1 %v20275_v0  ;;  %2761 = vmatprep.mubr.bf16.mxu1 %v13438_v50  ;;  %v13502_v50 = vld [vmem:[%s16501_s26 + $0x310] ss:$28 sps:$4 sm:$0xff]  }
 0x143   : > { %3088 = vmatpush1.bf16.msra.mxu0 %v13541_v3  ;;  %v13529_v3 = vld [vmem:[%s16501_s26 + $0x23c] ss:$28 sps:$4 sm:$0xff]  }
 0x144   : > { %3089 = vmatprep.subr.bf16.mxu0 %v20275_v0 }
 0x145   : > { %2805 = vmatpush2.bf16.msra.mxu1 %v13435_v52  ;;  %v13504_v52 = vld [vmem:[%s16501_s26 + $0x34c] ss:$28 sps:$4 sm:$0xff]  }
 0x146   : > { %2806 = vmatprep.subr.bf16.mxu1 %v20275_v0 }
 0x147   : > { %3090 = vmatpush1.bf16.msra.mxu0 %v13542_v5  ;;  %v13532_v5 = vld [vmem:[%s16501_s26 + $0x238] ss:$28 sps:$4 sm:$0xff]  }
 0x148   : > { %2570 = vmatmul.mubr.bf16.gmra.mxu0 %v13440_v53  ;;  %2762 = vmatmul.mubr.bf16.gmra.mxu1 %v13441_v54  ;;  %v13506_v53 = vld [vmem:[%s16501_s26 + $0x194] ss:$28 sps:$4 sm:$0xff]   ;;  %v13508_v54 = vld [vmem:[%s16501_s26 + $0x348] ss:$28 sps:$4 sm:$0xff]  }
 0x149   : > { %2807 = vmatpush2.bf16.msra.mxu1 %v13442_v56  ;;  %2577 = vmatprep.mubr.bf16.mxu0 %v13444_v57  ;;  %v13510_v56 = vld [vmem:[%s16501_s26 + $0x384] ss:$28 sps:$4 sm:$0xff]   ;;  %v13512_v57 = vld [vmem:[%s16501_s26 + $0x1cc] ss:$28 sps:$4 sm:$0xff]  }
 0x14a   : > { %2808 = vmatprep.subr.bf16.mxu1 %v20275_v0  ;;  %2769 = vmatprep.mubr.bf16.mxu1 %v13446_v58  ;;  %v13514_v58 = vld [vmem:[%s16501_s26 + $0x380] ss:$28 sps:$4 sm:$0xff]  }
 0x14b   : > { %3091 = vmatprep.subr.bf16.mxu0 %v20275_v0 }
 0x14c   : > { %3092 = vmatpush2.bf16.msra.mxu0 %v13550_v11  ;;  %v13545_v11 = vld [vmem:[%s16501_s26 + $0x2ac] ss:$28 sps:$4 sm:$0xff]  }
 0x14d   : > { %2809 = vmatpush2.bf16.msra.mxu1 %v13443_v60  ;;  %3093 = vmatprep.subr.bf16.mxu0 %v20275_v0  ;;  %v13519_v60 = vld [vmem:[%s16501_s26 + $0x3bc] ss:$28 sps:$4 sm:$0xff]  }
 0x14e   : > { %2810 = vmatprep.subr.bf16.mxu1 %v20275_v0 }
 0x150   : > { %2578 = vmatmul.mubr.bf16.gmra.mxu0 %v13448_v61  ;;  %2770 = vmatmul.mubr.bf16.gmra.mxu1 %v13449_v62  ;;  %v13521_v61 = vld [vmem:[%s16501_s26 + $0x204] ss:$28 sps:$4 sm:$0xff]   ;;  %v13632_v62 = vld [vmem:[#allocation7 + $0x188] sm:$0xff]  }
 0x151   : > { %2811 = vmatpush2.bf16.msra.mxu1 %v13450_v63  ;;  %2585 = vmatprep.mubr.bf16.mxu0 %v13452_v1  ;;  %v13523_v63 = vld [vmem:[%s16501_s26 + $0x3b8] ss:$28 sps:$4 sm:$0xff]   ;;  %v13524_v1 = vld [vmem:[%s16501_s26 + $0x200] ss:$28 sps:$4 sm:$0xff]  }
 0x152   : > { %2812 = vmatprep.subr.bf16.mxu1 %v20275_v0  ;;  %2777 = vmatprep.mubr.bf16.mxu1 %v13454_v2  ;;  %v13527_v2 = vld [vmem:[%s16501_s26 + $0x3f4] ss:$28 sps:$4 sm:$0xff]  }
 0x153   : > { %3094 = vmatpush2.bf16.msra.mxu0 %v13551_v19  ;;  %v13560_v19 = vld [vmem:[%s16501_s26 + $0x4d4] ss:$28 sps:$4 sm:$0xff]  }
 0x154   : > { %3095 = vmatprep.subr.bf16.mxu0 %v20275_v0 }
 0x155   : > { %2813 = vmatpush2.bf16.msra.mxu1 %v13451_v4  ;;  %v13531_v4 = vld [vmem:[%s16501_s26 + $0x3f0] ss:$28 sps:$4 sm:$0xff]  }
 0x156   : > { %2814 = vmatprep.subr.bf16.mxu1 %v20275_v0 }
 0x157   : > { %3096 = vmatpush2.bf16.msra.mxu0 %v13558_v21  ;;  %v13564_v21 = vld [vmem:[%s16501_s26 + $0x4d0] ss:$28 sps:$4 sm:$0xff]  }
 0x158   : > { %2586 = vmatmul.mubr.bf16.gmra.mxu0 %v13456_v6  ;;  %2778 = vmatmul.mubr.bf16.gmra.mxu1 %v13457_v7  ;;  %v13535_v6 = vld [vmem:[%s16501_s26 + $0x42c] ss:$28 sps:$4 sm:$0xff]   ;;  %v13537_v7 = vld [vmem:[%s16501_s26 + $0x274] ss:$28 sps:$4 sm:$0xff]  }
 0x159   : > { %2815 = vmatpush2.bf16.msra.mxu1 %v13458_v8  ;;  %2593 = vmatprep.mubr.bf16.mxu0 %v13460_v9  ;;  %v13539_v8 = vld [vmem:[%s16501_s26 + $0x428] ss:$28 sps:$4 sm:$0xff]   ;;  %v13540_v9 = vld [vmem:[%s16501_s26 + $0x270] ss:$28 sps:$4 sm:$0xff]  }
 0x15a   : > { %2816 = vmatprep.subr.bf16.mxu1 %v20275_v0  ;;  %2818 = vmatprep.mubr.bf16.mxu1 %v13464_v10  ;;  %v13543_v10 = vld [vmem:[%s16501_s26 + $0x464] ss:$28 sps:$4 sm:$0xff]  }
 0x15b   : > { %3097 = vmatprep.subr.bf16.mxu0 %v20275_v0 }
 0x15c   : > { %3098 = vmatpush2.bf16.msra.mxu0 %v13559_v27  ;;  %v13576_v27 = vld [vmem:[%s16501_s26 + $0x38c] ss:$28 sps:$4 sm:$0xff]  }
 0x15d   : > { %2817 = vmatpush2.bf16.msra.mxu1 %v13459_v12  ;;  %3099 = vmatprep.subr.bf16.mxu0 %v20275_v0  ;;  %v13547_v12 = vld [vmem:[%s16501_s26 + $0x460] ss:$28 sps:$4 sm:$0xff]  }
 0x15e   : > { %12954 = vmatprep.subr.bf16.mxu1 %v13466_v13 }
 0x160   : > { %2594 = vmatmul.mubr.bf16.gmra.mxu0 %v13465_v15  ;;  %2819 = vmatmul.mubr.bf16.vlgmr.msra.gmra.mxu1 %v13462_v14  ;;  %v13552_v14 = vld [vmem:[%s16501_s26 + $0x49c] ss:$28 sps:$4 sm:$0xff]   ;;  %v13554_v15 = vld [vmem:[%s16501_s26 + $0x2e4] ss:$28 sps:$4 sm:$0xff]  }
 0x161   : > { %12955 = vmatpush3.bf16.msra.mxu1 %v13466_v13  ;;  %2601 = vmatprep.mubr.bf16.mxu0 %v13467_v16  ;;  %v13548_v13 = vld [vmem:[%s16501_s26 + $0x2a8] ss:$28 sps:$4 sm:$0xff]  }
 0x162   : > { %2826 = vmatprep.mubr.bf16.mxu1 %v13469_v17  ;;  %12956 = vmatprep.subr.bf16.mxu1 %v13491_v18  ;;  %v13657_v16 = vld [vmem:[#allocation7 + $0x180] sm:$0xff]   ;;  %v13556_v17 = vld [vmem:[%s16501_s26 + $0x498] ss:$28 sps:$4 sm:$0xff]  }
 0x163   : > { %3100 = vmatpush2.bf16.msra.mxu0 %v13566_v28  ;;  %v13580_v28 = vld [vmem:[%s16501_s26 + $0x14] ss:$28 sps:$4 sm:$0xff]  }
 0x164   : > { %3101 = vmatprep.subr.bf16.mxu0 %v20275_v0 }
 0x165   : > { %12957 = vmatpush3.bf16.msra.mxu1 %v13491_v18  ;;  %v13557_v18 = vld [vmem:[%s16501_s26 + $0x2e0] ss:$28 sps:$4 sm:$0xff]  }
 0x166   : > { %12958 = vmatprep.subr.bf16.mxu1 %v13516_v20 }
 0x167   : > { %3102 = vmatpush2.bf16.msra.mxu0 %v13567_v34 }
 0x168   : > { %2602 = vmatmul.mubr.bf16.gmra.mxu0 %v13471_v22  ;;  %2827 = vmatmul.mubr.bf16.gmra.mxu1 %v13472_v23  ;;  %v13565_v22 = vld [vmem:[%s16501_s26 + $0x318] ss:$28 sps:$4 sm:$0xff]   ;;  %v13568_v23 = vld [vmem:[%s16501_s26 + $0x50c] ss:$28 sps:$4 sm:$0xff]  }
 0x169   : > { %2609 = vmatprep.mubr.bf16.mxu0 %v13473_v24  ;;  %2834 = vmatprep.mubr.bf16.mxu1 %v13475_v25  ;;  %v13570_v24 = vld [vmem:[%s16501_s26 + $0x354] ss:$28 sps:$4 sm:$0xff]   ;;  %v13572_v25 = vld [vmem:[%s16501_s26 + $0x508] ss:$28 sps:$4 sm:$0xff]  }
 0x16a   : > { %12959 = vmatpush3.bf16.msra.mxu1 %v13516_v20  ;;  %3103 = vmatprep.subr.bf16.mxu0 %v20275_v0  ;;  %v13562_v20 = vld [vmem:[%s16501_s26 + $0x31c] ss:$28 sps:$4 sm:$0xff]  }
 0x16b   : > { %12960 = vmatprep.subr.bf16.mxu1 %v13549_v26  ;;  %3104 = vmatpush2.bf16.msra.mxu0 %v13574_v35 }
 0x16c   : > { %3105 = vmatprep.subr.bf16.mxu0 %v20275_v0 }
 0x16e   : > { %12961 = vmatpush3.bf16.msra.mxu1 %v13549_v26  ;;  %v13573_v26 = vld [vmem:[%s16501_s26 + $0x350] ss:$28 sps:$4 sm:$0xff]  }
 0x16f   : > { %12962 = vmatprep.subr.bf16.mxu1 %v13582_v29  ;;  %3106 = vmatpush2.bf16.msra.mxu0 %v13575_v40  ;;  %v13588_v40 = vld [vmem:[%s16501_s26 + $0x48] ss:$28 sps:$4 sm:$0xff]  }
 0x170   : > { %2610 = vmatmul.mubr.bf16.gmra.mxu0 %v13477_v30  ;;  %2835 = vmatmul.mubr.bf16.gmra.mxu1 %v13478_v31  ;;  %v13581_v30 = vld [vmem:[%s16501_s26 + $0x388] ss:$28 sps:$4 sm:$0xff]  }
 0x171   : > { %2617 = vmatprep.mubr.bf16.mxu0 %v13479_v32  ;;  %2842 = vmatprep.mubr.bf16.mxu1 %v13481_v33  ;;  %v13583_v31 = vld [vmem:[%s16501_s26 + $0x3c4] ss:$28 sps:$4 sm:$0xff]   ;;  %v13585_v32 = vld [vmem:[%s16501_s26 + $0x4c] ss:$28 sps:$4 sm:$0xff]  }
 0x172   : > { %12963 = vmatpush3.bf16.msra.mxu1 %v13582_v29  ;;  %v13578_v29 = vld [vmem:[%s16501_s26 + $0x10] ss:$28 sps:$4 sm:$0xff]  }
 0x173   : > { %12964 = vmatprep.subr.bf16.mxu1 %v13607_v45 }
 0x176   : > { %12965 = vmatpush3.bf16.msra.mxu1 %v13607_v45 }
 0x177   : > { %12966 = vmatprep.subr.bf16.mxu1 %v13632_v62 }
 0x178   : > { %2618 = vmatmul.mubr.bf16.gmra.mxu0 %v13483_v36  ;;  %2843 = vmatmul.mubr.bf16.gmra.mxu1 %v13484_v37 }
 0x179   : > { %2625 = vmatprep.mubr.bf16.mxu0 %v13485_v38  ;;  %2850 = vmatprep.mubr.bf16.mxu1 %v13487_v39  ;;  %v13587_v39 = vld [vmem:[%s16501_s26 + $0x3c0] ss:$28 sps:$4 sm:$0xff]  }
 0x17a   : > { %12967 = vmatpush3.bf16.msra.mxu1 %v13632_v62 }
 0x17b   : > { %12968 = vmatprep.subr.bf16.mxu1 %v13657_v16 }
 0x17e   : > { %12969 = vmatpush3.bf16.msra.mxu1 %v13657_v16 }
 0x180   : > { %2626 = vmatmul.mubr.bf16.gmra.mxu0 %v13489_v41  ;;  %2851 = vmatmul.mubr.bf16.gmra.mxu1 %v13490_v42  ;;  %v13589_v41 = vld [vmem:[%s16501_s26 + $0x3fc] ss:$28 sps:$4 sm:$0xff]   ;;  %v13591_v42 = vld [vmem:[%s16501_s26 + $0x84] ss:$28 sps:$4 sm:$0xff]  }
 0x181   : > { %2633 = vmatprep.mubr.bf16.mxu0 %v13492_v43  ;;  %2858 = vmatprep.mubr.bf16.mxu1 %v13494_v44 }
 0x188   : > { %2634 = vmatmul.mubr.bf16.gmra.mxu0 %v13496_v46  ;;  %2859 = vmatmul.mubr.bf16.gmra.mxu1 %v13497_v47 }
 0x189   : > { %2641 = vmatprep.mubr.bf16.mxu0 %v13498_v48  ;;  %2866 = vmatprep.mubr.bf16.mxu1 %v13500_v49 }
 0x190   : > { %2642 = vmatmul.mubr.bf16.gmra.mxu0 %v13502_v50  ;;  %2867 = vmatmul.mubr.bf16.gmra.mxu1 %v13503_v51  ;;  %v13593_v51 = vld [vmem:[%s16501_s26 + $0x3f8] ss:$28 sps:$4 sm:$0xff]  }
 0x191   : > { %2649 = vmatprep.mubr.bf16.mxu0 %v13504_v52  ;;  %2874 = vmatprep.mubr.bf16.mxu1 %v13506_v53  ;;  %v13594_v52 = vld [vmem:[%s16501_s26 + $0x80] ss:$28 sps:$4 sm:$0xff]   ;;  %v13595_v53 = vld [vmem:[%s16501_s26 + $0x434] ss:$28 sps:$4 sm:$0xff]  }
 0x198   : > { %2650 = vmatmul.mubr.bf16.gmra.mxu0 %v13508_v54  ;;  %2875 = vmatmul.mubr.bf16.gmra.mxu1 %v13509_v55  ;;  %v13597_v54 = vld [vmem:[%s16501_s26 + $0xbc] ss:$28 sps:$4 sm:$0xff]  }
 0x199   : > { %2657 = vmatprep.mubr.bf16.mxu0 %v13510_v56  ;;  %2882 = vmatprep.mubr.bf16.mxu1 %v13512_v57 }
 0x1a0   : > { %2658 = vmatmul.mubr.bf16.gmra.mxu0 %v13514_v58  ;;  %2883 = vmatmul.mubr.bf16.gmra.mxu1 %v13515_v59 }
 0x1a1   : > { %2665 = vmatprep.mubr.bf16.mxu0 %v13519_v60  ;;  %2890 = vmatprep.mubr.bf16.mxu1 %v13521_v61 }
 0x1a8   : > { %2666 = vmatmul.mubr.bf16.gmra.mxu0 %v13523_v63  ;;  %2891 = vmatmul.mubr.bf16.gmra.mxu1 %v13524_v1  ;;  %v13599_v63 = vld [vmem:[%s16501_s26 + $0x430] ss:$28 sps:$4 sm:$0xff]   ;;  %v13600_v1 = vld [vmem:[%s16501_s26 + $0xb8] ss:$28 sps:$4 sm:$0xff]  }
 0x1a9   : > { %2673 = vmatprep.mubr.bf16.mxu0 %v13527_v2  ;;  %2898 = vmatprep.mubr.bf16.mxu1 %v13529_v3  ;;  %v13603_v2 = vld [vmem:[%s16501_s26 + $0x46c] ss:$28 sps:$4 sm:$0xff]   ;;  %v13606_v3 = vld [vmem:[%s16501_s26 + $0xf4] ss:$28 sps:$4 sm:$0xff]  }
 0x1b0   : > { %2674 = vmatmul.mubr.bf16.gmra.mxu0 %v13531_v4  ;;  %2899 = vmatmul.mubr.bf16.gmra.mxu1 %v13532_v5 }
 0x1b1   : > { %2681 = vmatprep.mubr.bf16.mxu0 %v13535_v6  ;;  %2906 = vmatprep.mubr.bf16.mxu1 %v13537_v7 }
 0x1b8   : > { %2682 = vmatmul.mubr.bf16.gmra.mxu0 %v13539_v8  ;;  %2907 = vmatmul.mubr.bf16.gmra.mxu1 %v13540_v9 }
 0x1b9   : > { %2689 = vmatprep.mubr.bf16.mxu0 %v13543_v10  ;;  %2914 = vmatprep.mubr.bf16.mxu1 %v13545_v11 }
 0x1c0   : > { %2690 = vmatmul.mubr.bf16.gmra.mxu0 %v13547_v12  ;;  %2915 = vmatmul.mubr.bf16.gmra.mxu1 %v13548_v13  ;;  %v13601_v12 = vld [vmem:[%s16501_s26 + $0x468] ss:$28 sps:$4 sm:$0xff]   ;;  %v13604_v13 = vld [vmem:[%s16501_s26 + $0xf0] ss:$28 sps:$4 sm:$0xff]  }
 0x1c1   : > { %2697 = vmatprep.mubr.bf16.mxu0 %v13552_v14  ;;  %2922 = vmatprep.mubr.bf16.mxu1 %v13554_v15  ;;  %v13610_v14 = vld [vmem:[%s16501_s26 + $0x4a4] ss:$28 sps:$4 sm:$0xff]   ;;  %v13613_v15 = vld [vmem:[%s16501_s26 + $0x12c] ss:$28 sps:$4 sm:$0xff]  }
 0x1c8   : > { %2698 = vmatmul.mubr.bf16.gmra.mxu0 %v13556_v17  ;;  %2923 = vmatmul.mubr.bf16.gmra.mxu1 %v13557_v18 }
 0x1c9   : > { %2705 = vmatprep.mubr.bf16.mxu0 %v13560_v19  ;;  %2930 = vmatprep.mubr.bf16.mxu1 %v13562_v20 }
 0x1d0   : > { %2706 = vmatmul.mubr.bf16.gmra.mxu0 %v13564_v21  ;;  %2931 = vmatmul.mubr.bf16.gmra.mxu1 %v13565_v22 }
 0x1d1   : > { %2713 = vmatprep.mubr.bf16.mxu0 %v13568_v23  ;;  %2938 = vmatprep.mubr.bf16.mxu1 %v13570_v24  ;;  %v13608_v24 = vld [vmem:[%s16501_s26 + $0x4a0] ss:$28 sps:$4 sm:$0xff]  }
 0x1d8   : > { %2714 = vmatmul.mubr.bf16.gmra.mxu0 %v13572_v25  ;;  %2939 = vmatmul.mubr.bf16.gmra.mxu1 %v13573_v26  ;;  %v13611_v25 = vld [vmem:[%s16501_s26 + $0x128] ss:$28 sps:$4 sm:$0xff]   ;;  %v13616_v26 = vld [vmem:[%s16501_s26 + $0x4dc] ss:$28 sps:$4 sm:$0xff]  }
 0x1d9   : > { %2946 = vmatprep.mubr.bf16.mxu1 %v13576_v27  ;;  %3107 = vmatprep.mubr.bf16.mxu0 %v13580_v28  ;;  %v13619_v27 = vld [vmem:[%s16501_s26 + $0x164] ss:$28 sps:$4 sm:$0xff]  }
 0x1e0   : > { %v16701_v33 = vpop.f32.mrf.mxu0  ;;  %v16703_v34 = vpop.f32.mrf.mxu1  ;;  %2947 = vmatmul.mubr.bf16.gmra.mxu1 %v13581_v30  ;;  %3108 = vmatmul.mubr.bf16.vlgmr.msra.gmra.mxu0 %v13578_v29 }
 0x1e1   : > { %2954 = vmatprep.mubr.bf16.mxu1 %v13583_v31  ;;  %3115 = vmatprep.mubr.bf16.mxu0 %v13585_v32 }
 0x1e2   : > { %v2533_v35 = vpop.f32.mrf.mxu0  ;;  %v2725_v36 = vpop.f32.mrf.mxu1 }
 0x1e4   : > { %v16705_v37 = vpop.f32.mrf.mxu0  ;;  %v16707_v38 = vpop.f32.mrf.mxu1 }
 0x1e6   : > { %v2536_v43 = vpop.f32.mrf.mxu0  ;;  %v2728_v44 = vpop.f32.mrf.mxu1 }
 0x1e7   : > { %v13625_v43 = vld [vmem:[%s16501_s26 + $0x19c] ss:$28 sps:$4 sm:$0xff]  }
 0x1e8   : > { %v16713_v45 = vpop.f32.mrf.mxu0  ;;  %v16715_v46 = vpop.f32.mrf.mxu1  ;;  %2955 = vmatmul.mubr.bf16.gmra.mxu1 %v13587_v39  ;;  %3116 = vmatmul.mubr.bf16.gmra.mxu0 %v13588_v40  ;;  %v13614_v40 = vld [vmem:[%s16501_s26 + $0x4d8] ss:$28 sps:$4 sm:$0xff]  }
 0x1e9   : > { %2962 = vmatprep.mubr.bf16.mxu1 %v13589_v41  ;;  %3123 = vmatprep.mubr.bf16.mxu0 %v13591_v42  ;;  %v13617_v41 = vld [vmem:[%s16501_s26 + $0x160] ss:$28 sps:$4 sm:$0xff]   ;;  %v13622_v42 = vld [vmem:[%s16501_s26 + $0x514] ss:$28 sps:$4 sm:$0xff]  }
 0x1ea   : > { %v2541_v47 = vpop.f32.mrf.mxu0  ;;  %v2733_v48 = vpop.f32.mrf.mxu1 }
 0x1ec   : > { %v16717_v49 = vpop.f32.mrf.mxu0  ;;  %v16719_v50 = vpop.f32.mrf.mxu1 }
 0x1ee   : > { %v2544_v55 = vpop.f32.mrf.mxu0  ;;  %v2736_v56 = vpop.f32.mrf.mxu1 }
 0x1ef   : > { %v13620_v56 = vld [vmem:[%s16501_s26 + $0x510] ss:$28 sps:$4 sm:$0xff]  }
 0x1f0   : > { %v16725_v57 = vpop.f32.mrf.mxu0  ;;  %v16727_v58 = vpop.f32.mrf.mxu1  ;;  %2963 = vmatmul.mubr.bf16.gmra.mxu1 %v13593_v51  ;;  %3124 = vmatmul.mubr.bf16.gmra.mxu0 %v13594_v52 }
 0x1f1   : > { %2970 = vmatprep.mubr.bf16.mxu1 %v13595_v53  ;;  %3131 = vmatprep.mubr.bf16.mxu0 %v13597_v54 }
 0x1f2   : > { %v2549_v59 = vpop.f32.mrf.mxu0  ;;  %v2741_v60 = vpop.f32.mrf.mxu1 }
 0x1f3   : > { %v13623_v59 = vld [vmem:[%s16501_s26 + $0x198] ss:$28 sps:$4 sm:$0xff]   ;;  %v13628_v60 = vld [vmem:[%s16501_s26 + $0x54c] ss:$28 sps:$4 sm:$0xff]  }
 0x1f4   : > { %v16729_v61 = vpop.f32.mrf.mxu0  ;;  %v16731_v62 = vpop.f32.mrf.mxu1 }
 0x1f6   : > { %v2552_v4 = vpop.f32.mrf.mxu0  ;;  %v2744_v5 = vpop.f32.mrf.mxu1 }
 0x1f8   : > { %v16737_v6 = vpop.f32.mrf.mxu0  ;;  %v16739_v7 = vpop.f32.mrf.mxu1  ;;  %2971 = vmatmul.mubr.bf16.gmra.mxu1 %v13599_v63  ;;  %3132 = vmatmul.mubr.bf16.gmra.mxu0 %v13600_v1  ;;  %v13631_v63 = vld [vmem:[%s16501_s26 + $0x1d4] ss:$28 sps:$4 sm:$0xff]  }
 0x1f9   : > { %2978 = vmatprep.mubr.bf16.mxu1 %v13603_v2  ;;  %3139 = vmatprep.mubr.bf16.mxu0 %v13606_v3 }
 0x1fa   : > { %v2557_v8 = vpop.f32.mrf.mxu0  ;;  %v2749_v9 = vpop.f32.mrf.mxu1 }
 0x1fb   : > { %v16789_v9 = vld [vmem:[#allocation8] ss:$0 sm:$0xff] }
 0x1fc   : > { %v16741_v10 = vpop.f32.mrf.mxu0  ;;  %v16743_v11 = vpop.f32.mrf.mxu1 }
 0x1fd   : > { %20362 = vst [vmem:[#allocation31_spill] sm:$0xff] %v16743_v11  ;;  %v13776_v11 = vld [vmem:[#allocation10 + $0x14] ss:$8 sps:$4 sm:$0xff]  }
 0x1fe   : > { %v2560_v16 = vpop.f32.mrf.mxu0  ;;  %v2752_v17 = vpop.f32.mrf.mxu1 }
 0x1ff   : > { %v2532_v16 = vadd.f32 %v16789_v9, %v16701_v33  ;;  %v13635_v17 = vld [vmem:[%s16501_s26 + $0x584] ss:$28 sps:$4 sm:$0xff]  }
 0x200   : > { %v16749_v18 = vpop.f32.mrf.mxu0  ;;  %v16751_v19 = vpop.f32.mrf.mxu1  ;;  %2979 = vmatmul.mubr.bf16.gmra.mxu1 %v13601_v12  ;;  %3140 = vmatmul.mubr.bf16.gmra.mxu0 %v13604_v13 }
 0x201   : > { %20363 = vst [vmem:[#allocation32_spill] sm:$0xff] %v16751_v19  ;;  %2986 = vmatprep.mubr.bf16.mxu1 %v13610_v14  ;;  %3147 = vmatprep.mubr.bf16.mxu0 %v13613_v15  ;;  %v13626_v14 = vld [vmem:[%s16501_s26 + $0x548] ss:$28 sps:$4 sm:$0xff]   ;;  %v13629_v15 = vld [vmem:[%s16501_s26 + $0x1d0] ss:$28 sps:$4 sm:$0xff]  }
 0x202   : > { %v2565_v20 = vpop.f32.mrf.mxu0  ;;  %v2757_v21 = vpop.f32.mrf.mxu1  ;;  %v13773_v19 = vld [vmem:[#allocation10 + $0x24] ss:$8 sps:$4 sm:$0xff]  }
 0x203   : > { %v13638_v20 = vld [vmem:[%s16501_s26 + $0x20c] ss:$28 sps:$4 sm:$0xff]  }
 0x204   : > { %v16753_v22 = vpop.f32.mrf.mxu0  ;;  %v16755_v23 = vpop.f32.mrf.mxu1 }
 0x205   : > { %20364 = vst [vmem:[#allocation33_spill] sm:$0xff] %v16755_v23 }
 0x206   : > { %v2568_v28 = vpop.f32.mrf.mxu0  ;;  %v2760_v29 = vpop.f32.mrf.mxu1 }
 0x208   : > { %v16761_v30 = vpop.f32.mrf.mxu0  ;;  %v16763_v31 = vpop.f32.mrf.mxu1  ;;  %2987 = vmatmul.mubr.bf16.gmra.mxu1 %v13608_v24  ;;  %3148 = vmatmul.mubr.bf16.gmra.mxu0 %v13611_v25 }
 0x209   : > { %20365 = vst [vmem:[#allocation34_spill] sm:$0xff] %v16763_v31  ;;  %2994 = vmatprep.mubr.bf16.mxu1 %v13616_v26  ;;  %3155 = vmatprep.mubr.bf16.mxu0 %v13619_v27  ;;  %v2535_v27 = vadd.f32 %v16789_v9, %v16705_v37 }
 0x20a   : > { %v2573_v32 = vpop.f32.mrf.mxu0  ;;  %v2765_v35 = vpop.f32.mrf.mxu1 }
 0x20c   : > { %v16765_v36 = vpop.f32.mrf.mxu0  ;;  %v16767_v39 = vpop.f32.mrf.mxu1 }
 0x20d   : > { %20366 = vst [vmem:[#allocation35_spill] sm:$0xff] %v16767_v39 }
 0x20e   : > { %v2576_v44 = vpop.f32.mrf.mxu0  ;;  %v2768_v47 = vpop.f32.mrf.mxu1 }
 0x20f   : > { %v13641_v44 = vld [vmem:[%s16501_s26 + $0x5bc] ss:$28 sps:$4 sm:$0xff]   ;;  %v13644_v47 = vld [vmem:[%s16501_s26 + $0x244] ss:$28 sps:$4 sm:$0xff]  }
 0x210   : > { %v16773_v48 = vpop.f32.mrf.mxu0  ;;  %v16775_v51 = vpop.f32.mrf.mxu1  ;;  %2995 = vmatmul.mubr.bf16.gmra.mxu1 %v13614_v40  ;;  %3156 = vmatmul.mubr.bf16.gmra.mxu0 %v13617_v41  ;;  %v13633_v40 = vld [vmem:[%s16501_s26 + $0x580] ss:$28 sps:$4 sm:$0xff]   ;;  %v13636_v41 = vld [vmem:[%s16501_s26 + $0x208] ss:$28 sps:$4 sm:$0xff]  }
 0x211   : > { %20367 = vst [vmem:[#allocation36_spill] sm:$0xff] %v16775_v51  ;;  %3002 = vmatprep.mubr.bf16.mxu1 %v13622_v42  ;;  %3163 = vmatprep.mubr.bf16.mxu0 %v13625_v43  ;;  %v2540_v42 = vadd.f32 %v16789_v9, %v16713_v45 }
 0x212   : > { %v2581_v52 = vpop.f32.mrf.mxu0  ;;  %v2773_v53 = vpop.f32.mrf.mxu1 }
 0x214   : > { %v16777_v54 = vpop.f32.mrf.mxu0  ;;  %v16779_v55 = vpop.f32.mrf.mxu1 }
 0x215   : > { %20368 = vst [vmem:[#allocation37_spill] sm:$0xff] %v16779_v55  ;;  %v13686_v55 = vld [vmem:[%s16501_s26 + $0x400] ss:$28 sps:$4 sm:$0xff]  }
 0x216   : > { %v2584_v1 = vpop.f32.mrf.mxu0  ;;  %v2776_v2 = vpop.f32.mrf.mxu1 }
 0x218   : > { %v16785_v3 = vpop.f32.mrf.mxu0  ;;  %v16787_v4 = vpop.f32.mrf.mxu1  ;;  %3003 = vmatmul.mubr.bf16.gmra.mxu1 %v13620_v56  ;;  %3164 = vmatmul.mubr.bf16.gmra.mxu0 %v13623_v59  ;;  %v2543_v59 = vadd.f32 %v16789_v9, %v16717_v49 }
 0x219   : > { %20369 = vst [vmem:[#allocation38_spill] sm:$0xff] %v16787_v4  ;;  %3010 = vmatprep.mubr.bf16.mxu1 %v13628_v60  ;;  %3171 = vmatprep.mubr.bf16.mxu0 %v13631_v63 }
 0x21a   : > { %v2589_v5 = vpop.f32.mrf.mxu0  ;;  %v2781_v8 = vpop.f32.mrf.mxu1 }
 0x21b   : > { %v13639_v5 = vld [vmem:[%s16501_s26 + $0x5b8] ss:$28 sps:$4 sm:$0xff]   ;;  %v13642_v8 = vld [vmem:[%s16501_s26 + $0x240] ss:$28 sps:$4 sm:$0xff]  }
 0x21c   : > { %v16791_v12 = vpop.f32.mrf.mxu0  ;;  %v16793_v13 = vpop.f32.mrf.mxu1 }
 0x21d   : > { %20370 = vst [vmem:[#allocation39_spill] sm:$0xff] %v16793_v13 }
 0x21e   : > { %v2592_v21 = vpop.f32.mrf.mxu0  ;;  %v2784_v24 = vpop.f32.mrf.mxu1 }
 0x220   : > { %v16801_v25 = vpop.f32.mrf.mxu0  ;;  %v2820_v26 = vpop.f32.mrf.mxu1  ;;  %3011 = vmatmul.mubr.bf16.gmra.mxu1 %v13626_v14  ;;  %3172 = vmatmul.mubr.bf16.gmra.mxu0 %v13629_v15  ;;  %v2548_v14 = vadd.f32 %v16789_v9, %v16725_v57  ;;  %v2551_v57 = vadd.f32 %v16789_v9, %v16729_v61 }
 0x221   : > { %v16805_v28 = vadd.f32 %v2820_v26, %v2532_v16  ;;  %3018 = vmatprep.mubr.bf16.mxu1 %v13635_v17  ;;  %3179 = vmatprep.mubr.bf16.mxu0 %v13638_v20  ;;  %v13647_v16 = vld [vmem:[%s16501_s26 + $0x5f4] ss:$28 sps:$4 sm:$0xff]   ;;  %v13650_v17 = vld [vmem:[%s16501_s26 + $0x27c] ss:$28 sps:$4 sm:$0xff]  }
 0x222   : > { %v2597_v33 = vpop.f32.mrf.mxu0  ;;  %v2822_v29 = vpop.f32.mrf.mxu1  ;;  %v13728_v20 = vld [vmem:[#allocation10 + $0x74] ss:$8 sps:$4 sm:$0xff]  }
 0x223   : > { %3857 = vmatprep.subr.bf16.mxu1 %v13728_v20  ;;  %v2564_v20 = vadd.f32 %v16789_v9, %v16749_v18 }
 0x224   : > { %v16807_v32 = vpop.f32.mrf.mxu0  ;;  %v2823_v35 = vpop.f32.mrf.mxu1 }
 0x225   : > { %v16813_v43 = vadd.f32 %v2823_v35, %v2535_v27 }
 0x226   : > { %v2600_v37 = vpop.f32.mrf.mxu0  ;;  %v2825_v52 = vpop.f32.mrf.mxu1 }
 0x227   : > { %v13653_v37 = vld [vmem:[%s16501_s26 + $0x62c] ss:$28 sps:$4 sm:$0xff]   ;;  %v13656_v52 = vld [vmem:[%s16501_s26 + $0x2b4] ss:$28 sps:$4 sm:$0xff]  }
 0x228   : > { %v16817_v53 = vpop.f32.mrf.mxu0  ;;  %v2828_v56 = vpop.f32.mrf.mxu1  ;;  %3019 = vmatmul.mubr.bf16.gmra.mxu1 %v13633_v40  ;;  %3180 = vmatmul.mubr.bf16.gmra.mxu0 %v13636_v41  ;;  %v13645_v41 = vld [vmem:[%s16501_s26 + $0x5f0] ss:$28 sps:$4 sm:$0xff]  }
 0x229   : > { %v16821_v60 = vadd.f32 %v2828_v56, %v2540_v42  ;;  %3026 = vmatprep.mubr.bf16.mxu1 %v13641_v44  ;;  %3187 = vmatprep.mubr.bf16.mxu0 %v13644_v47  ;;  %v13648_v42 = vld [vmem:[%s16501_s26 + $0x278] ss:$28 sps:$4 sm:$0xff]   ;;  %v2556_v44 = vadd.f32 %v16789_v9, %v16737_v6 }
 0x22a   : > { %v2605_v45 = vpop.f32.mrf.mxu0  ;;  %v2830_v63 = vpop.f32.mrf.mxu1 }
 0x22b   : > { %v2559_v63 = vadd.f32 %v16789_v9, %v16741_v10 }
 0x22c   : > { %v16823_v1 = vpop.f32.mrf.mxu0  ;;  %v2831_v2 = vpop.f32.mrf.mxu1 }
 0x22d   : > { %v16829_v15 = vadd.f32 %v2831_v2, %v2543_v59 }
 0x22e   : > { %v2608_v49 = vpop.f32.mrf.mxu0  ;;  %v2833_v21 = vpop.f32.mrf.mxu1 }
 0x22f   : > { %v13660_v21 = vld [vmem:[%s16501_s26 + $0x664] ss:$28 sps:$4 sm:$0xff]  }
 0x230   : > { %v16833_v24 = vpop.f32.mrf.mxu0  ;;  %v2836_v26 = vpop.f32.mrf.mxu1  ;;  %3027 = vmatmul.mubr.bf16.gmra.mxu1 %v13639_v5  ;;  %3188 = vmatmul.mubr.bf16.gmra.mxu0 %v13642_v8 }
 0x231   : > { %v16837_v27 = vadd.f32 %v2836_v26, %v2548_v14  ;;  %3034 = vmatprep.mubr.bf16.mxu1 %v13647_v16  ;;  %3195 = vmatprep.mubr.bf16.mxu0 %v13650_v17  ;;  %v13651_v16 = vld [vmem:[%s16501_s26 + $0x628] ss:$28 sps:$4 sm:$0xff]   ;;  %v13654_v17 = vld [vmem:[%s16501_s26 + $0x2b0] ss:$28 sps:$4 sm:$0xff]  }
 0x232   : > { %v2613_v33 = vpop.f32.mrf.mxu0  ;;  %v2838_v29 = vpop.f32.mrf.mxu1  ;;  %v13663_v26 = vld [vmem:[%s16501_s26 + $0x2ec] ss:$28 sps:$4 sm:$0xff]  }
 0x234   : > { %v16839_v35 = vpop.f32.mrf.mxu0  ;;  %v2839_v40 = vpop.f32.mrf.mxu1 }
 0x235   : > { %v16845_v47 = vadd.f32 %v2839_v40, %v2551_v57  ;;  %v2567_v40 = vadd.f32 %v16789_v9, %v16753_v22 }
 0x236   : > { %v2616_v61 = vpop.f32.mrf.mxu0  ;;  %v2841_v56 = vpop.f32.mrf.mxu1 }
 0x237   : > { %v13661_v61 = vld [vmem:[%s16501_s26 + $0x2e8] ss:$28 sps:$4 sm:$0xff]   ;;  %v2572_v56 = vadd.f32 %v16789_v9, %v16761_v30 }
 0x238   : > { %v16849_v59 = vpop.f32.mrf.mxu0  ;;  %v2844_v45 = vpop.f32.mrf.mxu1  ;;  %3035 = vmatmul.mubr.bf16.gmra.mxu1 %v13645_v41  ;;  %3196 = vmatmul.mubr.bf16.gmra.mxu0 %v13648_v42 }
 0x239   : > { %v16853_v2 = vadd.f32 %v2844_v45, %v2556_v44  ;;  %3042 = vmatprep.mubr.bf16.mxu1 %v13653_v37  ;;  %3203 = vmatprep.mubr.bf16.mxu0 %v13656_v52  ;;  %v13658_v52 = vld [vmem:[%s16501_s26 + $0x660] ss:$28 sps:$4 sm:$0xff]  }
 0x23a   : > { %v2621_v6 = vpop.f32.mrf.mxu0  ;;  %v2846_v5 = vpop.f32.mrf.mxu1 }
 0x23b   : > { %v13669_v6 = vld [vmem:[%s16501_s26 + $0x324] ss:$28 sps:$4 sm:$0xff]  }
 0x23c   : > { %v16855_v8 = vpop.f32.mrf.mxu0  ;;  %v2847_v14 = vpop.f32.mrf.mxu1 }
 0x23d   : > { %v16861_v49 = vadd.f32 %v2847_v14, %v2559_v63  ;;  %v13666_v63 = vld [vmem:[%s16501_s26 + $0x69c] ss:$28 sps:$4 sm:$0xff]  }
 0x23e   : > { %v2624_v10 = vpop.f32.mrf.mxu0  ;;  %v2849_v57 = vpop.f32.mrf.mxu1 }
 0x23f   : > { %v13664_v57 = vld [vmem:[%s16501_s26 + $0x698] ss:$28 sps:$4 sm:$0xff]  }
 0x240   : > { %v16865_v33 = vpop.f32.mrf.mxu0  ;;  %v2852_v29 = vpop.f32.mrf.mxu1  ;;  %3043 = vmatmul.mubr.bf16.gmra.mxu1 %v13651_v16  ;;  %3204 = vmatmul.mubr.bf16.gmra.mxu0 %v13654_v17  ;;  %v2575_v17 = vadd.f32 %v16789_v9, %v16765_v36 }
 0x241   : > { %v16869_v41 = vadd.f32 %v2852_v29, %v2564_v20  ;;  %3050 = vmatprep.mubr.bf16.mxu1 %v13660_v21  ;;  %3211 = vmatprep.mubr.bf16.mxu0 %v13663_v26  ;;  %v13667_v29 = vld [vmem:[%s16501_s26 + $0x320] ss:$28 sps:$4 sm:$0xff]   ;;  %v2628_v31 = vadd.f32 %v16789_v9, %v16865_v33 }
 0x242   : > { %v2629_v18 = vpop.f32.mrf.mxu0  ;;  %v2854_v42 = vpop.f32.mrf.mxu1 }
 0x243   : > { %v13672_v42 = vld [vmem:[%s16501_s26 + $0x6d4] ss:$28 sps:$4 sm:$0xff]  }
 0x244   : > { %v16871_v44 = vpop.f32.mrf.mxu0  ;;  %v2855_v37 = vpop.f32.mrf.mxu1 }
 0x245   : > { %v16877_v45 = vadd.f32 %v2855_v37, %v2567_v40  ;;  %v2580_v40 = vadd.f32 %v16789_v9, %v16773_v48  ;;  %v13675_v37 = vld [vmem:[%s16501_s26 + $0x35c] ss:$28 sps:$4 sm:$0xff]   ;;  %v2631_v33 = vadd.f32 %v16789_v9, %v16871_v44 }
 0x246   : > { %v2632_v22 = vpop.f32.mrf.mxu0  ;;  %v2857_v5 = vpop.f32.mrf.mxu1  ;;  %v13709_v44 = vld [vmem:[%s16501_s26 + $0x2b8] ss:$28 sps:$4 sm:$0xff]  }
 0x248   : > { %v16881_v14 = vpop.f32.mrf.mxu0  ;;  %v2860_v16 = vpop.f32.mrf.mxu1  ;;  %3051 = vmatmul.mubr.bf16.gmra.mxu1 %v13658_v52  ;;  %3212 = vmatmul.mubr.bf16.gmra.mxu0 %v13661_v61 }
 0x249   : > { %v16885_v20 = vadd.f32 %v2860_v16, %v2572_v56  ;;  %3058 = vmatprep.mubr.bf16.mxu1 %v13666_v63  ;;  %3219 = vmatprep.mubr.bf16.mxu0 %v13669_v6  ;;  %v2583_v63 = vadd.f32 %v16789_v9, %v16777_v54 }
 0x24a   : > { %v2637_v30 = vpop.f32.mrf.mxu0  ;;  %v2862_v21 = vpop.f32.mrf.mxu1 }
 0x24b   : > { %v13673_v30 = vld [vmem:[%s16501_s26 + $0x358] ss:$28 sps:$4 sm:$0xff]   ;;  %v2588_v21 = vadd.f32 %v16789_v9, %v16785_v3 }
 0x24c   : > { %v16887_v26 = vpop.f32.mrf.mxu0  ;;  %v2863_v10 = vpop.f32.mrf.mxu1 }
 0x24d   : > { %v16893_v18 = vadd.f32 %v2863_v10, %v2575_v17  ;;  %v13670_v17 = vld [vmem:[%s16501_s26 + $0x6d0] ss:$28 sps:$4 sm:$0xff]  }
 0x24e   : > { %v2640_v36 = vpop.f32.mrf.mxu0  ;;  %v2865_v52 = vpop.f32.mrf.mxu1 }
 0x24f   : > { %v2591_v36 = vadd.f32 %v16789_v9, %v16791_v12 }
 0x250   : > { %v16897_v61 = vpop.f32.mrf.mxu0  ;;  %v2868_v56 = vpop.f32.mrf.mxu1  ;;  %3059 = vmatmul.mubr.bf16.gmra.mxu1 %v13664_v57  ;;  %3220 = vmatmul.mubr.bf16.gmra.mxu0 %v13667_v29  ;;  %v13678_v57 = vld [vmem:[%s16501_s26 + $0x394] ss:$28 sps:$4 sm:$0xff]  }
 0x251   : > { %v16901_v6 = vadd.f32 %v2868_v56, %v2580_v40  ;;  %3066 = vmatprep.mubr.bf16.mxu1 %v13672_v42  ;;  %3227 = vmatprep.mubr.bf16.mxu0 %v13675_v37  ;;  %v13679_v29 = vld [vmem:[%s16501_s26 + $0x18] ss:$28 sps:$4 sm:$0xff]  }
 0x252   : > { %v2645_v48 = vpop.f32.mrf.mxu0  ;;  %v2870_v22 = vpop.f32.mrf.mxu1 }
 0x253   : > { %v13676_v22 = vld [vmem:[%s16501_s26 + $0x390] ss:$28 sps:$4 sm:$0xff]  }
 0x254   : > { %v16903_v5 = vpop.f32.mrf.mxu0  ;;  %v2871_v16 = vpop.f32.mrf.mxu1 }
 0x255   : > { %v16909_v10 = vadd.f32 %v2871_v16, %v2583_v63  ;;  %v13680_v16 = vld [vmem:[%s16501_s26 + $0x50] ss:$28 sps:$4 sm:$0xff]  }
 0x256   : > { %v2648_v54 = vpop.f32.mrf.mxu0  ;;  %v2873_v40 = vpop.f32.mrf.mxu1 }
 0x257   : > { %v2596_v54 = vadd.f32 %v16789_v9, %v16801_v25 }
 0x258   : > { %v16913_v42 = vpop.f32.mrf.mxu0  ;;  %v2876_v37 = vpop.f32.mrf.mxu1  ;;  %3067 = vmatmul.mubr.bf16.gmra.mxu1 %v13670_v17  ;;  %3228 = vmatmul.mubr.bf16.gmra.mxu0 %v13673_v30  ;;  %v13683_v17 = vld [vmem:[%s16501_s26 + $0x3cc] ss:$28 sps:$4 sm:$0xff]  }
 0x259   : > { %v16917_v52 = vadd.f32 %v2876_v37, %v2588_v21  ;;  %3235 = vmatprep.mubr.bf16.mxu0 %v13678_v57  ;;  %12970 = vmatprep.mubr.bf16.mxu1 %v13679_v29  ;;  %v13684_v30 = vld [vmem:[%s16501_s26 + $0x88] ss:$28 sps:$4 sm:$0xff]   ;;  %v13726_v21 = vld [vmem:[#allocation10 + $0x70] ss:$8 sps:$4 sm:$0xff]  }
 0x25a   : > { %v2653_v3 = vpop.f32.mrf.mxu0  ;;  %v2878_v56 = vpop.f32.mrf.mxu1  ;;  %v13741_v37 = vld [vmem:[#allocation10 + $0x64] ss:$8 sps:$4 sm:$0xff]  }
 0x25b   : > { %v2599_v3 = vadd.f32 %v16789_v9, %v16807_v32  ;;  %v13739_v56 = vld [vmem:[#allocation10 + $0x60] ss:$8 sps:$4 sm:$0xff]   ;;  %v2604_v32 = vadd.f32 %v16789_v9, %v16817_v53 }
 0x25c   : > { %v16919_v63 = vpop.f32.mrf.mxu0  ;;  %v2879_v48 = vpop.f32.mrf.mxu1 }
 0x25d   : > { %v16925_v40 = vadd.f32 %v2879_v48, %v2591_v36  ;;  %v13754_v48 = vld [vmem:[#allocation10 + $0x54] ss:$8 sps:$4 sm:$0xff]  }
 0x25e   : > { %v2656_v0 = vpop.f32.mrf.mxu0  ;;  %v2881_v12 = vpop.f32.mrf.mxu1 }
 0x260   : > { %v16929_v57 = vpop.f32.mrf.mxu0  ;;  %v2884_v29 = vpop.f32.mrf.mxu1  ;;  %3236 = vmatmul.mubr.bf16.gmra.mxu0 %v13676_v22  ;;  %12971 = vmatmul.mubr.bf16.vlgmr.msra.gmra.mxu1 %v13680_v16  ;;  %v13681_v22 = vld [vmem:[%s16501_s26 + $0x3c8] ss:$28 sps:$4 sm:$0xff]   ;;  %v13685_v16 = vld [vmem:[%s16501_s26 + $0xc0] ss:$28 sps:$4 sm:$0xff]  }
 0x261   : > { %v16933_v25 = vadd.f32 %v2884_v29, %v2596_v54  ;;  %3243 = vmatprep.mubr.bf16.mxu0 %v13683_v17  ;;  %12974 = vmatprep.mubr.bf16.mxu1 %v13684_v30  ;;  %v13688_v54 = vld [vmem:[%s16501_s26 + $0x404] ss:$28 sps:$4 sm:$0xff]   ;;  %v13689_v29 = vld [vmem:[%s16501_s26 + $0xf8] ss:$28 sps:$4 sm:$0xff]  }
 0x262   : > { %v2661_v0 = vpop.f32.mrf.mxu0  ;;  %v2886_v36 = vpop.f32.mrf.mxu1  ;;  %3858 = vmatpush1.bf16.msra.mxu1 %v13726_v21  ;;  %v13767_v21 = vld [vmem:[#allocation10 + $0x44] ss:$8 sps:$4 sm:$0xff]  }
 0x263   : > { %3859 = vmatprep.subr.bf16.mxu1 %v13741_v37  ;;  %v13752_v0 = vld [vmem:[#allocation10 + $0x50] ss:$8 sps:$4 sm:$0xff]  }
 0x264   : > { %v16935_v12 = vpop.f32.mrf.mxu0  ;;  %v2887_v13 = vpop.f32.mrf.mxu1 }
 0x265   : > { %v16941_v4 = vadd.f32 %v2887_v13, %v2599_v3  ;;  %v2607_v13 = vadd.f32 %v16789_v9, %v16823_v1  ;;  %v13693_v1 = vld [vmem:[%s16501_s26 + $0x43c] ss:$28 sps:$4 sm:$0xff]  }
 0x266   : > { %v2664_v17 = vpop.f32.mrf.mxu0  ;;  %v2889_v30 = vpop.f32.mrf.mxu1  ;;  %3860 = vmatpush1.bf16.msra.mxu1 %v13739_v56 }
 0x267   : > { %3861 = vmatprep.subr.bf16.mxu1 %v13754_v48  ;;  %v13765_v48 = vld [vmem:[#allocation10 + $0x40] ss:$8 sps:$4 sm:$0xff]  }
 0x268   : > { %v16945_v37 = vpop.f32.mrf.mxu0  ;;  %v2892_v36 = vpop.f32.mrf.mxu1  ;;  %3244 = vmatmul.mubr.bf16.gmra.mxu0 %v13681_v22  ;;  %12975 = vmatmul.mubr.bf16.gmra.mxu1 %v13685_v16  ;;  %v13690_v22 = vld [vmem:[%s16501_s26 + $0x130] ss:$28 sps:$4 sm:$0xff]   ;;  %v2612_v16 = vadd.f32 %v16789_v9, %v16833_v24  ;;  %v2615_v24 = vadd.f32 %v16789_v9, %v16839_v35  ;;  %v13699_v35 = vld [vmem:[%s16501_s26 + $0x1d8] ss:$28 sps:$4 sm:$0xff]  }
 0x269   : > { %v16949_v53 = vadd.f32 %v2892_v36, %v2604_v32  ;;  %3251 = vmatprep.mubr.bf16.mxu0 %v13688_v54  ;;  %12978 = vmatprep.mubr.bf16.mxu1 %v13689_v29  ;;  %v13694_v32 = vld [vmem:[%s16501_s26 + $0x168] ss:$28 sps:$4 sm:$0xff]   ;;  %v13770_v36 = vld [vmem:[#allocation10 + $0x34] ss:$8 sps:$4 sm:$0xff]  }
 0x26a   : > { %v2669_v3 = vpop.f32.mrf.mxu0  ;;  %v2894_v56 = vpop.f32.mrf.mxu1  ;;  %3862 = vmatpush1.bf16.msra.mxu1 %v13752_v0  ;;  %v13768_v0 = vld [vmem:[#allocation10 + $0x30] ss:$8 sps:$4 sm:$0xff]  }
 0x26b   : > { %3863 = vmatprep.subr.bf16.mxu1 %v13767_v21 }
 0x26c   : > { %v16951_v17 = vpop.f32.mrf.mxu0  ;;  %v2895_v30 = vpop.f32.mrf.mxu1 }
 0x26d   : > { %v16957_v51 = vadd.f32 %v2895_v30, %v2607_v13 }
 0x26e   : > { %v2672_v54 = vpop.f32.mrf.mxu0  ;;  %v2897_v29 = vpop.f32.mrf.mxu1  ;;  %3864 = vmatpush1.bf16.msra.mxu1 %v13765_v48 }
 0x26f   : > { %3865 = vmatprep.subr.bf16.mxu1 %v13770_v36  ;;  %v13691_v54 = vld [vmem:[%s16501_s26 + $0x438] ss:$28 sps:$4 sm:$0xff]   ;;  %v13695_v29 = vld [vmem:[%s16501_s26 + $0x1a0] ss:$28 sps:$4 sm:$0xff]  }
 0x270   : > { %v16961_v21 = vpop.f32.mrf.mxu0  ;;  %v2900_v3 = vpop.f32.mrf.mxu1  ;;  %3252 = vmatmul.mubr.bf16.gmra.mxu0 %v13686_v55  ;;  %12979 = vmatmul.mubr.bf16.gmra.mxu1 %v13690_v22  ;;  %v2620_v55 = vadd.f32 %v16789_v9, %v16849_v59  ;;  %v13698_v22 = vld [vmem:[%s16501_s26 + $0x474] ss:$28 sps:$4 sm:$0xff]  }
 0x271   : > { %v16965_v13 = vadd.f32 %v2900_v3, %v2612_v16  ;;  %3259 = vmatprep.mubr.bf16.mxu0 %v13693_v1  ;;  %12982 = vmatprep.mubr.bf16.mxu1 %v13694_v32  ;;  %v2623_v3 = vadd.f32 %v16789_v9, %v16855_v8 }
 0x272   : > { %v2677_v56 = vpop.f32.mrf.mxu0  ;;  %v2902_v48 = vpop.f32.mrf.mxu1  ;;  %3866 = vmatpush1.bf16.msra.mxu1 %v13768_v0 }
 0x273   : > { %3867 = vmatprep.subr.bf16.mxu1 %v13773_v19 }
 0x274   : > { %v16967_v30 = vpop.f32.mrf.mxu0  ;;  %v2903_v36 = vpop.f32.mrf.mxu1 }
 0x275   : > { %v16973_v39 = vadd.f32 %v2903_v36, %v2615_v24 }
 0x276   : > { %v2680_v16 = vpop.f32.mrf.mxu0  ;;  %v2905_v1 = vpop.f32.mrf.mxu1 }
 0x277   : > { %v13696_v16 = vld [vmem:[%s16501_s26 + $0x470] ss:$28 sps:$4 sm:$0xff]  }
 0x278   : > { %v16977_v32 = vpop.f32.mrf.mxu0  ;;  %v2908_v0 = vpop.f32.mrf.mxu1  ;;  %3260 = vmatmul.mubr.bf16.gmra.mxu0 %v13691_v54  ;;  %12983 = vmatmul.mubr.bf16.gmra.mxu1 %v13695_v29  ;;  %v13700_v1 = vld [vmem:[%s16501_s26 + $0x210] ss:$28 sps:$4 sm:$0xff]   ;;  %v13704_v29 = vld [vmem:[%s16501_s26 + $0x248] ss:$28 sps:$4 sm:$0xff]  }
 0x279   : > { %v16981_v56 = vadd.f32 %v2908_v0, %v2620_v55  ;;  %3267 = vmatprep.mubr.bf16.mxu0 %v13698_v22  ;;  %12986 = vmatprep.mubr.bf16.mxu1 %v13699_v35  ;;  %v13703_v54 = vld [vmem:[%s16501_s26 + $0x4ac] ss:$28 sps:$4 sm:$0xff]  }
 0x27a   : > { %v2685_v59 = vpop.f32.mrf.mxu0  ;;  %v2910_v24 = vpop.f32.mrf.mxu1  ;;  %v13771_v22 = vld [vmem:[#allocation10 + $0x20] ss:$8 sps:$4 sm:$0xff]  }
 0x27b   : > { %3868 = vmatpush1.bf16.msra.mxu1 %v13771_v22 }
 0x27c   : > { %v16983_v48 = vpop.f32.mrf.mxu0  ;;  %v2911_v36 = vpop.f32.mrf.mxu1  ;;  %3869 = vmatprep.subr.bf16.mxu1 %v13776_v11 }
 0x27d   : > { %v16989_v23 = vadd.f32 %v2911_v36, %v2623_v3 }
 0x27e   : > { %v2688_v8 = vpop.f32.mrf.mxu0  ;;  %v2913_v55 = vpop.f32.mrf.mxu1 }
 0x27f   : > { %20371 = vst [vmem:[#allocation40_spill] sm:$0xff] %v16989_v23  ;;  %v13701_v8 = vld [vmem:[%s16501_s26 + $0x4a8] ss:$28 sps:$4 sm:$0xff]   ;;  %v13705_v55 = vld [vmem:[%s16501_s26 + $0x280] ss:$28 sps:$4 sm:$0xff]  }
 0x280   : > { %v16993_v35 = vpop.f32.mrf.mxu0  ;;  %v2916_v0 = vpop.f32.mrf.mxu1  ;;  %3268 = vmatmul.mubr.bf16.gmra.mxu0 %v13696_v16  ;;  %12987 = vmatmul.mubr.bf16.gmra.mxu1 %v13700_v1  ;;  %v2636_v16 = vadd.f32 %v16789_v9, %v16881_v14  ;;  %v13708_v1 = vld [vmem:[%s16501_s26 + $0x4e4] ss:$28 sps:$4 sm:$0xff]  }
 0x281   : > { %v16997_v3 = vadd.f32 %v2916_v0, %v2628_v31  ;;  %3275 = vmatprep.mubr.bf16.mxu0 %v13703_v54  ;;  %12990 = vmatprep.mubr.bf16.mxu1 %v13704_v29  ;;  %v2639_v0 = vadd.f32 %v16789_v9, %v16887_v26 }
 0x282   : > { %v2693_v59 = vpop.f32.mrf.mxu0  ;;  %v2918_v24 = vpop.f32.mrf.mxu1 }
 0x283   : > { %20372 = vst [vmem:[#allocation41_spill] sm:$0xff] %v16997_v3 }
 0x284   : > { %v16999_v36 = vpop.f32.mrf.mxu0  ;;  %v2919_v19 = vpop.f32.mrf.mxu1 }
 0x285   : > { %v17005_v23 = vadd.f32 %v2919_v19, %v2631_v33 }
 0x286   : > { %v2696_v31 = vpop.f32.mrf.mxu0  ;;  %v2921_v54 = vpop.f32.mrf.mxu1 }
 0x287   : > { %20373 = vst [vmem:[#allocation42_spill] sm:$0xff] %v17005_v23  ;;  %v13706_v31 = vld [vmem:[%s16501_s26 + $0x4e0] ss:$28 sps:$4 sm:$0xff]   ;;  %v13710_v54 = vld [vmem:[%s16501_s26 + $0x2f0] ss:$28 sps:$4 sm:$0xff]   ;;  %v2644_v23 = vadd.f32 %v16789_v9, %v16897_v61  ;;  %v2647_v61 = vadd.f32 %v16789_v9, %v16903_v5 }
 0x288   : > { %v17009_v29 = vpop.f32.mrf.mxu0  ;;  %v2924_v22 = vpop.f32.mrf.mxu1  ;;  %3276 = vmatmul.mubr.bf16.gmra.mxu0 %v13701_v8  ;;  %12991 = vmatmul.mubr.bf16.gmra.mxu1 %v13705_v55  ;;  %v13713_v8 = vld [vmem:[%s16501_s26 + $0x51c] ss:$28 sps:$4 sm:$0xff]   ;;  %v13714_v55 = vld [vmem:[%s16501_s26 + $0x328] ss:$28 sps:$4 sm:$0xff]  }
 0x289   : > { %v17013_v59 = vadd.f32 %v2924_v22, %v2636_v16  ;;  %3283 = vmatprep.mubr.bf16.mxu0 %v13708_v1  ;;  %12994 = vmatprep.mubr.bf16.mxu1 %v13709_v44  ;;  %v13774_v1 = vld [vmem:[#allocation10 + $0x10] ss:$8 sps:$4 sm:$0xff]  }
 0x28a   : > { %v2701_v14 = vpop.f32.mrf.mxu0  ;;  %v2926_v33 = vpop.f32.mrf.mxu1  ;;  %3870 = vmatpush1.bf16.msra.mxu1 %v13774_v1  ;;  %v13719_v5 = vld [vmem:[%s16501_s26 + $0x398] ss:$28 sps:$4 sm:$0xff]  }
 0x28b   : > { %20374 = vst [vmem:[#allocation43_spill] sm:$0xff] %v17013_v59  ;;  %v13779_v59 = vld [vmem:[#allocation10 + $0x4] ss:$8 sps:$4 sm:$0xff]  }
 0x28c   : > { %v17015_v24 = vpop.f32.mrf.mxu0  ;;  %v2927_v19 = vpop.f32.mrf.mxu1  ;;  %3871 = vmatprep.subr.bf16.mxu1 %v13779_v59 }
 0x28d   : > { %v17021_v3 = vadd.f32 %v2927_v19, %v2639_v0 }
 0x28e   : > { %v2704_v26 = vpop.f32.mrf.mxu0  ;;  %v2929_v16 = vpop.f32.mrf.mxu1 }
 0x28f   : > { %20375 = vst [vmem:[#allocation44_spill] sm:$0xff] %v17021_v3  ;;  %v13711_v26 = vld [vmem:[%s16501_s26 + $0x518] ss:$28 sps:$4 sm:$0xff]   ;;  %v13715_v16 = vld [vmem:[%s16501_s26 + $0x360] ss:$28 sps:$4 sm:$0xff]  }
 0x290   : > { %v17025_v44 = vpop.f32.mrf.mxu0  ;;  %v2932_v22 = vpop.f32.mrf.mxu1  ;;  %3284 = vmatmul.mubr.bf16.gmra.mxu0 %v13706_v31  ;;  %12995 = vmatmul.mubr.bf16.gmra.mxu1 %v13710_v54  ;;  %v2652_v31 = vadd.f32 %v16789_v9, %v16913_v42  ;;  %v13718_v54 = vld [vmem:[%s16501_s26 + $0x554] ss:$28 sps:$4 sm:$0xff]  }
 0x291   : > { %v17029_v0 = vadd.f32 %v2932_v22, %v2644_v23  ;;  %3291 = vmatprep.mubr.bf16.mxu0 %v13713_v8  ;;  %12998 = vmatprep.mubr.bf16.mxu1 %v13714_v55  ;;  %v2655_v22 = vadd.f32 %v16789_v9, %v16919_v63 }
 0x292   : > { %v2709_v14 = vpop.f32.mrf.mxu0  ;;  %v2934_v33 = vpop.f32.mrf.mxu1 }
 0x293   : > { %20376 = vst [vmem:[#allocation45_spill] sm:$0xff] %v17029_v0 }
 0x294   : > { %v17031_v19 = vpop.f32.mrf.mxu0  ;;  %v2935_v11 = vpop.f32.mrf.mxu1 }
 0x295   : > { %v17037_v3 = vadd.f32 %v2935_v11, %v2647_v61 }
 0x296   : > { %v2712_v23 = vpop.f32.mrf.mxu0  ;;  %v2937_v8 = vpop.f32.mrf.mxu1 }
 0x297   : > { %20377 = vst [vmem:[#allocation46_spill] sm:$0xff] %v17037_v3  ;;  %v13716_v23 = vld [vmem:[%s16501_s26 + $0x550] ss:$28 sps:$4 sm:$0xff]   ;;  %v2660_v3 = vadd.f32 %v16789_v9, %v16929_v57 }
 0x298   : > { %v17041_v55 = vpop.f32.mrf.mxu0  ;;  %v2940_v1 = vpop.f32.mrf.mxu1  ;;  %3292 = vmatmul.mubr.bf16.gmra.mxu0 %v13711_v26  ;;  %12999 = vmatmul.mubr.bf16.gmra.mxu1 %v13715_v16  ;;  %v13720_v8 = vld [vmem:[%s16501_s26 + $0x3d0] ss:$28 sps:$4 sm:$0xff]   ;;  %v13724_v16 = vld [vmem:[%s16501_s26 + $0x408] ss:$28 sps:$4 sm:$0xff]  }
 0x299   : > { %v17045_v14 = vadd.f32 %v2940_v1, %v2652_v31  ;;  %3299 = vmatprep.mubr.bf16.mxu0 %v13718_v54  ;;  %13002 = vmatprep.mubr.bf16.mxu1 %v13719_v5  ;;  %v13723_v26 = vld [vmem:[%s16501_s26 + $0x58c] ss:$28 sps:$4 sm:$0xff]  }
 0x29a   : > { %v2717_v42 = vpop.f32.mrf.mxu0  ;;  %v2942_v61 = vpop.f32.mrf.mxu1  ;;  %v13777_v1 = vld [vmem:[#allocation10] ss:$8 sps:$4 sm:$0xff]  }
 0x29b   : > { %v2663_v42 = vadd.f32 %v16789_v9, %v16935_v12  ;;  %3872 = vmatpush1.bf16.msra.mxu1 %v13777_v1 }
 0x29c   : > { %v17047_v33 = vpop.f32.mrf.mxu0  ;;  %v2943_v11 = vpop.f32.mrf.mxu1 }
 0x29d   : > { %v17053_v0 = vadd.f32 %v2943_v11, %v2655_v22 }
 0x29e   : > { %v2720_v63 = vpop.f32.mrf.mxu0  ;;  %v2945_v31 = vpop.f32.mrf.mxu1 }
 0x29f   : > { %20378 = vst [vmem:[#allocation47_spill] sm:$0xff] %v17053_v0  ;;  %v13721_v31 = vld [vmem:[%s16501_s26 + $0x588] ss:$28 sps:$4 sm:$0xff]  }
 0x2a0   : > { %v2948_v54 = vpop.f32.mrf.mxu1  ;;  %v3109_v5 = vpop.f32.mrf.mxu0  ;;  %3300 = vmatmul.mubr.bf16.gmra.mxu0 %v13716_v23  ;;  %13003 = vmatmul.mubr.bf16.gmra.mxu1 %v13720_v8  ;;  %v13725_v23 = vld [vmem:[%s16501_s26 + $0x440] ss:$28 sps:$4 sm:$0xff]   ;;  %v2668_v8 = vadd.f32 %v16789_v9, %v16945_v37  ;;  %v2671_v37 = vadd.f32 %v16789_v9, %v16951_v17 }
 0x2a1   : > { %v17059_v57 = vadd.f32 %v2948_v54, %v2660_v3  ;;  %v17062_v22 = vadd.f32 %v3109_v5, %v16805_v28  ;;  %3307 = vmatprep.mubr.bf16.mxu0 %v13723_v26  ;;  %13006 = vmatprep.mubr.bf16.mxu1 %v13724_v16  ;;  %v13731_v3 = vld [vmem:[%s16501_s26 + $0x5c4] ss:$28 sps:$4 sm:$0xff]   ;;  %v13732_v28 = vld [vmem:[%s16501_s26 + $0x478] ss:$28 sps:$4 sm:$0xff]  }
 0x2a2   : > { %v2950_v61 = vpop.f32.mrf.mxu1  ;;  %v3111_v11 = vpop.f32.mrf.mxu0 }
 0x2a4   : > { %v2951_v59 = vpop.f32.mrf.mxu1  ;;  %v3112_v63 = vpop.f32.mrf.mxu0 }
 0x2a5   : > { %v17068_v0 = vadd.f32 %v2951_v59, %v2663_v42  ;;  %v17071_v12 = vadd.f32 %v3112_v63, %v16813_v43  ;;  %v13729_v63 = vld [vmem:[%s16501_s26 + $0x5c0] ss:$28 sps:$4 sm:$0xff]  }
 0x2a6   : > { %v2953_v26 = vpop.f32.mrf.mxu1  ;;  %v3114_v16 = vpop.f32.mrf.mxu0 }
 0x2a7   : > { %v13733_v26 = vld [vmem:[%s16501_s26 + $0x4b0] ss:$28 sps:$4 sm:$0xff]   ;;  %v13737_v16 = vld [vmem:[%s16501_s26 + $0x4e8] ss:$28 sps:$4 sm:$0xff]  }
 0x2a8   : > { %v2956_v54 = vpop.f32.mrf.mxu1  ;;  %v3117_v1 = vpop.f32.mrf.mxu0  ;;  %3308 = vmatmul.mubr.bf16.gmra.mxu0 %v13721_v31  ;;  %13007 = vmatmul.mubr.bf16.gmra.mxu1 %v13725_v23  ;;  %v2676_v31 = vadd.f32 %v16789_v9, %v16961_v21  ;;  %v2679_v21 = vadd.f32 %v16789_v9, %v16967_v30 }
 0x2a9   : > { %v17077_v5 = vadd.f32 %v2956_v54, %v2668_v8  ;;  %v17080_v43 = vadd.f32 %v3117_v1, %v16821_v60  ;;  %3315 = vmatprep.mubr.bf16.mxu0 %v13731_v3  ;;  %13010 = vmatprep.mubr.bf16.mxu1 %v13732_v28  ;;  %v13736_v8 = vld [vmem:[%s16501_s26 + $0x5fc] ss:$28 sps:$4 sm:$0xff]  }
 0x2aa   : > { %v2958_v42 = vpop.f32.mrf.mxu1  ;;  %v3119_v61 = vpop.f32.mrf.mxu0 }
 0x2ac   : > { %v2959_v11 = vpop.f32.mrf.mxu1  ;;  %v3120_v59 = vpop.f32.mrf.mxu0 }
 0x2ad   : > { %v17086_v23 = vadd.f32 %v2959_v11, %v2671_v37  ;;  %v17089_v17 = vadd.f32 %v3120_v59, %v16829_v15  ;;  %v13734_v59 = vld [vmem:[%s16501_s26 + $0x5f8] ss:$28 sps:$4 sm:$0xff]  }
 0x2ae   : > { %v2961_v60 = vpop.f32.mrf.mxu1  ;;  %v3122_v3 = vpop.f32.mrf.mxu0 }
 0x2af   : > { %v13738_v60 = vld [vmem:[%s16501_s26 + $0x520] ss:$28 sps:$4 sm:$0xff]   ;;  %v13745_v3 = vld [vmem:[%s16501_s26 + $0x558] ss:$28 sps:$4 sm:$0xff]  }
 0x2b0   : > { %v2964_v28 = vpop.f32.mrf.mxu1  ;;  %v3125_v54 = vpop.f32.mrf.mxu0  ;;  %3316 = vmatmul.mubr.bf16.gmra.mxu0 %v13729_v63  ;;  %13011 = vmatmul.mubr.bf16.gmra.mxu1 %v13733_v26  ;;  %v2684_v63 = vadd.f32 %v16789_v9, %v16977_v32  ;;  %v2687_v32 = vadd.f32 %v16789_v9, %v16983_v48 }
 0x2b1   : > { %v17095_v1 = vadd.f32 %v2964_v28, %v2676_v31  ;;  %v17098_v15 = vadd.f32 %v3125_v54, %v16837_v27  ;;  %3323 = vmatprep.mubr.bf16.mxu0 %v13736_v8  ;;  %13014 = vmatprep.mubr.bf16.mxu1 %v13737_v16  ;;  %v13744_v31 = vld [vmem:[%s16501_s26 + $0x634] ss:$28 sps:$4 sm:$0xff]  }
 0x2b2   : > { %v2966_v37 = vpop.f32.mrf.mxu1  ;;  %v3127_v42 = vpop.f32.mrf.mxu0 }
 0x2b4   : > { %v2967_v61 = vpop.f32.mrf.mxu1  ;;  %v3128_v11 = vpop.f32.mrf.mxu0 }
 0x2b5   : > { %v17104_v26 = vadd.f32 %v2967_v61, %v2679_v21  ;;  %v17107_v30 = vadd.f32 %v3128_v11, %v16845_v47  ;;  %v13742_v11 = vld [vmem:[%s16501_s26 + $0x630] ss:$28 sps:$4 sm:$0xff]  }
 0x2b6   : > { %v2969_v27 = vpop.f32.mrf.mxu1  ;;  %v3130_v8 = vpop.f32.mrf.mxu0 }
 0x2b7   : > { %v13746_v27 = vld [vmem:[%s16501_s26 + $0x590] ss:$28 sps:$4 sm:$0xff]   ;;  %v13750_v8 = vld [vmem:[%s16501_s26 + $0x5c8] ss:$28 sps:$4 sm:$0xff]  }
 0x2b8   : > { %v2972_v16 = vpop.f32.mrf.mxu1  ;;  %v3133_v28 = vpop.f32.mrf.mxu0  ;;  %3324 = vmatmul.mubr.bf16.gmra.mxu0 %v13734_v59  ;;  %13015 = vmatmul.mubr.bf16.gmra.mxu1 %v13738_v60  ;;  %v2692_v59 = vadd.f32 %v16789_v9, %v16993_v35 }
 0x2b9   : > { %v17113_v54 = vadd.f32 %v2972_v16, %v2684_v63  ;;  %v17116_v47 = vadd.f32 %v3133_v28, %v16853_v2  ;;  %3331 = vmatprep.mubr.bf16.mxu0 %v13744_v31  ;;  %13018 = vmatprep.mubr.bf16.mxu1 %v13745_v3  ;;  %v13749_v63 = vld [vmem:[%s16501_s26 + $0x66c] ss:$28 sps:$4 sm:$0xff]   ;;  %v2695_v28 = vadd.f32 %v16789_v9, %v16999_v36 }
 0x2ba   : > { %v2974_v21 = vpop.f32.mrf.mxu1  ;;  %v3135_v37 = vpop.f32.mrf.mxu0 }
 0x2bb   : > { %v13780_v37 = vld [vmem:[#allocation13 + $0x38] sm:$0xff]  }
 0x2bc   : > { %v2975_v42 = vpop.f32.mrf.mxu1  ;;  %v3136_v61 = vpop.f32.mrf.mxu0  ;;  %13034 = vmatprep.subr.bf16.mxu0 %v13780_v37 }
 0x2bd   : > { %v17122_v60 = vadd.f32 %v2975_v42, %v2687_v32  ;;  %v17125_v48 = vadd.f32 %v3136_v61, %v16861_v49  ;;  %13035 = vmatpush3.bf16.msra.mxu0 %v13780_v37 }
 0x2be   : > { %v2977_v2 = vpop.f32.mrf.mxu1  ;;  %v3138_v31 = vpop.f32.mrf.mxu0 }
 0x2bf   : > { %v13747_v2 = vld [vmem:[%s16501_s26 + $0x668] ss:$28 sps:$4 sm:$0xff]  }
 0x2c0   : > { %v2980_v3 = vpop.f32.mrf.mxu1  ;;  %v3141_v16 = vpop.f32.mrf.mxu0  ;;  %3332 = vmatmul.mubr.bf16.gmra.mxu0 %v13742_v11  ;;  %13019 = vmatmul.mubr.bf16.gmra.mxu1 %v13746_v27  ;;  %v13751_v11 = vld [vmem:[%s16501_s26 + $0x600] ss:$28 sps:$4 sm:$0xff]   ;;  %v2700_v27 = vadd.f32 %v16789_v9, %v17009_v29  ;;  %v2703_v29 = vadd.f32 %v16789_v9, %v17015_v24 }
 0x2c1   : > { %v17131_v35 = vadd.f32 %v2980_v3, %v2692_v59  ;;  %v17134_v49 = vadd.f32 %v3141_v16, %v16869_v41  ;;  %3339 = vmatprep.mubr.bf16.mxu0 %v13749_v63  ;;  %13022 = vmatprep.mubr.bf16.mxu1 %v13750_v8  ;;  %v13757_v59 = vld [vmem:[%s16501_s26 + $0x6a4] ss:$28 sps:$4 sm:$0xff]   ;;  %v13758_v41 = vld [vmem:[%s16501_s26 + $0x638] ss:$28 sps:$4 sm:$0xff]  }
 0x2c2   : > { %v2982_v32 = vpop.f32.mrf.mxu1  ;;  %v3143_v21 = vpop.f32.mrf.mxu0 }
 0x2c4   : > { %v2983_v42 = vpop.f32.mrf.mxu1  ;;  %v3144_v61 = vpop.f32.mrf.mxu0 }
 0x2c5   : > { %v17140_v31 = vadd.f32 %v2983_v42, %v2695_v28  ;;  %v17143_v36 = vadd.f32 %v3144_v61, %v16877_v45  ;;  %v13755_v61 = vld [vmem:[%s16501_s26 + $0x6a0] ss:$28 sps:$4 sm:$0xff]  }
 0x2c6   : > { %v2985_v63 = vpop.f32.mrf.mxu1  ;;  %v3146_v8 = vpop.f32.mrf.mxu0 }
 0x2c7   : > { %v13759_v63 = vld [vmem:[%s16501_s26 + $0x670] ss:$28 sps:$4 sm:$0xff]   ;;  %v13763_v8 = vld [vmem:[%s16501_s26 + $0x6a8] ss:$28 sps:$4 sm:$0xff]  }
 0x2c8   : > { %v2988_v3 = vpop.f32.mrf.mxu1  ;;  %v3149_v16 = vpop.f32.mrf.mxu0  ;;  %3340 = vmatmul.mubr.bf16.gmra.mxu0 %v13747_v2  ;;  %13023 = vmatmul.mubr.bf16.gmra.mxu1 %v13751_v11  ;;  %v2708_v2 = vadd.f32 %v16789_v9, %v17025_v44 }
 0x2c9   : > { %v17149_v28 = vadd.f32 %v2988_v3, %v2700_v27  ;;  %v17152_v45 = vadd.f32 %v3149_v16, %v16885_v20  ;;  %3347 = vmatprep.mubr.bf16.mxu0 %v13757_v59  ;;  %13026 = vmatprep.mubr.bf16.mxu1 %v13758_v41  ;;  %v13762_v27 = vld [vmem:[%s16501_s26 + $0x6dc] ss:$28 sps:$4 sm:$0xff]   ;;  %v2711_v16 = vadd.f32 %v16789_v9, %v17031_v19 }
 0x2ca   : > { %v2990_v32 = vpop.f32.mrf.mxu1  ;;  %v3151_v21 = vpop.f32.mrf.mxu0 }
 0x2cc   : > { %v2991_v42 = vpop.f32.mrf.mxu1  ;;  %v3152_v37 = vpop.f32.mrf.mxu0 }
 0x2cd   : > { %v17158_v11 = vadd.f32 %v2991_v42, %v2703_v29  ;;  %v17161_v24 = vadd.f32 %v3152_v37, %v16893_v18  ;;  %v13760_v37 = vld [vmem:[%s16501_s26 + $0x6d8] ss:$28 sps:$4 sm:$0xff]  }
 0x2ce   : > { %v2993_v20 = vpop.f32.mrf.mxu1  ;;  %v3154_v59 = vpop.f32.mrf.mxu0 }
 0x2cf   : > { %v13764_v20 = vld [vmem:[%s16501_s26 + $0x6e0] ss:$28 sps:$4 sm:$0xff]  }
 0x2d0   : > { %v2996_v41 = vpop.f32.mrf.mxu1  ;;  %v3157_v3 = vpop.f32.mrf.mxu0  ;;  %3348 = vmatmul.mubr.bf16.gmra.mxu0 %v13755_v61  ;;  %13027 = vmatmul.mubr.bf16.gmra.mxu1 %v13759_v63  ;;  %v17174_v59 = vld [vmem:[#allocation8] ss:$0 sm:$0xff] }
 0x2d1   : > { %v17167_v32 = vadd.f32 %v2996_v41, %v2708_v2  ;;  %v17170_v44 = vadd.f32 %v3157_v3, %v16901_v6  ;;  %3355 = vmatprep.mubr.bf16.mxu0 %v13762_v27  ;;  %13030 = vmatprep.mubr.bf16.mxu1 %v13763_v8  ;;  %v2716_v61 = vadd.f32 %v17174_v59, %v17041_v55  ;;  %v20379_v55 = vmov 0  }
 0x2d2   : > { %v2998_v18 = vpop.f32.mrf.mxu1  ;;  %v3159_v29 = vpop.f32.mrf.mxu0  ;;  %v2719_v8 = vadd.f32 %v17174_v59, %v17047_v33  ;;  %v2724_v33 = vadd.f32 %v17174_v59, %v16703_v34 }
 0x2d4   : > { %v2999_v21 = vpop.f32.mrf.mxu1  ;;  %v3160_v42 = vpop.f32.mrf.mxu0 }
 0x2d5   : > { %v17178_v63 = vadd.f32 %v2999_v21, %v2711_v16  ;;  %v17181_v9 = vadd.f32 %v3160_v42, %v16909_v10 }
 0x2d6   : > { %v3001_v6 = vpop.f32.mrf.mxu1  ;;  %v3162_v19 = vpop.f32.mrf.mxu0 }
 0x2d8   : > { %v3004_v2 = vpop.f32.mrf.mxu1  ;;  %v3165_v27 = vpop.f32.mrf.mxu0  ;;  %3356 = vmatmul.mubr.bf16.gmra.mxu0 %v13760_v37  ;;  %13031 = vmatmul.mubr.bf16.gmra.mxu1 %v13764_v20 }
 0x2d9   : > { %v17185_v41 = vadd.f32 %v3004_v2, %v2716_v61  ;;  %v17188_v3 = vadd.f32 %v3165_v27, %v16917_v52  ;;  %3889 = vmatprep.mubr.bf16.mxu1 %v20379_v55 }
 0x2da   : > { %v3006_v16 = vpop.f32.mrf.mxu1  ;;  %v3167_v18 = vpop.f32.mrf.mxu0 }
 0x2db   : > { %v13781_v16 = vld [vmem:[#allocation13 + $0x30] sm:$0xff]  }
 0x2dc   : > { %v3007_v10 = vpop.f32.mrf.mxu1  ;;  %v3168_v29 = vpop.f32.mrf.mxu0  ;;  %13036 = vmatprep.subr.bf16.mxu0 %v13781_v16 }
 0x2dd   : > { %v17191_v21 = vadd.f32 %v3007_v10, %v2719_v8  ;;  %v17194_v42 = vadd.f32 %v3168_v29, %v16925_v40  ;;  %v2727_v8 = vadd.f32 %v17174_v59, %v16707_v38  ;;  %13037 = vmatpush3.bf16.msra.mxu0 %v13781_v16 }
 0x2de   : > { %v3009_v37 = vpop.f32.mrf.mxu1  ;;  %v3170_v20 = vpop.f32.mrf.mxu0 }
 0x2df   : > { %20380 = vst [vmem:[#allocation48_spill] sm:$0xff] %v17191_v21  ;;  %v20410_v21 = vld [vmem:[#allocation38_spill] sm:$0xff] }
 0x2e0   : > { %v3012_v61 = vpop.f32.mrf.mxu1  ;;  %v3173_v6 = vpop.f32.mrf.mxu0 }
 0x2e1   : > { %v17198_v52 = vadd.f32 %v3012_v61, %v2724_v33  ;;  %v17201_v19 = vadd.f32 %v3173_v6, %v16933_v25  ;;  %v2732_v25 = vadd.f32 %v17174_v59, %v16715_v46 }
 0x2e2   : > { %v3014_v2 = vpop.f32.mrf.mxu1  ;;  %v3175_v27 = vpop.f32.mrf.mxu0 }
 0x2e3   : > { %20381 = vst [vmem:[#allocation49_spill] sm:$0xff] %v17198_v52  ;;  %v20406_v52 = vld [vmem:[#allocation37_spill] sm:$0xff] }
 0x2e4   : > { %v3015_v40 = vpop.f32.mrf.mxu1  ;;  %v3176_v18 = vpop.f32.mrf.mxu0 }
 0x2e5   : > { %v17205_v10 = vadd.f32 %v3015_v40, %v2727_v8  ;;  %v17208_v29 = vadd.f32 %v3176_v18, %v16941_v4  ;;  %v2735_v4 = vadd.f32 %v17174_v59, %v16719_v50 }
 0x2e6   : > { %v3017_v34 = vpop.f32.mrf.mxu1  ;;  %v3178_v37 = vpop.f32.mrf.mxu0 }
 0x2e7   : > { %20382 = vst [vmem:[#allocation50_spill] sm:$0xff] %v17205_v10  ;;  %v2740_v34 = vadd.f32 %v17174_v59, %v16727_v58  ;;  %v20403_v10 = vld [vmem:[#allocation36_spill] sm:$0xff] }
 0x2e8   : > { %v3020_v20 = vpop.f32.mrf.mxu1  ;;  %v3181_v33 = vpop.f32.mrf.mxu0 }
 0x2e9   : > { %v17212_v61 = vadd.f32 %v3020_v20, %v2732_v25  ;;  %v17215_v38 = vadd.f32 %v3181_v33, %v16949_v53 }
 0x2ea   : > { %v3022_v6 = vpop.f32.mrf.mxu1  ;;  %v3183_v2 = vpop.f32.mrf.mxu0 }
 0x2eb   : > { %20383 = vst [vmem:[#allocation51_spill] sm:$0xff] %v17212_v61  ;;  %v2743_v6 = vadd.f32 %v17174_v59, %v16731_v62 }
 0x2ec   : > { %v3023_v27 = vpop.f32.mrf.mxu1  ;;  %v3184_v8 = vpop.f32.mrf.mxu0 }
 0x2ed   : > { %v17219_v40 = vadd.f32 %v3023_v27, %v2735_v4  ;;  %v17222_v16 = vadd.f32 %v3184_v8, %v16957_v51 }
 0x2ee   : > { %v3025_v46 = vpop.f32.mrf.mxu1  ;;  %v3186_v18 = vpop.f32.mrf.mxu0 }
 0x2ef   : > { %20384 = vst [vmem:[#allocation52_spill] sm:$0xff] %v17219_v40  ;;  %v2748_v46 = vadd.f32 %v17174_v59, %v16739_v7 }
 0x2f0   : > { %v3028_v37 = vpop.f32.mrf.mxu1  ;;  %v3189_v53 = vpop.f32.mrf.mxu0 }
 0x2f1   : > { %v17226_v25 = vadd.f32 %v3028_v37, %v2740_v34  ;;  %v17229_v20 = vadd.f32 %v3189_v53, %v16965_v13 }
 0x2f2   : > { %v3030_v50 = vpop.f32.mrf.mxu1  ;;  %v3191_v33 = vpop.f32.mrf.mxu0 }
 0x2f3   : > { %20385 = vst [vmem:[#allocation53_spill] sm:$0xff] %v17226_v25  ;;  %v20388_v50 = vld [vmem:[#allocation31_spill] sm:$0xff]  ;;  %v20394_v25 = vld [vmem:[#allocation33_spill] sm:$0xff] }
 0x2f4   : > { %v3031_v2 = vpop.f32.mrf.mxu1  ;;  %v3192_v51 = vpop.f32.mrf.mxu0  ;;  %v2751_v33 = vadd.f32 %v17174_v59, %v20388_v50 }
 0x2f5   : > { %v17233_v4 = vadd.f32 %v3031_v2, %v2743_v6  ;;  %v17236_v27 = vadd.f32 %v3192_v51, %v16973_v39  ;;  %v20390_v51 = vld [vmem:[#allocation40_spill] sm:$0xff] }
 0x2f6   : > { %v3033_v58 = vpop.f32.mrf.mxu1  ;;  %v3194_v8 = vpop.f32.mrf.mxu0 }
 0x2f7   : > { %20386 = vst [vmem:[#allocation54_spill] sm:$0xff] %v17233_v4  ;;  %v20391_v4 = vld [vmem:[#allocation32_spill] sm:$0xff] }
 0x2f8   : > { %v3036_v18 = vpop.f32.mrf.mxu1  ;;  %v3197_v13 = vpop.f32.mrf.mxu0 }
 0x2f9   : > { %v17240_v34 = vadd.f32 %v3036_v18, %v2748_v46  ;;  %v17243_v37 = vadd.f32 %v3197_v13, %v16981_v56  ;;  %v2756_v46 = vadd.f32 %v17174_v59, %v20391_v4 }
 0x2fa   : > { %v3038_v62 = vpop.f32.mrf.mxu1  ;;  %v3199_v53 = vpop.f32.mrf.mxu0 }
 0x2fb   : > { %20387 = vst [vmem:[#allocation55_spill] sm:$0xff] %v17240_v34  ;;  %v20393_v62 = vld [vmem:[#allocation41_spill] sm:$0xff] }
 0x2fc   : > { %v3039_v6 = vpop.f32.mrf.mxu1  ;;  %v3200_v39 = vpop.f32.mrf.mxu0 }
 0x2fd   : > { %v17247_v2 = vadd.f32 %v3039_v6, %v2751_v33  ;;  %v17250_v58 = vadd.f32 %v3200_v39, %v20390_v51  ;;  %v2759_v33 = vadd.f32 %v17174_v59, %v20394_v25  ;;  %v13782_v6 = vld [vmem:[#allocation13 + $0x28] sm:$0xff]  }
 0x2fe   : > { %v3041_v7 = vpop.f32.mrf.mxu1  ;;  %v3202_v8 = vpop.f32.mrf.mxu0  ;;  %13038 = vmatprep.subr.bf16.mxu0 %v13782_v6  ;;  %v20399_v25 = vld [vmem:[#allocation43_spill] sm:$0xff] }
 0x2ff   : > { %20389 = vst [vmem:[#allocation31_spill] sm:$0xff] %v17247_v2  ;;  %v20396_v8 = vld [vmem:[#allocation42_spill] sm:$0xff]  ;;  %13039 = vmatpush3.bf16.msra.mxu0 %v13782_v6  ;;  %v20402_v6 = vld [vmem:[#allocation44_spill] sm:$0xff] }
 0x300   : > { %v3044_v18 = vpop.f32.mrf.mxu1  ;;  %v3205_v56 = vpop.f32.mrf.mxu0 }
 0x301   : > { %v17254_v13 = vadd.f32 %v3044_v18, %v2756_v46  ;;  %v17257_v53 = vadd.f32 %v3205_v56, %v20393_v62  ;;  %v20397_v18 = vld [vmem:[#allocation34_spill] sm:$0xff] }
 0x302   : > { %v3046_v50 = vpop.f32.mrf.mxu1  ;;  %v3207_v34 = vpop.f32.mrf.mxu0  ;;  %v2764_v56 = vadd.f32 %v17174_v59, %v20397_v18 }
 0x303   : > { %20392 = vst [vmem:[#allocation40_spill] sm:$0xff] %v17254_v13 }
 0x304   : > { %v3047_v39 = vpop.f32.mrf.mxu1  ;;  %v3208_v51 = vpop.f32.mrf.mxu0 }
 0x305   : > { %v17261_v7 = vadd.f32 %v3047_v39, %v2759_v33  ;;  %v17264_v2 = vadd.f32 %v3208_v51, %v20396_v8  ;;  %v20400_v39 = vld [vmem:[#allocation35_spill] sm:$0xff] }
 0x306   : > { %v3049_v4 = vpop.f32.mrf.mxu1  ;;  %v3210_v46 = vpop.f32.mrf.mxu0  ;;  %v2767_v51 = vadd.f32 %v17174_v59, %v20400_v39 }
 0x307   : > { %20395 = vst [vmem:[#allocation32_spill] sm:$0xff] %v17261_v7 }
 0x308   : > { %v3052_v62 = vpop.f32.mrf.mxu1  ;;  %v3213_v34 = vpop.f32.mrf.mxu0 }
 0x309   : > { %v17268_v50 = vadd.f32 %v3052_v62, %v2764_v56  ;;  %v17271_v13 = vadd.f32 %v3213_v34, %v20399_v25  ;;  %v2772_v56 = vadd.f32 %v17174_v59, %v20403_v10 }
 0x30a   : > { %v3054_v40 = vpop.f32.mrf.mxu1  ;;  %v3215_v33 = vpop.f32.mrf.mxu0 }
 0x30b   : > { %20398 = vst [vmem:[#allocation41_spill] sm:$0xff] %v17268_v50  ;;  %v20405_v40 = vld [vmem:[#allocation45_spill] sm:$0xff] }
 0x30c   : > { %v3055_v8 = vpop.f32.mrf.mxu1  ;;  %v3216_v7 = vpop.f32.mrf.mxu0 }
 0x30d   : > { %v17275_v4 = vadd.f32 %v3055_v8, %v2767_v51  ;;  %v17278_v46 = vadd.f32 %v3216_v7, %v20402_v6  ;;  %v2775_v51 = vadd.f32 %v17174_v59, %v20406_v52 }
 0x30e   : > { %v3057_v18 = vpop.f32.mrf.mxu1  ;;  %v3218_v61 = vpop.f32.mrf.mxu0 }
 0x30f   : > { %20401 = vst [vmem:[#allocation33_spill] sm:$0xff] %v17275_v4  ;;  %v20408_v61 = vld [vmem:[#allocation46_spill] sm:$0xff] }
 0x310   : > { %v3060_v62 = vpop.f32.mrf.mxu1  ;;  %v3221_v34 = vpop.f32.mrf.mxu0 }
 0x311   : > { %v17282_v25 = vadd.f32 %v3060_v62, %v2772_v56  ;;  %v17285_v33 = vadd.f32 %v3221_v34, %v20405_v40  ;;  %v2780_v56 = vadd.f32 %v17174_v59, %v20410_v21 }
 0x312   : > { %v3062_v39 = vpop.f32.mrf.mxu1  ;;  %v3223_v50 = vpop.f32.mrf.mxu0 }
 0x313   : > { %20404 = vst [vmem:[#allocation42_spill] sm:$0xff] %v17282_v25  ;;  %v20412_v25 = vld [vmem:[#allocation39_spill] sm:$0xff] }
 0x314   : > { %v3063_v8 = vpop.f32.mrf.mxu1  ;;  %v3224_v7 = vpop.f32.mrf.mxu0 }
 0x315   : > { %v17289_v6 = vadd.f32 %v3063_v8, %v2775_v51  ;;  %v17292_v18 = vadd.f32 %v3224_v7, %v20408_v61  ;;  %v2783_v51 = vadd.f32 %v17174_v59, %v20412_v25 }
 0x316   : > { %v3065_v10 = vpop.f32.mrf.mxu1  ;;  %v3226_v4 = vpop.f32.mrf.mxu0 }
 0x317   : > { %20407 = vst [vmem:[#allocation34_spill] sm:$0xff] %v17289_v6  ;;  %20409 = vst [vmem:[#allocation43_spill] sm:$0xff] %v17292_v18  ;;  %v20414_v4 = vld [vmem:[#allocation47_spill] sm:$0xff] }
 0x318   : > { %v3068_v62 = vpop.f32.mrf.mxu1  ;;  %v3229_v34 = vpop.f32.mrf.mxu0 }
 0x319   : > { %v17296_v40 = vadd.f32 %v3068_v62, %v2780_v56  ;;  %v17299_v50 = vadd.f32 %v3229_v34, %v17045_v14 }
 0x31a   : > { %v3070_v52 = vpop.f32.mrf.mxu1  ;;  %v3231_v39 = vpop.f32.mrf.mxu0 }
 0x31b   : > { %20411 = vst [vmem:[#allocation35_spill] sm:$0xff] %v17296_v40  ;;  %v13783_v39 = vld [vmem:[#allocation13 + $0x20] sm:$0xff]  }
 0x31c   : > { %v3071_v8 = vpop.f32.mrf.mxu1  ;;  %v3232_v7 = vpop.f32.mrf.mxu0  ;;  %13040 = vmatprep.subr.bf16.mxu0 %v13783_v39 }
 0x31d   : > { %v17303_v61 = vadd.f32 %v3071_v8, %v2783_v51  ;;  %v17306_v10 = vadd.f32 %v3232_v7, %v20414_v4  ;;  %13041 = vmatpush3.bf16.msra.mxu0 %v13783_v39 }
 0x31e   : > { %v3073_v21 = vpop.f32.mrf.mxu1  ;;  %v3234_v6 = vpop.f32.mrf.mxu0 }
 0x31f   : > { %20413 = vst [vmem:[#allocation44_spill] sm:$0xff] %v17303_v61 }
 0x320   : > { %v3237_v18 = vpop.f32.mrf.mxu0  ;;  %v12972_v56 = vpop.f32.mrf.mxu1 }
 0x321   : > { %v17309_v62 = vadd.f32 %v3237_v18, %v17059_v57  ;;  %v3407_v52 = vadd.f32 %v12972_v56, %v17080_v43 }
 0x322   : > { %v3239_v14 = vpop.f32.mrf.mxu0  ;;  %v3398_v34 = vpop.f32.mrf.mxu1 }
 0x323   : > { %v3399_v51 = vadd.f32 %v3398_v34, %v17062_v22  ;;  %v3655_v57 = vmax.f32 %v3407_v52, 0.0 }
 0x324   : > { %v3240_v59 = vpop.f32.mrf.mxu0  ;;  %v12973_v25 = vpop.f32.mrf.mxu1 }
 0x325   : > { %v17314_v8 = vadd.f32 %v3240_v59, %v17068_v0  ;;  %v3410_v7 = vadd.f32 %v12973_v25, %v17089_v17  ;;  %v3653_v56 = vmax.f32 %v3399_v51, 0.0 }
 0x326   : > { %v3242_v6 = vpop.f32.mrf.mxu0  ;;  %v3401_v4 = vpop.f32.mrf.mxu1 }
 0x327   : > { %v3656_v18 = vmax.f32 %v3410_v7, 0.0  ;;  %v3402_v21 = vadd.f32 %v3401_v4, %v17071_v12 }
 0x328   : > { %v3245_v14 = vpop.f32.mrf.mxu0  ;;  %v12976_v43 = vpop.f32.mrf.mxu1 }
 0x329   : > { %v3718_v61 = vpack.c.bf16 %v3656_v18, %v3655_v57  ;;  %v3654_v40 = vmax.f32 %v3402_v21, 0.0  ;;  %v17319_v22 = vadd.f32 %v3245_v14, %v17077_v5  ;;  %v3423_v17 = vadd.f32 %v12976_v43, %v17116_v47 }
 0x32a   : > { %v3247_v0 = vpop.f32.mrf.mxu0  ;;  %v3414_v34 = vpop.f32.mrf.mxu1 }
 0x32b   : > { %v3717_v59 = vpack.c.bf16 %v3654_v40, %v3653_v56  ;;  %v3415_v52 = vadd.f32 %v3414_v34, %v17098_v15  ;;  %v3659_v5 = vmax.f32 %v3423_v17, 0.0 }
 0x32c   : > { %v3248_v25 = vpop.f32.mrf.mxu0  ;;  %v12977_v6 = vpop.f32.mrf.mxu1 }
 0x32d   : > { %v17324_v39 = vadd.f32 %v3248_v25, %v17086_v23  ;;  %v3426_v12 = vadd.f32 %v12977_v6, %v17125_v48  ;;  %3890 = vmatmul.mubr.bf16.vlgmr.msra.gmra.mxu1 %v3717_v59  ;;  %v3657_v18 = vmax.f32 %v3415_v52, 0.0 }
 0x32e   : > { %v3250_v51 = vpop.f32.mrf.mxu0  ;;  %v3417_v7 = vpop.f32.mrf.mxu1  ;;  %3899 = vmatprep.mubr.bf16.mxu1 %v20379_v55 }
 0x32f   : > { %v3660_v4 = vmax.f32 %v3426_v12, 0.0  ;;  %v3418_v40 = vadd.f32 %v3417_v7, %v17107_v30 }
 0x330   : > { %v3253_v57 = vpop.f32.mrf.mxu0  ;;  %v12980_v47 = vpop.f32.mrf.mxu1 }
 0x331   : > { %v3720_v21 = vpack.c.bf16 %v3660_v4, %v3659_v5  ;;  %v3658_v14 = vmax.f32 %v3418_v40, 0.0  ;;  %v17330_v15 = vadd.f32 %v3253_v57, %v17095_v1  ;;  %v3439_v56 = vadd.f32 %v12980_v47, %v17152_v45 }
 0x332   : > { %v3255_v23 = vpop.f32.mrf.mxu0  ;;  %v3430_v43 = vpop.f32.mrf.mxu1 }
 0x333   : > { %v3719_v48 = vpack.c.bf16 %v3658_v14, %v3657_v18  ;;  %v3431_v59 = vadd.f32 %v3430_v43, %v17134_v49  ;;  %v3663_v1 = vmax.f32 %v3439_v56, 0.0  ;;  %v13784_v23 = vld [vmem:[#allocation13 + $0x18] sm:$0xff]  }
 0x334   : > { %v3256_v0 = vpop.f32.mrf.mxu0  ;;  %v12981_v34 = vpop.f32.mrf.mxu1  ;;  %13042 = vmatprep.subr.bf16.mxu0 %v13784_v23 }
 0x335   : > { %v17335_v17 = vadd.f32 %v3256_v0, %v17104_v26  ;;  %v3442_v30 = vadd.f32 %v12981_v34, %v17161_v24  ;;  %3900 = vmatmul.mubr.bf16.gmra.mxu1 %v3718_v61  ;;  %v3661_v7 = vmax.f32 %v3431_v59, 0.0  ;;  %13043 = vmatpush3.bf16.msra.mxu0 %v13784_v23 }
 0x336   : > { %v3258_v25 = vpop.f32.mrf.mxu0  ;;  %v3433_v6 = vpop.f32.mrf.mxu1  ;;  %3909 = vmatprep.mubr.bf16.mxu1 %v20379_v55 }
 0x337   : > { %v3664_v52 = vmax.f32 %v3442_v30, 0.0  ;;  %v3434_v12 = vadd.f32 %v3433_v6, %v17143_v36 }
 0x338   : > { %v3261_v51 = vpop.f32.mrf.mxu0  ;;  %v12984_v45 = vpop.f32.mrf.mxu1 }
 0x339   : > { %v17340_v5 = vpack.c.bf16 %v3664_v52, %v3663_v1  ;;  %v3662_v49 = vmax.f32 %v3434_v12, 0.0  ;;  %v17343_v26 = vadd.f32 %v3261_v51, %v17113_v54  ;;  %v3455_v40 = vadd.f32 %v12984_v45, %v17188_v3 }
 0x33a   : > { %v3263_v4 = vpop.f32.mrf.mxu0  ;;  %v3446_v24 = vpop.f32.mrf.mxu1 }
 0x33b   : > { %v3721_v61 = vpack.c.bf16 %v3662_v49, %v3661_v7  ;;  %v3447_v18 = vadd.f32 %v3446_v24, %v17170_v44  ;;  %v3667_v54 = vmax.f32 %v3455_v40, 0.0 }
 0x33c   : > { %v3264_v57 = vpop.f32.mrf.mxu0  ;;  %v12985_v47 = vpop.f32.mrf.mxu1 }
 0x33d   : > { %v17348_v36 = vadd.f32 %v3264_v57, %v17122_v60  ;;  %v3458_v14 = vadd.f32 %v12985_v47, %v17194_v42  ;;  %3910 = vmatmul.mubr.bf16.gmra.mxu1 %v3719_v48  ;;  %v3665_v44 = vmax.f32 %v3447_v18, 0.0 }
 0x33e   : > { %v3266_v43 = vpop.f32.mrf.mxu0  ;;  %v3449_v56 = vpop.f32.mrf.mxu1  ;;  %3919 = vmatprep.mubr.bf16.mxu1 %v20379_v55 }
 0x33f   : > { %v3668_v0 = vmax.f32 %v3458_v14, 0.0  ;;  %v3450_v34 = vadd.f32 %v3449_v56, %v17181_v9 }
 0x340   : > { %v3269_v3 = vpop.f32.mrf.mxu0  ;;  %v12988_v59 = vpop.f32.mrf.mxu1 }
 0x341   : > { %v17353_v30 = vpack.c.bf16 %v3668_v0, %v3667_v54  ;;  %v3666_v60 = vmax.f32 %v3450_v34, 0.0  ;;  %v17356_v42 = vadd.f32 %v3269_v3, %v17131_v35  ;;  %v3471_v1 = vadd.f32 %v12988_v59, %v17215_v38 }
 0x342   : > { %v3271_v48 = vpop.f32.mrf.mxu0  ;;  %v3462_v25 = vpop.f32.mrf.mxu1 }
 0x343   : > { %v17358_v6 = vpack.c.bf16 %v3666_v60, %v3665_v44  ;;  %v3463_v9 = vadd.f32 %v3462_v25, %v17201_v19  ;;  %v3671_v35 = vmax.f32 %v3471_v1, 0.0 }
 0x344   : > { %v3272_v52 = vpop.f32.mrf.mxu0  ;;  %v12989_v12 = vpop.f32.mrf.mxu1 }
 0x345   : > { %v17363_v51 = vadd.f32 %v3272_v52, %v17140_v31  ;;  %v3474_v45 = vadd.f32 %v12989_v12, %v17222_v16  ;;  %3920 = vmatmul.mubr.bf16.gmra.mxu1 %v3720_v21  ;;  %v3669_v57 = vmax.f32 %v3463_v9, 0.0 }
 0x346   : > { %v3274_v7 = vpop.f32.mrf.mxu0  ;;  %v3465_v49 = vpop.f32.mrf.mxu1  ;;  %3929 = vmatprep.mubr.bf16.mxu1 %v20379_v55 }
 0x347   : > { %v3672_v4 = vmax.f32 %v3474_v45, 0.0  ;;  %v3466_v24 = vadd.f32 %v3465_v49, %v17208_v29 }
 0x348   : > { %v3277_v40 = vpop.f32.mrf.mxu0  ;;  %v12992_v38 = vpop.f32.mrf.mxu1 }
 0x349   : > { %v17368_v47 = vpack.c.bf16 %v3672_v4, %v3671_v35  ;;  %v3670_v19 = vmax.f32 %v3466_v24, 0.0  ;;  %v17371_v31 = vadd.f32 %v3277_v40, %v17149_v28  ;;  %v3487_v14 = vadd.f32 %v12992_v38, %v17243_v37 }
 0x34a   : > { %v3279_v18 = vpop.f32.mrf.mxu0  ;;  %v3478_v16 = vpop.f32.mrf.mxu1 }
 0x34b   : > { %v17373_v21 = vpack.c.bf16 %v3670_v19, %v3669_v57  ;;  %v3479_v56 = vadd.f32 %v3478_v16, %v17229_v20  ;;  %v3675_v28 = vmax.f32 %v3487_v14, 0.0 }
 0x34c   : > { %v3280_v23 = vpop.f32.mrf.mxu0  ;;  %v12993_v43 = vpop.f32.mrf.mxu1 }
 0x34d   : > { %v17378_v29 = vadd.f32 %v3280_v23, %v17158_v11  ;;  %v3490_v54 = vadd.f32 %v12993_v43, %v17250_v58  ;;  %3930 = vmatmul.mubr.bf16.gmra.mxu1 %v3721_v61  ;;  %v3673_v60 = vmax.f32 %v3479_v56, 0.0  ;;  %v13785_v56 = vld [vmem:[#allocation13 + $0x10] sm:$0xff]  }
 0x34e   : > { %v3282_v0 = vpop.f32.mrf.mxu0  ;;  %v3481_v34 = vpop.f32.mrf.mxu1  ;;  %3939 = vmatprep.mubr.bf16.mxu1 %v20379_v55  ;;  %13044 = vmatprep.subr.bf16.mxu0 %v13785_v56 }
 0x34f   : > { %v3676_v3 = vmax.f32 %v3490_v54, 0.0  ;;  %v3482_v59 = vadd.f32 %v3481_v34, %v17236_v27  ;;  %13045 = vmatpush3.bf16.msra.mxu0 %v13785_v56 }
 0x350   : > { %v3285_v44 = vpop.f32.mrf.mxu0  ;;  %v12996_v37 = vpop.f32.mrf.mxu1 }
 0x351   : > { %v17383_v48 = vpack.c.bf16 %v3676_v3, %v3675_v28  ;;  %v3674_v20 = vmax.f32 %v3482_v59, 0.0  ;;  %v17386_v11 = vadd.f32 %v3285_v44, %v17167_v32  ;;  %v3503_v1 = vadd.f32 %v12996_v37, %v17271_v13  ;;  %v20416_v28 = vld [vmem:[#allocation43_spill] sm:$0xff] }
 0x352   : > { %v3287_v25 = vpop.f32.mrf.mxu0  ;;  %v3494_v58 = vpop.f32.mrf.mxu1 }
 0x353   : > { %v17388_v61 = vpack.c.bf16 %v3674_v20, %v3673_v60  ;;  %v3495_v9 = vadd.f32 %v3494_v58, %v17257_v53  ;;  %v3679_v49 = vmax.f32 %v3503_v1, 0.0 }
 0x354   : > { %v3288_v52 = vpop.f32.mrf.mxu0  ;;  %v12997_v12 = vpop.f32.mrf.mxu1 }
 0x355   : > { %v17393_v27 = vadd.f32 %v3288_v52, %v17178_v63  ;;  %v3506_v45 = vadd.f32 %v12997_v12, %v17278_v46  ;;  %3940 = vmatmul.mubr.bf16.gmra.mxu1 %v17340_v5  ;;  %v3677_v40 = vmax.f32 %v3495_v9, 0.0  ;;  %v20418_v9 = vld [vmem:[#allocation50_spill] sm:$0xff] }
 0x356   : > { %v3290_v7 = vpop.f32.mrf.mxu0  ;;  %v3497_v32 = vpop.f32.mrf.mxu1  ;;  %3949 = vmatprep.mubr.bf16.mxu1 %v20379_v55 }
 0x357   : > { %v3680_v35 = vmax.f32 %v3506_v45, 0.0  ;;  %v3498_v4 = vadd.f32 %v3497_v32, %v17264_v2  ;;  %v20415_v2 = vld [vmem:[#allocation48_spill] sm:$0xff] }
 0x358   : > { %v3293_v13 = vpop.f32.mrf.mxu0  ;;  %v13000_v24 = vpop.f32.mrf.mxu1 }
 0x359   : > { %v17399_v38 = vpack.c.bf16 %v3680_v35, %v3679_v49  ;;  %v3678_v53 = vmax.f32 %v3498_v4, 0.0  ;;  %v17402_v63 = vadd.f32 %v3293_v13, %v17185_v41  ;;  %v3519_v19 = vadd.f32 %v13000_v24, %v17299_v50 }
 0x35a   : > { %v3295_v46 = vpop.f32.mrf.mxu0  ;;  %v3510_v57 = vpop.f32.mrf.mxu1 }
 0x35b   : > { %v17404_v5 = vpack.c.bf16 %v3678_v53, %v3677_v40  ;;  %v3511_v14 = vadd.f32 %v3510_v57, %v17285_v33  ;;  %v3683_v0 = vmax.f32 %v3519_v19, 0.0  ;;  %v20419_v46 = vld [vmem:[#allocation51_spill] sm:$0xff] }
 0x35c   : > { %v3296_v18 = vpop.f32.mrf.mxu0  ;;  %v13001_v16 = vpop.f32.mrf.mxu1 }
 0x35d   : > { %v17409_v23 = vadd.f32 %v3296_v18, %v20415_v2  ;;  %v3522_v43 = vadd.f32 %v13001_v16, %v17306_v10  ;;  %3950 = vmatmul.mubr.bf16.gmra.mxu1 %v17358_v6  ;;  %v3681_v33 = vmax.f32 %v3511_v14, 0.0  ;;  %v20417_v10 = vld [vmem:[#allocation49_spill] sm:$0xff] }
 0x35e   : > { %v3298_v41 = vpop.f32.mrf.mxu0  ;;  %v3513_v54 = vpop.f32.mrf.mxu1  ;;  %3959 = vmatprep.mubr.bf16.mxu1 %v20379_v55 }
 0x35f   : > { %v3684_v34 = vmax.f32 %v3522_v43, 0.0  ;;  %v3514_v50 = vadd.f32 %v3513_v54, %v20416_v28 }
 0x360   : > { %v3301_v3 = vpop.f32.mrf.mxu0  ;;  %v13004_v59 = vpop.f32.mrf.mxu1 }
 0x361   : > { %v17415_v44 = vpack.c.bf16 %v3684_v34, %v3683_v0  ;;  %v3682_v37 = vmax.f32 %v3514_v50, 0.0  ;;  %v17418_v60 = vadd.f32 %v3301_v3, %v20417_v10  ;;  %v3535_v58 = vadd.f32 %v13004_v59, %v17319_v22 }
 0x362   : > { %v3303_v6 = vpop.f32.mrf.mxu0  ;;  %v3526_v20 = vpop.f32.mrf.mxu1 }
 0x363   : > { %v17420_v25 = vpack.c.bf16 %v3682_v37, %v3681_v33  ;;  %v3527_v12 = vadd.f32 %v3526_v20, %v17309_v62  ;;  %v3687_v35 = vmax.f32 %v3535_v58, 0.0  ;;  %v20421_v33 = vld [vmem:[#allocation53_spill] sm:$0xff] }
 0x364   : > { %v3304_v1 = vpop.f32.mrf.mxu0  ;;  %v13005_v52 = vpop.f32.mrf.mxu1 }
 0x365   : > { %v17425_v45 = vadd.f32 %v3304_v1, %v20418_v9  ;;  %v3538_v7 = vadd.f32 %v13005_v52, %v17324_v39  ;;  %3960 = vmatmul.mubr.bf16.gmra.mxu1 %v17353_v30  ;;  %v3685_v40 = vmax.f32 %v3527_v12, 0.0 }
 0x366   : > { %v3306_v32 = vpop.f32.mrf.mxu0  ;;  %v3529_v49 = vpop.f32.mrf.mxu1  ;;  %3969 = vmatprep.mubr.bf16.mxu1 %v20379_v55 }
 0x367   : > { %v3688_v4 = vmax.f32 %v3538_v7, 0.0  ;;  %v3530_v13 = vadd.f32 %v3529_v49, %v17314_v8  ;;  %v20420_v8 = vld [vmem:[#allocation52_spill] sm:$0xff] }
 0x368   : > { %v3309_v22 = vpop.f32.mrf.mxu0  ;;  %v13008_v24 = vpop.f32.mrf.mxu1 }
 0x369   : > { %v17431_v53 = vpack.c.bf16 %v3688_v4, %v3687_v35  ;;  %v3686_v62 = vmax.f32 %v3530_v13, 0.0  ;;  %v17434_v57 = vadd.f32 %v3309_v22, %v20419_v46  ;;  %v3551_v18 = vadd.f32 %v13008_v24, %v17343_v26  ;;  %v20423_v24 = vld [vmem:[#allocation55_spill] sm:$0xff] }
 0x36a   : > { %v3311_v39 = vpop.f32.mrf.mxu0  ;;  %v3542_v19 = vpop.f32.mrf.mxu1 }
 0x36b   : > { %v17436_v30 = vpack.c.bf16 %v3686_v62, %v3685_v40  ;;  %v3543_v2 = vadd.f32 %v3542_v19, %v17330_v15  ;;  %v3691_v0 = vmax.f32 %v3551_v18, 0.0 }
 0x36c   : > { %v3312_v16 = vpop.f32.mrf.mxu0  ;;  %v13009_v14 = vpop.f32.mrf.mxu1 }
 0x36d   : > { %v17441_v43 = vadd.f32 %v3312_v16, %v20420_v8  ;;  %v3554_v56 = vadd.f32 %v13009_v14, %v17348_v36  ;;  %3970 = vmatmul.mubr.bf16.gmra.mxu1 %v17373_v21  ;;  %v3689_v3 = vmax.f32 %v3543_v2, 0.0  ;;  %v20424_v16 = vld [vmem:[#allocation31_spill] sm:$0xff] }
 0x36e   : > { %v3314_v41 = vpop.f32.mrf.mxu0  ;;  %v3545_v54 = vpop.f32.mrf.mxu1  ;;  %3979 = vmatprep.mubr.bf16.mxu1 %v20379_v55 }
 0x36f   : > { %v3692_v34 = vmax.f32 %v3554_v56, 0.0  ;;  %v3546_v28 = vadd.f32 %v3545_v54, %v17335_v17  ;;  %v20422_v17 = vld [vmem:[#allocation54_spill] sm:$0xff] }
 0x370   : > { %v3317_v26 = vpop.f32.mrf.mxu0  ;;  %v13012_v50 = vpop.f32.mrf.mxu1 }
 0x371   : > { %v17447_v59 = vpack.c.bf16 %v3692_v34, %v3691_v0  ;;  %v3690_v15 = vmax.f32 %v3546_v28, 0.0  ;;  %v17450_v37 = vadd.f32 %v3317_v26, %v20421_v33  ;;  %v3567_v6 = vadd.f32 %v13012_v50, %v17371_v31  ;;  %v20425_v26 = vld [vmem:[#allocation40_spill] sm:$0xff] }
 0x372   : > { %v3319_v36 = vpop.f32.mrf.mxu0  ;;  %v3558_v10 = vpop.f32.mrf.mxu1 }
 0x373   : > { %v17452_v21 = vpack.c.bf16 %v3690_v15, %v3689_v3  ;;  %v3559_v1 = vadd.f32 %v3558_v10, %v17356_v42  ;;  %v3695_v32 = vmax.f32 %v3567_v6, 0.0  ;;  %v20426_v6 = vld [vmem:[#allocation32_spill] sm:$0xff] }
 0x374   : > { %v3320_v20 = vpop.f32.mrf.mxu0  ;;  %v13013_v58 = vpop.f32.mrf.mxu1 }
 0x375   : > { %v17457_v52 = vadd.f32 %v3320_v20, %v20422_v17  ;;  %v3570_v12 = vadd.f32 %v13013_v58, %v17378_v29  ;;  %3980 = vmatmul.mubr.bf16.gmra.mxu1 %v17368_v47  ;;  %v3693_v13 = vmax.f32 %v3559_v1, 0.0 }
 0x376   : > { %v3322_v9 = vpop.f32.mrf.mxu0  ;;  %v3561_v7 = vpop.f32.mrf.mxu1  ;;  %3989 = vmatprep.mubr.bf16.mxu1 %v20379_v55 }
 0x377   : > { %v3696_v49 = vmax.f32 %v3570_v12, 0.0  ;;  %v3562_v35 = vadd.f32 %v3561_v7, %v17363_v51 }
 0x378   : > { %v3325_v31 = vpop.f32.mrf.mxu0  ;;  %v13016_v4 = vpop.f32.mrf.mxu1 }
 0x379   : > { %v17463_v22 = vpack.c.bf16 %v3696_v49, %v3695_v32  ;;  %v3694_v42 = vmax.f32 %v3562_v35, 0.0  ;;  %v3326_v40 = vadd.f32 %v3325_v31, %v20423_v24  ;;  %v3583_v47 = vadd.f32 %v13016_v4, %v17402_v63  ;;  %v20427_v35 = vld [vmem:[#allocation41_spill] sm:$0xff] }
 0x37a   : > { %v3327_v62 = vpop.f32.mrf.mxu0  ;;  %v3574_v29 = vpop.f32.mrf.mxu1 }
 0x37b   : > { %v17466_v46 = vpack.c.bf16 %v3694_v42, %v3693_v13  ;;  %v3575_v18 = vadd.f32 %v3574_v29, %v17386_v11  ;;  %v3699_v56 = vmax.f32 %v3583_v47, 0.0  ;;  %v13786_v13 = vld [vmem:[#allocation13 + $0x8] sm:$0xff]  }
 0x37c   : > { %v3328_v39 = vpop.f32.mrf.mxu0  ;;  %v13017_v19 = vpop.f32.mrf.mxu1  ;;  %13046 = vmatprep.subr.bf16.mxu0 %v13786_v13 }
 0x37d   : > { %v3329_v51 = vadd.f32 %v3328_v39, %v20424_v16  ;;  %v3586_v14 = vadd.f32 %v13017_v19, %v17409_v23  ;;  %3990 = vmatmul.mubr.bf16.gmra.mxu1 %v17388_v61  ;;  %v3697_v34 = vmax.f32 %v3575_v18, 0.0  ;;  %13047 = vmatpush3.bf16.msra.mxu0 %v13786_v13  ;;  %v13787_v16 = vld [vmem:[#allocation13] sm:$0xff]   ;;  %v20432_v13 = vld [vmem:[#allocation44_spill] sm:$0xff] }
 0x37e   : > { %v3330_v2 = vpop.f32.mrf.mxu0  ;;  %v3577_v8 = vpop.f32.mrf.mxu1  ;;  %3999 = vmatprep.mubr.bf16.mxu1 %v20379_v55  ;;  %13048 = vmatprep.subr.bf16.mxu0 %v13787_v16 }
 0x37f   : > { %v3700_v41 = vmax.f32 %v3586_v14, 0.0  ;;  %v3578_v54 = vadd.f32 %v3577_v8, %v17393_v27 }
 0x380   : > { %v3333_v0 = vpop.f32.mrf.mxu0  ;;  %v13020_v63 = vpop.f32.mrf.mxu1 }
 0x381   : > { %v17475_v28 = vpack.c.bf16 %v3700_v41, %v3699_v56  ;;  %v3698_v11 = vmax.f32 %v3578_v54, 0.0  ;;  %v3334_v50 = vadd.f32 %v3333_v0, %v20425_v26  ;;  %v3599_v61 = vadd.f32 %v13020_v63, %v17434_v57  ;;  %13049 = vmatpush3.bf16.msra.mxu0 %v13787_v16 }
 0x382   : > { %v3335_v3 = vpop.f32.mrf.mxu0  ;;  %v3590_v23 = vpop.f32.mrf.mxu1 }
 0x383   : > { %v17478_v15 = vpack.c.bf16 %v3698_v11, %v3697_v34  ;;  %v3591_v10 = vadd.f32 %v3590_v23, %v17418_v60  ;;  %v3703_v17 = vmax.f32 %v3599_v61, 0.0  ;;  %v20430_v61 = vld [vmem:[#allocation34_spill] sm:$0xff] }
 0x384   : > { %v3336_v33 = vpop.f32.mrf.mxu0  ;;  %v13021_v36 = vpop.f32.mrf.mxu1 }
 0x385   : > { %v3337_v27 = vadd.f32 %v3336_v33, %v20426_v6  ;;  %v3602_v20 = vadd.f32 %v13021_v36, %v17441_v43  ;;  %4000 = vmatmul.mubr.bf16.gmra.mxu1 %v17383_v48  ;;  %v3701_v32 = vmax.f32 %v3591_v10, 0.0 }
 0x386   : > { %v3338_v58 = vpop.f32.mrf.mxu0  ;;  %v3593_v1 = vpop.f32.mrf.mxu1  ;;  %4009 = vmatprep.mubr.bf16.mxu1 %v20379_v55 }
 0x387   : > { %v3704_v12 = vmax.f32 %v3602_v20, 0.0  ;;  %v3594_v9 = vadd.f32 %v3593_v1, %v17425_v45  ;;  %v20428_v45 = vld [vmem:[#allocation33_spill] sm:$0xff] }
 0x388   : > { %v3341_v7 = vpop.f32.mrf.mxu0  ;;  %v13024_v57 = vpop.f32.mrf.mxu1 }
 0x389   : > { %v17487_v49 = vpack.c.bf16 %v3704_v12, %v3703_v17  ;;  %v3702_v60 = vmax.f32 %v3594_v9, 0.0  ;;  %v3342_v31 = vadd.f32 %v3341_v7, %v20427_v35  ;;  %v3615_v42 = vadd.f32 %v13024_v57, %v3326_v40  ;;  %v20431_v57 = vld [vmem:[#allocation35_spill] sm:$0xff] }
 0x38a   : > { %v3343_v4 = vpop.f32.mrf.mxu0  ;;  %v3606_v43 = vpop.f32.mrf.mxu1 }
 0x38b   : > { %v17490_v48 = vpack.c.bf16 %v3702_v60, %v3701_v32  ;;  %v3607_v29 = vadd.f32 %v3606_v43, %v17450_v37  ;;  %v3707_v14 = vmax.f32 %v3615_v42, 0.0 }
 0x38c   : > { %v3344_v24 = vpop.f32.mrf.mxu0  ;;  %v13025_v62 = vpop.f32.mrf.mxu1 }
 0x38d   : > { %v3345_v47 = vadd.f32 %v3344_v24, %v20428_v45  ;;  %v3618_v39 = vadd.f32 %v13025_v62, %v3329_v51  ;;  %4010 = vmatmul.mubr.bf16.gmra.mxu1 %v17404_v5  ;;  %v3705_v41 = vmax.f32 %v3607_v29, 0.0  ;;  %v20429_v51 = vld [vmem:[#allocation42_spill] sm:$0xff] }
 0x38e   : > { %v3346_v19 = vpop.f32.mrf.mxu0  ;;  %v3609_v18 = vpop.f32.mrf.mxu1  ;;  %4019 = vmatprep.mubr.bf16.mxu1 %v20379_v55 }
 0x38f   : > { %v3708_v2 = vmax.f32 %v3618_v39, 0.0  ;;  %v3610_v40 = vadd.f32 %v3609_v18, %v17457_v52 }
 0x390   : > { %v3349_v8 = vpop.f32.mrf.mxu0  ;;  %v13028_v56 = vpop.f32.mrf.mxu1 }
 0x391   : > { %v17497_v37 = vpack.c.bf16 %v3708_v2, %v3707_v14  ;;  %v3706_v54 = vmax.f32 %v3610_v40, 0.0  ;;  %v3350_v0 = vadd.f32 %v3349_v8, %v20429_v51  ;;  %v3631_v11 = vadd.f32 %v13028_v56, %v3342_v31 }
 0x392   : > { %v3351_v5 = vpop.f32.mrf.mxu0  ;;  %v3622_v63 = vpop.f32.mrf.mxu1 }
 0x393   : > { %v17500_v34 = vpack.c.bf16 %v3706_v54, %v3705_v41  ;;  %v3623_v23 = vadd.f32 %v3622_v63, %v3334_v50  ;;  %v3711_v6 = vmax.f32 %v3631_v11, 0.0 }
 0x394   : > { %v3352_v26 = vpop.f32.mrf.mxu0  ;;  %v13029_v3 = vpop.f32.mrf.mxu1 }
 0x395   : > { %v3353_v52 = vadd.f32 %v3352_v26, %v20430_v61  ;;  %v3634_v33 = vadd.f32 %v13029_v3, %v3345_v47  ;;  %4020 = vmatmul.mubr.bf16.gmra.mxu1 %v17399_v38  ;;  %v3709_v12 = vmax.f32 %v3623_v23, 0.0 }
 0x396   : > { %v3354_v36 = vpop.f32.mrf.mxu0  ;;  %v3625_v10 = vpop.f32.mrf.mxu1  ;;  %4029 = vmatprep.mubr.bf16.mxu1 %v20379_v55 }
 0x397   : > { %v3712_v20 = vmax.f32 %v3634_v33, 0.0  ;;  %v3626_v58 = vadd.f32 %v3625_v10, %v3337_v27  ;;  %v826_v36 = vld [vmem:[%s16509_s30] sm:$0xff] }
 0x398   : > { %v3357_v1 = vpop.f32.mrf.mxu0  ;;  %v13032_v17 = vpop.f32.mrf.mxu1 }
 0x399   : > { %v17505_v9 = vpack.c.bf16 %v3712_v20, %v3711_v6  ;;  %v3710_v7 = vmax.f32 %v3626_v58, 0.0  ;;  %v3358_v50 = vadd.f32 %v3357_v1, %v20431_v57 }
 0x39a   : > { %v3359_v32 = vpop.f32.mrf.mxu0  ;;  %v3638_v60 = vpop.f32.mrf.mxu1 }
 0x39b   : > { %v17508_v35 = vpack.c.bf16 %v3710_v7, %v3709_v12  ;;  %v3647_v4 = vadd.f32 %v13032_v17, %v3358_v50  ;;  %v3639_v43 = vadd.f32 %v3638_v60, %v3350_v0  ;;  %v827_v12 = vld [vmem:[%s16509_s30 + $0x8] sm:$0xff] }
 0x39c   : > { %v3360_v38 = vpop.f32.mrf.mxu0  ;;  %v13033_v31 = vpop.f32.mrf.mxu1 }
 0x39d   : > { %v3361_v42 = vadd.f32 %v3360_v38, %v20432_v13  ;;  %4030 = vmatmul.mubr.bf16.gmra.mxu1 %v17420_v25  ;;  %v3715_v45 = vmax.f32 %v3647_v4, 0.0  ;;  %v3713_v47 = vmax.f32 %v3639_v43, 0.0  ;;  %v828_v4 = vld [vmem:[%s16509_s30 + $0x10] sm:$0xff] }
 0x39e   : > { %v3641_v27 = vpop.f32.mrf.mxu1  ;;  %4039 = vmatprep.mubr.bf16.mxu1 %v20379_v55  ;;  %v3362_v24 = vpop.f32.mrf.mxu0 }
 0x39f   : > { %v3650_v62 = vadd.f32 %v13033_v31, %v3361_v42  ;;  %v3642_v29 = vadd.f32 %v3641_v27, %v3353_v52 }
 0x3a1   : > { %v3716_v39 = vmax.f32 %v3650_v62, 0.0  ;;  %v3714_v19 = vmax.f32 %v3642_v29, 0.0 }
 0x3a3   : > { %v17513_v18 = vpack.c.bf16 %v3716_v39, %v3715_v45  ;;  %v17515_v16 = vpack.c.bf16 %v3714_v19, %v3713_v47  ;;  %v829_v47 = vld [vmem:[%s16509_s30 + $0x18] sm:$0xff] }
 0x3a5   : > { %4040 = vmatmul.mubr.bf16.gmra.mxu1 %v17415_v44  ;;  %v3767_v44 = vlaneseq }
 0x3a6   : > { %4049 = vmatprep.mubr.bf16.mxu1 %v20379_v55 }
 0x3a7   : > { %v17533_v25 = vshrl.u32 %v3767_v44, 7 }
 0x3a9   : > { %20433 = vst [vmem:[#allocation36_spill] sm:$0xff] %v17533_v25 }
 0x3ad   : > { %4050 = vmatmul.mubr.bf16.gmra.mxu1 %v17436_v30  ;;  %v3765_v30 = vld [vmem:[#allocation11] sm:$0x3] }
 0x3ae   : > { %4059 = vmatprep.mubr.bf16.mxu1 %v20379_v55 }
 0x3b5   : > { %4060 = vmatmul.mubr.bf16.gmra.mxu1 %v17431_v53  ;;  %v3769_v53 = vsub.s32 0, %v17533_v25 }
 0x3b6   : > { %4069 = vmatprep.mubr.bf16.mxu1 %v20379_v55 }
 0x3bd   : > { %4070 = vmatmul.mubr.bf16.gmra.mxu1 %v17452_v21  ;;  %v17542_v21 = vrot.slane %v3765_v30, %v3769_v53 }
 0x3be   : > { %4079 = vmatprep.mubr.bf16.mxu1 %v20379_v55 }
 0x3c5   : > { %4080 = vmatmul.mubr.bf16.gmra.mxu1 %v17447_v59  ;;  %v3773_v59 = vsub.s32 1, %v17533_v25 }
 0x3c6   : > { %4089 = vmatprep.mubr.bf16.mxu1 %v20379_v55 }
 0x3cd   : > { %4090 = vmatmul.mubr.bf16.gmra.mxu1 %v17466_v46 }
 0x3ce   : > { %4099 = vmatprep.mubr.bf16.mxu1 %v20379_v55 }
 0x3d5   : > { %4100 = vmatmul.mubr.bf16.gmra.mxu1 %v17463_v22  ;;  %v17546_v22 = vrot.slane %v3765_v30, %v3773_v59 }
 0x3d6   : > { %4109 = vmatprep.mubr.bf16.mxu1 %v20379_v55 }
 0x3dd   : > { %4110 = vmatmul.mubr.bf16.gmra.mxu1 %v17478_v15 }
 0x3de   : > { %4119 = vmatprep.mubr.bf16.mxu1 %v20379_v55 }
 0x3e5   : > { %4120 = vmatmul.mubr.bf16.gmra.mxu1 %v17475_v28 }
 0x3e6   : > { %4129 = vmatprep.mubr.bf16.mxu1 %v20379_v55 }
 0x3ed   : > { %v3891_v46 = vpop.f32.mrf.mxu1  ;;  %4130 = vmatmul.mubr.bf16.gmra.mxu1 %v17490_v48 }
 0x3ee   : > { %v3892_v28 = vadd.f32 %v3891_v46, %v17542_v21  ;;  %4139 = vmatprep.mubr.bf16.mxu1 %v20379_v55 }
 0x3ef   : > { %v3893_v15 = vpop.f32.mrf.mxu1 }
 0x3f0   : > { %11044 = vst [vmem:[%s17551_s4 + $0x8] sm:$0xff] %v3892_v28  ;;  %v3894_v14 = vadd.f32 %v3893_v15, %v17546_v22 }
 0x3f1   : > { %v3895_v2 = vpop.f32.mrf.mxu1 }
 0x3f2   : > { %v4210_v40 = vmul.f32 1.442695, %v3894_v14  ;;  %v3896_v8 = vadd.f32 %v3895_v2, %v17542_v21 }
 0x3f3   : > { %v3897_v56 = vpop.f32.mrf.mxu1 }
 0x3f4   : > { %13868 = vpow2.f32 %v4210_v40  ;;  %11047 = vst [vmem:[%s17551_s4 + $0x20] sm:$0xff] %v3896_v8  ;;  %v3898_v48 = vadd.f32 %v3897_v56, %v17546_v22  ;;  %v830_v40 = vld [vmem:[%s16509_s30 + $0x20] sm:$0xff] }
 0x3f5   : > { %v3901_v41 = vpop.f32.mrf.mxu1  ;;  %4140 = vmatmul.mubr.bf16.gmra.mxu1 %v17487_v49 }
 0x3f6   : > { %v4212_v54 = vmul.f32 1.442695, %v3898_v48  ;;  %v3902_v51 = vadd.f32 %v3901_v41, %v17542_v21  ;;  %4149 = vmatprep.mubr.bf16.mxu1 %v20379_v55 }
 0x3f7   : > { %v3903_v0 = vpop.f32.mrf.mxu1 }
 0x3f8   : > { %13870 = vpow2.f32 %v4212_v54  ;;  %11050 = vst [vmem:[%s17551_s4 + $0x38] sm:$0xff] %v3902_v51  ;;  %v3904_v5 = vadd.f32 %v3903_v0, %v17546_v22 }
 0x3f9   : > { %v3905_v63 = vpop.f32.mrf.mxu1 }
 0x3fa   : > { %v4214_v11 = vmul.f32 1.442695, %v3904_v5  ;;  %v17564_v26 = vadd.f32 %v3905_v63, %v17542_v21  ;;  %v831_v63 = vld [vmem:[%s16509_s30 + $0x28] sm:$0xff] }
 0x3fb   : > { %v3907_v3 = vpop.f32.mrf.mxu1 }
 0x3fc   : > { %13872 = vpow2.f32 %v4214_v11  ;;  %11053 = vst [vmem:[%s17551_s4 + $0x50] sm:$0xff] %v17564_v26  ;;  %v3908_v49 = vadd.f32 %v3907_v3, %v17546_v22 }
 0x3fd   : > { %v3911_v23 = vpop.f32.mrf.mxu1  ;;  %4150 = vmatmul.mubr.bf16.gmra.mxu1 %v17500_v34 }
 0x3fe   : > { %v4216_v61 = vmul.f32 1.442695, %v3908_v49  ;;  %v17571_v52 = vadd.f32 %v3911_v23, %v17542_v21  ;;  %4159 = vmatprep.mubr.bf16.mxu1 %v20379_v55 }
 0x3ff   : > { %v3913_v33 = vpop.f32.mrf.mxu1 }
 0x400   : > { %13874 = vpow2.f32 %v4216_v61  ;;  %11056 = vst [vmem:[%s17551_s4 + $0x68] sm:$0xff] %v17571_v52  ;;  %v3914_v10 = vadd.f32 %v3913_v33, %v17546_v22 }
 0x401   : > { %v13869_v6 = vpop.eup %13868  ;;  %v3915_v20 = vpop.f32.mrf.mxu1 }
 0x402   : > { %11045 = vst [vmem:[%s17551_s4 + $0x10] sm:$0xff] %v13869_v6  ;;  %v4218_v34 = vmul.f32 1.442695, %v3914_v10  ;;  %v17580_v58 = vadd.f32 %v3915_v20, %v17542_v21  ;;  %v4338_v1 = vmul.f32 %v13869_v6, %v826_v36  ;;  %v832_v10 = vld [vmem:[%s16509_s30 + $0x30] sm:$0xff] }
 0x403   : > { %v3917_v17 = vpop.f32.mrf.mxu1 }
 0x404   : > { %13876 = vpow2.f32 %v4218_v34  ;;  %11059 = vst [vmem:[%s17551_s4 + $0x80] sm:$0xff] %v17580_v58  ;;  %v3918_v7 = vadd.f32 %v3917_v17, %v17546_v22  ;;  %v4402_v57 = vadd.f32 %v4338_v1, %v3892_v28 }
 0x405   : > { %v13871_v50 = vpop.eup %13870  ;;  %v3921_v32 = vpop.f32.mrf.mxu1  ;;  %4160 = vmatmul.mubr.bf16.gmra.mxu1 %v17497_v37 }
 0x406   : > { %11048 = vst [vmem:[%s17551_s4 + $0x28] sm:$0xff] %v13871_v50  ;;  %v4220_v60 = vmul.f32 1.442695, %v3918_v7  ;;  %v17589_v38 = vadd.f32 %v3921_v32, %v17542_v21  ;;  %4169 = vmatprep.mubr.bf16.mxu1 %v20379_v55  ;;  %v4339_v31 = vmul.f32 %v13871_v50, %v827_v12  ;;  %11043 = vst [vmem:[%s17551_s4] sm:$0xff] %v4402_v57 }
 0x407   : > { %v3923_v43 = vpop.f32.mrf.mxu1 }
 0x408   : > { %13878 = vpow2.f32 %v4220_v60  ;;  %11062 = vst [vmem:[%s17551_s4 + $0x98] sm:$0xff] %v17589_v38  ;;  %v3924_v37 = vadd.f32 %v3923_v43, %v17546_v22  ;;  %v4403_v13 = vadd.f32 %v4339_v31, %v3896_v8 }
 0x409   : > { %v13873_v42 = vpop.eup %13872  ;;  %v3925_v27 = vpop.f32.mrf.mxu1 }
 0x40a   : > { %v4340_v24 = vmul.f32 %v13873_v42, %v828_v4  ;;  %11051 = vst [vmem:[%s17551_s4 + $0x40] sm:$0xff] %v13873_v42  ;;  %v4222_v62 = vmul.f32 1.442695, %v3924_v37  ;;  %v17599_v29 = vadd.f32 %v3925_v27, %v17542_v21  ;;  %v4466_v45 = vpack.c.bf16 %v4403_v13, %v4402_v57  ;;  %11046 = vst [vmem:[%s17551_s4 + $0x18] sm:$0xff] %v4403_v13  ;;  %v833_v57 = vld [vmem:[%s16509_s30 + $0x38] sm:$0xff]  ;;  %v834_v27 = vld [vmem:[%s16509_s30 + $0x40] sm:$0xff] }
 0x40b   : > { %v3927_v39 = vpop.f32.mrf.mxu1  ;;  %v13788_v37 = vld [vmem:[#allocation16 + $0x188] ss:$28 sps:$4 sm:$0xff]  }
 0x40c   : > { %v4404_v19 = vadd.f32 %v4340_v24, %v3902_v51  ;;  %13880 = vpow2.f32 %v4222_v62  ;;  %11065 = vst [vmem:[%s17551_s4 + $0xb0] sm:$0xff] %v17599_v29  ;;  %v3928_v44 = vadd.f32 %v3927_v39, %v17546_v22  ;;  %13050 = vmatprep.mubr.bf16.mxu0 %v4466_v45  ;;  %v13790_v13 = vld [vmem:[#allocation16 + $0x18c] ss:$28 sps:$4 sm:$0xff]   ;;  %v13793_v24 = vld [vmem:[#allocation16 + $0x194] ss:$28 sps:$4 sm:$0xff]  }
 0x40d   : > { %v13875_v30 = vpop.eup %13874  ;;  %v3931_v46 = vpop.f32.mrf.mxu1  ;;  %4170 = vmatmul.mubr.bf16.gmra.mxu1 %v17508_v35  ;;  %5343 = vmatprep.subr.bf16.mxu0 %v13790_v13 }
 0x40e   : > { %11049 = vst [vmem:[%s17551_s4 + $0x30] sm:$0xff] %v4404_v19  ;;  %v4341_v28 = vmul.f32 %v13875_v30, %v829_v47  ;;  %11054 = vst [vmem:[%s17551_s4 + $0x58] sm:$0xff] %v13875_v30  ;;  %v4224_v15 = vmul.f32 1.442695, %v3928_v44  ;;  %v17610_v14 = vadd.f32 %v3931_v46, %v17542_v21  ;;  %4179 = vmatprep.mubr.bf16.mxu1 %v20379_v55  ;;  %5696 = vmatprep.subr.bf16.mxu1 %v13793_v24 }
 0x40f   : > { %v3933_v2 = vpop.f32.mrf.mxu1 }
 0x410   : > { %v4405_v8 = vadd.f32 %v4341_v28, %v17564_v26  ;;  %13882 = vpow2.f32 %v4224_v15  ;;  %11068 = vst [vmem:[%s17551_s4 + $0xc8] sm:$0xff] %v17610_v14  ;;  %v3934_v35 = vadd.f32 %v3933_v2, %v17546_v22  ;;  %v835_v28 = vld [vmem:[%s16509_s30 + $0x48] sm:$0xff] }
 0x411   : > { %v13877_v56 = vpop.eup %13876  ;;  %v3935_v48 = vpop.f32.mrf.mxu1 }
 0x412   : > { %11052 = vst [vmem:[%s17551_s4 + $0x48] sm:$0xff] %v4405_v8  ;;  %11057 = vst [vmem:[%s17551_s4 + $0x70] sm:$0xff] %v13877_v56  ;;  %v4226_v41 = vmul.f32 1.442695, %v3934_v35  ;;  %v17621_v54 = vadd.f32 %v3935_v48, %v17542_v21  ;;  %v4467_v51 = vpack.c.bf16 %v4405_v8, %v4404_v19  ;;  %v4342_v0 = vmul.f32 %v13877_v56, %v830_v40 }
 0x413   : > { %v3937_v5 = vpop.f32.mrf.mxu1 }
 0x414   : > { %13884 = vpow2.f32 %v4226_v41  ;;  %11071 = vst [vmem:[%s17551_s4 + $0xe0] sm:$0xff] %v17621_v54  ;;  %v3938_v11 = vadd.f32 %v3937_v5, %v17546_v22  ;;  %13051 = vmatmul.mubr.bf16.vlgmr.msra.gmra.mxu0 %v4467_v51  ;;  %v4406_v26 = vadd.f32 %v4342_v0, %v17571_v52  ;;  %v836_v41 = vld [vmem:[%s16509_s30 + $0x50] sm:$0xff] }
 0x415   : > { %v13879_v3 = vpop.eup %13878  ;;  %v3941_v49 = vpop.f32.mrf.mxu1  ;;  %4180 = vmatmul.mubr.bf16.gmra.mxu1 %v17505_v9  ;;  %5344 = vmatpush1.bf16.msra.mxu0 %v13788_v37 }
 0x416   : > { %11060 = vst [vmem:[%s17551_s4 + $0x88] sm:$0xff] %v13879_v3  ;;  %v4228_v23 = vmul.f32 1.442695, %v3938_v11  ;;  %v17631_v61 = vadd.f32 %v3941_v49, %v17542_v21  ;;  %4189 = vmatprep.mubr.bf16.mxu1 %v20379_v55  ;;  %v4343_v33 = vmul.f32 %v13879_v3, %v831_v63  ;;  %11055 = vst [vmem:[%s17551_s4 + $0x60] sm:$0xff] %v4406_v26  ;;  %v837_v49 = vld [vmem:[%s16509_s30 + $0x58] sm:$0xff] }
 0x417   : > { %v3943_v36 = vpop.f32.mrf.mxu1 }
 0x418   : > { %13886 = vpow2.f32 %v4228_v23  ;;  %11074 = vst [vmem:[%s17551_s4 + $0xf8] sm:$0xff] %v17631_v61  ;;  %v3944_v52 = vadd.f32 %v3943_v36, %v17546_v22  ;;  %v4407_v9 = vadd.f32 %v4343_v33, %v17580_v58 }
 0x419   : > { %v13881_v6 = vpop.eup %13880  ;;  %v3945_v20 = vpop.f32.mrf.mxu1 }
 0x41a   : > { %11063 = vst [vmem:[%s17551_s4 + $0xa0] sm:$0xff] %v13881_v6  ;;  %v4230_v34 = vmul.f32 1.442695, %v3944_v52  ;;  %v17642_v1 = vadd.f32 %v3945_v20, %v17542_v21  ;;  %v4468_v17 = vpack.c.bf16 %v4407_v9, %v4406_v26  ;;  %11058 = vst [vmem:[%s17551_s4 + $0x78] sm:$0xff] %v4407_v9  ;;  %v4344_v12 = vmul.f32 %v13881_v6, %v832_v10  ;;  %v13794_v6 = vld [vmem:[#allocation16 + $0x150] ss:$28 sps:$4 sm:$0xff]  }
 0x41b   : > { %v3947_v7 = vpop.f32.mrf.mxu1  ;;  %v13796_v20 = vld [vmem:[#allocation16 + $0x154] ss:$28 sps:$4 sm:$0xff]  }
 0x41c   : > { %13888 = vpow2.f32 %v4230_v34  ;;  %11077 = vst [vmem:[%s17551_s4 + $0x110] sm:$0xff] %v17642_v1  ;;  %v3948_v58 = vadd.f32 %v3947_v7, %v17546_v22  ;;  %13054 = vmatprep.mubr.bf16.mxu0 %v4468_v17  ;;  %v4408_v50 = vadd.f32 %v4344_v12, %v17589_v38  ;;  %v13791_v38 = vld [vmem:[#allocation16 + $0x190] ss:$28 sps:$4 sm:$0xff]   ;;  %v838_v17 = vld [vmem:[%s16509_s30 + $0x60] sm:$0xff]  ;;  %5345 = vmatprep.subr.bf16.mxu0 %v13796_v20 }
 0x41d   : > { %v13883_v32 = vpop.eup %13882  ;;  %v3951_v60 = vpop.f32.mrf.mxu1  ;;  %4190 = vmatmul.mubr.bf16.gmra.mxu1 %v17515_v16  ;;  %5346 = vmatpush1.bf16.msra.mxu0 %v13794_v6 }
 0x41e   : > { %11066 = vst [vmem:[%s17551_s4 + $0xb8] sm:$0xff] %v13883_v32  ;;  %v4232_v31 = vmul.f32 1.442695, %v3948_v58  ;;  %v17653_v4 = vadd.f32 %v3951_v60, %v17542_v21  ;;  %4199 = vmatprep.mubr.bf16.mxu1 %v20379_v55  ;;  %v4345_v43 = vmul.f32 %v13883_v32, %v833_v57  ;;  %11061 = vst [vmem:[%s17551_s4 + $0x90] sm:$0xff] %v4408_v50  ;;  %5697 = vmatpush1.bf16.msra.mxu1 %v13791_v38 }
 0x41f   : > { %v3953_v42 = vpop.f32.mrf.mxu1 }
 0x420   : > { %13890 = vpow2.f32 %v4232_v31  ;;  %11080 = vst [vmem:[%s17551_s4 + $0x128] sm:$0xff] %v17653_v4  ;;  %v3954_v16 = vadd.f32 %v3953_v42, %v17546_v22  ;;  %v4409_v62 = vadd.f32 %v4345_v43, %v17599_v29  ;;  %v839_v43 = vld [vmem:[%s16509_s30 + $0x68] sm:$0xff] }
 0x421   : > { %v13885_v45 = vpop.eup %13884  ;;  %v3955_v47 = vpop.f32.mrf.mxu1 }
 0x422   : > { %11069 = vst [vmem:[%s17551_s4 + $0xd0] sm:$0xff] %v13885_v45  ;;  %v4234_v39 = vmul.f32 1.442695, %v3954_v16  ;;  %v17664_v19 = vadd.f32 %v3955_v47, %v17542_v21  ;;  %v4469_v44 = vpack.c.bf16 %v4409_v62, %v4408_v50  ;;  %11064 = vst [vmem:[%s17551_s4 + $0xa8] sm:$0xff] %v4409_v62  ;;  %v4346_v30 = vmul.f32 %v13885_v45, %v834_v27  ;;  %v840_v62 = vld [vmem:[%s16509_s30 + $0x70] sm:$0xff] }
 0x423   : > { %v3957_v46 = vpop.f32.mrf.mxu1 }
 0x424   : > { %13892 = vpow2.f32 %v4234_v39  ;;  %11083 = vst [vmem:[%s17551_s4 + $0x140] sm:$0xff] %v17664_v19  ;;  %v3958_v29 = vadd.f32 %v3957_v46, %v17546_v22  ;;  %13055 = vmatmul.mubr.bf16.gmra.mxu0 %v4469_v44  ;;  %v4410_v15 = vadd.f32 %v4346_v30, %v17610_v14 }
 0x425   : > { %v13887_v2 = vpop.eup %13886  ;;  %v3961_v40 = vpop.f32.mrf.mxu1  ;;  %4200 = vmatmul.mubr.bf16.gmra.mxu1 %v17513_v18 }
 0x426   : > { %11072 = vst [vmem:[%s17551_s4 + $0xe8] sm:$0xff] %v13887_v2  ;;  %v4236_v8 = vmul.f32 1.442695, %v3958_v29  ;;  %v17675_v35 = vadd.f32 %v3961_v40, %v17542_v21  ;;  %v4347_v56 = vmul.f32 %v13887_v2, %v835_v28  ;;  %11067 = vst [vmem:[%s17551_s4 + $0xc0] sm:$0xff] %v4410_v15  ;;  %5728 = vmatprep.mubr.bf16.mxu1 %v20379_v55 }
 0x427   : > { %v3963_v48 = vpop.f32.mrf.mxu1 }
 0x428   : > { %13894 = vpow2.f32 %v4236_v8  ;;  %11086 = vst [vmem:[%s17551_s4 + $0x158] sm:$0xff] %v17675_v35  ;;  %v3964_v14 = vadd.f32 %v3963_v48, %v17546_v22  ;;  %v4411_v18 = vadd.f32 %v4347_v56, %v17621_v54 }
 0x429   : > { %v13889_v51 = vpop.eup %13888  ;;  %v3965_v0 = vpop.f32.mrf.mxu1 }
 0x42a   : > { %11075 = vst [vmem:[%s17551_s4 + $0x100] sm:$0xff] %v13889_v51  ;;  %v4238_v5 = vmul.f32 1.442695, %v3964_v14  ;;  %v17686_v63 = vadd.f32 %v3965_v0, %v17542_v21  ;;  %v4470_v11 = vpack.c.bf16 %v4411_v18, %v4410_v15  ;;  %11070 = vst [vmem:[%s17551_s4 + $0xd8] sm:$0xff] %v4411_v18  ;;  %v4348_v26 = vmul.f32 %v13889_v51, %v836_v41  ;;  %v841_v15 = vld [vmem:[%s16509_s30 + $0x78] sm:$0xff]  ;;  %v842_v0 = vld [vmem:[%s16509_s30 + $0x80] sm:$0xff] }
 0x42b   : > { %v3967_v3 = vpop.f32.mrf.mxu1  ;;  %v13797_v14 = vld [vmem:[#allocation16 + $0x118] ss:$28 sps:$4 sm:$0xff]  }
 0x42c   : > { %13896 = vpow2.f32 %v4238_v5  ;;  %11089 = vst [vmem:[%s17551_s4 + $0x170] sm:$0xff] %v17686_v63  ;;  %v3968_v54 = vadd.f32 %v3967_v3, %v17546_v22  ;;  %13058 = vmatprep.mubr.bf16.mxu0 %v4470_v11  ;;  %v4412_v23 = vadd.f32 %v4348_v26, %v17631_v61  ;;  %v13799_v18 = vld [vmem:[#allocation16 + $0x11c] ss:$28 sps:$4 sm:$0xff]  }
 0x42d   : > { %v13891_v33 = vpop.eup %13890  ;;  %v3971_v36 = vpop.f32.mrf.mxu1  ;;  %v13800_v5 = vld [vmem:[#allocation16 + $0x158] ss:$28 sps:$4 sm:$0xff]   ;;  %5347 = vmatprep.subr.bf16.mxu0 %v13799_v18 }
 0x42e   : > { %11078 = vst [vmem:[%s17551_s4 + $0x118] sm:$0xff] %v13891_v33  ;;  %v4240_v10 = vmul.f32 1.442695, %v3968_v54  ;;  %v17696_v52 = vadd.f32 %v3971_v36, %v17542_v21  ;;  %v4349_v9 = vmul.f32 %v13891_v33, %v837_v49  ;;  %11073 = vst [vmem:[%s17551_s4 + $0xf0] sm:$0xff] %v4412_v23  ;;  %v13802_v11 = vld [vmem:[#allocation16 + $0x15c] ss:$28 sps:$4 sm:$0xff]   ;;  %5348 = vmatpush1.bf16.msra.mxu0 %v13797_v14 }
 0x42f   : > { %v3973_v34 = vpop.f32.mrf.mxu1  ;;  %5698 = vmatprep.subr.bf16.mxu1 %v13802_v11  ;;  %v13820_v11 = vld [vmem:[#allocation16 + $0x7c] ss:$28 sps:$4 sm:$0xff]  }
 0x430   : > { %13898 = vpow2.f32 %v4240_v10  ;;  %11092 = vst [vmem:[%s17551_s4 + $0x188] sm:$0xff] %v17696_v52  ;;  %v3974_v61 = vadd.f32 %v3973_v34, %v17546_v22  ;;  %v4413_v12 = vadd.f32 %v4349_v9, %v17642_v1  ;;  %5699 = vmatpush1.bf16.msra.mxu1 %v13800_v5 }
 0x431   : > { %v13893_v7 = vpop.eup %13892  ;;  %v3975_v57 = vpop.f32.mrf.mxu1 }
 0x432   : > { %11081 = vst [vmem:[%s17551_s4 + $0x130] sm:$0xff] %v13893_v7  ;;  %v4242_v58 = vmul.f32 1.442695, %v3974_v61  ;;  %v17706_v50 = vadd.f32 %v3975_v57, %v17542_v21  ;;  %v4471_v32 = vpack.c.bf16 %v4413_v12, %v4412_v23  ;;  %11076 = vst [vmem:[%s17551_s4 + $0x108] sm:$0xff] %v4413_v12  ;;  %v4350_v60 = vmul.f32 %v13893_v7, %v838_v17  ;;  %v844_v57 = vld [vmem:[%s16509_s30 + $0x90] sm:$0xff] }
 0x433   : > { %v3977_v31 = vpop.f32.mrf.mxu1 }
 0x434   : > { %13900 = vpow2.f32 %v4242_v58  ;;  %11095 = vst [vmem:[%s17551_s4 + $0x1a0] sm:$0xff] %v17706_v50  ;;  %v3978_v1 = vadd.f32 %v3977_v31, %v17546_v22  ;;  %13059 = vmatmul.mubr.bf16.gmra.mxu0 %v4471_v32  ;;  %v4414_v37 = vadd.f32 %v4350_v60, %v17653_v4  ;;  %v13808_v58 = vld [vmem:[#allocation16 + $0x124] ss:$28 sps:$4 sm:$0xff]  }
 0x435   : > { %v13895_v13 = vpop.eup %13894  ;;  %v3981_v42 = vpop.f32.mrf.mxu1  ;;  %v13806_v60 = vld [vmem:[#allocation16 + $0x120] ss:$28 sps:$4 sm:$0xff]   ;;  %5700 = vmatprep.subr.bf16.mxu1 %v13808_v58 }
 0x436   : > { %11084 = vst [vmem:[%s17551_s4 + $0x148] sm:$0xff] %v13895_v13  ;;  %v4244_v27 = vmul.f32 1.442695, %v3978_v1  ;;  %v17716_v38 = vadd.f32 %v3981_v42, %v17542_v21  ;;  %v4351_v24 = vmul.f32 %v13895_v13, %v839_v43  ;;  %11079 = vst [vmem:[%s17551_s4 + $0x120] sm:$0xff] %v4414_v37  ;;  %5701 = vmatpush1.bf16.msra.mxu1 %v13806_v60  ;;  %v849_v60 = vld [vmem:[%s16509_s30 + $0xb8] sm:$0xff] }
 0x437   : > { %v3983_v16 = vpop.f32.mrf.mxu1 }
 0x438   : > { %13902 = vpow2.f32 %v4244_v27  ;;  %11098 = vst [vmem:[%s17551_s4 + $0x1b8] sm:$0xff] %v17716_v38  ;;  %v3984_v4 = vadd.f32 %v3983_v16, %v17546_v22  ;;  %v4415_v45 = vadd.f32 %v4351_v24, %v17664_v19  ;;  %v845_v24 = vld [vmem:[%s16509_s30 + $0x98] sm:$0xff]  ;;  %v13814_v16 = vld [vmem:[#allocation16 + $0xec] ss:$28 sps:$4 sm:$0xff]  }
 0x439   : > { %v13897_v47 = vpop.eup %13896  ;;  %v3985_v39 = vpop.f32.mrf.mxu1  ;;  %5702 = vmatprep.subr.bf16.mxu1 %v13814_v16 }
 0x43a   : > { %11087 = vst [vmem:[%s17551_s4 + $0x160] sm:$0xff] %v13897_v47  ;;  %v4246_v44 = vmul.f32 1.442695, %v3984_v4  ;;  %v17726_v30 = vadd.f32 %v3985_v39, %v17542_v21  ;;  %v4472_v46 = vpack.c.bf16 %v4415_v45, %v4414_v37  ;;  %11082 = vst [vmem:[%s17551_s4 + $0x138] sm:$0xff] %v4415_v45  ;;  %v4352_v28 = vmul.f32 %v13897_v47, %v840_v62  ;;  %v13812_v4 = vld [vmem:[#allocation16 + $0xe8] ss:$28 sps:$4 sm:$0xff]  }
 0x43b   : > { %v3987_v29 = vpop.f32.mrf.mxu1  ;;  %5703 = vmatpush1.bf16.msra.mxu1 %v13812_v4 }
 0x43c   : > { %13904 = vpow2.f32 %v4246_v44  ;;  %11101 = vst [vmem:[%s17551_s4 + $0x1d0] sm:$0xff] %v17726_v30  ;;  %v3988_v19 = vadd.f32 %v3987_v29, %v17546_v22  ;;  %13062 = vmatprep.mubr.bf16.mxu0 %v4472_v46  ;;  %v4416_v2 = vadd.f32 %v4352_v28, %v17675_v35  ;;  %v13803_v28 = vld [vmem:[#allocation16 + $0xe0] ss:$28 sps:$4 sm:$0xff]  }
 0x43d   : > { %v13899_v40 = vpop.eup %13898  ;;  %v3991_v8 = vpop.f32.mrf.mxu1  ;;  %v13805_v29 = vld [vmem:[#allocation16 + $0xe4] ss:$28 sps:$4 sm:$0xff]  }
 0x43e   : > { %11090 = vst [vmem:[%s17551_s4 + $0x178] sm:$0xff] %v13899_v40  ;;  %v4248_v56 = vmul.f32 1.442695, %v3988_v19  ;;  %v17736_v48 = vadd.f32 %v3991_v8, %v17542_v21  ;;  %v4353_v41 = vmul.f32 %v13899_v40, %v841_v15  ;;  %11085 = vst [vmem:[%s17551_s4 + $0x150] sm:$0xff] %v4416_v2  ;;  %v846_v19 = vld [vmem:[%s16509_s30 + $0xa0] sm:$0xff]  ;;  %5349 = vmatprep.subr.bf16.mxu0 %v13805_v29 }
 0x43f   : > { %v3993_v51 = vpop.f32.mrf.mxu1  ;;  %v13815_v8 = vld [vmem:[#allocation16 + $0xb0] ss:$28 sps:$4 sm:$0xff]   ;;  %5350 = vmatpush1.bf16.msra.mxu0 %v13803_v28 }
 0x440   : > { %13906 = vpow2.f32 %v4248_v56  ;;  %11104 = vst [vmem:[%s17551_s4 + $0x1e8] sm:$0xff] %v17736_v48  ;;  %v3994_v35 = vadd.f32 %v3993_v51, %v17546_v22  ;;  %v4417_v26 = vadd.f32 %v4353_v41, %v17686_v63  ;;  %v843_v63 = vld [vmem:[%s16509_s30 + $0x88] sm:$0xff] }
 0x441   : > { %v13901_v3 = vpop.eup %13900  ;;  %v3995_v49 = vpop.f32.mrf.mxu1 }
 0x442   : > { %11093 = vst [vmem:[%s17551_s4 + $0x190] sm:$0xff] %v13901_v3  ;;  %v4250_v54 = vmul.f32 1.442695, %v3994_v35  ;;  %v17746_v23 = vadd.f32 %v3995_v49, %v17542_v21  ;;  %v4473_v33 = vpack.c.bf16 %v4417_v26, %v4416_v2  ;;  %11088 = vst [vmem:[%s17551_s4 + $0x168] sm:$0xff] %v4417_v26  ;;  %v4354_v36 = vmul.f32 %v13901_v3, %v842_v0  ;;  %v13818_v3 = vld [vmem:[#allocation16 + $0x78] ss:$28 sps:$4 sm:$0xff]  }
 0x443   : > { %v3997_v10 = vpop.f32.mrf.mxu1 }
 0x444   : > { %13908 = vpow2.f32 %v4250_v54  ;;  %11107 = vst [vmem:[%s17551_s4 + $0x200] sm:$0xff] %v17746_v23  ;;  %v3998_v9 = vadd.f32 %v3997_v10, %v17546_v22  ;;  %13063 = vmatmul.mubr.bf16.gmra.mxu0 %v4473_v33  ;;  %v4418_v6 = vadd.f32 %v4354_v36, %v17696_v52 }
 0x445   : > { %v13903_v20 = vpop.eup %13902  ;;  %v4001_v34 = vpop.f32.mrf.mxu1 }
 0x446   : > { %11096 = vst [vmem:[%s17551_s4 + $0x1a8] sm:$0xff] %v13903_v20  ;;  %v4252_v17 = vmul.f32 1.442695, %v3998_v9  ;;  %v17756_v61 = vadd.f32 %v4001_v34, %v17542_v21  ;;  %v4355_v12 = vmul.f32 %v13903_v20, %v843_v63  ;;  %11091 = vst [vmem:[%s17551_s4 + $0x180] sm:$0xff] %v4418_v6  ;;  %v848_v9 = vld [vmem:[%s16509_s30 + $0xb0] sm:$0xff] }
 0x447   : > { %v4003_v7 = vpop.f32.mrf.mxu1  ;;  %v13821_v34 = vld [vmem:[#allocation16 + $0x40] ss:$28 sps:$4 sm:$0xff]  }
 0x448   : > { %13910 = vpow2.f32 %v4252_v17  ;;  %11110 = vst [vmem:[%s17551_s4 + $0x218] sm:$0xff] %v17756_v61  ;;  %v4004_v52 = vadd.f32 %v4003_v7, %v17546_v22  ;;  %v4419_v32 = vadd.f32 %v4355_v12, %v17706_v50 }
 0x449   : > { %v13905_v31 = vpop.eup %13904  ;;  %v4005_v43 = vpop.f32.mrf.mxu1 }
 0x44a   : > { %11099 = vst [vmem:[%s17551_s4 + $0x1c0] sm:$0xff] %v13905_v31  ;;  %v4254_v1 = vmul.f32 1.442695, %v4004_v52  ;;  %v17766_v37 = vadd.f32 %v4005_v43, %v17542_v21  ;;  %v4474_v13 = vpack.c.bf16 %v4419_v32, %v4418_v6  ;;  %11094 = vst [vmem:[%s17551_s4 + $0x198] sm:$0xff] %v4419_v32  ;;  %v4356_v42 = vmul.f32 %v13905_v31, %v844_v57  ;;  %v13823_v6 = vld [vmem:[#allocation16 + $0x44] ss:$28 sps:$4 sm:$0xff]  }
 0x44b   : > { %v4007_v27 = vpop.f32.mrf.mxu1  ;;  %v13829_v31 = vld [vmem:[#allocation16 + $0xc] ss:$28 sps:$4 sm:$0xff]  }
 0x44c   : > { %13912 = vpow2.f32 %v4254_v1  ;;  %11113 = vst [vmem:[%s17551_s4 + $0x230] sm:$0xff] %v17766_v37  ;;  %v4008_v50 = vadd.f32 %v4007_v27, %v17546_v22  ;;  %13066 = vmatprep.mubr.bf16.mxu0 %v4474_v13  ;;  %v4420_v62 = vadd.f32 %v4356_v42, %v17716_v38  ;;  %v13817_v38 = vld [vmem:[#allocation16 + $0xb4] ss:$28 sps:$4 sm:$0xff]   ;;  %v13827_v1 = vld [vmem:[#allocation16 + $0x8] ss:$28 sps:$4 sm:$0xff]  }
 0x44d   : > { %v13907_v45 = vpop.eup %13906  ;;  %v4011_v47 = vpop.f32.mrf.mxu1  ;;  %5704 = vmatprep.subr.bf16.mxu1 %v13817_v38 }
 0x44e   : > { %11102 = vst [vmem:[%s17551_s4 + $0x1d8] sm:$0xff] %v13907_v45  ;;  %v4256_v39 = vmul.f32 1.442695, %v4008_v50  ;;  %v17776_v44 = vadd.f32 %v4011_v47, %v17542_v21  ;;  %v4357_v46 = vmul.f32 %v13907_v45, %v845_v24  ;;  %11097 = vst [vmem:[%s17551_s4 + $0x1b0] sm:$0xff] %v4420_v62  ;;  %5705 = vmatpush1.bf16.msra.mxu1 %v13815_v8  ;;  %v13809_v50 = vld [vmem:[#allocation16 + $0xa8] ss:$28 sps:$4 sm:$0xff]  }
 0x44f   : > { %v4013_v15 = vpop.f32.mrf.mxu1  ;;  %5706 = vmatprep.subr.bf16.mxu1 %v13820_v11  ;;  %v850_v45 = vld [vmem:[%s16509_s30 + $0xc0] sm:$0xff] }
 0x450   : > { %13914 = vpow2.f32 %v4256_v39  ;;  %11116 = vst [vmem:[%s17551_s4 + $0x248] sm:$0xff] %v17776_v44  ;;  %v4014_v2 = vadd.f32 %v4013_v15, %v17546_v22  ;;  %v4421_v40 = vadd.f32 %v4357_v46, %v17726_v30  ;;  %v847_v30 = vld [vmem:[%s16509_s30 + $0xa8] sm:$0xff] }
 0x451   : > { %v13909_v56 = vpop.eup %13908  ;;  %v4015_v41 = vpop.f32.mrf.mxu1 }
 0x452   : > { %11105 = vst [vmem:[%s17551_s4 + $0x1f0] sm:$0xff] %v13909_v56  ;;  %v4258_v14 = vmul.f32 1.442695, %v4014_v2  ;;  %v17786_v18 = vadd.f32 %v4015_v41, %v17542_v21  ;;  %v4475_v51 = vpack.c.bf16 %v4421_v40, %v4420_v62  ;;  %11100 = vst [vmem:[%s17551_s4 + $0x1c8] sm:$0xff] %v4421_v40  ;;  %v4358_v0 = vmul.f32 %v13909_v56, %v846_v19  ;;  %v13811_v62 = vld [vmem:[#allocation16 + $0xac] ss:$28 sps:$4 sm:$0xff]  }
 0x453   : > { %v4017_v5 = vpop.f32.mrf.mxu1  ;;  %5707 = vmatpush1.bf16.msra.mxu1 %v13818_v3  ;;  %5351 = vmatprep.subr.bf16.mxu0 %v13811_v62  ;;  %v851_v2 = vld [vmem:[%s16509_s30 + $0xc8] sm:$0xff] }
 0x454   : > { %13916 = vpow2.f32 %v4258_v14  ;;  %11119 = vst [vmem:[%s17551_s4 + $0x260] sm:$0xff] %v17786_v18  ;;  %v4018_v35 = vadd.f32 %v4017_v5, %v17546_v22  ;;  %13067 = vmatmul.mubr.bf16.gmra.mxu0 %v4475_v51  ;;  %v4422_v26 = vadd.f32 %v4358_v0, %v17736_v48  ;;  %5708 = vmatprep.subr.bf16.mxu1 %v13823_v6  ;;  %v852_v5 = vld [vmem:[%s16509_s30 + $0xd0] sm:$0xff] }
 0x455   : > { %v13911_v49 = vpop.eup %13910  ;;  %v4021_v54 = vpop.f32.mrf.mxu1  ;;  %5352 = vmatpush1.bf16.msra.mxu0 %v13809_v50 }
 0x456   : > { %11108 = vst [vmem:[%s17551_s4 + $0x208] sm:$0xff] %v13911_v49  ;;  %v4260_v33 = vmul.f32 1.442695, %v4018_v35  ;;  %v17796_v36 = vadd.f32 %v4021_v54, %v17542_v21  ;;  %v4359_v10 = vmul.f32 %v13911_v49, %v847_v30  ;;  %11103 = vst [vmem:[%s17551_s4 + $0x1e0] sm:$0xff] %v4422_v26 }
 0x457   : > { %v4023_v63 = vpop.f32.mrf.mxu1  ;;  %5709 = vmatpush1.bf16.msra.mxu1 %v13821_v34 }
 0x458   : > { %13918 = vpow2.f32 %v4260_v33  ;;  %11122 = vst [vmem:[%s17551_s4 + $0x278] sm:$0xff] %v17796_v36  ;;  %v4024_v48 = vadd.f32 %v4023_v63, %v17546_v22  ;;  %v4423_v20 = vadd.f32 %v4359_v10, %v17746_v23  ;;  %5710 = vmatprep.subr.bf16.mxu1 %v13829_v31  ;;  %v853_v10 = vld [vmem:[%s16509_s30 + $0xd8] sm:$0xff] }
 0x459   : > { %v13913_v17 = vpop.eup %13912  ;;  %v4025_v12 = vpop.f32.mrf.mxu1 }
 0x45a   : > { %11111 = vst [vmem:[%s17551_s4 + $0x220] sm:$0xff] %v13913_v17  ;;  %v4262_v7 = vmul.f32 1.442695, %v4024_v48  ;;  %v17806_v57 = vadd.f32 %v4025_v12, %v17542_v21  ;;  %v4476_v58 = vpack.c.bf16 %v4423_v20, %v4422_v26  ;;  %11106 = vst [vmem:[%s17551_s4 + $0x1f8] sm:$0xff] %v4423_v20  ;;  %v4360_v52 = vmul.f32 %v13913_v17, %v848_v9  ;;  %v13824_v17 = vld [vmem:[#allocation16 + $0x70] ss:$28 sps:$4 sm:$0xff]  }
 0x45b   : > { %v4027_v32 = vpop.f32.mrf.mxu1  ;;  %5711 = vmatpush1.bf16.msra.mxu1 %v13827_v1  ;;  %v13826_v12 = vld [vmem:[#allocation16 + $0x74] ss:$28 sps:$4 sm:$0xff]  }
 0x45c   : > { %13920 = vpow2.f32 %v4262_v7  ;;  %11125 = vst [vmem:[%s17551_s4 + $0x290] sm:$0xff] %v17806_v57  ;;  %v4028_v23 = vadd.f32 %v4027_v32, %v17546_v22  ;;  %13070 = vmatprep.mubr.bf16.mxu0 %v4476_v58  ;;  %v4424_v43 = vadd.f32 %v4360_v52, %v17756_v61  ;;  %v854_v58 = vld [vmem:[%s16509_s30 + $0xe0] sm:$0xff]  ;;  %5353 = vmatprep.subr.bf16.mxu0 %v13826_v12 }
 0x45d   : > { %v13915_v13 = vpop.eup %13914  ;;  %v4031_v42 = vpop.f32.mrf.mxu1  ;;  %5354 = vmatpush1.bf16.msra.mxu0 %v13824_v17 }
 0x45e   : > { %11114 = vst [vmem:[%s17551_s4 + $0x238] sm:$0xff] %v13915_v13  ;;  %v4264_v27 = vmul.f32 1.442695, %v4028_v23  ;;  %v17816_v24 = vadd.f32 %v4031_v42, %v17542_v21  ;;  %v4361_v16 = vmul.f32 %v13915_v13, %v849_v60  ;;  %11109 = vst [vmem:[%s17551_s4 + $0x210] sm:$0xff] %v4424_v43  ;;  %v855_v42 = vld [vmem:[%s16509_s30 + $0xe8] sm:$0xff] }
 0x45f   : > { %v4033_v4 = vpop.f32.mrf.mxu1 }
 0x460   : > { %13922 = vpow2.f32 %v4264_v27  ;;  %11128 = vst [vmem:[%s17551_s4 + $0x2a8] sm:$0xff] %v17816_v24  ;;  %v4034_v61 = vadd.f32 %v4033_v4, %v17546_v22  ;;  %v4425_v47 = vadd.f32 %v4361_v16, %v17766_v37 }
 0x461   : > { %v13917_v39 = vpop.eup %13916  ;;  %v4035_v46 = vpop.f32.mrf.mxu1 }
 0x462   : > { %11117 = vst [vmem:[%s17551_s4 + $0x250] sm:$0xff] %v13917_v39  ;;  %v4266_v28 = vmul.f32 1.442695, %v4034_v61  ;;  %v17826_v29 = vadd.f32 %v4035_v46, %v17542_v21  ;;  %v4477_v15 = vpack.c.bf16 %v4425_v47, %v4424_v43  ;;  %11112 = vst [vmem:[%s17551_s4 + $0x228] sm:$0xff] %v4425_v47  ;;  %v4362_v19 = vmul.f32 %v13917_v39, %v850_v45  ;;  %v856_v47 = vld [vmem:[%s16509_s30 + $0xf0] sm:$0xff] }
 0x463   : > { %v4037_v38 = vpop.f32.mrf.mxu1 }
 0x464   : > { %13924 = vpow2.f32 %v4266_v28  ;;  %11131 = vst [vmem:[%s17551_s4 + $0x2c0] sm:$0xff] %v17826_v29  ;;  %v4038_v37 = vadd.f32 %v4037_v38, %v17546_v22  ;;  %13071 = vmatmul.mubr.bf16.gmra.mxu0 %v4477_v15  ;;  %v4426_v40 = vadd.f32 %v4362_v19, %v17776_v44 }
 0x465   : > { %v13919_v8 = vpop.eup %13918  ;;  %v4041_v56 = vpop.f32.mrf.mxu1 }
 0x466   : > { %11120 = vst [vmem:[%s17551_s4 + $0x268] sm:$0xff] %v13919_v8  ;;  %v4268_v41 = vmul.f32 1.442695, %v4038_v37  ;;  %v17836_v14 = vadd.f32 %v4041_v56, %v17542_v21  ;;  %v4363_v51 = vmul.f32 %v13919_v8, %v851_v2  ;;  %11115 = vst [vmem:[%s17551_s4 + $0x240] sm:$0xff] %v4426_v40 }
 0x467   : > { %v4043_v0 = vpop.f32.mrf.mxu1 }
 0x468   : > { %13926 = vpow2.f32 %v4268_v41  ;;  %11134 = vst [vmem:[%s17551_s4 + $0x2d8] sm:$0xff] %v17836_v14  ;;  %v4044_v44 = vadd.f32 %v4043_v0, %v17546_v22  ;;  %v4427_v30 = vadd.f32 %v4363_v51, %v17786_v18 }
 0x469   : > { %v13921_v11 = vpop.eup %13920  ;;  %v4045_v35 = vpop.f32.mrf.mxu1 }
 0x46a   : > { %11123 = vst [vmem:[%s17551_s4 + $0x280] sm:$0xff] %v13921_v11  ;;  %v4270_v26 = vmul.f32 1.442695, %v4044_v44  ;;  %v17846_v3 = vadd.f32 %v4045_v35, %v17542_v21  ;;  %v4478_v49 = vpack.c.bf16 %v4427_v30, %v4426_v40  ;;  %11118 = vst [vmem:[%s17551_s4 + $0x258] sm:$0xff] %v4427_v30  ;;  %v4364_v54 = vmul.f32 %v13921_v11, %v852_v5  ;;  %v857_v40 = vld [vmem:[%s16509_s30 + $0xf8] sm:$0xff]  ;;  %v858_v35 = vld [vmem:[%s16509_s30 + $0x100] sm:$0xff] }
 0x46b   : > { %v4047_v33 = vpop.f32.mrf.mxu1  ;;  %v13830_v44 = vld [vmem:[#allocation16 + $0x38] ss:$28 sps:$4 sm:$0xff]  }
 0x46c   : > { %13928 = vpow2.f32 %v4270_v26  ;;  %11137 = vst [vmem:[%s17551_s4 + $0x2f0] sm:$0xff] %v17846_v3  ;;  %v4048_v18 = vadd.f32 %v4047_v33, %v17546_v22  ;;  %13074 = vmatprep.mubr.bf16.mxu0 %v4478_v49  ;;  %v4428_v63 = vadd.f32 %v4364_v54, %v17796_v36  ;;  %v13832_v30 = vld [vmem:[#allocation16 + $0x3c] ss:$28 sps:$4 sm:$0xff]   ;;  %v13835_v26 = vld [vmem:[#allocation16 + $0x4] ss:$28 sps:$4 sm:$0xff]  }
 0x46d   : > { %v13923_v9 = vpop.eup %13922  ;;  %v4051_v6 = vpop.f32.mrf.mxu1  ;;  %5355 = vmatprep.subr.bf16.mxu0 %v13832_v30 }
 0x46e   : > { %11126 = vst [vmem:[%s17551_s4 + $0x298] sm:$0xff] %v13923_v9  ;;  %v4272_v48 = vmul.f32 1.442695, %v4048_v18  ;;  %v17856_v20 = vadd.f32 %v4051_v6, %v17542_v21  ;;  %v4365_v34 = vmul.f32 %v13923_v9, %v853_v10  ;;  %11121 = vst [vmem:[%s17551_s4 + $0x270] sm:$0xff] %v4428_v63  ;;  %5356 = vmatpush1.bf16.msra.mxu0 %v13830_v44  ;;  %v13833_v10 = vld [vmem:[#allocation16] ss:$28 sps:$4 sm:$0xff]  }
 0x46f   : > { %v4053_v7 = vpop.f32.mrf.mxu1  ;;  %5357 = vmatprep.subr.bf16.mxu0 %v13835_v26 }
 0x470   : > { %13930 = vpow2.f32 %v4272_v48  ;;  %11140 = vst [vmem:[%s17551_s4 + $0x308] sm:$0xff] %v17856_v20  ;;  %v4054_v36 = vadd.f32 %v4053_v7, %v17546_v22  ;;  %v4429_v52 = vadd.f32 %v4365_v34, %v17806_v57 }
 0x471   : > { %v13925_v32 = vpop.eup %13924  ;;  %v4055_v60 = vpop.f32.mrf.mxu1 }
 0x472   : > { %11129 = vst [vmem:[%s17551_s4 + $0x2b0] sm:$0xff] %v13925_v32  ;;  %v4274_v31 = vmul.f32 1.442695, %v4054_v36  ;;  %v17866_v23 = vadd.f32 %v4055_v60, %v17542_v21  ;;  %v4479_v43 = vpack.c.bf16 %v4429_v52, %v4428_v63  ;;  %11124 = vst [vmem:[%s17551_s4 + $0x288] sm:$0xff] %v4429_v52  ;;  %v4366_v1 = vmul.f32 %v13925_v32, %v854_v58  ;;  %v860_v60 = vld [vmem:[%s16509_s30 + $0x110] sm:$0xff] }
 0x473   : > { %v4057_v13 = vpop.f32.mrf.mxu1  ;;  %5358 = vmatpush1.bf16.msra.mxu0 %v13833_v10 }
 0x474   : > { %13932 = vpow2.f32 %v4274_v31  ;;  %11143 = vst [vmem:[%s17551_s4 + $0x320] sm:$0xff] %v17866_v23  ;;  %v4058_v57 = vadd.f32 %v4057_v13, %v17546_v22  ;;  %13075 = vmatmul.mubr.bf16.gmra.mxu0 %v4479_v43  ;;  %v4430_v27 = vadd.f32 %v4366_v1, %v17816_v24 }
 0x475   : > { %v13927_v16 = vpop.eup %13926  ;;  %v4061_v50 = vpop.f32.mrf.mxu1 }
 0x476   : > { %11132 = vst [vmem:[%s17551_s4 + $0x2c8] sm:$0xff] %v13927_v16  ;;  %v4276_v62 = vmul.f32 1.442695, %v4058_v57  ;;  %v17876_v4 = vadd.f32 %v4061_v50, %v17542_v21  ;;  %v4367_v45 = vmul.f32 %v13927_v16, %v855_v42  ;;  %11127 = vst [vmem:[%s17551_s4 + $0x2a0] sm:$0xff] %v4430_v27  ;;  %v861_v50 = vld [vmem:[%s16509_s30 + $0x118] sm:$0xff] }
 0x477   : > { %v4063_v61 = vpop.f32.mrf.mxu1 }
 0x478   : > { %13934 = vpow2.f32 %v4276_v62  ;;  %11146 = vst [vmem:[%s17551_s4 + $0x338] sm:$0xff] %v17876_v4  ;;  %v4064_v24 = vadd.f32 %v4063_v61, %v17546_v22  ;;  %v4431_v39 = vadd.f32 %v4367_v45, %v17826_v29 }
 0x479   : > { %v13929_v46 = vpop.eup %13928  ;;  %v4065_v28 = vpop.f32.mrf.mxu1 }
 0x47a   : > { %11135 = vst [vmem:[%s17551_s4 + $0x2e0] sm:$0xff] %v13929_v46  ;;  %v4278_v15 = vmul.f32 1.442695, %v4064_v24  ;;  %v17886_v19 = vadd.f32 %v4065_v28, %v17542_v21  ;;  %v4480_v38 = vpack.c.bf16 %v4431_v39, %v4430_v27  ;;  %11130 = vst [vmem:[%s17551_s4 + $0x2b8] sm:$0xff] %v4431_v39  ;;  %v4368_v2 = vmul.f32 %v13929_v46, %v856_v47  ;;  %v862_v28 = vld [vmem:[%s16509_s30 + $0x120] sm:$0xff] }
 0x47b   : > { %v4067_v37 = vpop.f32.mrf.mxu1 }
 0x47c   : > { %13936 = vpow2.f32 %v4278_v15  ;;  %11149 = vst [vmem:[%s17551_s4 + $0x350] sm:$0xff] %v17886_v19  ;;  %v4068_v29 = vadd.f32 %v4067_v37, %v17546_v22  ;;  %13078 = vmatprep.mubr.bf16.mxu0 %v4480_v38  ;;  %v4432_v8 = vadd.f32 %v4368_v2, %v17836_v14  ;;  %v13838_v15 = vld [vmem:[#allocation16 + $0x19c] ss:$28 sps:$4 sm:$0xff]  }
 0x47d   : > { %v13931_v56 = vpop.eup %13930  ;;  %v4071_v41 = vpop.f32.mrf.mxu1  ;;  %6049 = vmatprep.subr.bf16.mxu0 %v13838_v15  ;;  %v868_v15 = vld [vmem:[%s16509_s30 + $0x150] sm:$0xff] }
 0x47e   : > { %11138 = vst [vmem:[%s17551_s4 + $0x2f8] sm:$0xff] %v13931_v56  ;;  %v4280_v51 = vmul.f32 1.442695, %v4068_v29  ;;  %v17896_v0 = vadd.f32 %v4071_v41, %v17542_v21  ;;  %v4369_v5 = vmul.f32 %v13931_v56, %v857_v40  ;;  %11133 = vst [vmem:[%s17551_s4 + $0x2d0] sm:$0xff] %v4432_v8 }
 0x47f   : > { %v4073_v11 = vpop.f32.mrf.mxu1 }
 0x480   : > { %13938 = vpow2.f32 %v4280_v51  ;;  %11152 = vst [vmem:[%s17551_s4 + $0x368] sm:$0xff] %v17896_v0  ;;  %v4074_v14 = vadd.f32 %v4073_v11, %v17546_v22  ;;  %v4433_v49 = vadd.f32 %v4369_v5, %v17846_v3  ;;  %v859_v3 = vld [vmem:[%s16509_s30 + $0x108] sm:$0xff] }
 0x481   : > { %v13933_v54 = vpop.eup %13932  ;;  %v4075_v33 = vpop.f32.mrf.mxu1  ;;  %v863_v51 = vld [vmem:[%s16509_s30 + $0x128] sm:$0xff] }
 0x482   : > { %11141 = vst [vmem:[%s17551_s4 + $0x310] sm:$0xff] %v13933_v54  ;;  %v4282_v18 = vmul.f32 1.442695, %v4074_v14  ;;  %v17906_v63 = vadd.f32 %v4075_v33, %v17542_v21  ;;  %v4481_v9 = vpack.c.bf16 %v4433_v49, %v4432_v8  ;;  %11136 = vst [vmem:[%s17551_s4 + $0x2e8] sm:$0xff] %v4433_v49  ;;  %v4370_v6 = vmul.f32 %v13933_v54, %v858_v35  ;;  %v864_v49 = vld [vmem:[%s16509_s30 + $0x130] sm:$0xff] }
 0x483   : > { %v4077_v48 = vpop.f32.mrf.mxu1 }
 0x484   : > { %13940 = vpow2.f32 %v4282_v18  ;;  %11155 = vst [vmem:[%s17551_s4 + $0x380] sm:$0xff] %v17906_v63  ;;  %v4078_v34 = vadd.f32 %v4077_v48, %v17546_v22  ;;  %13079 = vmatmul.mubr.bf16.gmra.mxu0 %v4481_v9  ;;  %v4434_v17 = vadd.f32 %v4370_v6, %v17856_v20 }
 0x485   : > { %v13935_v12 = vpop.eup %13934  ;;  %v4081_v7 = vpop.f32.mrf.mxu1 }
 0x486   : > { %11144 = vst [vmem:[%s17551_s4 + $0x328] sm:$0xff] %v13935_v12  ;;  %v4284_v58 = vmul.f32 1.442695, %v4078_v34  ;;  %v17916_v36 = vadd.f32 %v4081_v7, %v17542_v21  ;;  %v4371_v52 = vmul.f32 %v13935_v12, %v859_v3  ;;  %11139 = vst [vmem:[%s17551_s4 + $0x300] sm:$0xff] %v4434_v17  ;;  %v865_v34 = vld [vmem:[%s16509_s30 + $0x138] sm:$0xff] }
 0x487   : > { %v4083_v32 = vpop.f32.mrf.mxu1 }
 0x488   : > { %13942 = vpow2.f32 %v4284_v58  ;;  %11158 = vst [vmem:[%s17551_s4 + $0x398] sm:$0xff] %v17916_v36  ;;  %v4084_v20 = vadd.f32 %v4083_v32, %v17546_v22  ;;  %v4435_v31 = vadd.f32 %v4371_v52, %v17866_v23 }
 0x489   : > { %v13937_v43 = vpop.eup %13936  ;;  %v4085_v1 = vpop.f32.mrf.mxu1 }
 0x48a   : > { %11147 = vst [vmem:[%s17551_s4 + $0x340] sm:$0xff] %v13937_v43  ;;  %v4286_v13 = vmul.f32 1.442695, %v4084_v20  ;;  %v17926_v42 = vadd.f32 %v4085_v1, %v17542_v21  ;;  %v4482_v57 = vpack.c.bf16 %v4435_v31, %v4434_v17  ;;  %11142 = vst [vmem:[%s17551_s4 + $0x318] sm:$0xff] %v4435_v31  ;;  %v4372_v27 = vmul.f32 %v13937_v43, %v860_v60  ;;  %v866_v20 = vld [vmem:[%s16509_s30 + $0x140] sm:$0xff] }
 0x48b   : > { %v4087_v16 = vpop.f32.mrf.mxu1 }
 0x48c   : > { %13944 = vpow2.f32 %v4286_v13  ;;  %11161 = vst [vmem:[%s17551_s4 + $0x3b0] sm:$0xff] %v17926_v42  ;;  %v4088_v23 = vadd.f32 %v4087_v16, %v17546_v22  ;;  %13082 = vmatprep.mubr.bf16.mxu0 %v4482_v57  ;;  %v4436_v62 = vadd.f32 %v4372_v27, %v17876_v4 }
 0x48d   : > { %v13939_v45 = vpop.eup %13938  ;;  %v4091_v61 = vpop.f32.mrf.mxu1 }
 0x48e   : > { %11150 = vst [vmem:[%s17551_s4 + $0x358] sm:$0xff] %v13939_v45  ;;  %v4288_v47 = vmul.f32 1.442695, %v4088_v23  ;;  %v17936_v24 = vadd.f32 %v4091_v61, %v17542_v21  ;;  %v4373_v39 = vmul.f32 %v13939_v45, %v861_v50  ;;  %11145 = vst [vmem:[%s17551_s4 + $0x330] sm:$0xff] %v4436_v62  ;;  %v867_v23 = vld [vmem:[%s16509_s30 + $0x148] sm:$0xff] }
 0x48f   : > { %v4093_v46 = vpop.f32.mrf.mxu1 }
 0x490   : > { %13946 = vpow2.f32 %v4288_v47  ;;  %11164 = vst [vmem:[%s17551_s4 + $0x3c8] sm:$0xff] %v17936_v24  ;;  %v4094_v4 = vadd.f32 %v4093_v46, %v17546_v22  ;;  %v4437_v38 = vadd.f32 %v4373_v39, %v17886_v19 }
 0x491   : > { %v13941_v2 = vpop.eup %13940  ;;  %v4095_v37 = vpop.f32.mrf.mxu1 }
 0x492   : > { %11153 = vst [vmem:[%s17551_s4 + $0x370] sm:$0xff] %v13941_v2  ;;  %v4290_v40 = vmul.f32 1.442695, %v4094_v4  ;;  %v17946_v29 = vadd.f32 %v4095_v37, %v17542_v21  ;;  %v4483_v8 = vpack.c.bf16 %v4437_v38, %v4436_v62  ;;  %11148 = vst [vmem:[%s17551_s4 + $0x348] sm:$0xff] %v4437_v38  ;;  %v4374_v56 = vmul.f32 %v13941_v2, %v862_v28 }
 0x493   : > { %v4097_v41 = vpop.f32.mrf.mxu1 }
 0x494   : > { %13948 = vpow2.f32 %v4290_v40  ;;  %11167 = vst [vmem:[%s17551_s4 + $0x3e0] sm:$0xff] %v17946_v29  ;;  %v4098_v19 = vadd.f32 %v4097_v41, %v17546_v22  ;;  %13083 = vmatmul.mubr.bf16.gmra.mxu0 %v4483_v8  ;;  %v4438_v5 = vadd.f32 %v4374_v56, %v17896_v0 }
 0x495   : > { %v13943_v44 = vpop.eup %13942  ;;  %v4101_v30 = vpop.f32.mrf.mxu1 }
 0x496   : > { %11156 = vst [vmem:[%s17551_s4 + $0x388] sm:$0xff] %v13943_v44  ;;  %v4292_v11 = vmul.f32 1.442695, %v4098_v19  ;;  %v17956_v35 = vadd.f32 %v4101_v30, %v17542_v21  ;;  %v4375_v26 = vmul.f32 %v13943_v44, %v863_v51  ;;  %11151 = vst [vmem:[%s17551_s4 + $0x360] sm:$0xff] %v4438_v5  ;;  %v869_v51 = vld [vmem:[%s16509_s30 + $0x158] sm:$0xff] }
 0x497   : > { %v4103_v14 = vpop.f32.mrf.mxu1 }
 0x498   : > { %13950 = vpow2.f32 %v4292_v11  ;;  %11170 = vst [vmem:[%s17551_s4 + $0x3f8] sm:$0xff] %v17956_v35  ;;  %v4104_v0 = vadd.f32 %v4103_v14, %v17546_v22  ;;  %v4439_v54 = vadd.f32 %v4375_v26, %v17906_v63 }
 0x499   : > { %v13945_v33 = vpop.eup %13944  ;;  %v4105_v10 = vpop.f32.mrf.mxu1 }
 0x49a   : > { %11159 = vst [vmem:[%s17551_s4 + $0x3a0] sm:$0xff] %v13945_v33  ;;  %v4294_v18 = vmul.f32 1.442695, %v4104_v0  ;;  %v17966_v9 = vadd.f32 %v4105_v10, %v17542_v21  ;;  %v4484_v6 = vpack.c.bf16 %v4439_v54, %v4438_v5  ;;  %11154 = vst [vmem:[%s17551_s4 + $0x378] sm:$0xff] %v4439_v54  ;;  %v4376_v48 = vmul.f32 %v13945_v33, %v864_v49  ;;  %v870_v49 = vld [vmem:[%s16509_s30 + $0x160] sm:$0xff] }
 0x49b   : > { %v4107_v3 = vpop.f32.mrf.mxu1 }
 0x49c   : > { %13952 = vpow2.f32 %v4294_v18  ;;  %11173 = vst [vmem:[%s17551_s4 + $0x410] sm:$0xff] %v17966_v9  ;;  %v4108_v63 = vadd.f32 %v4107_v3, %v17546_v22  ;;  %13086 = vmatprep.mubr.bf16.mxu0 %v4484_v6  ;;  %v4440_v17 = vadd.f32 %v4376_v48, %v17916_v36 }
 0x49d   : > { %v13947_v12 = vpop.eup %13946  ;;  %v4111_v7 = vpop.f32.mrf.mxu1 }
 0x49e   : > { %11162 = vst [vmem:[%s17551_s4 + $0x3b8] sm:$0xff] %v13947_v12  ;;  %v4296_v58 = vmul.f32 1.442695, %v4108_v63  ;;  %v17976_v52 = vadd.f32 %v4111_v7, %v17542_v21  ;;  %v4377_v32 = vmul.f32 %v13947_v12, %v865_v34  ;;  %11157 = vst [vmem:[%s17551_s4 + $0x390] sm:$0xff] %v4440_v17  ;;  %v871_v34 = vld [vmem:[%s16509_s30 + $0x168] sm:$0xff] }
 0x49f   : > { %v4113_v60 = vpop.f32.mrf.mxu1 }
 0x4a0   : > { %13954 = vpow2.f32 %v4296_v58  ;;  %11176 = vst [vmem:[%s17551_s4 + $0x428] sm:$0xff] %v17976_v52  ;;  %v4114_v36 = vadd.f32 %v4113_v60, %v17546_v22  ;;  %v4441_v31 = vadd.f32 %v4377_v32, %v17926_v42 }
 0x4a1   : > { %v13949_v43 = vpop.eup %13948  ;;  %v4115_v1 = vpop.f32.mrf.mxu1 }
 0x4a2   : > { %11165 = vst [vmem:[%s17551_s4 + $0x3d0] sm:$0xff] %v13949_v43  ;;  %v4298_v13 = vmul.f32 1.442695, %v4114_v36  ;;  %v17986_v57 = vadd.f32 %v4115_v1, %v17542_v21  ;;  %v4485_v27 = vpack.c.bf16 %v4441_v31, %v4440_v17  ;;  %11160 = vst [vmem:[%s17551_s4 + $0x3a8] sm:$0xff] %v4441_v31  ;;  %v4378_v16 = vmul.f32 %v13949_v43, %v866_v20  ;;  %v872_v20 = vld [vmem:[%s16509_s30 + $0x170] sm:$0xff] }
 0x4a3   : > { %v4117_v50 = vpop.f32.mrf.mxu1 }
 0x4a4   : > { %13956 = vpow2.f32 %v4298_v13  ;;  %11179 = vst [vmem:[%s17551_s4 + $0x440] sm:$0xff] %v17986_v57  ;;  %v4118_v42 = vadd.f32 %v4117_v50, %v17546_v22  ;;  %13087 = vmatmul.mubr.bf16.gmra.mxu0 %v4485_v27  ;;  %v4442_v62 = vadd.f32 %v4378_v16, %v17936_v24 }
 0x4a5   : > { %v13951_v45 = vpop.eup %13950  ;;  %v4121_v61 = vpop.f32.mrf.mxu1 }
 0x4a6   : > { %11168 = vst [vmem:[%s17551_s4 + $0x3e8] sm:$0xff] %v13951_v45  ;;  %v4300_v47 = vmul.f32 1.442695, %v4118_v42  ;;  %v17996_v39 = vadd.f32 %v4121_v61, %v17542_v21  ;;  %v4379_v46 = vmul.f32 %v13951_v45, %v867_v23  ;;  %11163 = vst [vmem:[%s17551_s4 + $0x3c0] sm:$0xff] %v4442_v62  ;;  %v873_v23 = vld [vmem:[%s16509_s30 + $0x178] sm:$0xff] }
 0x4a7   : > { %v4123_v28 = vpop.f32.mrf.mxu1 }
 0x4a8   : > { %13958 = vpow2.f32 %v4300_v47  ;;  %11182 = vst [vmem:[%s17551_s4 + $0x458] sm:$0xff] %v17996_v39  ;;  %v4124_v24 = vadd.f32 %v4123_v28, %v17546_v22  ;;  %v4443_v4 = vadd.f32 %v4379_v46, %v17946_v29 }
 0x4a9   : > { %v13953_v38 = vpop.eup %13952  ;;  %v4125_v2 = vpop.f32.mrf.mxu1 }
 0x4aa   : > { %11171 = vst [vmem:[%s17551_s4 + $0x400] sm:$0xff] %v13953_v38  ;;  %v4302_v37 = vmul.f32 1.442695, %v4124_v24  ;;  %v18006_v40 = vadd.f32 %v4125_v2, %v17542_v21  ;;  %v4486_v8 = vpack.c.bf16 %v4443_v4, %v4442_v62  ;;  %11166 = vst [vmem:[%s17551_s4 + $0x3d8] sm:$0xff] %v4443_v4  ;;  %v4380_v56 = vmul.f32 %v13953_v38, %v868_v15  ;;  %v874_v15 = vld [vmem:[%s16509_s30 + $0x180] sm:$0xff] }
 0x4ab   : > { %v4127_v41 = vpop.f32.mrf.mxu1 }
 0x4ac   : > { %13960 = vpow2.f32 %v4302_v37  ;;  %11185 = vst [vmem:[%s17551_s4 + $0x470] sm:$0xff] %v18006_v40  ;;  %v4128_v29 = vadd.f32 %v4127_v41, %v17546_v22  ;;  %13090 = vmatprep.mubr.bf16.mxu0 %v4486_v8  ;;  %v4444_v19 = vadd.f32 %v4380_v56, %v17956_v35 }
 0x4ad   : > { %v13955_v5 = vpop.eup %13954  ;;  %v4131_v44 = vpop.f32.mrf.mxu1 }
 0x4ae   : > { %11174 = vst [vmem:[%s17551_s4 + $0x418] sm:$0xff] %v13955_v5  ;;  %v4304_v30 = vmul.f32 1.442695, %v4128_v29  ;;  %v18016_v11 = vadd.f32 %v4131_v44, %v17542_v21  ;;  %v4381_v26 = vmul.f32 %v13955_v5, %v869_v51  ;;  %11169 = vst [vmem:[%s17551_s4 + $0x3f0] sm:$0xff] %v4444_v19  ;;  %v875_v51 = vld [vmem:[%s16509_s30 + $0x188] sm:$0xff] }
 0x4af   : > { %v4133_v14 = vpop.f32.mrf.mxu1 }
 0x4b0   : > { %13962 = vpow2.f32 %v4304_v30  ;;  %11188 = vst [vmem:[%s17551_s4 + $0x488] sm:$0xff] %v18016_v11  ;;  %v4134_v35 = vadd.f32 %v4133_v14, %v17546_v22  ;;  %v4445_v0 = vadd.f32 %v4381_v26, %v17966_v9 }
 0x4b1   : > { %v13957_v54 = vpop.eup %13956  ;;  %v4135_v33 = vpop.f32.mrf.mxu1 }
 0x4b2   : > { %11177 = vst [vmem:[%s17551_s4 + $0x430] sm:$0xff] %v13957_v54  ;;  %v4306_v10 = vmul.f32 1.442695, %v4134_v35  ;;  %v18026_v18 = vadd.f32 %v4135_v33, %v17542_v21  ;;  %v4487_v6 = vpack.c.bf16 %v4445_v0, %v4444_v19  ;;  %11172 = vst [vmem:[%s17551_s4 + $0x408] sm:$0xff] %v4445_v0  ;;  %v4382_v48 = vmul.f32 %v13957_v54, %v870_v49  ;;  %v876_v49 = vld [vmem:[%s16509_s30 + $0x190] sm:$0xff] }
 0x4b3   : > { %v4137_v3 = vpop.f32.mrf.mxu1 }
 0x4b4   : > { %13964 = vpow2.f32 %v4306_v10  ;;  %11191 = vst [vmem:[%s17551_s4 + $0x4a0] sm:$0xff] %v18026_v18  ;;  %v4138_v9 = vadd.f32 %v4137_v3, %v17546_v22  ;;  %13091 = vmatmul.mubr.bf16.gmra.mxu0 %v4487_v6  ;;  %v4446_v63 = vadd.f32 %v4382_v48, %v17976_v52 }
 0x4b5   : > { %v13959_v17 = vpop.eup %13958  ;;  %v4141_v12 = vpop.f32.mrf.mxu1 }
 0x4b6   : > { %11180 = vst [vmem:[%s17551_s4 + $0x448] sm:$0xff] %v13959_v17  ;;  %v4308_v7 = vmul.f32 1.442695, %v4138_v9  ;;  %v18036_v58 = vadd.f32 %v4141_v12, %v17542_v21  ;;  %v4383_v32 = vmul.f32 %v13959_v17, %v871_v34  ;;  %11175 = vst [vmem:[%s17551_s4 + $0x420] sm:$0xff] %v4446_v63  ;;  %v877_v34 = vld [vmem:[%s16509_s30 + $0x198] sm:$0xff] }
 0x4b7   : > { %v4143_v60 = vpop.f32.mrf.mxu1 }
 0x4b8   : > { %13966 = vpow2.f32 %v4308_v7  ;;  %11194 = vst [vmem:[%s17551_s4 + $0x4b8] sm:$0xff] %v18036_v58  ;;  %v4144_v52 = vadd.f32 %v4143_v60, %v17546_v22  ;;  %v4447_v36 = vadd.f32 %v4383_v32, %v17986_v57 }
 0x4b9   : > { %v13961_v31 = vpop.eup %13960  ;;  %v4145_v43 = vpop.f32.mrf.mxu1 }
 0x4ba   : > { %11183 = vst [vmem:[%s17551_s4 + $0x460] sm:$0xff] %v13961_v31  ;;  %v4310_v1 = vmul.f32 1.442695, %v4144_v52  ;;  %v18046_v13 = vadd.f32 %v4145_v43, %v17542_v21  ;;  %v4488_v27 = vpack.c.bf16 %v4447_v36, %v4446_v63  ;;  %11178 = vst [vmem:[%s17551_s4 + $0x438] sm:$0xff] %v4447_v36  ;;  %v4384_v16 = vmul.f32 %v13961_v31, %v872_v20  ;;  %v878_v20 = vld [vmem:[%s16509_s30 + $0x1a0] sm:$0xff] }
 0x4bb   : > { %v4147_v50 = vpop.f32.mrf.mxu1 }
 0x4bc   : > { %13968 = vpow2.f32 %v4310_v1  ;;  %11197 = vst [vmem:[%s17551_s4 + $0x4d0] sm:$0xff] %v18046_v13  ;;  %v4148_v57 = vadd.f32 %v4147_v50, %v17546_v22  ;;  %13094 = vmatprep.mubr.bf16.mxu0 %v4488_v27  ;;  %v4448_v42 = vadd.f32 %v4384_v16, %v17996_v39 }
 0x4bd   : > { %v13963_v62 = vpop.eup %13962  ;;  %v4151_v45 = vpop.f32.mrf.mxu1 }
 0x4be   : > { %11186 = vst [vmem:[%s17551_s4 + $0x478] sm:$0xff] %v13963_v62  ;;  %v4312_v61 = vmul.f32 1.442695, %v4148_v57  ;;  %v18056_v47 = vadd.f32 %v4151_v45, %v17542_v21  ;;  %v4385_v46 = vmul.f32 %v13963_v62, %v873_v23  ;;  %11181 = vst [vmem:[%s17551_s4 + $0x450] sm:$0xff] %v4448_v42  ;;  %v879_v23 = vld [vmem:[%s16509_s30 + $0x1a8] sm:$0xff] }
 0x4bf   : > { %v4153_v28 = vpop.f32.mrf.mxu1 }
 0x4c0   : > { %13970 = vpow2.f32 %v4312_v61  ;;  %11200 = vst [vmem:[%s17551_s4 + $0x4e8] sm:$0xff] %v18056_v47  ;;  %v4154_v39 = vadd.f32 %v4153_v28, %v17546_v22  ;;  %v4449_v24 = vadd.f32 %v4385_v46, %v18006_v40 }
 0x4c1   : > { %v13965_v4 = vpop.eup %13964  ;;  %v4155_v38 = vpop.f32.mrf.mxu1 }
 0x4c2   : > { %11189 = vst [vmem:[%s17551_s4 + $0x490] sm:$0xff] %v13965_v4  ;;  %v4314_v2 = vmul.f32 1.442695, %v4154_v39  ;;  %v18066_v37 = vadd.f32 %v4155_v38, %v17542_v21  ;;  %v4489_v8 = vpack.c.bf16 %v4449_v24, %v4448_v42  ;;  %11184 = vst [vmem:[%s17551_s4 + $0x468] sm:$0xff] %v4449_v24  ;;  %v4386_v56 = vmul.f32 %v13965_v4, %v874_v15  ;;  %v880_v24 = vld [vmem:[%s16509_s30 + $0x1b0] sm:$0xff] }
 0x4c3   : > { %v4157_v41 = vpop.f32.mrf.mxu1  ;;  %v18120_v4 = vld [vmem:[#allocation14] ss:$0 sm:$0xff] }
 0x4c4   : > { %13972 = vpow2.f32 %v4314_v2  ;;  %11203 = vst [vmem:[%s17551_s4 + $0x500] sm:$0xff] %v18066_v37  ;;  %v4158_v40 = vadd.f32 %v4157_v41, %v17546_v22  ;;  %13095 = vmatmul.mubr.bf16.gmra.mxu0 %v4489_v8  ;;  %v4450_v29 = vadd.f32 %v4386_v56, %v18016_v11 }
 0x4c5   : > { %v13967_v19 = vpop.eup %13966  ;;  %v4161_v5 = vpop.f32.mrf.mxu1 }
 0x4c6   : > { %11192 = vst [vmem:[%s17551_s4 + $0x4a8] sm:$0xff] %v13967_v19  ;;  %v4316_v44 = vmul.f32 1.442695, %v4158_v40  ;;  %v18076_v30 = vadd.f32 %v4161_v5, %v17542_v21  ;;  %v4387_v26 = vmul.f32 %v13967_v19, %v875_v51  ;;  %11187 = vst [vmem:[%s17551_s4 + $0x480] sm:$0xff] %v4450_v29 }
 0x4c7   : > { %v4163_v14 = vpop.f32.mrf.mxu1 }
 0x4c8   : > { %13974 = vpow2.f32 %v4316_v44  ;;  %11206 = vst [vmem:[%s17551_s4 + $0x518] sm:$0xff] %v18076_v30  ;;  %v4164_v11 = vadd.f32 %v4163_v14, %v17546_v22  ;;  %v4451_v35 = vadd.f32 %v4387_v26, %v18026_v18  ;;  %v881_v14 = vld [vmem:[%s16509_s30 + $0x1b8] sm:$0xff] }
 0x4c9   : > { %v13969_v0 = vpop.eup %13968  ;;  %v4165_v54 = vpop.f32.mrf.mxu1 }
 0x4ca   : > { %11195 = vst [vmem:[%s17551_s4 + $0x4c0] sm:$0xff] %v13969_v0  ;;  %v4318_v33 = vmul.f32 1.442695, %v4164_v11  ;;  %v18086_v10 = vadd.f32 %v4165_v54, %v17542_v21  ;;  %v4490_v6 = vpack.c.bf16 %v4451_v35, %v4450_v29  ;;  %11190 = vst [vmem:[%s17551_s4 + $0x498] sm:$0xff] %v4451_v35  ;;  %v4388_v48 = vmul.f32 %v13969_v0, %v876_v49 }
 0x4cb   : > { %v4167_v3 = vpop.f32.mrf.mxu1 }
 0x4cc   : > { %13976 = vpow2.f32 %v4318_v33  ;;  %11209 = vst [vmem:[%s17551_s4 + $0x530] sm:$0xff] %v18086_v10  ;;  %v4168_v18 = vadd.f32 %v4167_v3, %v17546_v22  ;;  %13098 = vmatprep.mubr.bf16.mxu0 %v4490_v6  ;;  %v4452_v9 = vadd.f32 %v4388_v48, %v18036_v58 }
 0x4cd   : > { %v13971_v63 = vpop.eup %13970  ;;  %v4171_v17 = vpop.f32.mrf.mxu1 }
 0x4ce   : > { %11198 = vst [vmem:[%s17551_s4 + $0x4d8] sm:$0xff] %v13971_v63  ;;  %v4320_v12 = vmul.f32 1.442695, %v4168_v18  ;;  %v18096_v7 = vadd.f32 %v4171_v17, %v17542_v21  ;;  %v4389_v32 = vmul.f32 %v13971_v63, %v877_v34  ;;  %11193 = vst [vmem:[%s17551_s4 + $0x4b0] sm:$0xff] %v4452_v9 }
 0x4cf   : > { %v4173_v60 = vpop.f32.mrf.mxu1 }
 0x4d0   : > { %13978 = vpow2.f32 %v4320_v12  ;;  %11212 = vst [vmem:[%s17551_s4 + $0x548] sm:$0xff] %v18096_v7  ;;  %v4174_v58 = vadd.f32 %v4173_v60, %v17546_v22  ;;  %v4453_v52 = vadd.f32 %v4389_v32, %v18046_v13 }
 0x4d1   : > { %v13973_v36 = vpop.eup %13972  ;;  %v4175_v31 = vpop.f32.mrf.mxu1 }
 0x4d2   : > { %11201 = vst [vmem:[%s17551_s4 + $0x4f0] sm:$0xff] %v13973_v36  ;;  %v4322_v43 = vmul.f32 1.442695, %v4174_v58  ;;  %v18106_v1 = vadd.f32 %v4175_v31, %v17542_v21  ;;  %v4491_v27 = vpack.c.bf16 %v4453_v52, %v4452_v9  ;;  %11196 = vst [vmem:[%s17551_s4 + $0x4c8] sm:$0xff] %v4453_v52  ;;  %v4390_v16 = vmul.f32 %v13973_v36, %v878_v20  ;;  %v882_v9 = vld [vmem:[%s16509_s30 + $0x1c0] sm:$0xff]  ;;  %v883_v31 = vld [vmem:[%s16509_s30 + $0x1c8] sm:$0xff] }
 0x4d3   : > { %v4177_v50 = vpop.f32.mrf.mxu1 }
 0x4d4   : > { %13980 = vpow2.f32 %v4322_v43  ;;  %11215 = vst [vmem:[%s17551_s4 + $0x560] sm:$0xff] %v18106_v1  ;;  %v4178_v13 = vadd.f32 %v4177_v50, %v17546_v22  ;;  %v13052_v57 = vpop.f32.mrf.mxu0  ;;  %13099 = vmatmul.mubr.bf16.gmra.mxu0 %v4491_v27  ;;  %v4454_v42 = vadd.f32 %v4390_v16, %v18056_v47 }
 0x4d5   : > { %v13975_v62 = vpop.eup %13974  ;;  %v4181_v45 = vpop.f32.mrf.mxu1  ;;  %v4612_v12 = vadd.f32 %v13052_v57, %v18120_v4 }
 0x4d6   : > { %11204 = vst [vmem:[%s17551_s4 + $0x508] sm:$0xff] %v13975_v62  ;;  %v4324_v61 = vmul.f32 1.442695, %v4178_v13  ;;  %v18116_v46 = vadd.f32 %v4181_v45, %v17542_v21  ;;  %v4603_v28 = vpop.f32.mrf.mxu0  ;;  %v4391_v15 = vmul.f32 %v13975_v62, %v879_v23  ;;  %11199 = vst [vmem:[%s17551_s4 + $0x4e0] sm:$0xff] %v4454_v42 }
 0x4d7   : > { %v4183_v39 = vpop.f32.mrf.mxu1  ;;  %v4604_v56 = vadd.f32 %v18120_v4, %v4603_v28  ;;  %v4860_v23 = vmax.f32 %v4612_v12, 0.0 }
 0x4d8   : > { %13982 = vpow2.f32 %v4324_v61  ;;  %11218 = vst [vmem:[%s17551_s4 + $0x578] sm:$0xff] %v18116_v46  ;;  %v4184_v47 = vadd.f32 %v4183_v39, %v17546_v22  ;;  %v13053_v38 = vpop.f32.mrf.mxu0  ;;  %v4455_v2 = vadd.f32 %v4391_v15, %v18066_v37  ;;  %v884_v15 = vld [vmem:[%s16509_s30 + $0x1d0] sm:$0xff] }
 0x4d9   : > { %v13977_v8 = vpop.eup %13976  ;;  %v4185_v41 = vpop.f32.mrf.mxu1  ;;  %v4858_v35 = vmax.f32 %v4604_v56, 0.0  ;;  %v4615_v3 = vadd.f32 %v13053_v38, %v18120_v4 }
 0x4da   : > { %11207 = vst [vmem:[%s17551_s4 + $0x520] sm:$0xff] %v13977_v8  ;;  %v4326_v51 = vmul.f32 1.442695, %v4184_v47  ;;  %v18129_v40 = vadd.f32 %v4185_v41, %v17542_v21  ;;  %v4606_v29 = vpop.f32.mrf.mxu0  ;;  %v4492_v19 = vpack.c.bf16 %v4455_v2, %v4454_v42  ;;  %11202 = vst [vmem:[%s17551_s4 + $0x4f8] sm:$0xff] %v4455_v2  ;;  %v4392_v5 = vmul.f32 %v13977_v8, %v880_v24 }
 0x4db   : > { %v4607_v44 = vadd.f32 %v18120_v4, %v4606_v29  ;;  %v4187_v26 = vpop.f32.mrf.mxu1  ;;  %v4861_v36 = vmax.f32 %v4615_v3, 0.0 }
 0x4dc   : > { %13984 = vpow2.f32 %v4326_v51  ;;  %11221 = vst [vmem:[%s17551_s4 + $0x590] sm:$0xff] %v18129_v40  ;;  %v4188_v37 = vadd.f32 %v4187_v26, %v17546_v22  ;;  %13102 = vmatprep.mubr.bf16.mxu0 %v4492_v19  ;;  %v4456_v49 = vadd.f32 %v4392_v5, %v18076_v30  ;;  %v885_v5 = vld [vmem:[%s16509_s30 + $0x1d8] sm:$0xff] }
 0x4dd   : > { %v13979_v11 = vpop.eup %13978  ;;  %v4859_v0 = vmax.f32 %v4607_v44, 0.0  ;;  %v4191_v54 = vpop.f32.mrf.mxu1  ;;  %v18169_v61 = vpack.c.bf16 %v4861_v36, %v4860_v23 }
 0x4de   : > { %11210 = vst [vmem:[%s17551_s4 + $0x538] sm:$0xff] %v13979_v11  ;;  %v4328_v33 = vmul.f32 1.442695, %v4188_v37  ;;  %v18140_v6 = vadd.f32 %v4191_v54, %v17542_v21  ;;  %v4393_v48 = vmul.f32 %v13979_v11, %v881_v14  ;;  %11205 = vst [vmem:[%s17551_s4 + $0x510] sm:$0xff] %v4456_v49  ;;  %v886_v54 = vld [vmem:[%s16509_s30 + $0x1e0] sm:$0xff] }
 0x4df   : > { %v18144_v34 = vpack.c.bf16 %v4859_v0, %v4858_v35  ;;  %v4193_v18 = vpop.f32.mrf.mxu1 }
 0x4e0   : > { %13986 = vpow2.f32 %v4328_v33  ;;  %11224 = vst [vmem:[%s17551_s4 + $0x5a8] sm:$0xff] %v18140_v6  ;;  %v4194_v30 = vadd.f32 %v4193_v18, %v17546_v22  ;;  %v4457_v63 = vadd.f32 %v4393_v48, %v18086_v10 }
 0x4e1   : > { %v13981_v17 = vpop.eup %13980  ;;  %v4195_v32 = vpop.f32.mrf.mxu1  ;;  %5729 = vmatmul.mubr.bf16.vlgmr.msra.gmra.mxu1 %v18144_v34 }
 0x4e2   : > { %11213 = vst [vmem:[%s17551_s4 + $0x550] sm:$0xff] %v13981_v17  ;;  %v4330_v60 = vmul.f32 1.442695, %v4194_v30  ;;  %v18155_v20 = vadd.f32 %v4195_v32, %v17542_v21  ;;  %v4493_v58 = vpack.c.bf16 %v4457_v63, %v4456_v49  ;;  %11208 = vst [vmem:[%s17551_s4 + $0x528] sm:$0xff] %v4457_v63  ;;  %5738 = vmatprep.mubr.bf16.mxu1 %v20379_v55 }
 0x4e3   : > { %v4394_v52 = vmul.f32 %v13981_v17, %v882_v9  ;;  %v4197_v10 = vpop.f32.mrf.mxu1  ;;  %v887_v9 = vld [vmem:[%s16509_s30 + $0x1e8] sm:$0xff] }
 0x4e4   : > { %13988 = vpow2.f32 %v4330_v60  ;;  %11227 = vst [vmem:[%s17551_s4 + $0x5c0] sm:$0xff] %v18155_v20  ;;  %v4198_v43 = vadd.f32 %v4197_v10, %v17546_v22  ;;  %v13056_v27 = vpop.f32.mrf.mxu0  ;;  %13103 = vmatmul.mubr.bf16.gmra.mxu0 %v4493_v58  ;;  %v888_v58 = vld [vmem:[%s16509_s30 + $0x1f0] sm:$0xff] }
 0x4e5   : > { %v4458_v16 = vadd.f32 %v4394_v52, %v18096_v7  ;;  %v13983_v50 = vpop.eup %13982  ;;  %v4201_v13 = vpop.f32.mrf.mxu1  ;;  %v4628_v33 = vadd.f32 %v13056_v27, %v18120_v4 }
 0x4e6   : > { %11216 = vst [vmem:[%s17551_s4 + $0x568] sm:$0xff] %v13983_v50  ;;  %v4332_v57 = vmul.f32 1.442695, %v4198_v43  ;;  %v18166_v42 = vadd.f32 %v4201_v13, %v17542_v21  ;;  %v4619_v62 = vpop.f32.mrf.mxu0  ;;  %v4395_v45 = vmul.f32 %v13983_v50, %v883_v31  ;;  %v889_v50 = vld [vmem:[%s16509_s30 + $0x1f8] sm:$0xff] }
 0x4e7   : > { %11211 = vst [vmem:[%s17551_s4 + $0x540] sm:$0xff] %v4458_v16  ;;  %v4203_v28 = vpop.f32.mrf.mxu1  ;;  %v4620_v38 = vadd.f32 %v18120_v4, %v4619_v62  ;;  %v4864_v17 = vmax.f32 %v4628_v33, 0.0  ;;  %v13845_v33 = vld [vmem:[#allocation16 + $0xf0] ss:$28 sps:$4 sm:$0xff]  }
 0x4e8   : > { %13990 = vpow2.f32 %v4332_v57  ;;  %11230 = vst [vmem:[%s17551_s4 + $0x5d8] sm:$0xff] %v18166_v42  ;;  %v4204_v7 = vadd.f32 %v4203_v28, %v17546_v22  ;;  %v13057_v39 = vpop.f32.mrf.mxu0  ;;  %v4459_v24 = vadd.f32 %v4395_v45, %v18106_v1 }
 0x4e9   : > { %v13985_v47 = vpop.eup %13984  ;;  %v4205_v2 = vpop.f32.mrf.mxu1  ;;  %5739 = vmatmul.mubr.bf16.gmra.mxu1 %v18169_v61  ;;  %v4862_v14 = vmax.f32 %v4620_v38, 0.0  ;;  %v4631_v35 = vadd.f32 %v13057_v39, %v18120_v4 }
 0x4ea   : > { %11219 = vst [vmem:[%s17551_s4 + $0x580] sm:$0xff] %v13985_v47  ;;  %v4334_v8 = vmul.f32 1.442695, %v4204_v7  ;;  %v18180_v56 = vadd.f32 %v4205_v2, %v17542_v21  ;;  %v4622_v41 = vpop.f32.mrf.mxu0  ;;  %v4494_v51 = vpack.c.bf16 %v4459_v24, %v4458_v16  ;;  %11214 = vst [vmem:[%s17551_s4 + $0x558] sm:$0xff] %v4459_v24  ;;  %5748 = vmatprep.mubr.bf16.mxu1 %v20379_v55 }
 0x4eb   : > { %v4396_v1 = vmul.f32 %v13985_v47, %v884_v15  ;;  %v4623_v29 = vadd.f32 %v18120_v4, %v4622_v41  ;;  %v4207_v19 = vpop.f32.mrf.mxu1  ;;  %v4865_v18 = vmax.f32 %v4631_v35, 0.0  ;;  %v13836_v41 = vld [vmem:[#allocation16 + $0x198] ss:$28 sps:$4 sm:$0xff]  }
 0x4ec   : > { %13992 = vpow2.f32 %v4334_v8  ;;  %11233 = vst [vmem:[%s17551_s4 + $0x5f0] sm:$0xff] %v18180_v56  ;;  %v4208_v44 = vadd.f32 %v4207_v19, %v17546_v22  ;;  %13106 = vmatprep.mubr.bf16.mxu0 %v4494_v51  ;;  %v13847_v35 = vld [vmem:[#allocation16 + $0xf4] ss:$28 sps:$4 sm:$0xff]  }
 0x4ed   : > { %v4460_v21 = vadd.f32 %v4396_v1, %v18116_v46  ;;  %v13987_v26 = vpop.eup %13986  ;;  %v4863_v37 = vmax.f32 %v4623_v29, 0.0  ;;  %v18206_v60 = vpack.c.bf16 %v4865_v18, %v4864_v17  ;;  %v13841_v1 = vld [vmem:[#allocation16 + $0x164] ss:$28 sps:$4 sm:$0xff]  }
 0x4ee   : > { %11222 = vst [vmem:[%s17551_s4 + $0x598] sm:$0xff] %v13987_v26  ;;  %v4336_v49 = vmul.f32 1.442695, %v4208_v44  ;;  %v4397_v11 = vmul.f32 %v13987_v26, %v885_v5  ;;  %v13839_v44 = vld [vmem:[#allocation16 + $0x160] ss:$28 sps:$4 sm:$0xff]  }
 0x4ef   : > { %11217 = vst [vmem:[%s17551_s4 + $0x570] sm:$0xff] %v4460_v21  ;;  %v18193_v0 = vpack.c.bf16 %v4863_v37, %v4862_v14  ;;  %v13851_v37 = vld [vmem:[#allocation16 + $0x1a0] ss:$28 sps:$4 sm:$0xff]  }
 0x4f0   : > { %13994 = vpow2.f32 %v4336_v49  ;;  %v4461_v22 = vadd.f32 %v4397_v11, %v18129_v40  ;;  %v13842_v11 = vld [vmem:[#allocation16 + $0x128] ss:$28 sps:$4 sm:$0xff]   ;;  %13114 = vmatprep.subr.bf16.mxu1 %v13851_v37 }
 0x4f1   : > { %v13989_v46 = vpop.eup %13988  ;;  %5749 = vmatmul.mubr.bf16.gmra.mxu1 %v18193_v0 }
 0x4f2   : > { %11225 = vst [vmem:[%s17551_s4 + $0x5b0] sm:$0xff] %v13989_v46  ;;  %v4495_v48 = vpack.c.bf16 %v4461_v22, %v4460_v21  ;;  %11220 = vst [vmem:[%s17551_s4 + $0x588] sm:$0xff] %v4461_v22  ;;  %5758 = vmatprep.mubr.bf16.mxu1 %v20379_v55  ;;  %v4398_v3 = vmul.f32 %v13989_v46, %v886_v54  ;;  %v13844_v21 = vld [vmem:[#allocation16 + $0x12c] ss:$28 sps:$4 sm:$0xff]   ;;  %13115 = vmatpush3.bf16.msra.mxu1 %v13851_v37 }
 0x4f4   : > { %v13060_v30 = vpop.f32.mrf.mxu0  ;;  %13107 = vmatmul.mubr.bf16.gmra.mxu0 %v4495_v48  ;;  %v4462_v40 = vadd.f32 %v4398_v3, %v18140_v6  ;;  %v13850_v3 = vld [vmem:[#allocation16 + $0xbc] ss:$28 sps:$4 sm:$0xff]  }
 0x4f5   : > { %v13991_v63 = vpop.eup %13990  ;;  %v4644_v7 = vadd.f32 %v13060_v30, %v18120_v4 }
 0x4f6   : > { %11228 = vst [vmem:[%s17551_s4 + $0x5c8] sm:$0xff] %v13991_v63  ;;  %v4635_v12 = vpop.f32.mrf.mxu0  ;;  %v4399_v32 = vmul.f32 %v13991_v63, %v887_v9  ;;  %11223 = vst [vmem:[%s17551_s4 + $0x5a0] sm:$0xff] %v4462_v40 }
 0x4f7   : > { %v4636_v31 = vadd.f32 %v18120_v4, %v4635_v12  ;;  %v4868_v47 = vmax.f32 %v4644_v7, 0.0 }
 0x4f8   : > { %v13061_v52 = vpop.f32.mrf.mxu0  ;;  %v4463_v36 = vadd.f32 %v4399_v32, %v18155_v20 }
 0x4f9   : > { %v13993_v10 = vpop.eup %13992  ;;  %5759 = vmatmul.mubr.bf16.gmra.mxu1 %v18206_v60  ;;  %v4866_v13 = vmax.f32 %v4636_v31, 0.0  ;;  %v4647_v45 = vadd.f32 %v13061_v52, %v18120_v4 }
 0x4fa   : > { %11231 = vst [vmem:[%s17551_s4 + $0x5e0] sm:$0xff] %v13993_v10  ;;  %v4638_v6 = vpop.f32.mrf.mxu0  ;;  %v4496_v43 = vpack.c.bf16 %v4463_v36, %v4462_v40  ;;  %11226 = vst [vmem:[%s17551_s4 + $0x5b8] sm:$0xff] %v4463_v36  ;;  %5768 = vmatprep.mubr.bf16.mxu1 %v20379_v55  ;;  %v4400_v27 = vmul.f32 %v13993_v10, %v888_v58  ;;  %v13848_v40 = vld [vmem:[#allocation16 + $0xb8] ss:$28 sps:$4 sm:$0xff]  }
 0x4fb   : > { %v4639_v16 = vadd.f32 %v18120_v4, %v4638_v6 }
 0x4fc   : > { %13110 = vmatprep.mubr.bf16.mxu0 %v4496_v43  ;;  %v4464_v20 = vadd.f32 %v4400_v27, %v18166_v42  ;;  %v4869_v42 = vmax.f32 %v4647_v45, 0.0 }
 0x4fd   : > { %v13995_v23 = vpop.eup %13994  ;;  %v4867_v57 = vmax.f32 %v4639_v16, 0.0 }
 0x4fe   : > { %11234 = vst [vmem:[%s17551_s4 + $0x5f8] sm:$0xff] %v13995_v23  ;;  %v4401_v62 = vmul.f32 %v13995_v23, %v889_v50  ;;  %11229 = vst [vmem:[%s17551_s4 + $0x5d0] sm:$0xff] %v4464_v20  ;;  %v18229_v2 = vpack.c.bf16 %v4869_v42, %v4868_v47 }
 0x4ff   : > { %v18221_v28 = vpack.c.bf16 %v4867_v57, %v4866_v13 }
 0x500   : > { %v4465_v15 = vadd.f32 %v4401_v62, %v18180_v56  ;;  %20435 = vst [vmem:[#allocation37_spill] sm:$0xff] %v18229_v2 }
 0x501   : > { %20434 = vst [vmem:[#allocation45_spill] sm:$0xff] %v18221_v28  ;;  %5769 = vmatmul.mubr.bf16.gmra.mxu1 %v18221_v28 }
 0x502   : > { %v4497_v39 = vpack.c.bf16 %v4465_v15, %v4464_v20  ;;  %11232 = vst [vmem:[%s17551_s4 + $0x5e8] sm:$0xff] %v4465_v15  ;;  %5778 = vmatprep.mubr.bf16.mxu1 %v20379_v55 }
 0x504   : > { %v13064_v24 = vpop.f32.mrf.mxu0  ;;  %13111 = vmatmul.mubr.bf16.gmra.mxu0 %v4497_v39 }
 0x505   : > { %5375 = vmatprep.mubr.bf16.mxu0 %v20379_v55  ;;  %v4660_v49 = vadd.f32 %v13064_v24, %v18120_v4 }
 0x506   : > { %v4651_v38 = vpop.f32.mrf.mxu0 }
 0x507   : > { %v4652_v56 = vadd.f32 %v18120_v4, %v4651_v38  ;;  %v4872_v46 = vmax.f32 %v4660_v49, 0.0 }
 0x508   : > { %v13065_v8 = vpop.f32.mrf.mxu0 }
 0x509   : > { %5779 = vmatmul.mubr.bf16.gmra.mxu1 %v18229_v2  ;;  %v4870_v19 = vmax.f32 %v4652_v56, 0.0  ;;  %v4663_v26 = vadd.f32 %v13065_v8, %v18120_v4 }
 0x50a   : > { %v4654_v51 = vpop.f32.mrf.mxu0  ;;  %5788 = vmatprep.mubr.bf16.mxu1 %v20379_v55 }
 0x50b   : > { %v4655_v29 = vadd.f32 %v18120_v4, %v4654_v51  ;;  %v4873_v54 = vmax.f32 %v4663_v26, 0.0 }
 0x50c   : > { %5376 = vmatmul.mubr.bf16.vlgmr.msra.gmra.mxu0 %v18144_v34 }
 0x50d   : > { %v4871_v5 = vmax.f32 %v4655_v29, 0.0  ;;  %6050 = vmatpush1.bf16.msra.mxu0 %v13836_v41  ;;  %5385 = vmatprep.mubr.bf16.mxu0 %v20379_v55  ;;  %v18245_v18 = vpack.c.bf16 %v4873_v54, %v4872_v46  ;;  %v13856_v54 = vld [vmem:[#allocation16 + $0x130] ss:$28 sps:$4 sm:$0xff]  }
 0x50e   : > { %6051 = vmatprep.subr.bf16.mxu0 %v13841_v1 }
 0x50f   : > { %v18238_v14 = vpack.c.bf16 %v4871_v5, %v4870_v19  ;;  %20437 = vst [vmem:[#allocation38_spill] sm:$0xff] %v18245_v18 }
 0x511   : > { %20436 = vst [vmem:[#allocation46_spill] sm:$0xff] %v18238_v14  ;;  %5789 = vmatmul.mubr.bf16.gmra.mxu1 %v18238_v14  ;;  %6052 = vmatpush1.bf16.msra.mxu0 %v13839_v44 }
 0x512   : > { %5798 = vmatprep.mubr.bf16.mxu1 %v20379_v55  ;;  %6053 = vmatprep.subr.bf16.mxu0 %v13844_v21  ;;  %v13855_v21 = vld [vmem:[#allocation16 + $0x168] ss:$28 sps:$4 sm:$0xff]  }
 0x513   : > { %13116 = vmatprep.subr.bf16.mxu1 %v13855_v21 }
 0x514   : > { %v13068_v22 = vpop.f32.mrf.mxu0  ;;  %5386 = vmatmul.mubr.bf16.gmra.mxu0 %v18169_v61  ;;  %13117 = vmatpush3.bf16.msra.mxu1 %v13855_v21  ;;  %v13864_v21 = vld [vmem:[#allocation16 + $0x18] ss:$28 sps:$4 sm:$0xff]  }
 0x515   : > { %5395 = vmatprep.mubr.bf16.mxu0 %v20379_v55  ;;  %6054 = vmatpush1.bf16.msra.mxu0 %v13842_v11  ;;  %v4676_v36 = vadd.f32 %v13068_v22, %v18120_v4 }
 0x516   : > { %v4667_v48 = vpop.f32.mrf.mxu0  ;;  %6055 = vmatprep.subr.bf16.mxu0 %v13847_v35  ;;  %13118 = vmatprep.subr.bf16.mxu1 %v13856_v54 }
 0x517   : > { %v4668_v30 = vadd.f32 %v18120_v4, %v4667_v48  ;;  %v4876_v6 = vmax.f32 %v4676_v36, 0.0 }
 0x518   : > { %v13069_v9 = vpop.f32.mrf.mxu0  ;;  %13119 = vmatpush3.bf16.msra.mxu1 %v13856_v54 }
 0x519   : > { %5799 = vmatmul.mubr.bf16.gmra.mxu1 %v18245_v18  ;;  %6056 = vmatpush1.bf16.msra.mxu0 %v13845_v33  ;;  %v4874_v12 = vmax.f32 %v4668_v30, 0.0  ;;  %v4679_v58 = vadd.f32 %v13069_v9, %v18120_v4  ;;  %v13860_v9 = vld [vmem:[#allocation16 + $0xf8] ss:$28 sps:$4 sm:$0xff]  }
 0x51a   : > { %v4670_v63 = vpop.f32.mrf.mxu0  ;;  %5808 = vmatprep.mubr.bf16.mxu1 %v20379_v55  ;;  %6057 = vmatprep.subr.bf16.mxu0 %v13850_v3 }
 0x51b   : > { %v4671_v17 = vadd.f32 %v18120_v4, %v4670_v63  ;;  %v4877_v10 = vmax.f32 %v4679_v58, 0.0  ;;  %13120 = vmatprep.subr.bf16.mxu1 %v13860_v9  ;;  %v13852_v63 = vld [vmem:[#allocation16 + $0x80] ss:$28 sps:$4 sm:$0xff]  }
 0x51c   : > { %5396 = vmatmul.mubr.bf16.gmra.mxu0 %v18193_v0  ;;  %13121 = vmatpush3.bf16.msra.mxu1 %v13860_v9 }
 0x51d   : > { %v4875_v32 = vmax.f32 %v4671_v17, 0.0  ;;  %5405 = vmatprep.mubr.bf16.mxu0 %v20379_v55  ;;  %6058 = vmatpush1.bf16.msra.mxu0 %v13848_v40  ;;  %v18261_v27 = vpack.c.bf16 %v4877_v10, %v4876_v6  ;;  %v13854_v17 = vld [vmem:[#allocation16 + $0x84] ss:$28 sps:$4 sm:$0xff]  }
 0x51e   : > { %6059 = vmatprep.subr.bf16.mxu0 %v13854_v17 }
 0x51f   : > { %v18254_v52 = vpack.c.bf16 %v4875_v32, %v4874_v12  ;;  %20439 = vst [vmem:[#allocation47_spill] sm:$0xff] %v18261_v27 }
 0x521   : > { %20438 = vst [vmem:[#allocation39_spill] sm:$0xff] %v18254_v52  ;;  %5809 = vmatmul.mubr.bf16.gmra.mxu1 %v18254_v52  ;;  %6060 = vmatpush1.bf16.msra.mxu0 %v13852_v63 }
 0x522   : > { %5818 = vmatprep.mubr.bf16.mxu1 %v20379_v55 }
 0x524   : > { %v13072_v31 = vpop.f32.mrf.mxu0  ;;  %5406 = vmatmul.mubr.bf16.gmra.mxu0 %v18206_v60 }
 0x525   : > { %5415 = vmatprep.mubr.bf16.mxu0 %v20379_v55  ;;  %v4692_v15 = vadd.f32 %v13072_v31, %v18120_v4  ;;  %v13861_v31 = vld [vmem:[#allocation16 + $0xc0] ss:$28 sps:$4 sm:$0xff]  }
 0x526   : > { %v4683_v43 = vpop.f32.mrf.mxu0  ;;  %13122 = vmatprep.subr.bf16.mxu1 %v13861_v31 }
 0x527   : > { %v4684_v50 = vadd.f32 %v18120_v4, %v4683_v43  ;;  %v4880_v42 = vmax.f32 %v4692_v15, 0.0  ;;  %13123 = vmatpush3.bf16.msra.mxu1 %v13861_v31 }
 0x528   : > { %v13073_v16 = vpop.f32.mrf.mxu0 }
 0x529   : > { %5819 = vmatmul.mubr.bf16.gmra.mxu1 %v18261_v27  ;;  %v4878_v13 = vmax.f32 %v4684_v50, 0.0  ;;  %v4695_v62 = vadd.f32 %v13073_v16, %v18120_v4 }
 0x52a   : > { %v4686_v20 = vpop.f32.mrf.mxu0  ;;  %5828 = vmatprep.mubr.bf16.mxu1 %v20379_v55 }
 0x52b   : > { %v4687_v23 = vadd.f32 %v18120_v4, %v4686_v20  ;;  %v4881_v7 = vmax.f32 %v4695_v62, 0.0 }
 0x52c   : > { %5416 = vmatmul.mubr.bf16.gmra.mxu0 %v18221_v28 }
 0x52d   : > { %v4879_v57 = vmax.f32 %v4687_v23, 0.0  ;;  %5425 = vmatprep.mubr.bf16.mxu0 %v20379_v55  ;;  %v18277_v47 = vpack.c.bf16 %v4881_v7, %v4880_v42 }
 0x52f   : > { %v18270_v45 = vpack.c.bf16 %v4879_v57, %v4878_v13  ;;  %20441 = vst [vmem:[#allocation43_spill] sm:$0xff] %v18277_v47  ;;  %v13862_v57 = vld [vmem:[#allocation16 + $0x88] ss:$28 sps:$4 sm:$0xff]  }
 0x530   : > { %13124 = vmatprep.subr.bf16.mxu1 %v13862_v57 }
 0x531   : > { %20440 = vst [vmem:[#allocation48_spill] sm:$0xff] %v18270_v45  ;;  %5829 = vmatmul.mubr.bf16.gmra.mxu1 %v18270_v45 }
 0x532   : > { %5838 = vmatprep.mubr.bf16.mxu1 %v20379_v55  ;;  %13125 = vmatpush3.bf16.msra.mxu1 %v13862_v57 }
 0x534   : > { %v13076_v39 = vpop.f32.mrf.mxu0  ;;  %5426 = vmatmul.mubr.bf16.gmra.mxu0 %v18229_v2 }
 0x535   : > { %5435 = vmatprep.mubr.bf16.mxu0 %v20379_v55  ;;  %v4708_v5 = vadd.f32 %v13076_v39, %v18120_v4 }
 0x536   : > { %v4699_v24 = vpop.f32.mrf.mxu0 }
 0x537   : > { %v4700_v8 = vadd.f32 %v18120_v4, %v4699_v24  ;;  %v4884_v37 = vmax.f32 %v4708_v5, 0.0 }
 0x538   : > { %v13077_v38 = vpop.f32.mrf.mxu0 }
 0x539   : > { %5839 = vmatmul.mubr.bf16.gmra.mxu1 %v18277_v47  ;;  %v4882_v51 = vmax.f32 %v4700_v8, 0.0  ;;  %v4711_v29 = vadd.f32 %v13077_v38, %v18120_v4  ;;  %v13863_v38 = vld [vmem:[#allocation16 + $0x50] ss:$28 sps:$4 sm:$0xff]  }
 0x53a   : > { %v4702_v56 = vpop.f32.mrf.mxu0  ;;  %5848 = vmatprep.mubr.bf16.mxu1 %v20379_v55  ;;  %13126 = vmatprep.subr.bf16.mxu1 %v13863_v38 }
 0x53b   : > { %v4703_v41 = vadd.f32 %v18120_v4, %v4702_v56  ;;  %v4885_v44 = vmax.f32 %v4711_v29, 0.0  ;;  %13127 = vmatpush3.bf16.msra.mxu1 %v13863_v38 }
 0x53c   : > { %5436 = vmatmul.mubr.bf16.gmra.mxu0 %v18238_v14  ;;  %13128 = vmatprep.subr.bf16.mxu1 %v13864_v21 }
 0x53d   : > { %v4883_v1 = vmax.f32 %v4703_v41, 0.0  ;;  %5445 = vmatprep.mubr.bf16.mxu0 %v20379_v55  ;;  %v18293_v11 = vpack.c.bf16 %v4885_v44, %v4884_v37 }
 0x53f   : > { %v18286_v19 = vpack.c.bf16 %v4883_v1, %v4882_v51  ;;  %20443 = vst [vmem:[#allocation50_spill] sm:$0xff] %v18293_v11  ;;  %13129 = vmatpush3.bf16.msra.mxu1 %v13864_v21  ;;  %v5030_v21 = vsub.s32 2, %v17533_v25 }
 0x541   : > { %20442 = vst [vmem:[#allocation49_spill] sm:$0xff] %v18286_v19  ;;  %5849 = vmatmul.mubr.bf16.gmra.mxu1 %v18286_v19 }
 0x542   : > { %5858 = vmatprep.mubr.bf16.mxu1 %v20379_v55 }
 0x544   : > { %v13080_v26 = vpop.f32.mrf.mxu0  ;;  %5446 = vmatmul.mubr.bf16.gmra.mxu0 %v18245_v18 }
 0x545   : > { %5455 = vmatprep.mubr.bf16.mxu0 %v20379_v55  ;;  %v4724_v12 = vadd.f32 %v13080_v26, %v18120_v4 }
 0x546   : > { %v4715_v49 = vpop.f32.mrf.mxu0 }
 0x547   : > { %v4716_v22 = vadd.f32 %v18120_v4, %v4715_v49  ;;  %v4888_v36 = vmax.f32 %v4724_v12, 0.0  ;;  %v13857_v49 = vld [vmem:[#allocation16 + $0x48] ss:$28 sps:$4 sm:$0xff]  }
 0x548   : > { %v13081_v35 = vpop.f32.mrf.mxu0 }
 0x549   : > { %5859 = vmatmul.mubr.bf16.gmra.mxu1 %v18293_v11  ;;  %v4886_v48 = vmax.f32 %v4716_v22, 0.0  ;;  %v4727_v30 = vadd.f32 %v13081_v35, %v18120_v4  ;;  %v13859_v35 = vld [vmem:[#allocation16 + $0x4c] ss:$28 sps:$4 sm:$0xff]  }
 0x54a   : > { %v4718_v46 = vpop.f32.mrf.mxu0  ;;  %5868 = vmatprep.mubr.bf16.mxu1 %v20379_v55  ;;  %6061 = vmatprep.subr.bf16.mxu0 %v13859_v35  ;;  %v18380_v35 = vld [vmem:[#allocation17] sm:$0xff] }
 0x54b   : > { %v4719_v33 = vadd.f32 %v18120_v4, %v4718_v46  ;;  %v4889_v32 = vmax.f32 %v4727_v30, 0.0  ;;  %6062 = vmatpush1.bf16.msra.mxu0 %v13857_v49 }
 0x54c   : > { %5456 = vmatmul.mubr.bf16.gmra.mxu0 %v18254_v52 }
 0x54d   : > { %v4887_v3 = vmax.f32 %v4719_v33, 0.0  ;;  %5465 = vmatprep.mubr.bf16.mxu0 %v20379_v55  ;;  %v18309_v6 = vpack.c.bf16 %v4889_v32, %v4888_v36 }
 0x54f   : > { %v18302_v40 = vpack.c.bf16 %v4887_v3, %v4886_v48  ;;  %20445 = vst [vmem:[#allocation52_spill] sm:$0xff] %v18309_v6 }
 0x551   : > { %20444 = vst [vmem:[#allocation51_spill] sm:$0xff] %v18302_v40  ;;  %5869 = vmatmul.mubr.bf16.gmra.mxu1 %v18302_v40 }
 0x552   : > { %5878 = vmatprep.mubr.bf16.mxu1 %v20379_v55 }
 0x554   : > { %v13084_v58 = vpop.f32.mrf.mxu0  ;;  %5466 = vmatmul.mubr.bf16.gmra.mxu0 %v18261_v27 }
 0x555   : > { %5475 = vmatprep.mubr.bf16.mxu0 %v20379_v55  ;;  %v4740_v7 = vadd.f32 %v13084_v58, %v18120_v4 }
 0x556   : > { %v4731_v10 = vpop.f32.mrf.mxu0 }
 0x557   : > { %v4732_v16 = vadd.f32 %v18120_v4, %v4731_v10  ;;  %v4892_v24 = vmax.f32 %v4740_v7, 0.0 }
 0x558   : > { %v13085_v43 = vpop.f32.mrf.mxu0 }
 0x559   : > { %5879 = vmatmul.mubr.bf16.gmra.mxu1 %v18309_v6  ;;  %v4890_v23 = vmax.f32 %v4732_v16, 0.0  ;;  %v4743_v62 = vadd.f32 %v13085_v43, %v18120_v4 }
 0x55a   : > { %v4734_v50 = vpop.f32.mrf.mxu0  ;;  %5888 = vmatprep.mubr.bf16.mxu1 %v20379_v55 }
 0x55b   : > { %v4735_v20 = vadd.f32 %v18120_v4, %v4734_v50  ;;  %v4893_v39 = vmax.f32 %v4743_v62, 0.0 }
 0x55c   : > { %5476 = vmatmul.mubr.bf16.gmra.mxu0 %v18270_v45 }
 0x55d   : > { %v4891_v13 = vmax.f32 %v4735_v20, 0.0  ;;  %5485 = vmatprep.mubr.bf16.mxu0 %v20379_v55  ;;  %v18325_v56 = vpack.c.bf16 %v4893_v39, %v4892_v24 }
 0x55f   : > { %v18318_v15 = vpack.c.bf16 %v4891_v13, %v4890_v23  ;;  %20447 = vst [vmem:[#allocation54_spill] sm:$0xff] %v18325_v56 }
 0x561   : > { %20446 = vst [vmem:[#allocation53_spill] sm:$0xff] %v18318_v15  ;;  %5889 = vmatmul.mubr.bf16.gmra.mxu1 %v18318_v15 }
 0x562   : > { %5898 = vmatprep.mubr.bf16.mxu1 %v20379_v55 }
 0x564   : > { %v13088_v42 = vpop.f32.mrf.mxu0  ;;  %5486 = vmatmul.mubr.bf16.gmra.mxu0 %v18277_v47 }
 0x565   : > { %5495 = vmatprep.mubr.bf16.mxu0 %v20379_v55  ;;  %v4756_v54 = vadd.f32 %v13088_v42, %v18120_v4 }
 0x566   : > { %v4747_v8 = vpop.f32.mrf.mxu0 }
 0x567   : > { %v4748_v51 = vadd.f32 %v18120_v4, %v4747_v8  ;;  %v4896_v33 = vmax.f32 %v4756_v54, 0.0  ;;  %v5034_v54 = vsub.s32 3, %v17533_v25 }
 0x568   : > { %v13089_v41 = vpop.f32.mrf.mxu0 }
 0x569   : > { %5899 = vmatmul.mubr.bf16.gmra.mxu1 %v18325_v56  ;;  %v4894_v5 = vmax.f32 %v4748_v51, 0.0  ;;  %v4759_v26 = vadd.f32 %v13089_v41, %v18120_v4 }
 0x56a   : > { %v4750_v1 = vpop.f32.mrf.mxu0  ;;  %5908 = vmatprep.mubr.bf16.mxu1 %v20379_v55 }
 0x56b   : > { %v4751_v29 = vadd.f32 %v18120_v4, %v4750_v1  ;;  %v4897_v22 = vmax.f32 %v4759_v26, 0.0 }
 0x56c   : > { %5496 = vmatmul.mubr.bf16.gmra.mxu0 %v18286_v19 }
 0x56d   : > { %v4895_v44 = vmax.f32 %v4751_v29, 0.0  ;;  %5505 = vmatprep.mubr.bf16.mxu0 %v20379_v55  ;;  %v18341_v3 = vpack.c.bf16 %v4897_v22, %v4896_v33  ;;  %v18386_v33 = vrot.slane %v18380_v35, %v5030_v21 }
 0x56f   : > { %v18334_v37 = vpack.c.bf16 %v4895_v44, %v4894_v5  ;;  %20449 = vst [vmem:[#allocation31_spill] sm:$0xff] %v18341_v3 }
 0x571   : > { %20448 = vst [vmem:[#allocation55_spill] sm:$0xff] %v18334_v37  ;;  %5909 = vmatmul.mubr.bf16.gmra.mxu1 %v18334_v37 }
 0x572   : > { %5918 = vmatprep.mubr.bf16.mxu1 %v20379_v55 }
 0x574   : > { %v13092_v46 = vpop.f32.mrf.mxu0  ;;  %5506 = vmatmul.mubr.bf16.gmra.mxu0 %v18293_v11 }
 0x575   : > { %5515 = vmatprep.mubr.bf16.mxu0 %v20379_v55  ;;  %v4772_v10 = vadd.f32 %v13092_v46, %v18120_v4 }
 0x576   : > { %v4763_v48 = vpop.f32.mrf.mxu0 }
 0x577   : > { %v4764_v30 = vadd.f32 %v18120_v4, %v4763_v48  ;;  %v4900_v16 = vmax.f32 %v4772_v10, 0.0 }
 0x578   : > { %v13093_v9 = vpop.f32.mrf.mxu0 }
 0x579   : > { %5919 = vmatmul.mubr.bf16.gmra.mxu1 %v18341_v3  ;;  %v4898_v12 = vmax.f32 %v4764_v30, 0.0  ;;  %v4775_v58 = vadd.f32 %v13093_v9, %v18120_v4  ;;  %v18392_v30 = vrot.slane %v18380_v35, %v5034_v54 }
 0x57a   : > { %v4766_v63 = vpop.f32.mrf.mxu0  ;;  %5928 = vmatprep.mubr.bf16.mxu1 %v20379_v55 }
 0x57b   : > { %v4767_v17 = vadd.f32 %v18120_v4, %v4766_v63  ;;  %v4901_v31 = vmax.f32 %v4775_v58, 0.0 }
 0x57c   : > { %5516 = vmatmul.mubr.bf16.gmra.mxu0 %v18302_v40 }
 0x57d   : > { %v4899_v32 = vmax.f32 %v4767_v17, 0.0  ;;  %5525 = vmatprep.mubr.bf16.mxu0 %v20379_v55  ;;  %v18357_v20 = vpack.c.bf16 %v4901_v31, %v4900_v16 }
 0x57f   : > { %v18350_v36 = vpack.c.bf16 %v4899_v32, %v4898_v12  ;;  %20451 = vst [vmem:[#allocation32_spill] sm:$0xff] %v18357_v20 }
 0x581   : > { %20450 = vst [vmem:[#allocation40_spill] sm:$0xff] %v18350_v36  ;;  %5929 = vmatmul.mubr.bf16.gmra.mxu1 %v18350_v36 }
 0x582   : > { %5938 = vmatprep.mubr.bf16.mxu1 %v20379_v55 }
 0x584   : > { %v13096_v43 = vpop.f32.mrf.mxu0  ;;  %5526 = vmatmul.mubr.bf16.gmra.mxu0 %v18309_v6 }
 0x585   : > { %5535 = vmatprep.mubr.bf16.mxu0 %v20379_v55  ;;  %v4788_v38 = vadd.f32 %v13096_v43, %v18120_v4 }
 0x586   : > { %v4779_v50 = vpop.f32.mrf.mxu0 }
 0x587   : > { %v4780_v13 = vadd.f32 %v18120_v4, %v4779_v50  ;;  %v4904_v51 = vmax.f32 %v4788_v38, 0.0 }
 0x588   : > { %v13097_v23 = vpop.f32.mrf.mxu0 }
 0x589   : > { %5939 = vmatmul.mubr.bf16.gmra.mxu1 %v18357_v20  ;;  %v4902_v7 = vmax.f32 %v4780_v13, 0.0  ;;  %v4791_v42 = vadd.f32 %v13097_v23, %v18120_v4 }
 0x58a   : > { %v4782_v57 = vpop.f32.mrf.mxu0  ;;  %5948 = vmatprep.mubr.bf16.mxu1 %v20379_v55 }
 0x58b   : > { %v4783_v62 = vadd.f32 %v18120_v4, %v4782_v57  ;;  %v4905_v8 = vmax.f32 %v4791_v42, 0.0 }
 0x58c   : > { %5536 = vmatmul.mubr.bf16.gmra.mxu0 %v18318_v15 }
 0x58d   : > { %v4903_v39 = vmax.f32 %v4783_v62, 0.0  ;;  %5545 = vmatprep.mubr.bf16.mxu0 %v20379_v55  ;;  %v18373_v29 = vpack.c.bf16 %v4905_v8, %v4904_v51 }
 0x58f   : > { %v18366_v24 = vpack.c.bf16 %v4903_v39, %v4902_v7  ;;  %20453 = vst [vmem:[#allocation33_spill] sm:$0xff] %v18373_v29  ;;  %v13867_v39 = vld [vmem:[#allocation16 + $0x14] ss:$28 sps:$4 sm:$0xff]  }
 0x590   : > { %6063 = vmatprep.subr.bf16.mxu0 %v13867_v39 }
 0x591   : > { %20452 = vst [vmem:[#allocation41_spill] sm:$0xff] %v18366_v24  ;;  %5949 = vmatmul.mubr.bf16.gmra.mxu1 %v18366_v24 }
 0x592   : > { %5958 = vmatprep.mubr.bf16.mxu1 %v20379_v55 }
 0x594   : > { %v13100_v41 = vpop.f32.mrf.mxu0  ;;  %5546 = vmatmul.mubr.bf16.gmra.mxu0 %v18325_v56 }
 0x595   : > { %5555 = vmatprep.mubr.bf16.mxu0 %v20379_v55  ;;  %v4804_v63 = vadd.f32 %v13100_v41, %v18120_v4  ;;  %v13865_v41 = vld [vmem:[#allocation16 + $0x10] ss:$28 sps:$4 sm:$0xff]  }
 0x596   : > { %v4795_v1 = vpop.f32.mrf.mxu0  ;;  %6064 = vmatpush1.bf16.msra.mxu0 %v13865_v41 }
 0x597   : > { %v4796_v44 = vadd.f32 %v18120_v4, %v4795_v1  ;;  %v4908_v16 = vmax.f32 %v4804_v63, 0.0 }
 0x598   : > { %v13101_v5 = vpop.f32.mrf.mxu0 }
 0x599   : > { %5959 = vmatmul.mubr.bf16.gmra.mxu1 %v18373_v29  ;;  %v4906_v22 = vmax.f32 %v4796_v44, 0.0  ;;  %v4807_v48 = vadd.f32 %v13101_v5, %v18120_v4 }
 0x59a   : > { %v4798_v26 = vpop.f32.mrf.mxu0  ;;  %5968 = vmatprep.mubr.bf16.mxu1 %v20379_v55 }
 0x59b   : > { %v4799_v49 = vadd.f32 %v18120_v4, %v4798_v26  ;;  %v4909_v32 = vmax.f32 %v4807_v48, 0.0 }
 0x59c   : > { %5556 = vmatmul.mubr.bf16.gmra.mxu0 %v18334_v37 }
 0x59d   : > { %v4907_v46 = vmax.f32 %v4799_v49, 0.0  ;;  %5565 = vmatprep.mubr.bf16.mxu0 %v20379_v55  ;;  %v18402_v62 = vpack.c.bf16 %v4909_v32, %v4908_v16 }
 0x59f   : > { %v18389_v9 = vpack.c.bf16 %v4907_v46, %v4906_v22  ;;  %20455 = vst [vmem:[#allocation34_spill] sm:$0xff] %v18402_v62 }
 0x5a1   : > { %20454 = vst [vmem:[#allocation42_spill] sm:$0xff] %v18389_v9  ;;  %v5730_v17 = vpop.f32.mrf.mxu1  ;;  %5969 = vmatmul.mubr.bf16.gmra.mxu1 %v18389_v9 }
 0x5a2   : > { %v5731_v12 = vadd.f32 %v5730_v17, %v18386_v33  ;;  %5978 = vmatprep.mubr.bf16.mxu1 %v20379_v55 }
 0x5a3   : > { %v5732_v58 = vpop.f32.mrf.mxu1 }
 0x5a4   : > { %v11867_v10 = vmul.f32 -1.442695, %v5731_v12  ;;  %v5733_v31 = vadd.f32 %v5732_v58, %v18392_v30  ;;  %v13104_v43 = vpop.f32.mrf.mxu0  ;;  %5566 = vmatmul.mubr.bf16.gmra.mxu0 %v18341_v3 }
 0x5a5   : > { %v5734_v50 = vpop.f32.mrf.mxu1  ;;  %5575 = vmatprep.mubr.bf16.mxu0 %v20379_v55 }
 0x5a6   : > { %13996 = vpow2.f32 %v11867_v10  ;;  %v11868_v23 = vmul.f32 -1.442695, %v5733_v31  ;;  %v5735_v13 = vadd.f32 %v5734_v50, %v18386_v33  ;;  %v4811_v57 = vpop.f32.mrf.mxu0  ;;  %v4820_v50 = vadd.f32 %v13104_v43, %v18120_v4 }
 0x5a7   : > { %v5736_v7 = vpop.f32.mrf.mxu1  ;;  %v4812_v51 = vadd.f32 %v18120_v4, %v4811_v57 }
 0x5a8   : > { %13998 = vpow2.f32 %v11868_v23  ;;  %v11874_v42 = vmul.f32 -1.442695, %v5735_v13  ;;  %v5737_v38 = vadd.f32 %v5736_v7, %v18392_v30  ;;  %v13105_v8 = vpop.f32.mrf.mxu0  ;;  %v4912_v43 = vmax.f32 %v4820_v50, 0.0 }
 0x5a9   : > { %v5740_v1 = vpop.f32.mrf.mxu1  ;;  %5979 = vmatmul.mubr.bf16.gmra.mxu1 %v18402_v62  ;;  %v4910_v46 = vmax.f32 %v4812_v51, 0.0  ;;  %v4823_v32 = vadd.f32 %v13105_v8, %v18120_v4 }
 0x5aa   : > { %14000 = vpow2.f32 %v11874_v42  ;;  %v11875_v5 = vmul.f32 -1.442695, %v5737_v38  ;;  %v5741_v44 = vadd.f32 %v5740_v1, %v18386_v33  ;;  %v4814_v21 = vpop.f32.mrf.mxu0  ;;  %5988 = vmatprep.mubr.bf16.mxu1 %v20379_v55 }
 0x5ab   : > { %v4815_v26 = vadd.f32 %v18120_v4, %v4814_v21  ;;  %v5742_v49 = vpop.f32.mrf.mxu1  ;;  %v4913_v39 = vmax.f32 %v4823_v32, 0.0  ;;  %v18429_v32 = vld [vmem:[#allocation14] ss:$0 sm:$0xff] }
 0x5ac   : > { %14002 = vpow2.f32 %v11875_v5  ;;  %v11881_v54 = vmul.f32 -1.442695, %v5741_v44  ;;  %v5743_v22 = vadd.f32 %v5742_v49, %v18392_v30  ;;  %5576 = vmatmul.mubr.bf16.gmra.mxu0 %v18350_v36 }
 0x5ad   : > { %v4911_v48 = vmax.f32 %v4815_v26, 0.0  ;;  %v5744_v63 = vpop.f32.mrf.mxu1  ;;  %5585 = vmatprep.mubr.bf16.mxu0 %v20379_v55 }
 0x5ae   : > { %14004 = vpow2.f32 %v11881_v54  ;;  %v11882_v17 = vmul.f32 -1.442695, %v5743_v22  ;;  %v5745_v12 = vadd.f32 %v5744_v63, %v18386_v33  ;;  %v18426_v54 = vpack.c.bf16 %v4913_v39, %v4912_v43 }
 0x5af   : > { %v18415_v58 = vpack.c.bf16 %v4911_v48, %v4910_v46  ;;  %v5746_v10 = vpop.f32.mrf.mxu1 }
 0x5b0   : > { %14006 = vpow2.f32 %v11882_v17  ;;  %v11888_v31 = vmul.f32 -1.442695, %v5745_v12  ;;  %v5747_v16 = vadd.f32 %v5746_v10, %v18392_v30  ;;  %20457 = vst [vmem:[#allocation44_spill] sm:$0xff] %v18426_v54 }
 0x5b1   : > { %20456 = vst [vmem:[#allocation35_spill] sm:$0xff] %v18415_v58  ;;  %v5750_v23 = vpop.f32.mrf.mxu1  ;;  %5989 = vmatmul.mubr.bf16.gmra.mxu1 %v18415_v58 }
 0x5b2   : > { %14008 = vpow2.f32 %v11888_v31  ;;  %v11889_v13 = vmul.f32 -1.442695, %v5747_v16  ;;  %v5751_v57 = vadd.f32 %v5750_v23, %v18386_v33  ;;  %5998 = vmatprep.mubr.bf16.mxu1 %v20379_v55 }
 0x5b3   : > { %v13997_v7 = vpop.eup %13996  ;;  %v5752_v42 = vpop.f32.mrf.mxu1 }
 0x5b4   : > { %v8037_v38 = vadd.f32 1.0, %v13997_v7  ;;  %14010 = vpow2.f32 %v11889_v13  ;;  %v11895_v8 = vmul.f32 -1.442695, %v5751_v57  ;;  %v5753_v41 = vadd.f32 %v5752_v42, %v18392_v30  ;;  %v13108_v51 = vpop.f32.mrf.mxu0  ;;  %5586 = vmatmul.mubr.bf16.gmra.mxu0 %v18357_v20 }
 0x5b5   : > { %v13999_v4 = vpop.eup %13998  ;;  %v5754_v1 = vpop.f32.mrf.mxu1  ;;  %5595 = vmatprep.mubr.bf16.mxu0 %v20379_v55 }
 0x5b6   : > { %14012 = vrcp.f32 %v8037_v38  ;;  %v8038_v5 = vadd.f32 1.0, %v13999_v4  ;;  %v11896_v44 = vmul.f32 -1.442695, %v5753_v41  ;;  %v5755_v21 = vadd.f32 %v5754_v1, %v18386_v33  ;;  %v4827_v26 = vpop.f32.mrf.mxu0 }
 0x5b7   : > { %v14001_v49 = vpop.eup %14000  ;;  %14014 = vpow2.f32 %v11895_v8  ;;  %v5756_v22 = vpop.f32.mrf.mxu1  ;;  %v4828_v10 = vadd.f32 %v18429_v32, %v4827_v26 }
 0x5b8   : > { %14016 = vrcp.f32 %v8038_v5  ;;  %v8044_v46 = vadd.f32 1.0, %v14001_v49  ;;  %v11902_v48 = vmul.f32 -1.442695, %v5755_v21  ;;  %v5757_v63 = vadd.f32 %v5756_v22, %v18392_v30  ;;  %v13109_v17 = vpop.f32.mrf.mxu0 }
 0x5b9   : > { %v14003_v12 = vpop.eup %14002  ;;  %14018 = vpow2.f32 %v11896_v44  ;;  %v5760_v31 = vpop.f32.mrf.mxu1  ;;  %5999 = vmatmul.mubr.bf16.gmra.mxu1 %v18426_v54  ;;  %v4914_v4 = vmax.f32 %v4828_v10, 0.0  ;;  %v4839_v49 = vadd.f32 %v18429_v32, %v13109_v17 }
 0x5ba   : > { %14020 = vrcp.f32 %v8044_v46  ;;  %v8045_v16 = vadd.f32 1.0, %v14003_v12  ;;  %v11903_v50 = vmul.f32 -1.442695, %v5757_v63  ;;  %v5761_v23 = vadd.f32 %v5760_v31, %v18386_v33  ;;  %v4830_v13 = vpop.f32.mrf.mxu0  ;;  %6008 = vmatprep.mubr.bf16.mxu1 %v20379_v55 }
 0x5bb   : > { %v14005_v57 = vpop.eup %14004  ;;  %14022 = vpow2.f32 %v11902_v48  ;;  %v4831_v7 = vadd.f32 %v18429_v32, %v4830_v13  ;;  %v5762_v39 = vpop.f32.mrf.mxu1  ;;  %v4836_v31 = vadd.f32 %v18429_v32, %v13108_v51 }
 0x5bc   : > { %14024 = vrcp.f32 %v8045_v16  ;;  %v8051_v42 = vadd.f32 1.0, %v14005_v57  ;;  %v11909_v38 = vmul.f32 -1.442695, %v5761_v23  ;;  %v5763_v8 = vadd.f32 %v5762_v39, %v18392_v30  ;;  %5596 = vmatmul.mubr.bf16.gmra.mxu0 %v18366_v24 }
 0x5bd   : > { %v14007_v41 = vpop.eup %14006  ;;  %14026 = vpow2.f32 %v11903_v50  ;;  %v4915_v43 = vmax.f32 %v4831_v7, 0.0  ;;  %v5764_v1 = vpop.f32.mrf.mxu1  ;;  %5605 = vmatprep.mubr.bf16.mxu0 %v20379_v55  ;;  %v4917_v57 = vmax.f32 %v4839_v49, 0.0 }
 0x5be   : > { %14028 = vrcp.f32 %v8051_v42  ;;  %v8052_v5 = vadd.f32 1.0, %v14007_v41  ;;  %v11910_v44 = vmul.f32 -1.442695, %v5763_v8  ;;  %v5765_v21 = vadd.f32 %v5764_v1, %v18386_v33 }
 0x5bf   : > { %v14009_v26 = vpop.eup %14008  ;;  %14030 = vpow2.f32 %v11909_v38  ;;  %v18441_v22 = vpack.c.bf16 %v4915_v43, %v4914_v4  ;;  %v5766_v46 = vpop.f32.mrf.mxu1  ;;  %v4916_v4 = vmax.f32 %v4836_v31, 0.0 }
 0x5c0   : > { %14032 = vrcp.f32 %v8052_v5  ;;  %v8058_v48 = vadd.f32 1.0, %v14009_v26  ;;  %v11916_v63 = vmul.f32 -1.442695, %v5765_v21  ;;  %v5767_v12 = vadd.f32 %v5766_v46, %v18392_v30 }
 0x5c1   : > { %20458 = vst [vmem:[#allocation56_spill] sm:$0xff] %v18441_v22  ;;  %v14011_v10 = vpop.eup %14010  ;;  %14034 = vpow2.f32 %v11910_v44  ;;  %v5770_v16 = vpop.f32.mrf.mxu1  ;;  %6009 = vmatmul.mubr.bf16.gmra.mxu1 %v18441_v22 }
 0x5c2   : > { %14036 = vrcp.f32 %v8058_v48  ;;  %v8059_v50 = vadd.f32 1.0, %v14011_v10  ;;  %v11917_v23 = vmul.f32 -1.442695, %v5767_v12  ;;  %v5771_v17 = vadd.f32 %v5770_v16, %v18386_v33  ;;  %6018 = vmatprep.mubr.bf16.mxu1 %v20379_v55 }
 0x5c3   : > { %v14013_v13 = vpop.eup %14012  ;;  %14038 = vpow2.f32 %v11916_v63  ;;  %v5772_v7 = vpop.f32.mrf.mxu1  ;;  %v18454_v48 = vpack.c.bf16 %v4917_v57, %v4916_v4  ;;  %v18467_v57 = vrot.slane %v18380_v35, %v3769_v53  ;;  %v18475_v53 = vrot.slane %v18380_v35, %v3773_v59 }
 0x5c4   : > { %v14015_v39 = vpop.eup %14014  ;;  %14040 = vrcp.f32 %v8059_v50  ;;  %v11923_v42 = vmul.f32 -1.442695, %v5771_v17  ;;  %v5773_v51 = vadd.f32 %v5772_v7, %v18392_v30  ;;  %v18449_v38 = vpop.f32.mrf.mxu0  ;;  %5606 = vmatmul.mubr.bf16.gmra.mxu0 %v18373_v29 }
 0x5c5   : > { %v14017_v8 = vpop.eup %14016  ;;  %v8065_v41 = vadd.f32 1.0, %v14015_v39  ;;  %14042 = vpow2.f32 %v11917_v23  ;;  %v5774_v43 = vpop.f32.mrf.mxu1  ;;  %5615 = vmatprep.mubr.bf16.mxu0 %v20379_v55  ;;  %20459 = vst [vmem:[#allocation57_spill] sm:$0xff] %v18454_v48 }
 0x5c6   : > { %v14019_v1 = vpop.eup %14018  ;;  %v12579_v5 = vpack.c.bf16 %v14017_v8, %v14013_v13  ;;  %14044 = vpow2.f32 %v11923_v42  ;;  %v11924_v44 = vmul.f32 -1.442695, %v5773_v51  ;;  %v5775_v21 = vadd.f32 %v5774_v43, %v18386_v33  ;;  %v4843_v26 = vpop.f32.mrf.mxu0 }
 0x5c7   : > { %v14021_v49 = vpop.eup %14020  ;;  %14046 = vrcp.f32 %v8065_v41  ;;  %v8066_v46 = vadd.f32 1.0, %v14019_v1  ;;  %v5776_v63 = vpop.f32.mrf.mxu1  ;;  %v4844_v31 = vadd.f32 %v18429_v32, %v4843_v26 }
 0x5c8   : > { %v14023_v12 = vpop.eup %14022  ;;  %10788 = vst [vmem:[%s18458_s29 + $0x8] sm:$0xff] %v12579_v5  ;;  %14048 = vpow2.f32 %v11924_v44  ;;  %v11930_v10 = vmul.f32 -1.442695, %v5775_v21  ;;  %v5777_v16 = vadd.f32 %v5776_v63, %v18392_v30  ;;  %v13113_v50 = vpop.f32.mrf.mxu0 }
 0x5c9   : > { %v14025_v23 = vpop.eup %14024  ;;  %14050 = vrcp.f32 %v8066_v46  ;;  %v8072_v17 = vadd.f32 1.0, %v14023_v12  ;;  %v5780_v13 = vpop.f32.mrf.mxu1  ;;  %6019 = vmatmul.mubr.bf16.gmra.mxu1 %v18454_v48  ;;  %v4918_v44 = vmax.f32 %v4844_v31, 0.0  ;;  %v4855_v12 = vadd.f32 %v18429_v32, %v13113_v50 }
 0x5ca   : > { %v14027_v7 = vpop.eup %14026  ;;  %v12583_v39 = vpack.c.bf16 %v14025_v23, %v14021_v49  ;;  %14052 = vpow2.f32 %v11930_v10  ;;  %v11931_v42 = vmul.f32 -1.442695, %v5777_v16  ;;  %v5781_v51 = vadd.f32 %v5780_v13, %v18386_v33  ;;  %v4846_v8 = vpop.f32.mrf.mxu0  ;;  %6028 = vmatprep.mubr.bf16.mxu1 %v20379_v55 }
 0x5cb   : > { %v14029_v41 = vpop.eup %14028  ;;  %14054 = vrcp.f32 %v8072_v17  ;;  %v8073_v4 = vadd.f32 1.0, %v14027_v7  ;;  %v4847_v43 = vadd.f32 %v18429_v32, %v4846_v8  ;;  %v5782_v1 = vpop.f32.mrf.mxu1  ;;  %v4852_v8 = vadd.f32 %v18429_v32, %v18449_v38 }
 0x5cc   : > { %v14031_v5 = vpop.eup %14030  ;;  %10792 = vst [vmem:[%s18458_s29 + $0x24] sm:$0xff] %v12583_v39  ;;  %14056 = vpow2.f32 %v11931_v42  ;;  %v11937_v21 = vmul.f32 -1.442695, %v5781_v51  ;;  %v5783_v26 = vadd.f32 %v5782_v1, %v18392_v30  ;;  %v5377_v49 = vpop.f32.mrf.mxu0  ;;  %5616 = vmatmul.mubr.bf16.gmra.mxu0 %v18389_v9 }
 0x5cd   : > { %v14033_v46 = vpop.eup %14032  ;;  %14058 = vrcp.f32 %v8073_v4  ;;  %v8079_v63 = vadd.f32 1.0, %v14031_v5  ;;  %v4919_v10 = vmax.f32 %v4847_v43, 0.0  ;;  %v5784_v16 = vpop.f32.mrf.mxu1  ;;  %5625 = vmatprep.mubr.bf16.mxu0 %v20379_v55  ;;  %v5378_v23 = vadd.f32 %v5377_v49, %v18467_v57 }
 0x5ce   : > { %v14035_v59 = vpop.eup %14034  ;;  %v12587_v35 = vpack.c.bf16 %v14033_v46, %v14029_v41  ;;  %14060 = vpow2.f32 %v11937_v21  ;;  %v11938_v31 = vmul.f32 -1.442695, %v5783_v26  ;;  %v5379_v17 = vpop.f32.mrf.mxu0  ;;  %v5785_v42 = vadd.f32 %v5784_v16, %v18386_v33 }
 0x5cf   : > { %v14037_v13 = vpop.eup %14036  ;;  %14062 = vrcp.f32 %v8079_v63  ;;  %v8080_v7 = vadd.f32 1.0, %v14035_v59  ;;  %v18483_v39 = vpack.c.bf16 %v4919_v10, %v4918_v44  ;;  %v5786_v50 = vpop.f32.mrf.mxu1  ;;  %v11865_v41 = vmul.f32 -1.442695, %v5378_v23 }
 0x5d0   : > { %v14039_v51 = vpop.eup %14038  ;;  %10796 = vst [vmem:[%s18458_s29 + $0x40] sm:$0xff] %v12587_v35  ;;  %14064 = vpow2.f32 %v11938_v31  ;;  %v5380_v4 = vadd.f32 %v5379_v17, %v18475_v53  ;;  %v5381_v43 = vpop.f32.mrf.mxu0  ;;  %v11944_v21 = vmul.f32 -1.442695, %v5785_v42  ;;  %v5787_v44 = vadd.f32 %v5786_v50, %v18392_v30 }
 0x5d1   : > { %20460 = vst [vmem:[#allocation58_spill] sm:$0xff] %v18483_v39  ;;  %v14041_v1 = vpop.eup %14040  ;;  %14066 = vrcp.f32 %v8080_v7  ;;  %v8086_v5 = vadd.f32 1.0, %v14039_v51  ;;  %v5790_v26 = vpop.f32.mrf.mxu1  ;;  %6029 = vmatmul.mubr.bf16.gmra.mxu1 %v18483_v39  ;;  %v4921_v63 = vmax.f32 %v4855_v12, 0.0  ;;  %v5382_v59 = vadd.f32 %v5381_v43, %v18467_v57 }
 0x5d2   : > { %v14043_v49 = vpop.eup %14042  ;;  %v12591_v46 = vpack.c.bf16 %v14041_v1, %v14037_v13  ;;  %14068 = vpow2.f32 %v11865_v41  ;;  %v5383_v32 = vpop.f32.mrf.mxu0  ;;  %6038 = vmatprep.mubr.bf16.mxu1 %v20379_v55  ;;  %v11866_v16 = vmul.f32 -1.442695, %v5380_v4  ;;  %v4920_v17 = vmax.f32 %v4852_v8, 0.0 }
 0x5d3   : > { %v14045_v38 = vpop.eup %14044  ;;  %14070 = vrcp.f32 %v8086_v5  ;;  %v8087_v10 = vadd.f32 1.0, %v14043_v49  ;;  %v5792_v35 = vpop.f32.mrf.mxu1  ;;  %v11945_v13 = vmul.f32 -1.442695, %v5787_v44  ;;  %v5791_v42 = vadd.f32 %v5790_v26, %v18386_v33 }
 0x5d4   : > { %v14047_v31 = vpop.eup %14046  ;;  %10800 = vst [vmem:[%s18458_s29 + $0x5c] sm:$0xff] %v12591_v46  ;;  %v8093_v23 = vadd.f32 1.0, %v14045_v38  ;;  %14072 = vpow2.f32 %v11944_v21  ;;  %v5387_v7 = vpop.f32.mrf.mxu0  ;;  %5626 = vmatmul.mubr.bf16.gmra.mxu0 %v18402_v62  ;;  %v18498_v4 = vpack.c.bf16 %v4921_v63, %v4920_v17  ;;  %v11872_v5 = vmul.f32 -1.442695, %v5382_v59 }
 0x5d5   : > { %v14049_v12 = vpop.eup %14048  ;;  %14074 = vrcp.f32 %v8087_v10  ;;  %v5794_v50 = vpop.f32.mrf.mxu1  ;;  %5635 = vmatprep.mubr.bf16.mxu0 %v20379_v55  ;;  %v5384_v21 = vadd.f32 %v5383_v32, %v18475_v53  ;;  %v11951_v10 = vmul.f32 -1.442695, %v5791_v42 }
 0x5d6   : > { %v14051_v51 = vpop.eup %14050  ;;  %14076 = vrcp.f32 %v8093_v23  ;;  %v8094_v41 = vadd.f32 1.0, %v14049_v12  ;;  %20461 = vst [vmem:[#allocation59_spill] sm:$0xff] %v18498_v4  ;;  %v5389_v43 = vpop.f32.mrf.mxu0  ;;  %v5793_v23 = vadd.f32 %v5792_v35, %v18392_v30 }
 0x5d7   : > { %v14053_v8 = vpop.eup %14052  ;;  %v12595_v1 = vpack.c.bf16 %v14051_v51, %v14047_v31  ;;  %14078 = vpow2.f32 %v11866_v16  ;;  %v5796_v49 = vpop.f32.mrf.mxu1  ;;  %v11873_v12 = vmul.f32 -1.442695, %v5384_v21  ;;  %v5390_v21 = vadd.f32 %v5389_v43, %v18475_v53 }
 0x5d8   : > { %v14055_v44 = vpop.eup %14054  ;;  %14080 = vrcp.f32 %v8094_v41  ;;  %v8100_v26 = vadd.f32 1.0, %v14053_v8  ;;  %v5391_v46 = vpop.f32.mrf.mxu0 }
 0x5d9   : > { %v14057_v38 = vpop.eup %14056  ;;  %10804 = vst [vmem:[%s18458_s29 + $0x78] sm:$0xff] %v12595_v1  ;;  %14082 = vpow2.f32 %v11945_v13  ;;  %v5800_v63 = vpop.f32.mrf.mxu1  ;;  %6039 = vmatmul.mubr.bf16.gmra.mxu1 %v18498_v4  ;;  %v5388_v13 = vadd.f32 %v5387_v7, %v18467_v57  ;;  %v11952_v1 = vmul.f32 -1.442695, %v5793_v23 }
 0x5da   : > { %v14059_v17 = vpop.eup %14058  ;;  %14084 = vrcp.f32 %v8100_v26  ;;  %v8101_v16 = vadd.f32 1.0, %v14057_v38  ;;  %v18504_v59 = vpop.f32.mrf.mxu0  ;;  %13130 = vmatprep.mubr.bf16.mxu1 %v18144_v34  ;;  %v5795_v26 = vadd.f32 %v5794_v50, %v18386_v33 }
 0x5db   : > { %v14061_v32 = vpop.eup %14060  ;;  %v12599_v31 = vpack.c.bf16 %v14059_v17, %v14055_v44  ;;  %14086 = vpow2.f32 %v11872_v5  ;;  %v18508_v42 = vpop.f32.mrf.mxu1 }
 0x5dc   : > { %v14063_v35 = vpop.eup %14062  ;;  %14088 = vrcp.f32 %v8101_v16  ;;  %v8107_v51 = vadd.f32 1.0, %v14061_v32  ;;  %v18510_v41 = vpop.f32.mrf.mxu0  ;;  %5636 = vmatmul.mubr.bf16.gmra.mxu0 %v18415_v58  ;;  %v11879_v32 = vmul.f32 -1.442695, %v5388_v13  ;;  %v11880_v13 = vmul.f32 -1.442695, %v5390_v21 }
 0x5dd   : > { %v14065_v8 = vpop.eup %14064  ;;  %10808 = vst [vmem:[%s18458_s29 + $0x94] sm:$0xff] %v12599_v31  ;;  %14090 = vpow2.f32 %v11951_v10  ;;  %v18515_v44 = vpop.f32.mrf.mxu1  ;;  %5645 = vmatprep.mubr.bf16.mxu0 %v20379_v55  ;;  %v5797_v31 = vadd.f32 %v5796_v49, %v18392_v30  ;;  %v5803_v62 = vadd.f32 %v18508_v42, %v18392_v30 }
 0x5de   : > { %v14067_v7 = vpop.eup %14066  ;;  %14092 = vrcp.f32 %v8107_v51  ;;  %v8108_v5 = vadd.f32 1.0, %v14065_v8  ;;  %v18519_v38 = vpop.f32.mrf.mxu0  ;;  %v11958_v51 = vmul.f32 -1.442695, %v5795_v26  ;;  %v5392_v8 = vadd.f32 %v5391_v46, %v18467_v57 }
 0x5df   : > { %v14069_v17 = vpop.eup %14068  ;;  %v12603_v16 = vpack.c.bf16 %v14067_v7, %v14063_v35  ;;  %14094 = vpow2.f32 %v11873_v12  ;;  %v18521_v10 = vpop.f32.mrf.mxu1  ;;  %v11966_v9 = vmul.f32 -1.442695, %v5803_v62 }
 0x5e0   : > { %v14071_v23 = vpop.eup %14070  ;;  %14096 = vrcp.f32 %v8108_v5  ;;  %v8035_v50 = vadd.f32 1.0, %v14069_v17  ;;  %v18524_v25 = vpop.f32.mrf.mxu0  ;;  %v11959_v17 = vmul.f32 -1.442695, %v5797_v31 }
 0x5e1   : > { %v14073_v58 = vpop.eup %14072  ;;  %10812 = vst [vmem:[%s18458_s29 + $0xb0] sm:$0xff] %v12603_v16  ;;  %14098 = vpow2.f32 %v11952_v1  ;;  %v18527_v43 = vpop.f32.mrf.mxu1  ;;  %13131 = vmatmul.mubr.bf16.vlgmr.msra.gmra.mxu1 %v18169_v61  ;;  %v5801_v16 = vadd.f32 %v5800_v63, %v18386_v33  ;;  %v5394_v63 = vadd.f32 %v18504_v59, %v18475_v53 }
 0x5e2   : > { %v14075_v35 = vpop.eup %14074  ;;  %14100 = vrcp.f32 %v8035_v50  ;;  %v8114_v12 = vadd.f32 1.0, %v14073_v58  ;;  %v18531_v7 = vpop.f32.mrf.mxu0  ;;  %13134 = vmatprep.mubr.bf16.mxu1 %v18193_v0 }
 0x5e3   : > { %v14077_v49 = vpop.eup %14076  ;;  %v12607_v5 = vpack.c.bf16 %v14075_v35, %v14071_v23  ;;  %14102 = vpow2.f32 %v11879_v32  ;;  %v18534_v1 = vpop.f32.mrf.mxu1  ;;  %v11886_v35 = vmul.f32 -1.442695, %v5392_v8 }
 0x5e4   : > { %v14079_v26 = vpop.eup %14078  ;;  %14104 = vrcp.f32 %v8114_v12  ;;  %v18537_v50 = vpop.f32.mrf.mxu0  ;;  %5646 = vmatmul.mubr.bf16.gmra.mxu0 %v18426_v54 }
 0x5e5   : > { %v14081_v58 = vpop.eup %14080  ;;  %10816 = vst [vmem:[%s18458_s29 + $0xcc] sm:$0xff] %v12607_v5  ;;  %v8036_v46 = vadd.f32 1.0, %v14079_v26  ;;  %14106 = vpow2.f32 %v11958_v51  ;;  %v18541_v21 = vpop.f32.mrf.mxu1  ;;  %5655 = vmatprep.mubr.bf16.mxu0 %v20379_v55  ;;  %v11965_v51 = vmul.f32 -1.442695, %v5801_v16 }
 0x5e6   : > { %v14083_v32 = vpop.eup %14082  ;;  %v12611_v23 = vpack.c.bf16 %v14081_v58, %v14077_v49  ;;  %14108 = vpow2.f32 %v11880_v13  ;;  %v18546_v31 = vpop.f32.mrf.mxu0 }
 0x5e7   : > { %v14085_v12 = vpop.eup %14084  ;;  %14110 = vrcp.f32 %v8036_v46  ;;  %v8115_v54 = vadd.f32 1.0, %v14083_v32  ;;  %v18548_v5 = vpop.f32.mrf.mxu1  ;;  %v11887_v32 = vmul.f32 -1.442695, %v5394_v63 }
 0x5e8   : > { %v14087_v26 = vpop.eup %14086  ;;  %10820 = vst [vmem:[%s18458_s29 + $0xe8] sm:$0xff] %v12611_v23  ;;  %14112 = vpow2.f32 %v11959_v17  ;;  %v18553_v49 = vpop.f32.mrf.mxu0  ;;  %v5398_v17 = vadd.f32 %v18510_v41, %v18467_v57 }
 0x5e9   : > { %v14089_v13 = vpop.eup %14088  ;;  %14114 = vrcp.f32 %v8115_v54  ;;  %v8042_v59 = vadd.f32 1.0, %v14087_v26  ;;  %v18555_v8 = vpop.f32.mrf.mxu1  ;;  %13135 = vmatmul.mubr.bf16.gmra.mxu1 %v18206_v60 }
 0x5ea   : > { %v14091_v58 = vpop.eup %14090  ;;  %v12615_v46 = vpack.c.bf16 %v14089_v13, %v14085_v12  ;;  %14116 = vpow2.f32 %v11886_v35  ;;  %v18560_v16 = vpop.f32.mrf.mxu0  ;;  %13138 = vmatprep.mubr.bf16.mxu1 %v18221_v28  ;;  %v5805_v35 = vadd.f32 %v18515_v44, %v18386_v33 }
 0x5eb   : > { %v14093_v42 = vpop.eup %14092  ;;  %14118 = vrcp.f32 %v8042_v59  ;;  %v8121_v54 = vadd.f32 1.0, %v14091_v58  ;;  %v18563_v23 = vpop.f32.mrf.mxu1 }
 0x5ec   : > { %v14095_v26 = vpop.eup %14094  ;;  %10824 = vst [vmem:[%s18458_s29 + $0x104] sm:$0xff] %v12615_v46  ;;  %14120 = vpow2.f32 %v11965_v51  ;;  %v18568_v63 = vpop.f32.mrf.mxu0  ;;  %5656 = vmatmul.mubr.bf16.gmra.mxu0 %v18441_v22  ;;  %v11893_v51 = vmul.f32 -1.442695, %v5398_v17  ;;  %v5400_v22 = vadd.f32 %v18519_v38, %v18475_v53  ;;  %v5807_v17 = vadd.f32 %v18521_v10, %v18392_v30 }
 0x5ed   : > { %v14097_v41 = vpop.eup %14096  ;;  %14122 = vrcp.f32 %v8121_v54  ;;  %v8043_v12 = vadd.f32 1.0, %v14095_v26  ;;  %v18571_v13 = vpop.f32.mrf.mxu1  ;;  %5665 = vmatprep.mubr.bf16.mxu0 %v20379_v55  ;;  %v11972_v26 = vmul.f32 -1.442695, %v5805_v35 }
 0x5ee   : > { %v14099_v59 = vpop.eup %14098  ;;  %v12619_v58 = vpack.c.bf16 %v14097_v41, %v14093_v42  ;;  %14124 = vpow2.f32 %v11887_v32  ;;  %v18574_v62 = vpop.f32.mrf.mxu0 }
 0x5ef   : > { %v14101_v46 = vpop.eup %14100  ;;  %14126 = vrcp.f32 %v8043_v12  ;;  %v8122_v44 = vadd.f32 1.0, %v14099_v59  ;;  %v18578_v29 = vpop.f32.mrf.mxu1  ;;  %v11894_v12 = vmul.f32 -1.442695, %v5400_v22  ;;  %v5402_v59 = vadd.f32 %v18524_v25, %v18467_v57 }
 0x5f0   : > { %v14103_v54 = vpop.eup %14102  ;;  %10828 = vst [vmem:[%s18458_s29 + $0x120] sm:$0xff] %v12619_v58  ;;  %14128 = vpow2.f32 %v11966_v9  ;;  %v18581_v24 = vpop.f32.mrf.mxu0  ;;  %v5811_v22 = vadd.f32 %v18527_v43, %v18386_v33 }
 0x5f1   : > { %v14105_v20 = vpop.eup %14104  ;;  %14130 = vrcp.f32 %v8122_v44  ;;  %v8049_v32 = vadd.f32 1.0, %v14103_v54  ;;  %v18585_v42 = vpop.f32.mrf.mxu1  ;;  %13139 = vmatmul.mubr.bf16.gmra.mxu1 %v18229_v2 }
 0x5f2   : > { %v14107_v41 = vpop.eup %14106  ;;  %14132 = vpow2.f32 %v11893_v51  ;;  %v18588_v38 = vpop.f32.mrf.mxu0  ;;  %13142 = vmatprep.mubr.bf16.mxu1 %v18238_v14  ;;  %v11973_v14 = vmul.f32 -1.442695, %v5807_v17  ;;  %v5404_v17 = vadd.f32 %v18531_v7, %v18475_v53 }
 0x5f3   : > { %v14109_v9 = vpop.eup %14108  ;;  %14134 = vrcp.f32 %v8049_v32  ;;  %v8128_v35 = vadd.f32 1.0, %v14107_v41  ;;  %v18593_v58 = vpop.f32.mrf.mxu1 }
 0x5f4   : > { %v14111_v10 = vpop.eup %14110  ;;  %v8050_v44 = vadd.f32 1.0, %v14109_v9  ;;  %14136 = vpow2.f32 %v11972_v26  ;;  %v18595_v54 = vpop.f32.mrf.mxu0  ;;  %5666 = vmatmul.mubr.bf16.gmra.mxu0 %v18454_v48 }
 0x5f5   : > { %v14113_v51 = vpop.eup %14112  ;;  %v12578_v2 = vpack.c.bf16 %v14111_v10, %v14101_v46  ;;  %14138 = vrcp.f32 %v8128_v35  ;;  %v18600_v32 = vpop.f32.mrf.mxu1  ;;  %5675 = vmatprep.mubr.bf16.mxu0 %v20379_v55  ;;  %v11900_v46 = vmul.f32 -1.442695, %v5402_v59 }
 0x5f6   : > { %v14115_v25 = vpop.eup %14114  ;;  %14140 = vrcp.f32 %v8050_v44  ;;  %v8129_v41 = vadd.f32 1.0, %v14113_v51  ;;  %v18603_v26 = vpop.f32.mrf.mxu0  ;;  %v11979_v44 = vmul.f32 -1.442695, %v5811_v22 }
 0x5f7   : > { %v14117_v9 = vpop.eup %14116  ;;  %10787 = vst [vmem:[%s18458_s29] sm:$0xff] %v12578_v2  ;;  %v12623_v48 = vpack.c.bf16 %v14115_v25, %v14105_v20  ;;  %14142 = vpow2.f32 %v11894_v12  ;;  %v18608_v35 = vpop.f32.mrf.mxu1  ;;  %v5813_v2 = vadd.f32 %v18534_v1, %v18392_v30  ;;  %v11901_v25 = vmul.f32 -1.442695, %v5404_v17 }
 0x5f8   : > { %v14119_v43 = vpop.eup %14118  ;;  %14144 = vrcp.f32 %v8129_v41  ;;  %v8056_v10 = vadd.f32 1.0, %v14117_v9  ;;  %v18610_v28 = vpop.f32.mrf.mxu0 }
 0x5f9   : > { %v14121_v36 = vpop.eup %14120  ;;  %10832 = vst [vmem:[%s18458_s29 + $0x13c] sm:$0xff] %v12623_v48  ;;  %14146 = vpow2.f32 %v11973_v14  ;;  %v18615_v20 = vpop.f32.mrf.mxu1  ;;  %13143 = vmatmul.mubr.bf16.gmra.mxu1 %v18245_v18  ;;  %v5408_v14 = vadd.f32 %v18537_v50, %v18467_v57 }
 0x5fa   : > { %v14123_v12 = vpop.eup %14122  ;;  %14148 = vrcp.f32 %v8056_v10  ;;  %v8135_v7 = vadd.f32 1.0, %v14121_v36  ;;  %v18618_v59 = vpop.f32.mrf.mxu0  ;;  %13146 = vmatprep.mubr.bf16.mxu1 %v18254_v52  ;;  %v11980_v10 = vmul.f32 -1.442695, %v5813_v2 }
 0x5fb   : > { %v14125_v51 = vpop.eup %14124  ;;  %14150 = vpow2.f32 %v11900_v46  ;;  %v18623_v48 = vpop.f32.mrf.mxu1  ;;  %v5815_v46 = vadd.f32 %v18541_v21, %v18386_v33 }
 0x5fc   : > { %v14127_v1 = vpop.eup %14126  ;;  %14152 = vrcp.f32 %v8135_v7  ;;  %v8057_v22 = vadd.f32 1.0, %v14125_v51  ;;  %v18625_v41 = vpop.f32.mrf.mxu0  ;;  %5676 = vmatmul.mubr.bf16.gmra.mxu0 %v18483_v39  ;;  %v5410_v51 = vadd.f32 %v18546_v31, %v18475_v53 }
 0x5fd   : > { %v14129_v36 = vpop.eup %14128  ;;  %v12582_v9 = vpack.c.bf16 %v14127_v1, %v14119_v43  ;;  %14154 = vpow2.f32 %v11979_v44  ;;  %v18630_v17 = vpop.f32.mrf.mxu1  ;;  %5685 = vmatprep.mubr.bf16.mxu0 %v20379_v55  ;;  %v11907_v44 = vmul.f32 -1.442695, %v5408_v14  ;;  %v11986_v31 = vmul.f32 -1.442695, %v5815_v46 }
 0x5fe   : > { %v14131_v50 = vpop.eup %14130  ;;  %14156 = vrcp.f32 %v8057_v22  ;;  %v8136_v7 = vadd.f32 1.0, %v14129_v36  ;;  %v18635_v52 = vpop.f32.mrf.mxu0  ;;  %v5817_v22 = vadd.f32 %v18548_v5, %v18392_v30  ;;  %v11908_v14 = vmul.f32 -1.442695, %v5410_v51 }
 0x5ff   : > { %20462 = vst [vmem:[#allocation60_spill] sm:$0xff] %v18635_v52  ;;  %v14133_v39 = vpop.eup %14132  ;;  %10791 = vst [vmem:[%s18458_s29 + $0x1c] sm:$0xff] %v12582_v9  ;;  %v12627_v43 = vpack.c.bf16 %v14131_v50, %v14123_v12  ;;  %14158 = vpow2.f32 %v11901_v25  ;;  %v18638_v2 = vpop.f32.mrf.mxu1 }
 0x600   : > { %v14135_v21 = vpop.eup %14134  ;;  %14160 = vrcp.f32 %v8136_v7  ;;  %v8063_v1 = vadd.f32 1.0, %v14133_v39  ;;  %v18642_v18 = vpop.f32.mrf.mxu0  ;;  %v5412_v39 = vadd.f32 %v18553_v49, %v18467_v57  ;;  %v11987_v7 = vmul.f32 -1.442695, %v5817_v22 }
 0x601   : > { %v14137_v36 = vpop.eup %14136  ;;  %10836 = vst [vmem:[%s18458_s29 + $0x158] sm:$0xff] %v12627_v43  ;;  %14162 = vpow2.f32 %v11980_v10  ;;  %v18645_v52 = vpop.f32.mrf.mxu1  ;;  %13147 = vmatmul.mubr.bf16.gmra.mxu1 %v18261_v27  ;;  %v5821_v43 = vadd.f32 %v18555_v8, %v18386_v33  ;;  %v5414_v8 = vadd.f32 %v18560_v16, %v18475_v53 }
 0x602   : > { %v14139_v12 = vpop.eup %14138  ;;  %14164 = vrcp.f32 %v8063_v1  ;;  %v8142_v25 = vadd.f32 1.0, %v14137_v36  ;;  %v18650_v9 = vpop.f32.mrf.mxu0  ;;  %13150 = vmatprep.mubr.bf16.mxu1 %v18270_v45  ;;  %v11914_v22 = vmul.f32 -1.442695, %v5412_v39 }
 0x603   : > { %v14141_v5 = vpop.eup %14140  ;;  %14166 = vpow2.f32 %v11907_v44  ;;  %v18653_v10 = vpop.f32.mrf.mxu1 }
 0x604   : > { %v14143_v46 = vpop.eup %14142  ;;  %v12586_v50 = vpack.c.bf16 %v14141_v5, %v14135_v21  ;;  %14168 = vrcp.f32 %v8142_v25  ;;  %v18657_v51 = vpop.f32.mrf.mxu0  ;;  %5686 = vmatmul.mubr.bf16.gmra.mxu0 %v18498_v4  ;;  %v11993_v4 = vmul.f32 -1.442695, %v5821_v43 }
 0x605   : > { %v14145_v49 = vpop.eup %14144  ;;  %v8064_v1 = vadd.f32 1.0, %v14143_v46  ;;  %14170 = vpow2.f32 %v11986_v31  ;;  %v18660_v36 = vpop.f32.mrf.mxu1  ;;  %6081 = vmatprep.mubr.bf16.mxu0 %v20379_v55 }
 0x606   : > { %v14147_v44 = vpop.eup %14146  ;;  %10795 = vst [vmem:[%s18458_s29 + $0x38] sm:$0xff] %v12586_v50  ;;  %v12631_v21 = vpack.c.bf16 %v14145_v49, %v14139_v12  ;;  %14172 = vpow2.f32 %v11908_v14  ;;  %v18666_v25 = vpop.f32.mrf.mxu0  ;;  %v5823_v50 = vadd.f32 %v18563_v23, %v18392_v30 }
 0x607   : > { %v14149_v5 = vpop.eup %14148  ;;  %14174 = vrcp.f32 %v8064_v1  ;;  %v8143_v45 = vadd.f32 1.0, %v14147_v44  ;;  %v18668_v46 = vpop.f32.mrf.mxu1  ;;  %v11915_v1 = vmul.f32 -1.442695, %v5414_v8  ;;  %v5418_v44 = vadd.f32 %v18568_v63, %v18467_v57 }
 0x608   : > { %v14151_v31 = vpop.eup %14150  ;;  %10840 = vst [vmem:[%s18458_s29 + $0x174] sm:$0xff] %v12631_v21  ;;  %14176 = vpow2.f32 %v11987_v7  ;;  %v18673_v12 = vpop.f32.mrf.mxu0 }
 0x609   : > { %v14153_v14 = vpop.eup %14152  ;;  %14178 = vrcp.f32 %v8143_v45  ;;  %v8070_v39 = vadd.f32 1.0, %v14151_v31  ;;  %v18675_v16 = vpop.f32.mrf.mxu1  ;;  %13151 = vmatmul.mubr.bf16.gmra.mxu1 %v18277_v47  ;;  %v11994_v47 = vmul.f32 -1.442695, %v5823_v50 }
 0x60a   : > { %v14155_v49 = vpop.eup %14154  ;;  %14180 = vpow2.f32 %v11914_v22  ;;  %v18680_v7 = vpop.f32.mrf.mxu0  ;;  %13154 = vmatprep.mubr.bf16.mxu1 %v18286_v19  ;;  %v5825_v22 = vadd.f32 %v18571_v13, %v18386_v33 }
 0x60b   : > { %v14157_v23 = vpop.eup %14156  ;;  %14182 = vrcp.f32 %v8070_v39  ;;  %v8149_v43 = vadd.f32 1.0, %v14155_v49  ;;  %v18683_v45 = vpop.f32.mrf.mxu1 }
 0x60c   : > { %v14159_v21 = vpop.eup %14158  ;;  %v12590_v31 = vpack.c.bf16 %v14157_v23, %v14149_v5  ;;  %14184 = vpow2.f32 %v11993_v4  ;;  %v18687_v8 = vpop.f32.mrf.mxu0  ;;  %6082 = vmatmul.mubr.bf16.vlgmr.msra.gmra.mxu0 %v18144_v34  ;;  %v11921_v4 = vmul.f32 -1.442695, %v5418_v44  ;;  %v5420_v34 = vadd.f32 %v18574_v62, %v18475_v53 }
 0x60d   : > { %v14161_v63 = vpop.eup %14160  ;;  %14186 = vrcp.f32 %v8149_v43  ;;  %v8071_v19 = vadd.f32 1.0, %v14159_v21  ;;  %v18690_v39 = vpop.f32.mrf.mxu1  ;;  %6091 = vmatprep.mubr.bf16.mxu0 %v20379_v55  ;;  %v12000_v27 = vmul.f32 -1.442695, %v5825_v22 }
 0x60e   : > { %20463 = vst [vmem:[#allocation61_spill] sm:$0xff] %v18690_v39  ;;  %v14163_v49 = vpop.eup %14162  ;;  %10799 = vst [vmem:[%s18458_s29 + $0x54] sm:$0xff] %v12590_v31  ;;  %v12635_v5 = vpack.c.bf16 %v14161_v63, %v14153_v14  ;;  %14188 = vpow2.f32 %v11915_v1  ;;  %v18694_v50 = vpop.f32.mrf.mxu0  ;;  %v5827_v1 = vadd.f32 %v18578_v29, %v18392_v30  ;;  %v11922_v63 = vmul.f32 -1.442695, %v5420_v34 }
 0x60f   : > { %v14165_v13 = vpop.eup %14164  ;;  %14190 = vrcp.f32 %v8071_v19  ;;  %v8150_v23 = vadd.f32 1.0, %v14163_v49  ;;  %v18698_v43 = vpop.f32.mrf.mxu1  ;;  %v5422_v49 = vadd.f32 %v18581_v24, %v18467_v57  ;;  %v5831_v34 = vadd.f32 %v18585_v42, %v18386_v33 }
 0x610   : > { %v14167_v21 = vpop.eup %14166  ;;  %10844 = vst [vmem:[%s18458_s29 + $0x190] sm:$0xff] %v12635_v5  ;;  %14192 = vpow2.f32 %v11994_v47  ;;  %v18701_v39 = vpop.f32.mrf.mxu0 }
 0x611   : > { %v14169_v31 = vpop.eup %14168  ;;  %14194 = vrcp.f32 %v8150_v23  ;;  %v8077_v14 = vadd.f32 1.0, %v14167_v21  ;;  %v18705_v44 = vpop.f32.mrf.mxu1  ;;  %13155 = vmatmul.mubr.bf16.gmra.mxu1 %v18293_v11 }
 0x612   : > { %v14171_v19 = vpop.eup %14170  ;;  %14196 = vpow2.f32 %v11921_v4  ;;  %v18708_v62 = vpop.f32.mrf.mxu0  ;;  %13158 = vmatprep.mubr.bf16.mxu1 %v18302_v40  ;;  %v12001_v40 = vmul.f32 -1.442695, %v5827_v1  ;;  %v5424_v1 = vadd.f32 %v18588_v38, %v18475_v53 }
 0x613   : > { %v14173_v47 = vpop.eup %14172  ;;  %14198 = vrcp.f32 %v8077_v14  ;;  %v8156_v22 = vadd.f32 1.0, %v14171_v19  ;;  %v18713_v5 = vpop.f32.mrf.mxu1 }
 0x614   : > { %v14175_v29 = vpop.eup %14174  ;;  %v8078_v23 = vadd.f32 1.0, %v14173_v47  ;;  %14200 = vpow2.f32 %v12000_v27  ;;  %v18715_v21 = vpop.f32.mrf.mxu0  ;;  %6092 = vmatmul.mubr.bf16.gmra.mxu0 %v18169_v61 }
 0x615   : > { %20464 = vst [vmem:[#allocation62_spill] sm:$0xff] %v18715_v21  ;;  %v14177_v4 = vpop.eup %14176  ;;  %v12594_v11 = vpack.c.bf16 %v14175_v29, %v14165_v13  ;;  %14202 = vrcp.f32 %v8156_v22  ;;  %v18720_v14 = vpop.f32.mrf.mxu1  ;;  %6101 = vmatprep.mubr.bf16.mxu0 %v20379_v55  ;;  %v11928_v13 = vmul.f32 -1.442695, %v5422_v49 }
 0x616   : > { %20465 = vst [vmem:[#allocation63_spill] sm:$0xff] %v18720_v14  ;;  %v14179_v24 = vpop.eup %14178  ;;  %14204 = vrcp.f32 %v8078_v23  ;;  %v8157_v19 = vadd.f32 1.0, %v14177_v4  ;;  %v18723_v27 = vpop.f32.mrf.mxu0  ;;  %v12007_v23 = vmul.f32 -1.442695, %v5831_v34 }
 0x617   : > { %v14181_v47 = vpop.eup %14180  ;;  %10803 = vst [vmem:[%s18458_s29 + $0x70] sm:$0xff] %v12594_v11  ;;  %v12639_v61 = vpack.c.bf16 %v14179_v24, %v14169_v31  ;;  %14206 = vpow2.f32 %v11922_v63  ;;  %v18728_v22 = vpop.f32.mrf.mxu1  ;;  %v5833_v11 = vadd.f32 %v18593_v58, %v18392_v30  ;;  %v11929_v24 = vmul.f32 -1.442695, %v5424_v1 }
 0x618   : > { %v14183_v42 = vpop.eup %14182  ;;  %14208 = vrcp.f32 %v8157_v19  ;;  %v8084_v29 = vadd.f32 1.0, %v14181_v47  ;;  %v18730_v14 = vpop.f32.mrf.mxu0 }
 0x619   : > { %v14185_v21 = vpop.eup %14184  ;;  %10848 = vst [vmem:[%s18458_s29 + $0x1ac] sm:$0xff] %v12639_v61  ;;  %14210 = vpow2.f32 %v12001_v40  ;;  %v18735_v31 = vpop.f32.mrf.mxu1  ;;  %13159 = vmatmul.mubr.bf16.gmra.mxu1 %v18309_v6  ;;  %v5428_v40 = vadd.f32 %v18595_v54, %v18467_v57 }
 0x61a   : > { %v14187_v63 = vpop.eup %14186  ;;  %14212 = vrcp.f32 %v8084_v29  ;;  %v8163_v38 = vadd.f32 1.0, %v14185_v21  ;;  %v18738_v49 = vpop.f32.mrf.mxu0  ;;  %13162 = vmatprep.mubr.bf16.mxu1 %v18318_v15  ;;  %v12008_v29 = vmul.f32 -1.442695, %v5833_v11 }
 0x61b   : > { %v14189_v4 = vpop.eup %14188  ;;  %14214 = vpow2.f32 %v11928_v13  ;;  %v18743_v34 = vpop.f32.mrf.mxu1  ;;  %v5835_v13 = vadd.f32 %v18600_v32, %v18386_v33 }
 0x61c   : > { %v14191_v58 = vpop.eup %14190  ;;  %14216 = vrcp.f32 %v8163_v38  ;;  %v8085_v19 = vadd.f32 1.0, %v14189_v4  ;;  %v18745_v47 = vpop.f32.mrf.mxu0  ;;  %6102 = vmatmul.mubr.bf16.gmra.mxu0 %v18193_v0  ;;  %v5430_v4 = vadd.f32 %v18603_v26, %v18475_v53 }
 0x61d   : > { %v14193_v21 = vpop.eup %14192  ;;  %v12598_v61 = vpack.c.bf16 %v14191_v58, %v14183_v42  ;;  %14218 = vpow2.f32 %v12007_v23  ;;  %v18750_v1 = vpop.f32.mrf.mxu1  ;;  %6111 = vmatprep.mubr.bf16.mxu0 %v20379_v55  ;;  %v11935_v23 = vmul.f32 -1.442695, %v5428_v40  ;;  %v12014_v26 = vmul.f32 -1.442695, %v5835_v13 }
 0x61e   : > { %v14195_v54 = vpop.eup %14194  ;;  %14220 = vrcp.f32 %v8085_v19  ;;  %v8164_v38 = vadd.f32 1.0, %v14193_v21  ;;  %v18755_v15 = vpop.f32.mrf.mxu0  ;;  %v5837_v19 = vadd.f32 %v18608_v35, %v18392_v30  ;;  %v11936_v40 = vmul.f32 -1.442695, %v5430_v4 }
 0x61f   : > { %20466 = vst [vmem:[#allocation64_spill] sm:$0xff] %v18755_v15  ;;  %v14197_v0 = vpop.eup %14196  ;;  %10807 = vst [vmem:[%s18458_s29 + $0x8c] sm:$0xff] %v12598_v61  ;;  %v12643_v42 = vpack.c.bf16 %v14195_v54, %v14187_v63  ;;  %14222 = vpow2.f32 %v11929_v24  ;;  %v18758_v11 = vpop.f32.mrf.mxu1  ;;  %v5432_v61 = vadd.f32 %v18610_v28, %v18467_v57 }
 0x620   : > { %v14199_v32 = vpop.eup %14198  ;;  %14224 = vrcp.f32 %v8164_v38  ;;  %v8091_v58 = vadd.f32 1.0, %v14197_v0  ;;  %v18762_v6 = vpop.f32.mrf.mxu0  ;;  %v12015_v0 = vmul.f32 -1.442695, %v5837_v19 }
 0x621   : > { %v14201_v21 = vpop.eup %14200  ;;  %10852 = vst [vmem:[%s18458_s29 + $0x1c8] sm:$0xff] %v12643_v42  ;;  %14226 = vpow2.f32 %v12008_v29  ;;  %v18765_v15 = vpop.f32.mrf.mxu1  ;;  %13163 = vmatmul.mubr.bf16.gmra.mxu1 %v18325_v56  ;;  %v5841_v42 = vadd.f32 %v18615_v20, %v18386_v33  ;;  %v11942_v19 = vmul.f32 -1.442695, %v5432_v61  ;;  %v5434_v20 = vadd.f32 %v18618_v59, %v18475_v53 }
 0x622   : > { %v14203_v63 = vpop.eup %14202  ;;  %14228 = vrcp.f32 %v8091_v58  ;;  %v8170_v24 = vadd.f32 1.0, %v14201_v21  ;;  %v18770_v54 = vpop.f32.mrf.mxu0  ;;  %13166 = vmatprep.mubr.bf16.mxu1 %v18334_v37 }
 0x623   : > { %v14205_v35 = vpop.eup %14204  ;;  %14230 = vpow2.f32 %v11935_v23  ;;  %v18773_v29 = vpop.f32.mrf.mxu1 }
 0x624   : > { %v14207_v13 = vpop.eup %14206  ;;  %v12602_v38 = vpack.c.bf16 %v14205_v35, %v14199_v32  ;;  %14232 = vrcp.f32 %v8170_v24  ;;  %v18777_v4 = vpop.f32.mrf.mxu0  ;;  %6112 = vmatmul.mubr.bf16.gmra.mxu0 %v18206_v60 }
 0x625   : > { %v14209_v28 = vpop.eup %14208  ;;  %v8092_v58 = vadd.f32 1.0, %v14207_v13  ;;  %14234 = vpow2.f32 %v12014_v26  ;;  %v18780_v21 = vpop.f32.mrf.mxu1  ;;  %6121 = vmatprep.mubr.bf16.mxu0 %v20379_v55  ;;  %v12021_v26 = vmul.f32 -1.442695, %v5841_v42  ;;  %v5843_v13 = vadd.f32 %v18623_v48, %v18392_v30  ;;  %v20468_v42 = vld [vmem:[#allocation40_spill] sm:$0xff] }
 0x626   : > { %v14211_v23 = vpop.eup %14210  ;;  %10811 = vst [vmem:[%s18458_s29 + $0xa8] sm:$0xff] %v12602_v38  ;;  %v12647_v32 = vpack.c.bf16 %v14209_v28, %v14203_v63  ;;  %14236 = vpow2.f32 %v11936_v40  ;;  %v18786_v24 = vpop.f32.mrf.mxu0  ;;  %v11943_v38 = vmul.f32 -1.442695, %v5434_v20  ;;  %v5438_v28 = vadd.f32 %v18625_v41, %v18467_v57  ;;  %v20470_v20 = vld [vmem:[#allocation45_spill] sm:$0xff] }
 0x627   : > { %v14213_v35 = vpop.eup %14212  ;;  %14238 = vrcp.f32 %v8092_v58  ;;  %v8171_v60 = vadd.f32 1.0, %v14211_v23  ;;  %v18793_v61 = vpop.f32.mrf.mxu1 }
 0x628   : > { %v14215_v37 = vpop.eup %14214  ;;  %10856 = vst [vmem:[%s18458_s29 + $0x1e4] sm:$0xff] %v12647_v32  ;;  %14240 = vpow2.f32 %v12015_v0  ;;  %v18791_v56 = vpop.f32.mrf.mxu0  ;;  %v12022_v32 = vmul.f32 -1.442695, %v5843_v13 }
 0x629   : > { %v14217_v63 = vpop.eup %14216  ;;  %14242 = vrcp.f32 %v8171_v60  ;;  %v8098_v40 = vadd.f32 1.0, %v14215_v37  ;;  %13167 = vmatmul.mubr.bf16.gmra.mxu1 %v18341_v3  ;;  %v5845_v60 = vadd.f32 %v18630_v17, %v18386_v33 }
 0x62a   : > { %v14219_v59 = vpop.eup %14218  ;;  %14244 = vpow2.f32 %v11942_v19  ;;  %v18798_v0 = vpop.f32.mrf.mxu0  ;;  %13170 = vmatprep.mubr.bf16.mxu1 %v20468_v42 }
 0x62b   : > { %20467 = vst [vmem:[#allocation65_spill] sm:$0xff] %v18798_v0  ;;  %v14221_v48 = vpop.eup %14220  ;;  %14246 = vrcp.f32 %v8098_v40  ;;  %v8177_v58 = vadd.f32 1.0, %v14219_v59  ;;  %v18806_v42 = vpop.f32.mrf.mxu1 }
 0x62c   : > { %v14223_v23 = vpop.eup %14222  ;;  %v12606_v37 = vpack.c.bf16 %v14221_v48, %v14213_v35  ;;  %14248 = vpow2.f32 %v12021_v26  ;;  %v18803_v19 = vpop.f32.mrf.mxu0  ;;  %6122 = vmatmul.mubr.bf16.gmra.mxu0 %v20470_v20  ;;  %v11949_v26 = vmul.f32 -1.442695, %v5438_v28  ;;  %v20471_v48 = vld [vmem:[#allocation60_spill] sm:$0xff] }
 0x62d   : > { %20469 = vst [vmem:[#allocation66_spill] sm:$0xff] %v18803_v19  ;;  %v14225_v41 = vpop.eup %14224  ;;  %14250 = vrcp.f32 %v8177_v58  ;;  %v8099_v3 = vadd.f32 1.0, %v14223_v23  ;;  %6131 = vmatprep.mubr.bf16.mxu0 %v20379_v55  ;;  %v5440_v20 = vadd.f32 %v20471_v48, %v18475_v53  ;;  %v12028_v58 = vmul.f32 -1.442695, %v5845_v60  ;;  %v20473_v28 = vld [vmem:[#allocation32_spill] sm:$0xff] }
 0x62e   : > { %v14227_v40 = vpop.eup %14226  ;;  %10815 = vst [vmem:[%s18458_s29 + $0xc4] sm:$0xff] %v12606_v37  ;;  %v12651_v35 = vpack.c.bf16 %v14225_v41, %v14217_v63  ;;  %14252 = vpow2.f32 %v11943_v38  ;;  %v18810_v13 = vpop.f32.mrf.mxu0  ;;  %v5847_v63 = vadd.f32 %v18638_v2, %v18392_v30 }
 0x62f   : > { %v14229_v17 = vpop.eup %14228  ;;  %14254 = vrcp.f32 %v8099_v3  ;;  %v8178_v59 = vadd.f32 1.0, %v14227_v40  ;;  %v18819_v38 = vpop.f32.mrf.mxu1  ;;  %v20475_v40 = vld [vmem:[#allocation41_spill] sm:$0xff] }
 0x630   : > { %v14231_v19 = vpop.eup %14230  ;;  %10860 = vst [vmem:[%s18458_s29 + $0x200] sm:$0xff] %v12651_v35  ;;  %14256 = vpow2.f32 %v12022_v32  ;;  %v18815_v23 = vpop.f32.mrf.mxu0  ;;  %v11950_v35 = vmul.f32 -1.442695, %v5440_v20 }
 0x631   : > { %20472 = vst [vmem:[#allocation45_spill] sm:$0xff] %v18815_v23  ;;  %v14233_v0 = vpop.eup %14232  ;;  %14258 = vrcp.f32 %v8178_v59  ;;  %v8105_v37 = vadd.f32 1.0, %v14231_v19  ;;  %13171 = vmatmul.mubr.bf16.gmra.mxu1 %v20473_v28  ;;  %v5442_v19 = vadd.f32 %v18642_v18, %v18467_v57  ;;  %v20476_v28 = vld [vmem:[#allocation37_spill] sm:$0xff] }
 0x632   : > { %v14235_v3 = vpop.eup %14234  ;;  %14260 = vpow2.f32 %v11949_v26  ;;  %v18822_v41 = vpop.f32.mrf.mxu0  ;;  %13174 = vmatprep.mubr.bf16.mxu1 %v20475_v40 }
 0x633   : > { %20474 = vst [vmem:[#allocation60_spill] sm:$0xff] %v18822_v41  ;;  %v14237_v32 = vpop.eup %14236  ;;  %14262 = vrcp.f32 %v8105_v37  ;;  %v8184_v60 = vadd.f32 1.0, %v14235_v3  ;;  %v12029_v41 = vmul.f32 -1.442695, %v5847_v63  ;;  %v5851_v37 = vadd.f32 %v18645_v52, %v18386_v33  ;;  %v18832_v3 = vpop.f32.mrf.mxu1 }
 0x634   : > { %v14239_v59 = vpop.eup %14238  ;;  %v8106_v48 = vadd.f32 1.0, %v14237_v32  ;;  %14264 = vpow2.f32 %v12028_v58  ;;  %v18827_v2 = vpop.f32.mrf.mxu0  ;;  %6132 = vmatmul.mubr.bf16.gmra.mxu0 %v20476_v28  ;;  %v5444_v63 = vadd.f32 %v18650_v9, %v18475_v53 }
 0x635   : > { %v14241_v26 = vpop.eup %14240  ;;  %v12610_v23 = vpack.c.bf16 %v14239_v59, %v14229_v17  ;;  %14266 = vrcp.f32 %v8184_v60  ;;  %6141 = vmatprep.mubr.bf16.mxu0 %v20379_v55  ;;  %v11956_v17 = vmul.f32 -1.442695, %v5442_v19  ;;  %v20479_v19 = vld [vmem:[#allocation42_spill] sm:$0xff] }
 0x636   : > { %v14243_v18 = vpop.eup %14242  ;;  %14268 = vrcp.f32 %v8106_v48  ;;  %v8185_v20 = vadd.f32 1.0, %v14241_v26  ;;  %v18835_v58 = vpop.f32.mrf.mxu0  ;;  %v12035_v48 = vmul.f32 -1.442695, %v5851_v37  ;;  %v5853_v26 = vadd.f32 %v18653_v10, %v18392_v30 }
 0x637   : > { %20477 = vst [vmem:[#allocation37_spill] sm:$0xff] %v18835_v58  ;;  %v14245_v32 = vpop.eup %14244  ;;  %10819 = vst [vmem:[%s18458_s29 + $0xe0] sm:$0xff] %v12610_v23  ;;  %v12655_v28 = vpack.c.bf16 %v14243_v18, %v14233_v0  ;;  %14270 = vpow2.f32 %v11950_v35  ;;  %v18845_v58 = vpop.f32.mrf.mxu1  ;;  %v20478_v0 = vld [vmem:[#allocation33_spill] sm:$0xff] }
 0x638   : > { %v14247_v60 = vpop.eup %14246  ;;  %14272 = vrcp.f32 %v8185_v20  ;;  %v8112_v52 = vadd.f32 1.0, %v14245_v32  ;;  %v18840_v59 = vpop.f32.mrf.mxu0  ;;  %v11957_v20 = vmul.f32 -1.442695, %v5444_v63 }
 0x639   : > { %v14249_v40 = vpop.eup %14248  ;;  %10864 = vst [vmem:[%s18458_s29 + $0x21c] sm:$0xff] %v12655_v28  ;;  %14274 = vpow2.f32 %v12029_v41  ;;  %13175 = vmatmul.mubr.bf16.gmra.mxu1 %v20478_v0  ;;  %v5448_v41 = vadd.f32 %v18657_v51, %v18467_v57  ;;  %v20481_v28 = vld [vmem:[#allocation46_spill] sm:$0xff]  ;;  %v12036_v0 = vmul.f32 -1.442695, %v5853_v26 }
 0x63a   : > { %v14251_v23 = vpop.eup %14250  ;;  %14276 = vrcp.f32 %v8112_v52  ;;  %v8191_v35 = vadd.f32 1.0, %v14249_v40  ;;  %v18848_v9 = vpop.f32.mrf.mxu0  ;;  %13178 = vmatprep.mubr.bf16.mxu1 %v20479_v19  ;;  %v5855_v19 = vadd.f32 %v18660_v36, %v18386_v33 }
 0x63b   : > { %v14253_v18 = vpop.eup %14252  ;;  %14278 = vpow2.f32 %v11956_v17  ;;  %v18858_v17 = vpop.f32.mrf.mxu1 }
 0x63c   : > { %v14255_v37 = vpop.eup %14254  ;;  %14280 = vrcp.f32 %v8191_v35  ;;  %v8113_v10 = vadd.f32 1.0, %v14253_v18  ;;  %v18853_v32 = vpop.f32.mrf.mxu0  ;;  %6142 = vmatmul.mubr.bf16.gmra.mxu0 %v20481_v28  ;;  %v5450_v35 = vadd.f32 %v18666_v25, %v18475_v53 }
 0x63d   : > { %20480 = vst [vmem:[#allocation67_spill] sm:$0xff] %v18853_v32  ;;  %v14257_v52 = vpop.eup %14256  ;;  %v12614_v40 = vpack.c.bf16 %v14255_v37, %v14247_v60  ;;  %14282 = vpow2.f32 %v12035_v48  ;;  %6151 = vmatprep.mubr.bf16.mxu0 %v20379_v55  ;;  %v11963_v48 = vmul.f32 -1.442695, %v5448_v41  ;;  %v5857_v37 = vadd.f32 %v18668_v46, %v18392_v30  ;;  %v18871_v25 = vpop.f32.mrf.mxu1  ;;  %v20484_v46 = vld [vmem:[#allocation35_spill] sm:$0xff] }
 0x63e   : > { %v14259_v51 = vpop.eup %14258  ;;  %14284 = vrcp.f32 %v8113_v10  ;;  %v8192_v63 = vadd.f32 1.0, %v14257_v52  ;;  %v18863_v18 = vpop.f32.mrf.mxu0  ;;  %v12042_v52 = vmul.f32 -1.442695, %v5855_v19  ;;  %v5452_v41 = vadd.f32 %v18673_v12, %v18467_v57 }
 0x63f   : > { %20482 = vst [vmem:[#allocation46_spill] sm:$0xff] %v18863_v18  ;;  %v14261_v28 = vpop.eup %14260  ;;  %10823 = vst [vmem:[%s18458_s29 + $0xfc] sm:$0xff] %v12614_v40  ;;  %v12659_v60 = vpack.c.bf16 %v14259_v51, %v14251_v23  ;;  %14286 = vpow2.f32 %v11957_v20  ;;  %v20483_v18 = vld [vmem:[#allocation34_spill] sm:$0xff]  ;;  %v11964_v20 = vmul.f32 -1.442695, %v5450_v35 }
 0x640   : > { %v14263_v26 = vpop.eup %14262  ;;  %14288 = vrcp.f32 %v8192_v63  ;;  %v8119_v36 = vadd.f32 1.0, %v14261_v28  ;;  %v18868_v32 = vpop.f32.mrf.mxu0  ;;  %v12043_v28 = vmul.f32 -1.442695, %v5857_v37  ;;  %v20486_v35 = vld [vmem:[#allocation38_spill] sm:$0xff]  ;;  %v11970_v37 = vmul.f32 -1.442695, %v5452_v41 }
 0x641   : > { %v14265_v10 = vpop.eup %14264  ;;  %10868 = vst [vmem:[%s18458_s29 + $0x238] sm:$0xff] %v12659_v60  ;;  %14290 = vpow2.f32 %v12036_v0  ;;  %13179 = vmatmul.mubr.bf16.gmra.mxu1 %v20483_v18  ;;  %v5861_v60 = vadd.f32 %v18675_v16, %v18386_v33  ;;  %v18884_v18 = vpop.f32.mrf.mxu1  ;;  %v5454_v16 = vadd.f32 %v18680_v7, %v18475_v53  ;;  %v20488_v7 = vld [vmem:[#allocation44_spill] sm:$0xff] }
 0x642   : > { %v14267_v40 = vpop.eup %14266  ;;  %14292 = vrcp.f32 %v8119_v36  ;;  %v8198_v23 = vadd.f32 1.0, %v14265_v10  ;;  %v18876_v51 = vpop.f32.mrf.mxu0  ;;  %13182 = vmatprep.mubr.bf16.mxu1 %v20484_v46 }
 0x643   : > { %v14269_v63 = vpop.eup %14268  ;;  %14294 = vpow2.f32 %v11963_v48  ;;  %v18897_v41 = vpop.f32.mrf.mxu1 }
 0x644   : > { %v14271_v0 = vpop.eup %14270  ;;  %v12618_v19 = vpack.c.bf16 %v14269_v63, %v14263_v26  ;;  %14296 = vrcp.f32 %v8198_v23  ;;  %v18881_v36 = vpop.f32.mrf.mxu0  ;;  %6152 = vmatmul.mubr.bf16.gmra.mxu0 %v20486_v35 }
 0x645   : > { %20485 = vst [vmem:[#allocation68_spill] sm:$0xff] %v18881_v36  ;;  %v14273_v10 = vpop.eup %14272  ;;  %v8120_v12 = vadd.f32 1.0, %v14271_v0  ;;  %14298 = vpow2.f32 %v12042_v52  ;;  %6161 = vmatprep.mubr.bf16.mxu0 %v20379_v55  ;;  %v12049_v52 = vmul.f32 -1.442695, %v5861_v60  ;;  %v5863_v0 = vadd.f32 %v18683_v45, %v18392_v30  ;;  %v20490_v60 = vld [vmem:[#allocation56_spill] sm:$0xff] }
 0x646   : > { %v14275_v48 = vpop.eup %14274  ;;  %10827 = vst [vmem:[%s18458_s29 + $0x118] sm:$0xff] %v12618_v19  ;;  %v12663_v26 = vpack.c.bf16 %v14273_v10, %v14267_v40  ;;  %14300 = vpow2.f32 %v11964_v20  ;;  %v18890_v23 = vpop.f32.mrf.mxu0  ;;  %v11971_v10 = vmul.f32 -1.442695, %v5454_v16 }
 0x647   : > { %v14277_v63 = vpop.eup %14276  ;;  %14302 = vrcp.f32 %v8120_v12  ;;  %v8199_v35 = vadd.f32 1.0, %v14275_v48  ;;  %v5458_v12 = vadd.f32 %v18687_v8, %v18467_v57 }
 0x648   : > { %v14279_v46 = vpop.eup %14278  ;;  %10872 = vst [vmem:[%s18458_s29 + $0x254] sm:$0xff] %v12663_v26  ;;  %14304 = vpow2.f32 %v12043_v28  ;;  %v18895_v36 = vpop.f32.mrf.mxu0 }
 0x649   : > { %20487 = vst [vmem:[#allocation38_spill] sm:$0xff] %v18895_v36  ;;  %v14281_v40 = vpop.eup %14280  ;;  %14306 = vrcp.f32 %v8199_v35  ;;  %v8126_v20 = vadd.f32 1.0, %v14279_v46  ;;  %13183 = vmatmul.mubr.bf16.gmra.mxu1 %v20488_v7  ;;  %v12050_v35 = vmul.f32 -1.442695, %v5863_v0  ;;  %v20491_v7 = vld [vmem:[#allocation61_spill] sm:$0xff] }
 0x64a   : > { %v14283_v19 = vpop.eup %14282  ;;  %14308 = vpow2.f32 %v11970_v37  ;;  %v18902_v28 = vpop.f32.mrf.mxu0  ;;  %13186 = vmatprep.mubr.bf16.mxu1 %v20490_v60  ;;  %v5865_v36 = vadd.f32 %v20491_v7, %v18386_v33  ;;  %v20492_v37 = vld [vmem:[#allocation39_spill] sm:$0xff] }
 0x64b   : > { %20489 = vst [vmem:[#allocation69_spill] sm:$0xff] %v18902_v28  ;;  %v14285_v45 = vpop.eup %14284  ;;  %14310 = vrcp.f32 %v8126_v20  ;;  %v8205_v48 = vadd.f32 1.0, %v14283_v19  ;;  %v18908_v28 = vpop.f32.mrf.mxu1  ;;  %v5460_v19 = vadd.f32 %v18694_v50, %v18475_v53 }
 0x64c   : > { %v14287_v26 = vpop.eup %14286  ;;  %v12622_v46 = vpack.c.bf16 %v14285_v45, %v14277_v63  ;;  %14312 = vpow2.f32 %v12049_v52  ;;  %6162 = vmatmul.mubr.bf16.gmra.mxu0 %v20492_v37  ;;  %v18910_v60 = vpop.f32.mrf.mxu0  ;;  %v11977_v52 = vmul.f32 -1.442695, %v5458_v12 }
 0x64d   : > { %v14289_v16 = vpop.eup %14288  ;;  %14314 = vrcp.f32 %v8205_v48  ;;  %v8127_v8 = vadd.f32 1.0, %v14287_v26  ;;  %20493 = vst [vmem:[#allocation61_spill] sm:$0xff] %v18910_v60  ;;  %6171 = vmatprep.mubr.bf16.mxu0 %v20379_v55  ;;  %v12056_v48 = vmul.f32 -1.442695, %v5865_v36  ;;  %v5867_v60 = vadd.f32 %v18698_v43, %v18392_v30 }
 0x64e   : > { %v14291_v20 = vpop.eup %14290  ;;  %10831 = vst [vmem:[%s18458_s29 + $0x134] sm:$0xff] %v12622_v46  ;;  %v12667_v63 = vpack.c.bf16 %v14289_v16, %v14281_v40  ;;  %14316 = vpow2.f32 %v11971_v10  ;;  %v18919_v46 = vpop.f32.mrf.mxu1  ;;  %v20494_v10 = vld [vmem:[#allocation57_spill] sm:$0xff]  ;;  %v20495_v16 = vld [vmem:[#allocation58_spill] sm:$0xff]  ;;  %v11978_v36 = vmul.f32 -1.442695, %v5460_v19 }
 0x64f   : > { %v14293_v0 = vpop.eup %14292  ;;  %14318 = vrcp.f32 %v8127_v8  ;;  %v8206_v7 = vadd.f32 1.0, %v14291_v20  ;;  %v18921_v40 = vpop.f32.mrf.mxu0  ;;  %v5462_v8 = vadd.f32 %v18701_v39, %v18467_v57 }
 0x650   : > { %v14295_v45 = vpop.eup %14294  ;;  %10876 = vst [vmem:[%s18458_s29 + $0x270] sm:$0xff] %v12667_v63  ;;  %14320 = vpow2.f32 %v12050_v35  ;;  %v20496_v63 = vld [vmem:[#allocation47_spill] sm:$0xff] }
 0x651   : > { %v14297_v26 = vpop.eup %14296  ;;  %14322 = vrcp.f32 %v8206_v7  ;;  %v8133_v37 = vadd.f32 1.0, %v14295_v45  ;;  %13187 = vmatmul.mubr.bf16.gmra.mxu1 %v20494_v10  ;;  %v12057_v10 = vmul.f32 -1.442695, %v5867_v60  ;;  %v18932_v19 = vpop.f32.mrf.mxu0  ;;  %v5464_v60 = vadd.f32 %v18708_v62, %v18475_v53 }
 0x652   : > { %v14299_v12 = vpop.eup %14298  ;;  %14324 = vpow2.f32 %v11977_v52  ;;  %13190 = vmatprep.mubr.bf16.mxu1 %v20495_v16  ;;  %v5871_v52 = vadd.f32 %v18705_v44, %v18386_v33  ;;  %v18930_v16 = vpop.f32.mrf.mxu1 }
 0x653   : > { %v14301_v50 = vpop.eup %14300  ;;  %14326 = vrcp.f32 %v8133_v37  ;;  %v8212_v35 = vadd.f32 1.0, %v14299_v12 }
 0x654   : > { %v14303_v20 = vpop.eup %14302  ;;  %v8134_v43 = vadd.f32 1.0, %v14301_v50  ;;  %14328 = vpow2.f32 %v12056_v48  ;;  %6172 = vmatmul.mubr.bf16.gmra.mxu0 %v20496_v63  ;;  %v5873_v63 = vadd.f32 %v18713_v5, %v18392_v30  ;;  %v20500_v5 = vld [vmem:[#allocation48_spill] sm:$0xff] }
 0x655   : > { %v14305_v7 = vpop.eup %14304  ;;  %v12626_v45 = vpack.c.bf16 %v14303_v20, %v14293_v0  ;;  %14330 = vrcp.f32 %v8212_v35  ;;  %6181 = vmatprep.mubr.bf16.mxu0 %v20379_v55  ;;  %v11984_v0 = vmul.f32 -1.442695, %v5462_v8  ;;  %v12063_v20 = vmul.f32 -1.442695, %v5871_v52 }
 0x656   : > { %v14307_v39 = vpop.eup %14306  ;;  %14332 = vrcp.f32 %v8134_v43  ;;  %v8213_v37 = vadd.f32 1.0, %v14305_v7  ;;  %v18941_v43 = vpop.f32.mrf.mxu1 }
 0x657   : > { %v14309_v48 = vpop.eup %14308  ;;  %10835 = vst [vmem:[%s18458_s29 + $0x150] sm:$0xff] %v12626_v45  ;;  %v12671_v12 = vpack.c.bf16 %v14307_v39, %v14297_v26  ;;  %14334 = vpow2.f32 %v11978_v36  ;;  %v18943_v7 = vpop.f32.mrf.mxu0  ;;  %v20498_v26 = vld [vmem:[#allocation59_spill] sm:$0xff]  ;;  %v11985_v45 = vmul.f32 -1.442695, %v5464_v60  ;;  %v20499_v39 = vld [vmem:[#allocation62_spill] sm:$0xff] }
 0x658   : > { %v14311_v50 = vpop.eup %14310  ;;  %14336 = vrcp.f32 %v8213_v37  ;;  %v8140_v44 = vadd.f32 1.0, %v14309_v48  ;;  %20497 = vst [vmem:[#allocation39_spill] sm:$0xff] %v18943_v7  ;;  %v5468_v37 = vadd.f32 %v20499_v39, %v18467_v57  ;;  %v12064_v7 = vmul.f32 -1.442695, %v5873_v63 }
 0x659   : > { %v14313_v35 = vpop.eup %14312  ;;  %10880 = vst [vmem:[%s18458_s29 + $0x28c] sm:$0xff] %v12671_v12  ;;  %14338 = vpow2.f32 %v12057_v10  ;;  %13191 = vmatmul.mubr.bf16.gmra.mxu1 %v20498_v26  ;;  %v20501_v26 = vld [vmem:[#allocation63_spill] sm:$0xff] }
 0x65a   : > { %v14315_v36 = vpop.eup %14314  ;;  %14340 = vrcp.f32 %v8140_v44  ;;  %v8219_v8 = vadd.f32 1.0, %v14313_v35  ;;  %v5875_v44 = vadd.f32 %v20501_v26, %v18386_v33  ;;  %v18951_v35 = vpop.f32.mrf.mxu0  ;;  %v5877_v26 = vadd.f32 %v18728_v22, %v18392_v30 }
 0x65b   : > { %v14317_v62 = vpop.eup %14316  ;;  %14342 = vpow2.f32 %v11984_v0  ;;  %20502 = vst [vmem:[#allocation47_spill] sm:$0xff] %v18951_v35 }
 0x65c   : > { %v14319_v10 = vpop.eup %14318  ;;  %14344 = vrcp.f32 %v8219_v8  ;;  %v8141_v52 = vadd.f32 1.0, %v14317_v62  ;;  %6182 = vmatmul.mubr.bf16.gmra.mxu0 %v20500_v5  ;;  %v5470_v8 = vadd.f32 %v18723_v27, %v18475_v53  ;;  %v12070_v5 = vmul.f32 -1.442695, %v5875_v44  ;;  %v20503_v44 = vld [vmem:[#allocation43_spill] sm:$0xff] }
 0x65d   : > { %v14321_v48 = vpop.eup %14320  ;;  %v12630_v12 = vpack.c.bf16 %v14319_v10, %v14311_v50  ;;  %14346 = vpow2.f32 %v12063_v20  ;;  %6191 = vmatprep.mubr.bf16.mxu0 %v20379_v55  ;;  %v11991_v50 = vmul.f32 -1.442695, %v5468_v37  ;;  %v12071_v22 = vmul.f32 -1.442695, %v5877_v26 }
 0x65e   : > { %v14323_v0 = vpop.eup %14322  ;;  %14348 = vrcp.f32 %v8141_v52  ;;  %v8220_v60 = vadd.f32 1.0, %v14321_v48  ;;  %v18960_v52 = vpop.f32.mrf.mxu0  ;;  %v11992_v35 = vmul.f32 -1.442695, %v5470_v8 }
 0x65f   : > { %v14325_v62 = vpop.eup %14324  ;;  %10839 = vst [vmem:[%s18458_s29 + $0x16c] sm:$0xff] %v12630_v12  ;;  %v12675_v39 = vpack.c.bf16 %v14323_v0, %v14315_v36  ;;  %14350 = vpow2.f32 %v11985_v45  ;;  %v5472_v36 = vadd.f32 %v18730_v14, %v18467_v57 }
 0x660   : > { %v14327_v20 = vpop.eup %14326  ;;  %14352 = vrcp.f32 %v8220_v60  ;;  %v8147_v63 = vadd.f32 1.0, %v14325_v62  ;;  %v18967_v8 = vpop.f32.mrf.mxu0 }
 0x661   : > { %v14329_v10 = vpop.eup %14328  ;;  %10884 = vst [vmem:[%s18458_s29 + $0x2a8] sm:$0xff] %v12675_v39  ;;  %14354 = vpow2.f32 %v12064_v7  ;;  %v5881_v7 = vadd.f32 %v18735_v31, %v18386_v33  ;;  %v11998_v39 = vmul.f32 -1.442695, %v5472_v36 }
 0x662   : > { %v14331_v48 = vpop.eup %14330  ;;  %14356 = vrcp.f32 %v8147_v63  ;;  %v8226_v27 = vadd.f32 1.0, %v14329_v10  ;;  %v5883_v10 = vadd.f32 %v18743_v34, %v18392_v30  ;;  %v5885_v34 = vadd.f32 %v18750_v1, %v18386_v33  ;;  %v20505_v1 = vld [vmem:[#allocation64_spill] sm:$0xff] }
 0x663   : > { %v14333_v45 = vpop.eup %14332  ;;  %14358 = vpow2.f32 %v11991_v50  ;;  %v5474_v50 = vadd.f32 %v18738_v49, %v18475_v53  ;;  %v12077_v26 = vmul.f32 -1.442695, %v5881_v7  ;;  %v5478_v49 = vadd.f32 %v18745_v47, %v18467_v57 }
 0x664   : > { %v14335_v37 = vpop.eup %14334  ;;  %v12634_v12 = vpack.c.bf16 %v14333_v45, %v14327_v20  ;;  %14360 = vrcp.f32 %v8226_v27  ;;  %6192 = vmatmul.mubr.bf16.gmra.mxu0 %v20503_v44  ;;  %v18976_v45 = vpop.f32.mrf.mxu0  ;;  %v12078_v7 = vmul.f32 -1.442695, %v5883_v10  ;;  %v20504_v44 = vld [vmem:[#allocation49_spill] sm:$0xff] }
 0x665   : > { %v14337_v0 = vpop.eup %14336  ;;  %v8148_v60 = vadd.f32 1.0, %v14335_v37  ;;  %14362 = vpow2.f32 %v12070_v5  ;;  %6201 = vmatprep.mubr.bf16.mxu0 %v20379_v55 }
 0x666   : > { %v14339_v14 = vpop.eup %14338  ;;  %10843 = vst [vmem:[%s18458_s29 + $0x188] sm:$0xff] %v12634_v12  ;;  %v12679_v62 = vpack.c.bf16 %v14337_v0, %v14331_v48  ;;  %14364 = vpow2.f32 %v11992_v35  ;;  %v11999_v48 = vmul.f32 -1.442695, %v5474_v50 }
 0x667   : > { %v14341_v20 = vpop.eup %14340  ;;  %14366 = vrcp.f32 %v8148_v60  ;;  %v8227_v31 = vadd.f32 1.0, %v14339_v14  ;;  %v18983_v14 = vpop.f32.mrf.mxu0 }
 0x668   : > { %v14343_v63 = vpop.eup %14342  ;;  %10888 = vst [vmem:[%s18458_s29 + $0x2c4] sm:$0xff] %v12679_v62  ;;  %14368 = vpow2.f32 %v12071_v22 }
 0x669   : > { %v14345_v5 = vpop.eup %14344  ;;  %14370 = vrcp.f32 %v8227_v31  ;;  %v8154_v27 = vadd.f32 1.0, %v14343_v63  ;;  %v5480_v31 = vadd.f32 %v20505_v1, %v18475_v53 }
 0x66a   : > { %v14347_v35 = vpop.eup %14346  ;;  %14372 = vpow2.f32 %v11998_v39  ;;  %v12005_v39 = vmul.f32 -1.442695, %v5478_v49 }
 0x66b   : > { %v14349_v36 = vpop.eup %14348  ;;  %14374 = vrcp.f32 %v8154_v27  ;;  %v8233_v37 = vadd.f32 1.0, %v14347_v35  ;;  %v5887_v35 = vadd.f32 %v18758_v11, %v18392_v30 }
 0x66c   : > { %v14351_v12 = vpop.eup %14350  ;;  %v12638_v22 = vpack.c.bf16 %v14349_v36, %v14341_v20  ;;  %14376 = vpow2.f32 %v12077_v26  ;;  %6202 = vmatmul.mubr.bf16.gmra.mxu0 %v20504_v44  ;;  %v12084_v26 = vmul.f32 -1.442695, %v5885_v34  ;;  %v18992_v36 = vpop.f32.mrf.mxu0  ;;  %v20506_v34 = vld [vmem:[#allocation50_spill] sm:$0xff] }
 0x66d   : > { %v14353_v0 = vpop.eup %14352  ;;  %14378 = vrcp.f32 %v8233_v37  ;;  %v8155_v60 = vadd.f32 1.0, %v14351_v12  ;;  %6211 = vmatprep.mubr.bf16.mxu0 %v20379_v55  ;;  %v12006_v37 = vmul.f32 -1.442695, %v5480_v31  ;;  %v5482_v12 = vadd.f32 %v18762_v6, %v18467_v57 }
 0x66e   : > { %v14355_v47 = vpop.eup %14354  ;;  %10847 = vst [vmem:[%s18458_s29 + $0x1a4] sm:$0xff] %v12638_v22  ;;  %v12683_v62 = vpack.c.bf16 %v14353_v0, %v14345_v5  ;;  %14380 = vpow2.f32 %v11999_v48  ;;  %v12085_v11 = vmul.f32 -1.442695, %v5887_v35 }
 0x66f   : > { %v14357_v50 = vpop.eup %14356  ;;  %14382 = vrcp.f32 %v8155_v60  ;;  %v8234_v20 = vadd.f32 1.0, %v14355_v47  ;;  %v5891_v60 = vadd.f32 %v18765_v15, %v18386_v33  ;;  %v18999_v47 = vpop.f32.mrf.mxu0  ;;  %v12012_v1 = vmul.f32 -1.442695, %v5482_v12 }
 0x670   : > { %v14359_v63 = vpop.eup %14358  ;;  %10892 = vst [vmem:[%s18458_s29 + $0x2e0] sm:$0xff] %v12683_v62  ;;  %14384 = vpow2.f32 %v12078_v7 }
 0x671   : > { %v14361_v10 = vpop.eup %14360  ;;  %14386 = vrcp.f32 %v8234_v20  ;;  %v8161_v27 = vadd.f32 1.0, %v14359_v63  ;;  %v19008_v35 = vpop.f32.mrf.mxu0 }
 0x672   : > { %v14363_v5 = vpop.eup %14362  ;;  %14388 = vpow2.f32 %v12005_v39 }
 0x673   : > { %v14365_v48 = vpop.eup %14364  ;;  %14390 = vrcp.f32 %v8161_v27  ;;  %v8240_v49 = vadd.f32 1.0, %v14363_v5  ;;  %v5893_v27 = vadd.f32 %v18773_v29, %v18392_v30 }
 0x674   : > { %v14367_v22 = vpop.eup %14366  ;;  %v8162_v7 = vadd.f32 1.0, %v14365_v48  ;;  %14392 = vpow2.f32 %v12084_v26  ;;  %6212 = vmatmul.mubr.bf16.gmra.mxu0 %v20506_v34  ;;  %v12091_v26 = vmul.f32 -1.442695, %v5891_v60  ;;  %v5490_v60 = vadd.f32 %v18786_v24, %v18475_v53 }
 0x675   : > { %v14369_v44 = vpop.eup %14368  ;;  %v12642_v0 = vpack.c.bf16 %v14367_v22, %v14357_v50  ;;  %14394 = vrcp.f32 %v8240_v49  ;;  %6221 = vmatprep.mubr.bf16.mxu0 %v20379_v55  ;;  %v5484_v50 = vadd.f32 %v18770_v54, %v18475_v53  ;;  %v5488_v54 = vadd.f32 %v18777_v4, %v18467_v57  ;;  %v20507_v22 = vld [vmem:[#allocation51_spill] sm:$0xff] }
 0x676   : > { %v14371_v62 = vpop.eup %14370  ;;  %14396 = vrcp.f32 %v8162_v7  ;;  %v8241_v6 = vadd.f32 1.0, %v14369_v44  ;;  %v12092_v29 = vmul.f32 -1.442695, %v5893_v27  ;;  %v5895_v44 = vadd.f32 %v18780_v21, %v18386_v33 }
 0x677   : > { %v14373_v39 = vpop.eup %14372  ;;  %10851 = vst [vmem:[%s18458_s29 + $0x1c0] sm:$0xff] %v12642_v0  ;;  %v12687_v20 = vpack.c.bf16 %v14371_v62, %v14361_v10  ;;  %14398 = vpow2.f32 %v12006_v37  ;;  %v12013_v49 = vmul.f32 -1.442695, %v5484_v50  ;;  %v19015_v0 = vpop.f32.mrf.mxu0  ;;  %v5897_v21 = vadd.f32 %v18793_v61, %v18392_v30 }
 0x678   : > { %v14375_v31 = vpop.eup %14374  ;;  %14400 = vrcp.f32 %v8241_v6  ;;  %v8168_v63 = vadd.f32 1.0, %v14373_v39  ;;  %v12019_v39 = vmul.f32 -1.442695, %v5488_v54  ;;  %v5492_v27 = vadd.f32 %v18791_v56, %v18467_v57 }
 0x679   : > { %v14377_v15 = vpop.eup %14376  ;;  %10896 = vst [vmem:[%s18458_s29 + $0x2fc] sm:$0xff] %v12687_v20  ;;  %14402 = vpow2.f32 %v12085_v11  ;;  %v12099_v61 = vmul.f32 -1.442695, %v5897_v21 }
 0x67a   : > { %v14379_v5 = vpop.eup %14378  ;;  %14404 = vrcp.f32 %v8168_v63  ;;  %v8247_v10 = vadd.f32 1.0, %v14377_v15  ;;  %v19024_v63 = vpop.f32.mrf.mxu0  ;;  %v12026_v56 = vmul.f32 -1.442695, %v5492_v27 }
 0x67b   : > { %v14381_v48 = vpop.eup %14380  ;;  %14406 = vpow2.f32 %v12012_v1 }
 0x67c   : > { %v14383_v37 = vpop.eup %14382  ;;  %14408 = vrcp.f32 %v8247_v10  ;;  %v8169_v12 = vadd.f32 1.0, %v14381_v48  ;;  %6222 = vmatmul.mubr.bf16.gmra.mxu0 %v20507_v22  ;;  %v19030_v54 = vpop.f32.mrf.mxu0 }
 0x67d   : > { %v14385_v7 = vpop.eup %14384  ;;  %v12646_v34 = vpack.c.bf16 %v14383_v37, %v14375_v31  ;;  %14410 = vpow2.f32 %v12091_v26  ;;  %6231 = vmatprep.mubr.bf16.mxu0 %v20379_v55  ;;  %v12098_v31 = vmul.f32 -1.442695, %v5895_v44  ;;  %v12020_v26 = vmul.f32 -1.442695, %v5490_v60 }
 0x67e   : > { %v14387_v11 = vpop.eup %14386  ;;  %14412 = vrcp.f32 %v8169_v12  ;;  %v8248_v4 = vadd.f32 1.0, %v14385_v7  ;;  %v5903_v60 = vadd.f32 %v18819_v38, %v18392_v30 }
 0x67f   : > { %v14389_v62 = vpop.eup %14388  ;;  %10855 = vst [vmem:[%s18458_s29 + $0x1dc] sm:$0xff] %v12646_v34  ;;  %v12691_v6 = vpack.c.bf16 %v14387_v11, %v14379_v5  ;;  %14414 = vpow2.f32 %v12013_v49  ;;  %v5901_v49 = vadd.f32 %v18806_v42, %v18386_v33  ;;  %v20508_v34 = vld [vmem:[#allocation65_spill] sm:$0xff] }
 0x680   : > { %v14391_v20 = vpop.eup %14390  ;;  %14416 = vrcp.f32 %v8248_v4  ;;  %v8175_v1 = vadd.f32 1.0, %v14389_v62  ;;  %v19038_v62 = vpop.f32.mrf.mxu0  ;;  %v12106_v27 = vmul.f32 -1.442695, %v5903_v60 }
 0x681   : > { %v14393_v50 = vpop.eup %14392  ;;  %10900 = vst [vmem:[%s18458_s29 + $0x318] sm:$0xff] %v12691_v6  ;;  %14418 = vpow2.f32 %v12092_v29  ;;  %v5494_v29 = vadd.f32 %v20508_v34, %v18475_v53  ;;  %v12105_v42 = vmul.f32 -1.442695, %v5901_v49  ;;  %v20509_v6 = vld [vmem:[#allocation52_spill] sm:$0xff] }
 0x682   : > { %v14395_v15 = vpop.eup %14394  ;;  %14420 = vrcp.f32 %v8175_v1  ;;  %v8254_v24 = vadd.f32 1.0, %v14393_v50  ;;  %v20510_v50 = vld [vmem:[#allocation66_spill] sm:$0xff] }
 0x683   : > { %v14397_v5 = vpop.eup %14396  ;;  %14422 = vpow2.f32 %v12019_v39  ;;  %v12027_v21 = vmul.f32 -1.442695, %v5494_v29 }
 0x684   : > { %v14399_v10 = vpop.eup %14398  ;;  %v12650_v48 = vpack.c.bf16 %v14397_v5, %v14391_v20  ;;  %14424 = vrcp.f32 %v8254_v24  ;;  %6232 = vmatmul.mubr.bf16.gmra.mxu0 %v20509_v6  ;;  %v5905_v5 = vadd.f32 %v18832_v3, %v18386_v33 }
 0x685   : > { %v14401_v37 = vpop.eup %14400  ;;  %v8176_v12 = vadd.f32 1.0, %v14399_v10  ;;  %14426 = vpow2.f32 %v12098_v31  ;;  %6241 = vmatprep.mubr.bf16.mxu0 %v20379_v55  ;;  %v5498_v31 = vadd.f32 %v20510_v50, %v18467_v57 }
 0x686   : > { %v14403_v22 = vpop.eup %14402  ;;  %10859 = vst [vmem:[%s18458_s29 + $0x1f8] sm:$0xff] %v12650_v48  ;;  %v12695_v7 = vpack.c.bf16 %v14401_v37, %v14395_v15  ;;  %14428 = vpow2.f32 %v12020_v26  ;;  %v12112_v3 = vmul.f32 -1.442695, %v5905_v5 }
 0x687   : > { %v14405_v44 = vpop.eup %14404  ;;  %14430 = vrcp.f32 %v8176_v12  ;;  %v8255_v11 = vadd.f32 1.0, %v14403_v22  ;;  %v12033_v12 = vmul.f32 -1.442695, %v5498_v31 }
 0x688   : > { %v14407_v4 = vpop.eup %14406  ;;  %10904 = vst [vmem:[%s18458_s29 + $0x334] sm:$0xff] %v12695_v7  ;;  %14432 = vpow2.f32 %v12099_v61  ;;  %v19046_v61 = vpop.f32.mrf.mxu0 }
 0x689   : > { %v14409_v39 = vpop.eup %14408  ;;  %14434 = vrcp.f32 %v8255_v11  ;;  %v8182_v20 = vadd.f32 1.0, %v14407_v4  ;;  %v5907_v11 = vadd.f32 %v18845_v58, %v18392_v30  ;;  %v5911_v58 = vadd.f32 %v18858_v17, %v18386_v33 }
 0x68a   : > { %v14411_v1 = vpop.eup %14410  ;;  %14436 = vpow2.f32 %v12026_v56  ;;  %v5500_v56 = vadd.f32 %v18810_v13, %v18475_v53  ;;  %v19054_v4 = vpop.f32.mrf.mxu0  ;;  %v20511_v13 = vld [vmem:[#allocation45_spill] sm:$0xff] }
 0x68b   : > { %v14413_v15 = vpop.eup %14412  ;;  %14438 = vrcp.f32 %v8182_v20  ;;  %v8261_v24 = vadd.f32 1.0, %v14411_v1  ;;  %v5502_v20 = vadd.f32 %v20511_v13, %v18467_v57  ;;  %v12119_v17 = vmul.f32 -1.442695, %v5911_v58 }
 0x68c   : > { %v14415_v38 = vpop.eup %14414  ;;  %v12654_v26 = vpack.c.bf16 %v14413_v15, %v14405_v44  ;;  %14440 = vpow2.f32 %v12105_v42  ;;  %v12113_v15 = vmul.f32 -1.442695, %v5907_v11 }
 0x68d   : > { %v14417_v10 = vpop.eup %14416  ;;  %14442 = vrcp.f32 %v8261_v24  ;;  %v8183_v48 = vadd.f32 1.0, %v14415_v38  ;;  %v19060_v24 = vpop.f32.mrf.mxu0 }
 0x68e   : > { %v14419_v49 = vpop.eup %14418  ;;  %10863 = vst [vmem:[%s18458_s29 + $0x214] sm:$0xff] %v12654_v26  ;;  %v12699_v37 = vpack.c.bf16 %v14417_v10, %v14409_v39  ;;  %14444 = vpow2.f32 %v12027_v21  ;;  %v12034_v39 = vmul.f32 -1.442695, %v5500_v56  ;;  %v12040_v10 = vmul.f32 -1.442695, %v5502_v20 }
 0x68f   : > { %v14421_v22 = vpop.eup %14420  ;;  %14446 = vrcp.f32 %v8183_v48  ;;  %v8262_v7 = vadd.f32 1.0, %v14419_v49  ;;  %v20512_v48 = vld [vmem:[#allocation60_spill] sm:$0xff]  ;;  %v19068_v56 = vpop.f32.mrf.mxu0  ;;  %v5915_v20 = vadd.f32 %v18884_v18, %v18386_v33  ;;  %v5917_v18 = vadd.f32 %v18897_v41, %v18392_v30 }
 0x690   : > { %v14423_v34 = vpop.eup %14422  ;;  %10908 = vst [vmem:[%s18458_s29 + $0x350] sm:$0xff] %v12699_v37  ;;  %14448 = vpow2.f32 %v12106_v27  ;;  %v5504_v49 = vadd.f32 %v20512_v48, %v18475_v53 }
 0x691   : > { %v14425_v29 = vpop.eup %14424  ;;  %14450 = vrcp.f32 %v8262_v7  ;;  %v8189_v44 = vadd.f32 1.0, %v14423_v34  ;;  %v5913_v7 = vadd.f32 %v18871_v25, %v18392_v30  ;;  %v20513_v34 = vld [vmem:[#allocation53_spill] sm:$0xff]  ;;  %v12127_v41 = vmul.f32 -1.442695, %v5917_v18 }
 0x692   : > { %v14427_v42 = vpop.eup %14426  ;;  %14452 = vpow2.f32 %v12033_v12  ;;  %6242 = vmatmul.mubr.bf16.gmra.mxu0 %v20513_v34  ;;  %v12041_v11 = vmul.f32 -1.442695, %v5504_v49 }
 0x693   : > { %v14429_v60 = vpop.eup %14428  ;;  %14454 = vrcp.f32 %v8189_v44  ;;  %v8268_v6 = vadd.f32 1.0, %v14427_v42  ;;  %6251 = vmatprep.mubr.bf16.mxu0 %v20379_v55  ;;  %v5508_v42 = vadd.f32 %v18827_v2, %v18467_v57  ;;  %v12120_v13 = vmul.f32 -1.442695, %v5913_v7 }
 0x694   : > { %v14431_v1 = vpop.eup %14430  ;;  %v8190_v21 = vadd.f32 1.0, %v14429_v60  ;;  %14456 = vpow2.f32 %v12112_v3 }
 0x695   : > { %v14433_v50 = vpop.eup %14432  ;;  %v12658_v31 = vpack.c.bf16 %v14431_v1, %v14421_v22  ;;  %14458 = vrcp.f32 %v8268_v6  ;;  %v19076_v1 = vpop.f32.mrf.mxu0 }
 0x696   : > { %v14435_v38 = vpop.eup %14434  ;;  %14460 = vrcp.f32 %v8190_v21  ;;  %v8269_v26 = vadd.f32 1.0, %v14433_v50 }
 0x697   : > { %v14437_v27 = vpop.eup %14436  ;;  %10867 = vst [vmem:[%s18458_s29 + $0x230] sm:$0xff] %v12658_v31  ;;  %v12703_v5 = vpack.c.bf16 %v14435_v38, %v14425_v29  ;;  %14462 = vpow2.f32 %v12034_v39  ;;  %v20514_v31 = vld [vmem:[#allocation37_spill] sm:$0xff]  ;;  %v12047_v38 = vmul.f32 -1.442695, %v5508_v42  ;;  %v19084_v48 = vpop.f32.mrf.mxu0 }
 0x698   : > { %v14439_v37 = vpop.eup %14438  ;;  %14464 = vrcp.f32 %v8269_v26  ;;  %v8196_v12 = vadd.f32 1.0, %v14437_v27 }
 0x699   : > { %v14441_v22 = vpop.eup %14440  ;;  %10912 = vst [vmem:[%s18458_s29 + $0x36c] sm:$0xff] %v12703_v5  ;;  %14466 = vpow2.f32 %v12113_v15  ;;  %v5510_v15 = vadd.f32 %v20514_v31, %v18475_v53 }
 0x69a   : > { %v14443_v3 = vpop.eup %14442  ;;  %14468 = vrcp.f32 %v8196_v12  ;;  %v8275_v29 = vadd.f32 1.0, %v14441_v22  ;;  %v5512_v22 = vadd.f32 %v18840_v59, %v18467_v57 }
 0x69b   : > { %v14445_v44 = vpop.eup %14444  ;;  %14470 = vpow2.f32 %v12040_v10  ;;  %v12126_v10 = vmul.f32 -1.442695, %v5915_v20  ;;  %v12048_v12 = vmul.f32 -1.442695, %v5510_v15  ;;  %v5923_v20 = vadd.f32 %v18919_v46, %v18392_v30 }
 0x69c   : > { %v14447_v60 = vpop.eup %14446  ;;  %14472 = vrcp.f32 %v8275_v29  ;;  %v8197_v6 = vadd.f32 1.0, %v14445_v44  ;;  %v19090_v29 = vpop.f32.mrf.mxu0  ;;  %v12054_v59 = vmul.f32 -1.442695, %v5512_v22 }
 0x69d   : > { %v14449_v25 = vpop.eup %14448  ;;  %v12662_v39 = vpack.c.bf16 %v14447_v60, %v14439_v37  ;;  %14474 = vpow2.f32 %v12119_v17 }
 0x69e   : > { %v14451_v21 = vpop.eup %14450  ;;  %14476 = vrcp.f32 %v8197_v6  ;;  %v8276_v50 = vadd.f32 1.0, %v14449_v25  ;;  %v5514_v6 = vadd.f32 %v18848_v9, %v18475_v53 }
 0x69f   : > { %v14453_v2 = vpop.eup %14452  ;;  %10871 = vst [vmem:[%s18458_s29 + $0x24c] sm:$0xff] %v12662_v39  ;;  %v12707_v58 = vpack.c.bf16 %v14451_v21, %v14443_v3  ;;  %14478 = vpow2.f32 %v12041_v11  ;;  %v5921_v3 = vadd.f32 %v18908_v28, %v18386_v33  ;;  %v19098_v21 = vpop.f32.mrf.mxu0 }
 0x6a0   : > { %v14455_v26 = vpop.eup %14454  ;;  %14480 = vrcp.f32 %v8276_v50  ;;  %v8203_v27 = vadd.f32 1.0, %v14453_v2  ;;  %v20515_v50 = vld [vmem:[#allocation54_spill] sm:$0xff]  ;;  %v12055_v2 = vmul.f32 -1.442695, %v5514_v6  ;;  %v5930_v6 = vpop.f32.mrf.mxu1 }
 0x6a1   : > { %v14457_v5 = vpop.eup %14456  ;;  %10916 = vst [vmem:[%s18458_s29 + $0x388] sm:$0xff] %v12707_v58  ;;  %14482 = vpow2.f32 %v12120_v13  ;;  %v12133_v28 = vmul.f32 -1.442695, %v5921_v3  ;;  %6252 = vmatmul.mubr.bf16.gmra.mxu0 %v20515_v50  ;;  %v20516_v58 = vld [vmem:[#allocation67_spill] sm:$0xff]  ;;  %v20517_v3 = vld [vmem:[#allocation46_spill] sm:$0xff]  ;;  %v5522_v50 = vadd.f32 %v18868_v32, %v18467_v57 }
 0x6a2   : > { %v14459_v49 = vpop.eup %14458  ;;  %14484 = vrcp.f32 %v8203_v27  ;;  %v8282_v37 = vadd.f32 1.0, %v14457_v5  ;;  %6261 = vmatprep.mubr.bf16.mxu0 %v20379_v55  ;;  %v12134_v5 = vmul.f32 -1.442695, %v5923_v20 }
 0x6a3   : > { %v14461_v17 = vpop.eup %14460  ;;  %14486 = vpow2.f32 %v12047_v38  ;;  %v5518_v38 = vadd.f32 %v20516_v58, %v18467_v57  ;;  %v5931_v58 = vadd.f32 %v5930_v6, %v18386_v33  ;;  %v12068_v32 = vmul.f32 -1.442695, %v5522_v50 }
 0x6a4   : > { %v14463_v7 = vpop.eup %14462  ;;  %v12666_v34 = vpack.c.bf16 %v14461_v17, %v14455_v26  ;;  %14488 = vrcp.f32 %v8282_v37 }
 0x6a5   : > { %v14465_v44 = vpop.eup %14464  ;;  %v8204_v11 = vadd.f32 1.0, %v14463_v7  ;;  %14490 = vpow2.f32 %v12126_v10  ;;  %v5925_v10 = vadd.f32 %v18930_v16, %v18386_v33  ;;  %v12061_v7 = vmul.f32 -1.442695, %v5518_v38  ;;  %v5932_v38 = vpop.f32.mrf.mxu1 }
 0x6a6   : > { %v14467_v42 = vpop.eup %14466  ;;  %10875 = vst [vmem:[%s18458_s29 + $0x268] sm:$0xff] %v12666_v34  ;;  %v12711_v60 = vpack.c.bf16 %v14465_v44, %v14459_v49  ;;  %14492 = vpow2.f32 %v12048_v12  ;;  %v19106_v12 = vpop.f32.mrf.mxu0  ;;  %v5520_v44 = vadd.f32 %v20517_v3, %v18475_v53  ;;  %v20518_v3 = vld [vmem:[#allocation55_spill] sm:$0xff] }
 0x6a7   : > { %v14469_v25 = vpop.eup %14468  ;;  %14494 = vrcp.f32 %v8204_v11  ;;  %v8283_v39 = vadd.f32 1.0, %v14467_v42  ;;  %v12140_v16 = vmul.f32 -1.442695, %v5925_v10  ;;  %v5524_v10 = vadd.f32 %v18876_v51, %v18475_v53 }
 0x6a8   : > { %v14471_v13 = vpop.eup %14470  ;;  %10920 = vst [vmem:[%s18458_s29 + $0x3a4] sm:$0xff] %v12711_v60  ;;  %14496 = vpow2.f32 %v12127_v41  ;;  %v12062_v20 = vmul.f32 -1.442695, %v5520_v44 }
 0x6a9   : > { %v14473_v31 = vpop.eup %14472  ;;  %14498 = vrcp.f32 %v8283_v39  ;;  %v8210_v15 = vadd.f32 1.0, %v14471_v13 }
 0x6aa   : > { %v14475_v9 = vpop.eup %14474  ;;  %14500 = vpow2.f32 %v12054_v59  ;;  %v5927_v59 = vadd.f32 %v18941_v43, %v18392_v30 }
 0x6ab   : > { %v14477_v26 = vpop.eup %14476  ;;  %14502 = vrcp.f32 %v8210_v15  ;;  %v8289_v27 = vadd.f32 1.0, %v14475_v9 }
 0x6ac   : > { %v14479_v46 = vpop.eup %14478  ;;  %v12670_v18 = vpack.c.bf16 %v14477_v26, %v14469_v25  ;;  %14504 = vpow2.f32 %v12133_v28  ;;  %v19114_v25 = vpop.f32.mrf.mxu0  ;;  %v12141_v43 = vmul.f32 -1.442695, %v5927_v59 }
 0x6ad   : > { %v14481_v49 = vpop.eup %14480  ;;  %14506 = vrcp.f32 %v8289_v27  ;;  %v8211_v37 = vadd.f32 1.0, %v14479_v46 }
 0x6ae   : > { %v14483_v22 = vpop.eup %14482  ;;  %10879 = vst [vmem:[%s18458_s29 + $0x284] sm:$0xff] %v12670_v18  ;;  %v12715_v17 = vpack.c.bf16 %v14481_v49, %v14473_v31  ;;  %14508 = vpow2.f32 %v12055_v2  ;;  %v19119_v26 = vpop.f32.mrf.mxu0 }
 0x6af   : > { %v14485_v34 = vpop.eup %14484  ;;  %14510 = vrcp.f32 %v8211_v37  ;;  %v8290_v41 = vadd.f32 1.0, %v14483_v22 }
 0x6b0   : > { %v14487_v11 = vpop.eup %14486  ;;  %10924 = vst [vmem:[%s18458_s29 + $0x3c0] sm:$0xff] %v12715_v17  ;;  %14512 = vpow2.f32 %v12134_v5  ;;  %v12147_v17 = vmul.f32 -1.442695, %v5931_v58 }
 0x6b1   : > { %v14489_v42 = vpop.eup %14488  ;;  %14514 = vrcp.f32 %v8290_v41  ;;  %v8217_v60 = vadd.f32 1.0, %v14487_v11  ;;  %v19126_v41 = vpop.f32.mrf.mxu0  ;;  %6262 = vmatmul.mubr.bf16.gmra.mxu0 %v20518_v3 }
 0x6b2   : > { %v14491_v39 = vpop.eup %14490  ;;  %14516 = vpow2.f32 %v12061_v7  ;;  %v5933_v7 = vadd.f32 %v5932_v38, %v18392_v30  ;;  %6271 = vmatprep.mubr.bf16.mxu0 %v20379_v55 }
 0x6b3   : > { %v14493_v13 = vpop.eup %14492  ;;  %14518 = vrcp.f32 %v8217_v60  ;;  %v8296_v28 = vadd.f32 1.0, %v14491_v39 }
 0x6b4   : > { %v14495_v31 = vpop.eup %14494  ;;  %v8218_v15 = vadd.f32 1.0, %v14493_v13  ;;  %14520 = vpow2.f32 %v12140_v16  ;;  %v12069_v16 = vmul.f32 -1.442695, %v5524_v10 }
 0x6b5   : > { %v14497_v9 = vpop.eup %14496  ;;  %v12674_v2 = vpack.c.bf16 %v14495_v31, %v14485_v34  ;;  %14522 = vrcp.f32 %v8296_v28  ;;  %v5934_v34 = vpop.f32.mrf.mxu1  ;;  %v12148_v28 = vmul.f32 -1.442695, %v5933_v7 }
 0x6b6   : > { %v14499_v27 = vpop.eup %14498  ;;  %14524 = vrcp.f32 %v8218_v15  ;;  %v8297_v46 = vadd.f32 1.0, %v14497_v9  ;;  %v19133_v31 = vpop.f32.mrf.mxu0 }
 0x6b7   : > { %v14501_v18 = vpop.eup %14500  ;;  %10883 = vst [vmem:[%s18458_s29 + $0x2a0] sm:$0xff] %v12674_v2  ;;  %v12719_v5 = vpack.c.bf16 %v14499_v27, %v14489_v42  ;;  %14526 = vpow2.f32 %v12062_v20  ;;  %v20519_v42 = vld [vmem:[#allocation68_spill] sm:$0xff]  ;;  %v5935_v20 = vadd.f32 %v5934_v34, %v18386_v33  ;;  %v5936_v50 = vpop.f32.mrf.mxu1  ;;  %v5530_v2 = vadd.f32 %v18890_v23, %v18475_v53 }
 0x6b8   : > { %v14503_v49 = vpop.eup %14502  ;;  %14528 = vrcp.f32 %v8297_v46  ;;  %v8224_v37 = vadd.f32 1.0, %v14501_v18  ;;  %v5528_v60 = vadd.f32 %v20519_v42, %v18467_v57  ;;  %v5937_v18 = vadd.f32 %v5936_v50, %v18392_v30 }
 0x6b9   : > { %v14505_v22 = vpop.eup %14504  ;;  %10928 = vst [vmem:[%s18458_s29 + $0x3dc] sm:$0xff] %v12719_v5  ;;  %14530 = vpow2.f32 %v12141_v43  ;;  %v5940_v10 = vpop.f32.mrf.mxu1 }
 0x6ba   : > { %v14507_v44 = vpop.eup %14506  ;;  %14532 = vrcp.f32 %v8224_v37  ;;  %v8303_v11 = vadd.f32 1.0, %v14505_v22  ;;  %v12075_v38 = vmul.f32 -1.442695, %v5528_v60  ;;  %v12076_v22 = vmul.f32 -1.442695, %v5530_v2 }
 0x6bb   : > { %v14509_v51 = vpop.eup %14508  ;;  %14534 = vpow2.f32 %v12068_v32  ;;  %v12154_v32 = vmul.f32 -1.442695, %v5935_v20 }
 0x6bc   : > { %v14511_v59 = vpop.eup %14510  ;;  %14536 = vrcp.f32 %v8303_v11  ;;  %v8225_v6 = vadd.f32 1.0, %v14509_v51  ;;  %v12155_v11 = vmul.f32 -1.442695, %v5937_v18  ;;  %v5941_v51 = vadd.f32 %v5940_v10, %v18386_v33  ;;  %v20523_v10 = vld [vmem:[#allocation61_spill] sm:$0xff] }
 0x6bd   : > { %v14513_v39 = vpop.eup %14512  ;;  %v12678_v13 = vpack.c.bf16 %v14511_v59, %v14503_v49  ;;  %14538 = vpow2.f32 %v12147_v17  ;;  %v19140_v49 = vpop.f32.mrf.mxu0  ;;  %v20520_v17 = vld [vmem:[#allocation38_spill] sm:$0xff] }
 0x6be   : > { %v14515_v15 = vpop.eup %14514  ;;  %14540 = vrcp.f32 %v8225_v6  ;;  %v8304_v9 = vadd.f32 1.0, %v14513_v39  ;;  %v5532_v7 = vadd.f32 %v20520_v17, %v18467_v57  ;;  %v5942_v59 = vpop.f32.mrf.mxu1  ;;  %v12161_v2 = vmul.f32 -1.442695, %v5941_v51 }
 0x6bf   : > { %v14517_v43 = vpop.eup %14516  ;;  %10887 = vst [vmem:[%s18458_s29 + $0x2bc] sm:$0xff] %v12678_v13  ;;  %v12723_v58 = vpack.c.bf16 %v14515_v15, %v14507_v44  ;;  %14542 = vpow2.f32 %v12069_v16  ;;  %v19145_v16 = vpop.f32.mrf.mxu0 }
 0x6c0   : > { %v14519_v27 = vpop.eup %14518  ;;  %14544 = vrcp.f32 %v8304_v9  ;;  %v8231_v46 = vadd.f32 1.0, %v14517_v43  ;;  %v12082_v13 = vmul.f32 -1.442695, %v5532_v7  ;;  %v5943_v43 = vadd.f32 %v5942_v59, %v18392_v30  ;;  %v5944_v18 = vpop.f32.mrf.mxu1 }
 0x6c1   : > { %v14521_v5 = vpop.eup %14520  ;;  %10932 = vst [vmem:[%s18458_s29 + $0x3f8] sm:$0xff] %v12723_v58  ;;  %14546 = vpow2.f32 %v12148_v28  ;;  %v20521_v28 = vld [vmem:[#allocation69_spill] sm:$0xff]  ;;  %v19152_v58 = vpop.f32.mrf.mxu0 }
 0x6c2   : > { %v14523_v37 = vpop.eup %14522  ;;  %14548 = vrcp.f32 %v8231_v46  ;;  %v8310_v23 = vadd.f32 1.0, %v14521_v5  ;;  %v5534_v20 = vadd.f32 %v20521_v28, %v18475_v53  ;;  %v5946_v51 = vpop.f32.mrf.mxu1  ;;  %v5540_v28 = vadd.f32 %v18921_v40, %v18475_v53 }
 0x6c3   : > { %v14525_v34 = vpop.eup %14524  ;;  %14550 = vpow2.f32 %v12075_v38  ;;  %v20522_v38 = vld [vmem:[#allocation31_spill] sm:$0xff]  ;;  %v5542_v40 = vadd.f32 %v18932_v19, %v18467_v57 }
 0x6c4   : > { %v14527_v3 = vpop.eup %14526  ;;  %v12682_v44 = vpack.c.bf16 %v14525_v34, %v14519_v27  ;;  %14552 = vrcp.f32 %v8310_v23  ;;  %6272 = vmatmul.mubr.bf16.gmra.mxu0 %v20522_v38  ;;  %v12162_v34 = vmul.f32 -1.442695, %v5943_v43  ;;  %v5950_v43 = vpop.f32.mrf.mxu1 }
 0x6c5   : > { %v14529_v42 = vpop.eup %14528  ;;  %v8232_v60 = vadd.f32 1.0, %v14527_v3  ;;  %14554 = vpow2.f32 %v12154_v32  ;;  %6281 = vmatprep.mubr.bf16.mxu0 %v20379_v55  ;;  %v12083_v32 = vmul.f32 -1.442695, %v5534_v20  ;;  %v5945_v3 = vadd.f32 %v5944_v18, %v18386_v33 }
 0x6c6   : > { %v14531_v6 = vpop.eup %14530  ;;  %10891 = vst [vmem:[%s18458_s29 + $0x2d8] sm:$0xff] %v12682_v44  ;;  %v12727_v39 = vpack.c.bf16 %v14529_v42, %v14523_v37  ;;  %14556 = vpow2.f32 %v12076_v22  ;;  %v5538_v37 = vadd.f32 %v20523_v10, %v18467_v57  ;;  %v19159_v42 = vpop.f32.mrf.mxu0  ;;  %v12096_v19 = vmul.f32 -1.442695, %v5542_v40 }
 0x6c7   : > { %v14533_v50 = vpop.eup %14532  ;;  %14558 = vrcp.f32 %v8232_v60  ;;  %v8311_v15 = vadd.f32 1.0, %v14531_v6 }
 0x6c8   : > { %v14535_v9 = vpop.eup %14534  ;;  %10936 = vst [vmem:[%s18458_s29 + $0x414] sm:$0xff] %v12727_v39  ;;  %14560 = vpow2.f32 %v12155_v11  ;;  %v12089_v6 = vmul.f32 -1.442695, %v5538_v37  ;;  %v19166_v38 = vpop.f32.mrf.mxu0 }
 0x6c9   : > { %v14537_v27 = vpop.eup %14536  ;;  %14562 = vrcp.f32 %v8311_v15  ;;  %v8238_v46 = vadd.f32 1.0, %v14535_v9 }
 0x6ca   : > { %v14539_v5 = vpop.eup %14538  ;;  %14564 = vpow2.f32 %v12082_v13 }
 0x6cb   : > { %v14541_v23 = vpop.eup %14540  ;;  %14566 = vrcp.f32 %v8238_v46  ;;  %v8317_v22 = vadd.f32 1.0, %v14539_v5  ;;  %v12090_v5 = vmul.f32 -1.442695, %v5540_v28 }
 0x6cc   : > { %v14543_v17 = vpop.eup %14542  ;;  %v12686_v7 = vpack.c.bf16 %v14541_v23, %v14533_v50  ;;  %14568 = vpow2.f32 %v12161_v2  ;;  %v12168_v50 = vmul.f32 -1.442695, %v5945_v3  ;;  %v5947_v2 = vadd.f32 %v5946_v51, %v18392_v30 }
 0x6cd   : > { %v14545_v44 = vpop.eup %14544  ;;  %14570 = vrcp.f32 %v8317_v22  ;;  %v8239_v11 = vadd.f32 1.0, %v14543_v17  ;;  %v5951_v17 = vadd.f32 %v5950_v43, %v18386_v33 }
 0x6ce   : > { %v14547_v60 = vpop.eup %14546  ;;  %10895 = vst [vmem:[%s18458_s29 + $0x2f4] sm:$0xff] %v12686_v7  ;;  %v12731_v59 = vpack.c.bf16 %v14545_v44, %v14537_v27  ;;  %14572 = vpow2.f32 %v12083_v32  ;;  %v12169_v22 = vmul.f32 -1.442695, %v5947_v2  ;;  %v5952_v7 = vpop.f32.mrf.mxu1  ;;  %v20525_v2 = vld [vmem:[#allocation40_spill] sm:$0xff] }
 0x6cf   : > { %v14549_v39 = vpop.eup %14548  ;;  %14574 = vrcp.f32 %v8239_v11  ;;  %v8318_v13 = vadd.f32 1.0, %v14547_v60  ;;  %v20524_v60 = vld [vmem:[#allocation39_spill] sm:$0xff]  ;;  %v12175_v28 = vmul.f32 -1.442695, %v5951_v17 }
 0x6d0   : > { %v14551_v20 = vpop.eup %14550  ;;  %10940 = vst [vmem:[%s18458_s29 + $0x430] sm:$0xff] %v12731_v59  ;;  %14576 = vpow2.f32 %v12162_v34  ;;  %v19171_v34 = vpop.f32.mrf.mxu0  ;;  %v5544_v59 = vadd.f32 %v20524_v60, %v18475_v53 }
 0x6d1   : > { %v14553_v15 = vpop.eup %14552  ;;  %14578 = vrcp.f32 %v8318_v13  ;;  %v8245_v9 = vadd.f32 1.0, %v14551_v20  ;;  %v5953_v20 = vadd.f32 %v5952_v7, %v18392_v30 }
 0x6d2   : > { %v14555_v27 = vpop.eup %14554  ;;  %14580 = vpow2.f32 %v12089_v6 }
 0x6d3   : > { %v14557_v46 = vpop.eup %14556  ;;  %14582 = vrcp.f32 %v8245_v9  ;;  %v8324_v18 = vadd.f32 1.0, %v14555_v27  ;;  %v19178_v9 = vpop.f32.mrf.mxu0  ;;  %6282 = vmatmul.mubr.bf16.gmra.mxu0 %v20525_v2 }
 0x6d4   : > { %v14559_v32 = vpop.eup %14558  ;;  %v8246_v10 = vadd.f32 1.0, %v14557_v46  ;;  %14584 = vpow2.f32 %v12168_v50  ;;  %v5954_v50 = vpop.f32.mrf.mxu1  ;;  %6291 = vmatprep.mubr.bf16.mxu0 %v20379_v55  ;;  %v12097_v46 = vmul.f32 -1.442695, %v5544_v59 }
 0x6d5   : > { %v14561_v37 = vpop.eup %14560  ;;  %v12690_v23 = vpack.c.bf16 %v14559_v32, %v14549_v39  ;;  %14586 = vrcp.f32 %v8324_v18  ;;  %v20526_v18 = vld [vmem:[#allocation47_spill] sm:$0xff]  ;;  %v19185_v7 = vpop.f32.mrf.mxu0 }
 0x6d6   : > { %v14563_v3 = vpop.eup %14562  ;;  %14588 = vrcp.f32 %v8246_v10  ;;  %v8325_v44 = vadd.f32 1.0, %v14561_v37  ;;  %v5956_v17 = vpop.f32.mrf.mxu1 }
 0x6d7   : > { %v14565_v11 = vpop.eup %14564  ;;  %10899 = vst [vmem:[%s18458_s29 + $0x310] sm:$0xff] %v12690_v23  ;;  %v12735_v51 = vpack.c.bf16 %v14563_v3, %v14553_v15  ;;  %14590 = vpow2.f32 %v12090_v5  ;;  %v5548_v5 = vadd.f32 %v20526_v18, %v18467_v57  ;;  %v12176_v23 = vmul.f32 -1.442695, %v5953_v20 }
 0x6d8   : > { %v14567_v6 = vpop.eup %14566  ;;  %14592 = vrcp.f32 %v8325_v44  ;;  %v8252_v39 = vadd.f32 1.0, %v14565_v11  ;;  %v5550_v11 = vadd.f32 %v18960_v52, %v18475_v53  ;;  %v5960_v20 = vpop.f32.mrf.mxu1 }
 0x6d9   : > { %v14569_v13 = vpop.eup %14568  ;;  %10944 = vst [vmem:[%s18458_s29 + $0x44c] sm:$0xff] %v12735_v51  ;;  %14594 = vpow2.f32 %v12169_v22  ;;  %v5955_v22 = vadd.f32 %v5954_v50, %v18386_v33  ;;  %v12103_v60 = vmul.f32 -1.442695, %v5548_v5  ;;  %v19192_v50 = vpop.f32.mrf.mxu0 }
 0x6da   : > { %v14571_v15 = vpop.eup %14570  ;;  %14596 = vrcp.f32 %v8252_v39  ;;  %v8331_v43 = vadd.f32 1.0, %v14569_v13  ;;  %v5957_v39 = vadd.f32 %v5956_v17, %v18392_v30 }
 0x6db   : > { %v14573_v27 = vpop.eup %14572  ;;  %14598 = vpow2.f32 %v12096_v19 }
 0x6dc   : > { %v14575_v40 = vpop.eup %14574  ;;  %14600 = vrcp.f32 %v8331_v43  ;;  %v8253_v32 = vadd.f32 1.0, %v14573_v27  ;;  %v12104_v43 = vmul.f32 -1.442695, %v5550_v11  ;;  %v12183_v5 = vmul.f32 -1.442695, %v5957_v39 }
 0x6dd   : > { %v14577_v10 = vpop.eup %14576  ;;  %v12694_v37 = vpack.c.bf16 %v14575_v40, %v14567_v6  ;;  %14602 = vpow2.f32 %v12175_v28  ;;  %v12182_v28 = vmul.f32 -1.442695, %v5955_v22  ;;  %v5961_v40 = vadd.f32 %v5960_v20, %v18386_v33 }
 0x6de   : > { %v14579_v3 = vpop.eup %14578  ;;  %14604 = vrcp.f32 %v8253_v32  ;;  %v8332_v44 = vadd.f32 1.0, %v14577_v10  ;;  %v19197_v32 = vpop.f32.mrf.mxu0 }
 0x6df   : > { %v14581_v51 = vpop.eup %14580  ;;  %10903 = vst [vmem:[%s18458_s29 + $0x32c] sm:$0xff] %v12694_v37  ;;  %v12739_v19 = vpack.c.bf16 %v14579_v3, %v14571_v15  ;;  %14606 = vpow2.f32 %v12097_v46  ;;  %v5552_v15 = vadd.f32 %v18967_v8, %v18467_v57  ;;  %v5554_v3 = vadd.f32 %v18976_v45, %v18475_v53 }
 0x6e0   : > { %v14583_v59 = vpop.eup %14582  ;;  %14608 = vrcp.f32 %v8332_v44  ;;  %v8259_v6 = vadd.f32 1.0, %v14581_v51 }
 0x6e1   : > { %v14585_v13 = vpop.eup %14584  ;;  %10948 = vst [vmem:[%s18458_s29 + $0x468] sm:$0xff] %v12739_v19  ;;  %14610 = vpow2.f32 %v12176_v23  ;;  %v5962_v23 = vpop.f32.mrf.mxu1  ;;  %v12110_v8 = vmul.f32 -1.442695, %v5552_v15  ;;  %v12189_v19 = vmul.f32 -1.442695, %v5961_v40 }
 0x6e2   : > { %v14587_v2 = vpop.eup %14586  ;;  %14612 = vrcp.f32 %v8259_v6  ;;  %v8338_v52 = vadd.f32 1.0, %v14585_v13  ;;  %v20527_v6 = vld [vmem:[#allocation32_spill] sm:$0xff]  ;;  %v12111_v20 = vmul.f32 -1.442695, %v5554_v3  ;;  %v5560_v3 = vadd.f32 %v18992_v36, %v18475_v53 }
 0x6e3   : > { %v14589_v27 = vpop.eup %14588  ;;  %14614 = vpow2.f32 %v12103_v60  ;;  %v5963_v60 = vadd.f32 %v5962_v23, %v18392_v30  ;;  %v5562_v36 = vadd.f32 %v18999_v47, %v18467_v57 }
 0x6e4   : > { %v14591_v46 = vpop.eup %14590  ;;  %v12698_v18 = vpack.c.bf16 %v14589_v27, %v14583_v59  ;;  %14616 = vrcp.f32 %v8338_v52  ;;  %v19204_v59 = vpop.f32.mrf.mxu0  ;;  %6292 = vmatmul.mubr.bf16.gmra.mxu0 %v20527_v6 }
 0x6e5   : > { %v14593_v10 = vpop.eup %14592  ;;  %v8260_v37 = vadd.f32 1.0, %v14591_v46  ;;  %14618 = vpow2.f32 %v12182_v28  ;;  %v5964_v28 = vpop.f32.mrf.mxu1  ;;  %6301 = vmatprep.mubr.bf16.mxu0 %v20379_v55  ;;  %v12190_v46 = vmul.f32 -1.442695, %v5963_v60  ;;  %v12124_v47 = vmul.f32 -1.442695, %v5562_v36 }
 0x6e6   : > { %v14595_v22 = vpop.eup %14594  ;;  %10907 = vst [vmem:[%s18458_s29 + $0x348] sm:$0xff] %v12698_v18  ;;  %v12743_v17 = vpack.c.bf16 %v14593_v10, %v14587_v2  ;;  %14620 = vpow2.f32 %v12104_v43  ;;  %v5558_v2 = vadd.f32 %v18983_v14, %v18467_v57  ;;  %v5965_v18 = vadd.f32 %v5964_v28, %v18386_v33 }
 0x6e7   : > { %v14597_v44 = vpop.eup %14596  ;;  %14622 = vrcp.f32 %v8260_v37  ;;  %v8339_v11 = vadd.f32 1.0, %v14595_v22  ;;  %v5966_v10 = vpop.f32.mrf.mxu1 }
 0x6e8   : > { %v14599_v51 = vpop.eup %14598  ;;  %10952 = vst [vmem:[%s18458_s29 + $0x484] sm:$0xff] %v12743_v17  ;;  %14624 = vpow2.f32 %v12183_v5  ;;  %v19211_v37 = vpop.f32.mrf.mxu0  ;;  %v12117_v14 = vmul.f32 -1.442695, %v5558_v2  ;;  %v5967_v60 = vadd.f32 %v5966_v10, %v18392_v30 }
 0x6e9   : > { %v14601_v39 = vpop.eup %14600  ;;  %14626 = vrcp.f32 %v8339_v11  ;;  %v8266_v13 = vadd.f32 1.0, %v14599_v51  ;;  %v12196_v11 = vmul.f32 -1.442695, %v5965_v18  ;;  %v5970_v6 = vpop.f32.mrf.mxu1 }
 0x6ea   : > { %v14603_v45 = vpop.eup %14602  ;;  %14628 = vpow2.f32 %v12110_v8 }
 0x6eb   : > { %v14605_v52 = vpop.eup %14604  ;;  %14630 = vrcp.f32 %v8266_v13  ;;  %v8345_v43 = vadd.f32 1.0, %v14603_v45  ;;  %v19218_v13 = vpop.f32.mrf.mxu0 }
 0x6ec   : > { %v14607_v15 = vpop.eup %14606  ;;  %v12702_v27 = vpack.c.bf16 %v14605_v52, %v14597_v44  ;;  %14632 = vpow2.f32 %v12189_v19  ;;  %v5972_v18 = vpop.f32.mrf.mxu1 }
 0x6ed   : > { %v14609_v5 = vpop.eup %14608  ;;  %14634 = vrcp.f32 %v8345_v43  ;;  %v8267_v40 = vadd.f32 1.0, %v14607_v15 }
 0x6ee   : > { %v14611_v23 = vpop.eup %14610  ;;  %10911 = vst [vmem:[%s18458_s29 + $0x364] sm:$0xff] %v12702_v27  ;;  %v12747_v22 = vpack.c.bf16 %v14609_v5, %v14601_v39  ;;  %14636 = vpow2.f32 %v12111_v20  ;;  %v12118_v20 = vmul.f32 -1.442695, %v5560_v3  ;;  %v12197_v27 = vmul.f32 -1.442695, %v5967_v60  ;;  %v19223_v5 = vpop.f32.mrf.mxu0 }
 0x6ef   : > { %v14613_v17 = vpop.eup %14612  ;;  %14638 = vrcp.f32 %v8267_v40  ;;  %v8346_v8 = vadd.f32 1.0, %v14611_v23 }
 0x6f0   : > { %v14615_v44 = vpop.eup %14614  ;;  %10956 = vst [vmem:[%s18458_s29 + $0x4a0] sm:$0xff] %v12747_v22  ;;  %14640 = vpow2.f32 %v12190_v46  ;;  %v5971_v46 = vadd.f32 %v5970_v6, %v18386_v33  ;;  %v19230_v60 = vpop.f32.mrf.mxu0  ;;  %v20528_v6 = vld [vmem:[#allocation41_spill] sm:$0xff] }
 0x6f1   : > { %v14617_v51 = vpop.eup %14616  ;;  %14642 = vrcp.f32 %v8346_v8  ;;  %v8273_v19 = vadd.f32 1.0, %v14615_v44  ;;  %6302 = vmatmul.mubr.bf16.gmra.mxu0 %v20528_v6 }
 0x6f2   : > { %v14619_v39 = vpop.eup %14618  ;;  %14644 = vpow2.f32 %v12117_v14  ;;  %v5564_v14 = vadd.f32 %v19008_v35, %v18475_v53  ;;  %v12203_v44 = vmul.f32 -1.442695, %v5971_v46  ;;  %6311 = vmatprep.mubr.bf16.mxu0 %v20379_v55  ;;  %v19237_v46 = vpop.f32.mrf.mxu0 }
 0x6f3   : > { %v14621_v28 = vpop.eup %14620  ;;  %14646 = vrcp.f32 %v8273_v19  ;;  %v8352_v45 = vadd.f32 1.0, %v14619_v39  ;;  %v5974_v19 = vpop.f32.mrf.mxu1 }
 0x6f4   : > { %v14623_v2 = vpop.eup %14622  ;;  %v8274_v52 = vadd.f32 1.0, %v14621_v28  ;;  %14648 = vpow2.f32 %v12196_v11  ;;  %v5973_v11 = vadd.f32 %v5972_v18, %v18392_v30  ;;  %v12125_v28 = vmul.f32 -1.442695, %v5564_v14 }
 0x6f5   : > { %v14625_v43 = vpop.eup %14624  ;;  %v12706_v15 = vpack.c.bf16 %v14623_v2, %v14613_v17  ;;  %14650 = vrcp.f32 %v8352_v45  ;;  %v5568_v45 = vadd.f32 %v19015_v0, %v18467_v57  ;;  %v5570_v0 = vadd.f32 %v19024_v63, %v18475_v53 }
 0x6f6   : > { %v14627_v40 = vpop.eup %14626  ;;  %14652 = vrcp.f32 %v8274_v52  ;;  %v8353_v10 = vadd.f32 1.0, %v14625_v43  ;;  %v12204_v43 = vmul.f32 -1.442695, %v5973_v11  ;;  %v19244_v11 = vpop.f32.mrf.mxu0 }
 0x6f7   : > { %v14629_v23 = vpop.eup %14628  ;;  %10915 = vst [vmem:[%s18458_s29 + $0x380] sm:$0xff] %v12706_v15  ;;  %v12751_v22 = vpack.c.bf16 %v14627_v40, %v14617_v51  ;;  %14654 = vpow2.f32 %v12118_v20  ;;  %v5975_v15 = vadd.f32 %v5974_v19, %v18386_v33  ;;  %v12132_v6 = vmul.f32 -1.442695, %v5570_v0 }
 0x6f8   : > { %v14631_v17 = vpop.eup %14630  ;;  %14656 = vrcp.f32 %v8353_v10  ;;  %v8280_v8 = vadd.f32 1.0, %v14629_v23 }
 0x6f9   : > { %v14633_v3 = vpop.eup %14632  ;;  %10960 = vst [vmem:[%s18458_s29 + $0x4bc] sm:$0xff] %v12751_v22  ;;  %14658 = vpow2.f32 %v12197_v27  ;;  %v5976_v27 = vpop.f32.mrf.mxu1  ;;  %v12131_v22 = vmul.f32 -1.442695, %v5568_v45 }
 0x6fa   : > { %v14635_v51 = vpop.eup %14634  ;;  %14660 = vrcp.f32 %v8280_v8  ;;  %v8359_v39 = vadd.f32 1.0, %v14633_v3  ;;  %v12210_v3 = vmul.f32 -1.442695, %v5975_v15 }
 0x6fb   : > { %v14637_v35 = vpop.eup %14636  ;;  %14662 = vpow2.f32 %v12124_v47 }
 0x6fc   : > { %v14639_v20 = vpop.eup %14638  ;;  %14664 = vrcp.f32 %v8359_v39  ;;  %v8281_v36 = vadd.f32 1.0, %v14637_v35 }
 0x6fd   : > { %v14641_v2 = vpop.eup %14640  ;;  %v12710_v52 = vpack.c.bf16 %v14639_v20, %v14631_v17  ;;  %14666 = vpow2.f32 %v12203_v44  ;;  %v5977_v17 = vadd.f32 %v5976_v27, %v18392_v30  ;;  %v5980_v44 = vpop.f32.mrf.mxu1 }
 0x6fe   : > { %v14643_v18 = vpop.eup %14642  ;;  %14668 = vrcp.f32 %v8281_v36  ;;  %v8360_v40 = vadd.f32 1.0, %v14641_v2  ;;  %v5981_v20 = vadd.f32 %v5980_v44, %v18386_v33  ;;  %v19249_v36 = vpop.f32.mrf.mxu0 }
 0x6ff   : > { %v14645_v10 = vpop.eup %14644  ;;  %10919 = vst [vmem:[%s18458_s29 + $0x39c] sm:$0xff] %v12710_v52  ;;  %v12755_v23 = vpack.c.bf16 %v14643_v18, %v14635_v51  ;;  %14670 = vpow2.f32 %v12125_v28  ;;  %v5572_v51 = vadd.f32 %v19030_v54, %v18467_v57  ;;  %v12211_v45 = vmul.f32 -1.442695, %v5977_v17 }
 0x700   : > { %v14647_v47 = vpop.eup %14646  ;;  %14672 = vrcp.f32 %v8360_v40  ;;  %v8287_v14 = vadd.f32 1.0, %v14645_v10  ;;  %v5574_v18 = vadd.f32 %v19038_v62, %v18475_v53 }
 0x701   : > { %v14649_v8 = vpop.eup %14648  ;;  %10964 = vst [vmem:[%s18458_s29 + $0x4d8] sm:$0xff] %v12755_v23  ;;  %14674 = vpow2.f32 %v12204_v43  ;;  %v5982_v43 = vpop.f32.mrf.mxu1  ;;  %v12138_v54 = vmul.f32 -1.442695, %v5572_v51  ;;  %v12217_v23 = vmul.f32 -1.442695, %v5981_v20 }
 0x702   : > { %v14651_v19 = vpop.eup %14650  ;;  %14676 = vrcp.f32 %v8287_v14  ;;  %v8366_v63 = vadd.f32 1.0, %v14649_v8  ;;  %v20529_v14 = vld [vmem:[#allocation33_spill] sm:$0xff]  ;;  %v12139_v44 = vmul.f32 -1.442695, %v5574_v18  ;;  %v5580_v18 = vadd.f32 %v19054_v4, %v18475_v53 }
 0x703   : > { %v14653_v39 = vpop.eup %14652  ;;  %14678 = vpow2.f32 %v12131_v22  ;;  %v5983_v22 = vadd.f32 %v5982_v43, %v18392_v30  ;;  %v5582_v4 = vadd.f32 %v19060_v24, %v18467_v57 }
 0x704   : > { %v14655_v35 = vpop.eup %14654  ;;  %v12714_v28 = vpack.c.bf16 %v14653_v39, %v14647_v47  ;;  %14680 = vrcp.f32 %v8366_v63  ;;  %v19256_v47 = vpop.f32.mrf.mxu0  ;;  %6312 = vmatmul.mubr.bf16.gmra.mxu0 %v20529_v14 }
 0x705   : > { %v14657_v2 = vpop.eup %14656  ;;  %v8288_v52 = vadd.f32 1.0, %v14655_v35  ;;  %14682 = vpow2.f32 %v12210_v3  ;;  %v5984_v3 = vpop.f32.mrf.mxu1  ;;  %6321 = vmatprep.mubr.bf16.mxu0 %v20379_v55  ;;  %v12218_v35 = vmul.f32 -1.442695, %v5983_v22  ;;  %v12152_v24 = vmul.f32 -1.442695, %v5582_v4 }
 0x706   : > { %v14659_v15 = vpop.eup %14658  ;;  %10923 = vst [vmem:[%s18458_s29 + $0x3b8] sm:$0xff] %v12714_v28  ;;  %v12759_v27 = vpack.c.bf16 %v14657_v2, %v14651_v19  ;;  %14684 = vpow2.f32 %v12132_v6  ;;  %v5578_v19 = vadd.f32 %v19046_v61, %v18467_v57  ;;  %v5985_v28 = vadd.f32 %v5984_v3, %v18386_v33 }
 0x707   : > { %v14661_v40 = vpop.eup %14660  ;;  %14686 = vrcp.f32 %v8288_v52  ;;  %v8367_v0 = vadd.f32 1.0, %v14659_v15  ;;  %v5986_v2 = vpop.f32.mrf.mxu1 }
 0x708   : > { %v14663_v10 = vpop.eup %14662  ;;  %10968 = vst [vmem:[%s18458_s29 + $0x4f4] sm:$0xff] %v12759_v27  ;;  %14688 = vpow2.f32 %v12211_v45  ;;  %v19263_v52 = vpop.f32.mrf.mxu0  ;;  %v12145_v61 = vmul.f32 -1.442695, %v5578_v19  ;;  %v5987_v22 = vadd.f32 %v5986_v2, %v18392_v30 }
 0x709   : > { %v14665_v17 = vpop.eup %14664  ;;  %14690 = vrcp.f32 %v8367_v0  ;;  %v8294_v8 = vadd.f32 1.0, %v14663_v10  ;;  %v12224_v0 = vmul.f32 -1.442695, %v5985_v28  ;;  %v5990_v14 = vpop.f32.mrf.mxu1 }
 0x70a   : > { %v14667_v62 = vpop.eup %14666  ;;  %14692 = vpow2.f32 %v12138_v54 }
 0x70b   : > { %v14669_v63 = vpop.eup %14668  ;;  %14694 = vrcp.f32 %v8294_v8  ;;  %v8373_v6 = vadd.f32 1.0, %v14667_v62  ;;  %v19270_v8 = vpop.f32.mrf.mxu0 }
 0x70c   : > { %v14671_v51 = vpop.eup %14670  ;;  %v12718_v39 = vpack.c.bf16 %v14669_v63, %v14661_v40  ;;  %14696 = vpow2.f32 %v12217_v23  ;;  %v5992_v28 = vpop.f32.mrf.mxu1 }
 0x70d   : > { %v14673_v45 = vpop.eup %14672  ;;  %14698 = vrcp.f32 %v8373_v6  ;;  %v8295_v20 = vadd.f32 1.0, %v14671_v51 }
 0x70e   : > { %v14675_v43 = vpop.eup %14674  ;;  %10927 = vst [vmem:[%s18458_s29 + $0x3d4] sm:$0xff] %v12718_v39  ;;  %v12763_v15 = vpack.c.bf16 %v14673_v45, %v14665_v17  ;;  %14700 = vpow2.f32 %v12139_v44  ;;  %v12146_v44 = vmul.f32 -1.442695, %v5580_v18  ;;  %v12225_v39 = vmul.f32 -1.442695, %v5987_v22  ;;  %v19275_v45 = vpop.f32.mrf.mxu0 }
 0x70f   : > { %v14677_v27 = vpop.eup %14676  ;;  %14702 = vrcp.f32 %v8295_v20  ;;  %v8374_v54 = vadd.f32 1.0, %v14675_v43 }
 0x710   : > { %v14679_v40 = vpop.eup %14678  ;;  %10972 = vst [vmem:[%s18458_s29 + $0x510] sm:$0xff] %v12763_v15  ;;  %14704 = vpow2.f32 %v12218_v35  ;;  %v5991_v35 = vadd.f32 %v5990_v14, %v18386_v33  ;;  %v19282_v22 = vpop.f32.mrf.mxu0  ;;  %v20530_v14 = vld [vmem:[#allocation42_spill] sm:$0xff] }
 0x711   : > { %v14681_v10 = vpop.eup %14680  ;;  %14706 = vrcp.f32 %v8374_v54  ;;  %v8301_v23 = vadd.f32 1.0, %v14679_v40  ;;  %6322 = vmatmul.mubr.bf16.gmra.mxu0 %v20530_v14 }
 0x712   : > { %v14683_v17 = vpop.eup %14682  ;;  %14708 = vpow2.f32 %v12145_v61  ;;  %v5584_v61 = vadd.f32 %v19068_v56, %v18475_v53  ;;  %v12231_v40 = vmul.f32 -1.442695, %v5991_v35  ;;  %6331 = vmatprep.mubr.bf16.mxu0 %v20379_v55  ;;  %v19289_v35 = vpop.f32.mrf.mxu0 }
 0x713   : > { %v14685_v3 = vpop.eup %14684  ;;  %14710 = vrcp.f32 %v8301_v23  ;;  %v8380_v62 = vadd.f32 1.0, %v14683_v17  ;;  %v5994_v23 = vpop.f32.mrf.mxu1 }
 0x714   : > { %v14687_v19 = vpop.eup %14686  ;;  %v8302_v63 = vadd.f32 1.0, %v14685_v3  ;;  %14712 = vpow2.f32 %v12224_v0  ;;  %v5993_v0 = vadd.f32 %v5992_v28, %v18392_v30  ;;  %v12153_v3 = vmul.f32 -1.442695, %v5584_v61 }
 0x715   : > { %v14689_v6 = vpop.eup %14688  ;;  %v12722_v51 = vpack.c.bf16 %v14687_v19, %v14677_v27  ;;  %14714 = vrcp.f32 %v8380_v62  ;;  %v5588_v62 = vadd.f32 %v19076_v1, %v18467_v57  ;;  %v5590_v1 = vadd.f32 %v19084_v48, %v18475_v53 }
 0x716   : > { %v14691_v20 = vpop.eup %14690  ;;  %14716 = vrcp.f32 %v8302_v63  ;;  %v8381_v2 = vadd.f32 1.0, %v14689_v6  ;;  %v12232_v6 = vmul.f32 -1.442695, %v5993_v0  ;;  %v19296_v0 = vpop.f32.mrf.mxu0 }
 0x717   : > { %v14693_v43 = vpop.eup %14692  ;;  %10931 = vst [vmem:[%s18458_s29 + $0x3f0] sm:$0xff] %v12722_v51  ;;  %v12767_v15 = vpack.c.bf16 %v14691_v20, %v14681_v10  ;;  %14718 = vpow2.f32 %v12146_v44  ;;  %v5995_v51 = vadd.f32 %v5994_v23, %v18386_v33  ;;  %v12160_v14 = vmul.f32 -1.442695, %v5590_v1 }
 0x718   : > { %v14695_v27 = vpop.eup %14694  ;;  %14720 = vrcp.f32 %v8381_v2  ;;  %v8308_v54 = vadd.f32 1.0, %v14693_v43 }
 0x719   : > { %v14697_v18 = vpop.eup %14696  ;;  %10976 = vst [vmem:[%s18458_s29 + $0x52c] sm:$0xff] %v12767_v15  ;;  %14722 = vpow2.f32 %v12225_v39  ;;  %v5996_v39 = vpop.f32.mrf.mxu1  ;;  %v12159_v15 = vmul.f32 -1.442695, %v5588_v62 }
 0x71a   : > { %v14699_v10 = vpop.eup %14698  ;;  %14724 = vrcp.f32 %v8308_v54  ;;  %v8387_v17 = vadd.f32 1.0, %v14697_v18  ;;  %v12238_v18 = vmul.f32 -1.442695, %v5995_v51 }
 0x71b   : > { %v14701_v56 = vpop.eup %14700  ;;  %14726 = vpow2.f32 %v12152_v24 }
 0x71c   : > { %v14703_v44 = vpop.eup %14702  ;;  %14728 = vrcp.f32 %v8387_v17  ;;  %v8309_v4 = vadd.f32 1.0, %v14701_v56 }
 0x71d   : > { %v14705_v19 = vpop.eup %14704  ;;  %v12726_v63 = vpack.c.bf16 %v14703_v44, %v14695_v27  ;;  %14730 = vpow2.f32 %v12231_v40  ;;  %v5997_v27 = vadd.f32 %v5996_v39, %v18392_v30  ;;  %v6000_v40 = vpop.f32.mrf.mxu1 }
 0x71e   : > { %v14707_v28 = vpop.eup %14706  ;;  %14732 = vrcp.f32 %v8309_v4  ;;  %v8388_v20 = vadd.f32 1.0, %v14705_v19  ;;  %v6001_v44 = vadd.f32 %v6000_v40, %v18386_v33  ;;  %v19301_v4 = vpop.f32.mrf.mxu0 }
 0x71f   : > { %v14709_v2 = vpop.eup %14708  ;;  %10935 = vst [vmem:[%s18458_s29 + $0x40c] sm:$0xff] %v12726_v63  ;;  %v12771_v43 = vpack.c.bf16 %v14707_v28, %v14699_v10  ;;  %14734 = vpow2.f32 %v12153_v3  ;;  %v5592_v10 = vadd.f32 %v19090_v29, %v18467_v57  ;;  %v12239_v62 = vmul.f32 -1.442695, %v5997_v27 }
 0x720   : > { %v14711_v24 = vpop.eup %14710  ;;  %14736 = vrcp.f32 %v8388_v20  ;;  %v8315_v61 = vadd.f32 1.0, %v14709_v2  ;;  %v5594_v28 = vadd.f32 %v19098_v21, %v18475_v53 }
 0x721   : > { %v14713_v54 = vpop.eup %14712  ;;  %10980 = vst [vmem:[%s18458_s29 + $0x548] sm:$0xff] %v12771_v43  ;;  %14738 = vpow2.f32 %v12232_v6  ;;  %v6002_v6 = vpop.f32.mrf.mxu1  ;;  %v12166_v29 = vmul.f32 -1.442695, %v5592_v10  ;;  %v12245_v43 = vmul.f32 -1.442695, %v6001_v44 }
 0x722   : > { %v14715_v23 = vpop.eup %14714  ;;  %14740 = vrcp.f32 %v8315_v61  ;;  %v8394_v48 = vadd.f32 1.0, %v14713_v54  ;;  %v20531_v61 = vld [vmem:[#allocation34_spill] sm:$0xff]  ;;  %v12167_v40 = vmul.f32 -1.442695, %v5594_v28  ;;  %v5600_v28 = vadd.f32 %v19114_v25, %v18475_v53 }
 0x723   : > { %v14717_v17 = vpop.eup %14716  ;;  %14742 = vpow2.f32 %v12159_v15  ;;  %v6003_v15 = vadd.f32 %v6002_v6, %v18392_v30  ;;  %v5602_v25 = vadd.f32 %v19119_v26, %v18467_v57 }
 0x724   : > { %v14719_v56 = vpop.eup %14718  ;;  %v12730_v3 = vpack.c.bf16 %v14717_v17, %v14711_v24  ;;  %14744 = vrcp.f32 %v8394_v48  ;;  %v19308_v24 = vpop.f32.mrf.mxu0  ;;  %6332 = vmatmul.mubr.bf16.gmra.mxu0 %v20531_v61 }
 0x725   : > { %v14721_v19 = vpop.eup %14720  ;;  %v8316_v63 = vadd.f32 1.0, %v14719_v56  ;;  %14746 = vpow2.f32 %v12238_v18  ;;  %v6004_v18 = vpop.f32.mrf.mxu1  ;;  %6341 = vmatprep.mubr.bf16.mxu0 %v20379_v55  ;;  %v12246_v56 = vmul.f32 -1.442695, %v6003_v15  ;;  %v12180_v26 = vmul.f32 -1.442695, %v5602_v25 }
 0x726   : > { %v14723_v51 = vpop.eup %14722  ;;  %10939 = vst [vmem:[%s18458_s29 + $0x428] sm:$0xff] %v12730_v3  ;;  %v12775_v39 = vpack.c.bf16 %v14721_v19, %v14715_v23  ;;  %14748 = vpow2.f32 %v12160_v14  ;;  %v5598_v23 = vadd.f32 %v19106_v12, %v18467_v57  ;;  %v6005_v3 = vadd.f32 %v6004_v18, %v18386_v33 }
 0x727   : > { %v14725_v20 = vpop.eup %14724  ;;  %14750 = vrcp.f32 %v8316_v63  ;;  %v8395_v1 = vadd.f32 1.0, %v14723_v51  ;;  %v6006_v19 = vpop.f32.mrf.mxu1 }
 0x728   : > { %v14727_v2 = vpop.eup %14726  ;;  %10984 = vst [vmem:[%s18458_s29 + $0x564] sm:$0xff] %v12775_v39  ;;  %14752 = vpow2.f32 %v12239_v62  ;;  %v19315_v63 = vpop.f32.mrf.mxu0  ;;  %v12173_v12 = vmul.f32 -1.442695, %v5598_v23  ;;  %v6007_v15 = vadd.f32 %v6006_v19, %v18392_v30 }
 0x729   : > { %v14729_v27 = vpop.eup %14728  ;;  %14754 = vrcp.f32 %v8395_v1  ;;  %v8322_v54 = vadd.f32 1.0, %v14727_v2  ;;  %v12252_v1 = vmul.f32 -1.442695, %v6005_v3  ;;  %v6010_v61 = vpop.f32.mrf.mxu1 }
 0x72a   : > { %v14731_v21 = vpop.eup %14730  ;;  %14756 = vpow2.f32 %v12166_v29 }
 0x72b   : > { %v14733_v48 = vpop.eup %14732  ;;  %14758 = vrcp.f32 %v8322_v54  ;;  %v8401_v14 = vadd.f32 1.0, %v14731_v21  ;;  %v19322_v54 = vpop.f32.mrf.mxu0 }
 0x72c   : > { %v14735_v10 = vpop.eup %14734  ;;  %v12734_v17 = vpack.c.bf16 %v14733_v48, %v14725_v20  ;;  %14760 = vpow2.f32 %v12245_v43  ;;  %v6012_v3 = vpop.f32.mrf.mxu1 }
 0x72d   : > { %v14737_v62 = vpop.eup %14736  ;;  %14762 = vrcp.f32 %v8401_v14  ;;  %v8323_v44 = vadd.f32 1.0, %v14735_v10 }
 0x72e   : > { %v14739_v6 = vpop.eup %14738  ;;  %10943 = vst [vmem:[%s18458_s29 + $0x444] sm:$0xff] %v12734_v17  ;;  %v12779_v51 = vpack.c.bf16 %v14737_v62, %v14729_v27  ;;  %14764 = vpow2.f32 %v12167_v40  ;;  %v12174_v40 = vmul.f32 -1.442695, %v5600_v28  ;;  %v12253_v17 = vmul.f32 -1.442695, %v6007_v15  ;;  %v19327_v62 = vpop.f32.mrf.mxu0 }
 0x72f   : > { %v14741_v39 = vpop.eup %14740  ;;  %14766 = vrcp.f32 %v8323_v44  ;;  %v8402_v29 = vadd.f32 1.0, %v14739_v6 }
 0x730   : > { %v14743_v20 = vpop.eup %14742  ;;  %10988 = vst [vmem:[%s18458_s29 + $0x580] sm:$0xff] %v12779_v51  ;;  %14768 = vpow2.f32 %v12246_v56  ;;  %v6011_v56 = vadd.f32 %v6010_v61, %v18386_v33  ;;  %v19334_v15 = vpop.f32.mrf.mxu0  ;;  %v20532_v61 = vld [vmem:[#allocation35_spill] sm:$0xff] }
 0x731   : > { %v14745_v2 = vpop.eup %14744  ;;  %14770 = vrcp.f32 %v8402_v29  ;;  %v8329_v43 = vadd.f32 1.0, %v14743_v20  ;;  %6342 = vmatmul.mubr.bf16.gmra.mxu0 %v20532_v61 }
 0x732   : > { %v14747_v27 = vpop.eup %14746  ;;  %14772 = vpow2.f32 %v12173_v12  ;;  %v5604_v12 = vadd.f32 %v19126_v41, %v18475_v53  ;;  %v12259_v20 = vmul.f32 -1.442695, %v6011_v56  ;;  %6351 = vmatprep.mubr.bf16.mxu0 %v20379_v55  ;;  %v19341_v56 = vpop.f32.mrf.mxu0 }
 0x733   : > { %v14749_v18 = vpop.eup %14748  ;;  %14774 = vrcp.f32 %v8329_v43  ;;  %v8408_v21 = vadd.f32 1.0, %v14747_v27  ;;  %v6014_v43 = vpop.f32.mrf.mxu1 }
 0x734   : > { %v14751_v23 = vpop.eup %14750  ;;  %v8330_v48 = vadd.f32 1.0, %v14749_v18  ;;  %14776 = vpow2.f32 %v12252_v1  ;;  %v6013_v1 = vadd.f32 %v6012_v3, %v18392_v30  ;;  %v12181_v18 = vmul.f32 -1.442695, %v5604_v12 }
 0x735   : > { %v14753_v14 = vpop.eup %14752  ;;  %v12738_v10 = vpack.c.bf16 %v14751_v23, %v14741_v39  ;;  %14778 = vrcp.f32 %v8408_v21  ;;  %v5608_v21 = vadd.f32 %v19133_v31, %v18467_v57  ;;  %v5610_v31 = vadd.f32 %v19140_v49, %v18475_v53 }
 0x736   : > { %v14755_v44 = vpop.eup %14754  ;;  %14780 = vrcp.f32 %v8330_v48  ;;  %v8409_v19 = vadd.f32 1.0, %v14753_v14  ;;  %v12260_v14 = vmul.f32 -1.442695, %v6013_v1  ;;  %v19348_v1 = vpop.f32.mrf.mxu0 }
 0x737   : > { %v14757_v6 = vpop.eup %14756  ;;  %10947 = vst [vmem:[%s18458_s29 + $0x460] sm:$0xff] %v12738_v10  ;;  %v12783_v51 = vpack.c.bf16 %v14755_v44, %v14745_v2  ;;  %14782 = vpow2.f32 %v12174_v40  ;;  %v6015_v10 = vadd.f32 %v6014_v43, %v18386_v33  ;;  %v12188_v61 = vmul.f32 -1.442695, %v5610_v31 }
 0x738   : > { %v14759_v39 = vpop.eup %14758  ;;  %14784 = vrcp.f32 %v8409_v19  ;;  %v8336_v29 = vadd.f32 1.0, %v14757_v6 }
 0x739   : > { %v14761_v28 = vpop.eup %14760  ;;  %10992 = vst [vmem:[%s18458_s29 + $0x59c] sm:$0xff] %v12783_v51  ;;  %14786 = vpow2.f32 %v12253_v17  ;;  %v6016_v17 = vpop.f32.mrf.mxu1  ;;  %v12187_v51 = vmul.f32 -1.442695, %v5608_v21 }
 0x73a   : > { %v14763_v2 = vpop.eup %14762  ;;  %14788 = vrcp.f32 %v8336_v29  ;;  %v8415_v27 = vadd.f32 1.0, %v14761_v28  ;;  %v12266_v28 = vmul.f32 -1.442695, %v6015_v10 }
 0x73b   : > { %v14765_v41 = vpop.eup %14764  ;;  %14790 = vpow2.f32 %v12180_v26 }
 0x73c   : > { %v14767_v40 = vpop.eup %14766  ;;  %14792 = vrcp.f32 %v8415_v27  ;;  %v8337_v25 = vadd.f32 1.0, %v14765_v41 }
 0x73d   : > { %v14769_v23 = vpop.eup %14768  ;;  %v12742_v48 = vpack.c.bf16 %v14767_v40, %v14759_v39  ;;  %14794 = vpow2.f32 %v12259_v20  ;;  %v6017_v39 = vadd.f32 %v6016_v17, %v18392_v30  ;;  %v6020_v20 = vpop.f32.mrf.mxu1 }
 0x73e   : > { %v14771_v3 = vpop.eup %14770  ;;  %14796 = vrcp.f32 %v8337_v25  ;;  %v8416_v44 = vadd.f32 1.0, %v14769_v23  ;;  %v6021_v40 = vadd.f32 %v6020_v20, %v18386_v33  ;;  %v19353_v25 = vpop.f32.mrf.mxu0 }
 0x73f   : > { %v14773_v19 = vpop.eup %14772  ;;  %10951 = vst [vmem:[%s18458_s29 + $0x47c] sm:$0xff] %v12742_v48  ;;  %v12787_v6 = vpack.c.bf16 %v14771_v3, %v14763_v2  ;;  %14798 = vpow2.f32 %v12181_v18  ;;  %v5612_v2 = vadd.f32 %v19145_v16, %v18467_v57  ;;  %v12267_v21 = vmul.f32 -1.442695, %v6017_v39 }
 0x740   : > { %v14775_v26 = vpop.eup %14774  ;;  %14800 = vrcp.f32 %v8416_v44  ;;  %v8343_v12 = vadd.f32 1.0, %v14773_v19  ;;  %v5614_v3 = vadd.f32 %v19152_v58, %v18475_v53 }
 0x741   : > { %v14777_v29 = vpop.eup %14776  ;;  %10996 = vst [vmem:[%s18458_s29 + $0x5b8] sm:$0xff] %v12787_v6  ;;  %14802 = vpow2.f32 %v12260_v14  ;;  %v6022_v14 = vpop.f32.mrf.mxu1  ;;  %v12194_v16 = vmul.f32 -1.442695, %v5612_v2  ;;  %v12273_v6 = vmul.f32 -1.442695, %v6021_v40 }
 0x742   : > { %v14779_v43 = vpop.eup %14778  ;;  %14804 = vrcp.f32 %v8343_v12  ;;  %v8422_v49 = vadd.f32 1.0, %v14777_v29  ;;  %v20533_v12 = vld [vmem:[#allocation44_spill] sm:$0xff]  ;;  %v12195_v20 = vmul.f32 -1.442695, %v5614_v3  ;;  %v5620_v3 = vadd.f32 %v19166_v38, %v18475_v53 }
 0x743   : > { %v14781_v27 = vpop.eup %14780  ;;  %14806 = vpow2.f32 %v12187_v51  ;;  %v6023_v51 = vadd.f32 %v6022_v14, %v18392_v30  ;;  %v5622_v38 = vadd.f32 %v19171_v34, %v18467_v57 }
 0x744   : > { %v14783_v41 = vpop.eup %14782  ;;  %v12746_v18 = vpack.c.bf16 %v14781_v27, %v14775_v26  ;;  %14808 = vrcp.f32 %v8422_v49  ;;  %v19360_v26 = vpop.f32.mrf.mxu0  ;;  %6352 = vmatmul.mubr.bf16.gmra.mxu0 %v20533_v12 }
 0x745   : > { %v14785_v23 = vpop.eup %14784  ;;  %v8344_v48 = vadd.f32 1.0, %v14783_v41  ;;  %14810 = vpow2.f32 %v12266_v28  ;;  %v6024_v28 = vpop.f32.mrf.mxu1  ;;  %6361 = vmatprep.mubr.bf16.mxu0 %v20379_v55  ;;  %v12274_v41 = vmul.f32 -1.442695, %v6023_v51  ;;  %v12208_v34 = vmul.f32 -1.442695, %v5622_v38 }
 0x746   : > { %v14787_v10 = vpop.eup %14786  ;;  %10955 = vst [vmem:[%s18458_s29 + $0x498] sm:$0xff] %v12746_v18  ;;  %v12791_v17 = vpack.c.bf16 %v14785_v23, %v14779_v43  ;;  %14812 = vpow2.f32 %v12188_v61  ;;  %v5618_v43 = vadd.f32 %v19159_v42, %v18467_v57  ;;  %v6025_v18 = vadd.f32 %v6024_v28, %v18386_v33 }
 0x747   : > { %v14789_v44 = vpop.eup %14788  ;;  %14814 = vrcp.f32 %v8344_v48  ;;  %v8423_v31 = vadd.f32 1.0, %v14787_v10  ;;  %v6026_v23 = vpop.f32.mrf.mxu1 }
 0x748   : > { %v14791_v19 = vpop.eup %14790  ;;  %11000 = vst [vmem:[%s18458_s29 + $0x5d4] sm:$0xff] %v12791_v17  ;;  %14816 = vpow2.f32 %v12267_v21  ;;  %v19367_v48 = vpop.f32.mrf.mxu0  ;;  %v12201_v42 = vmul.f32 -1.442695, %v5618_v43  ;;  %v6027_v51 = vadd.f32 %v6026_v23, %v18392_v30 }
 0x749   : > { %v14793_v39 = vpop.eup %14792  ;;  %14818 = vrcp.f32 %v8423_v31  ;;  %v8350_v29 = vadd.f32 1.0, %v14791_v19  ;;  %v12280_v31 = vmul.f32 -1.442695, %v6025_v18  ;;  %v6030_v12 = vpop.f32.mrf.mxu1 }
 0x74a   : > { %v14795_v58 = vpop.eup %14794  ;;  %14820 = vpow2.f32 %v12194_v16 }
 0x74b   : > { %v14797_v49 = vpop.eup %14796  ;;  %14822 = vrcp.f32 %v8350_v29  ;;  %v8429_v61 = vadd.f32 1.0, %v14795_v58  ;;  %v19374_v29 = vpop.f32.mrf.mxu0 }
 0x74c   : > { %v14799_v2 = vpop.eup %14798  ;;  %v12750_v27 = vpack.c.bf16 %v14797_v49, %v14789_v44  ;;  %14824 = vpow2.f32 %v12273_v6  ;;  %v6032_v18 = vpop.f32.mrf.mxu1 }
 0x74d   : > { %v14801_v21 = vpop.eup %14800  ;;  %14826 = vrcp.f32 %v8429_v61  ;;  %v8351_v40 = vadd.f32 1.0, %v14799_v2 }
 0x74e   : > { %v14803_v14 = vpop.eup %14802  ;;  %10959 = vst [vmem:[%s18458_s29 + $0x4b4] sm:$0xff] %v12750_v27  ;;  %v12795_v10 = vpack.c.bf16 %v14801_v21, %v14793_v39  ;;  %14828 = vpow2.f32 %v12195_v20  ;;  %v12202_v20 = vmul.f32 -1.442695, %v5620_v3  ;;  %v12281_v27 = vmul.f32 -1.442695, %v6027_v51  ;;  %v19379_v21 = vpop.f32.mrf.mxu0 }
 0x74f   : > { %v14805_v17 = vpop.eup %14804  ;;  %14830 = vrcp.f32 %v8351_v40  ;;  %v8430_v16 = vadd.f32 1.0, %v14803_v14 }
 0x750   : > { %v14807_v44 = vpop.eup %14806  ;;  %11004 = vst [vmem:[%s18458_s29 + $0x5f0] sm:$0xff] %v12795_v10  ;;  %14832 = vpow2.f32 %v12274_v41  ;;  %v6031_v41 = vadd.f32 %v6030_v12, %v18386_v33  ;;  %v19386_v51 = vpop.f32.mrf.mxu0  ;;  %v20534_v12 = vld [vmem:[#allocation56_spill] sm:$0xff] }
 0x751   : > { %v14809_v19 = vpop.eup %14808  ;;  %14834 = vrcp.f32 %v8430_v16  ;;  %v8357_v6 = vadd.f32 1.0, %v14807_v44  ;;  %6362 = vmatmul.mubr.bf16.gmra.mxu0 %v20534_v12 }
 0x752   : > { %v14811_v39 = vpop.eup %14810  ;;  %14836 = vpow2.f32 %v12201_v42  ;;  %v5624_v42 = vadd.f32 %v19178_v9, %v18475_v53  ;;  %v12287_v44 = vmul.f32 -1.442695, %v6031_v41  ;;  %6371 = vmatprep.mubr.bf16.mxu0 %v20379_v55  ;;  %v19393_v41 = vpop.f32.mrf.mxu0 }
 0x753   : > { %v14813_v28 = vpop.eup %14812  ;;  %14838 = vrcp.f32 %v8357_v6  ;;  %v8436_v58 = vadd.f32 1.0, %v14811_v39  ;;  %v6034_v6 = vpop.f32.mrf.mxu1 }
 0x754   : > { %v14815_v43 = vpop.eup %14814  ;;  %v8358_v49 = vadd.f32 1.0, %v14813_v28  ;;  %14840 = vpow2.f32 %v12280_v31  ;;  %v6033_v31 = vadd.f32 %v6032_v18, %v18392_v30  ;;  %v12209_v28 = vmul.f32 -1.442695, %v5624_v42 }
 0x755   : > { %v14817_v61 = vpop.eup %14816  ;;  %v12754_v2 = vpack.c.bf16 %v14815_v43, %v14805_v17  ;;  %14842 = vrcp.f32 %v8436_v58  ;;  %v5628_v58 = vadd.f32 %v19185_v7, %v18467_v57  ;;  %v5630_v7 = vadd.f32 %v19192_v50, %v18475_v53 }
 0x756   : > { %v14819_v40 = vpop.eup %14818  ;;  %14844 = vrcp.f32 %v8358_v49  ;;  %v8437_v23 = vadd.f32 1.0, %v14817_v61  ;;  %v12288_v61 = vmul.f32 -1.442695, %v6033_v31  ;;  %v19400_v31 = vpop.f32.mrf.mxu0 }
 0x757   : > { %v14821_v14 = vpop.eup %14820  ;;  %10963 = vst [vmem:[%s18458_s29 + $0x4d0] sm:$0xff] %v12754_v2  ;;  %v12799_v10 = vpack.c.bf16 %v14819_v40, %v14809_v19  ;;  %14846 = vpow2.f32 %v12202_v20  ;;  %v6035_v2 = vadd.f32 %v6034_v6, %v18386_v33  ;;  %v12216_v12 = vmul.f32 -1.442695, %v5630_v7 }
 0x758   : > { %v14823_v17 = vpop.eup %14822  ;;  %14848 = vrcp.f32 %v8437_v23  ;;  %v8364_v16 = vadd.f32 1.0, %v14821_v14 }
 0x759   : > { %v14825_v3 = vpop.eup %14824  ;;  %11008 = vst [vmem:[%s18458_s29 + $0x60c] sm:$0xff] %v12799_v10  ;;  %14850 = vpow2.f32 %v12281_v27  ;;  %v6036_v27 = vpop.f32.mrf.mxu1  ;;  %v12215_v10 = vmul.f32 -1.442695, %v5628_v58 }
 0x75a   : > { %v14827_v19 = vpop.eup %14826  ;;  %14852 = vrcp.f32 %v8364_v16  ;;  %v8443_v39 = vadd.f32 1.0, %v14825_v3  ;;  %v12294_v3 = vmul.f32 -1.442695, %v6035_v2 }
 0x75b   : > { %v14829_v9 = vpop.eup %14828  ;;  %14854 = vpow2.f32 %v12208_v34 }
 0x75c   : > { %v14831_v20 = vpop.eup %14830  ;;  %14856 = vrcp.f32 %v8443_v39  ;;  %v8365_v38 = vadd.f32 1.0, %v14829_v9 }
 0x75d   : > { %v14833_v43 = vpop.eup %14832  ;;  %v12758_v49 = vpack.c.bf16 %v14831_v20, %v14823_v17  ;;  %14858 = vpow2.f32 %v12287_v44  ;;  %v6037_v17 = vadd.f32 %v6036_v27, %v18392_v30  ;;  %v6040_v44 = vpop.f32.mrf.mxu1 }
 0x75e   : > { %v14835_v18 = vpop.eup %14834  ;;  %14860 = vrcp.f32 %v8365_v38  ;;  %v8444_v40 = vadd.f32 1.0, %v14833_v43  ;;  %v6041_v20 = vadd.f32 %v6040_v44, %v18386_v33  ;;  %v19405_v38 = vpop.f32.mrf.mxu0 }
 0x75f   : > { %v14837_v23 = vpop.eup %14836  ;;  %10967 = vst [vmem:[%s18458_s29 + $0x4ec] sm:$0xff] %v12758_v49  ;;  %v12803_v14 = vpack.c.bf16 %v14835_v18, %v14827_v19  ;;  %14862 = vpow2.f32 %v12209_v28  ;;  %v5632_v19 = vadd.f32 %v19197_v32, %v18467_v57  ;;  %v12295_v58 = vmul.f32 -1.442695, %v6037_v17 }
 0x760   : > { %v14839_v34 = vpop.eup %14838  ;;  %14864 = vrcp.f32 %v8444_v40  ;;  %v8371_v42 = vadd.f32 1.0, %v14837_v23  ;;  %v5634_v18 = vadd.f32 %v19204_v59, %v18475_v53 }
 0x761   : > { %v14841_v16 = vpop.eup %14840  ;;  %11012 = vst [vmem:[%s18458_s29 + $0x628] sm:$0xff] %v12803_v14  ;;  %14866 = vpow2.f32 %v12288_v61  ;;  %v6042_v61 = vpop.f32.mrf.mxu1  ;;  %v12222_v32 = vmul.f32 -1.442695, %v5632_v19  ;;  %v12301_v14 = vmul.f32 -1.442695, %v6041_v20  ;;  %v20536_v20 = vld [vmem:[#allocation36_spill] sm:$0xff] }
 0x762   : > { %v14843_v6 = vpop.eup %14842  ;;  %14868 = vrcp.f32 %v8371_v42  ;;  %v8450_v50 = vadd.f32 1.0, %v14841_v16  ;;  %v20535_v42 = vld [vmem:[#allocation57_spill] sm:$0xff]  ;;  %v12223_v44 = vmul.f32 -1.442695, %v5634_v18 }
 0x763   : > { %v14845_v39 = vpop.eup %14844  ;;  %14870 = vpow2.f32 %v12215_v10  ;;  %v6043_v10 = vadd.f32 %v6042_v61, %v18392_v30 }
 0x764   : > { %v14847_v9 = vpop.eup %14846  ;;  %v12762_v28 = vpack.c.bf16 %v14845_v39, %v14839_v34  ;;  %14872 = vrcp.f32 %v8450_v50  ;;  %v19412_v34 = vpop.f32.mrf.mxu0  ;;  %6372 = vmatmul.mubr.bf16.gmra.mxu0 %v20535_v42 }
 0x765   : > { %v14849_v43 = vpop.eup %14848  ;;  %v8372_v49 = vadd.f32 1.0, %v14847_v9  ;;  %14874 = vpow2.f32 %v12294_v3  ;;  %v6044_v3 = vpop.f32.mrf.mxu1  ;;  %6381 = vmatprep.mubr.bf16.mxu0 %v20379_v55  ;;  %v12302_v9 = vmul.f32 -1.442695, %v6043_v10 }
 0x766   : > { %v14851_v2 = vpop.eup %14850  ;;  %10971 = vst [vmem:[%s18458_s29 + $0x508] sm:$0xff] %v12762_v28  ;;  %v12807_v27 = vpack.c.bf16 %v14849_v43, %v14843_v6  ;;  %14876 = vpow2.f32 %v12216_v12  ;;  %v5638_v6 = vadd.f32 %v19211_v37, %v18467_v57  ;;  %v6045_v28 = vadd.f32 %v6044_v3, %v18386_v33 }
 0x767   : > { %v14853_v40 = vpop.eup %14852  ;;  %14878 = vrcp.f32 %v8372_v49  ;;  %v8451_v7 = vadd.f32 1.0, %v14851_v2  ;;  %v5046_v43 = vsub.s32 6, %v20536_v20  ;;  %v6046_v61 = vpop.f32.mrf.mxu1  ;;  %v5640_v33 = vadd.f32 %v19218_v13, %v18475_v53 }
 0x768   : > { %v14855_v23 = vpop.eup %14854  ;;  %11016 = vst [vmem:[%s18458_s29 + $0x644] sm:$0xff] %v12807_v27  ;;  %14880 = vpow2.f32 %v12295_v58  ;;  %v19420_v2 = vpop.f32.mrf.mxu0  ;;  %v6047_v42 = vadd.f32 %v6046_v61, %v18392_v30 }
 0x769   : > { %v14857_v17 = vpop.eup %14856  ;;  %14882 = vrcp.f32 %v8451_v7  ;;  %v8378_v16 = vadd.f32 1.0, %v14855_v23  ;;  %v12308_v23 = vmul.f32 -1.442695, %v6045_v28  ;;  %v13132_v3 = vpop.f32.mrf.mxu1 }
 0x76a   : > { %v14859_v59 = vpop.eup %14858  ;;  %14884 = vpow2.f32 %v12222_v32  ;;  %v12229_v32 = vmul.f32 -1.442695, %v5638_v6  ;;  %v12309_v28 = vmul.f32 -1.442695, %v6047_v42 }
 0x76b   : > { %v14861_v50 = vpop.eup %14860  ;;  %14886 = vrcp.f32 %v8378_v16  ;;  %v8457_v12 = vadd.f32 1.0, %v14859_v59  ;;  %v19427_v16 = vld [vmem:[#allocation17] sm:$0xff]  ;;  %v19432_v59 = vpop.f32.mrf.mxu0 }
 0x76c   : > { %v14863_v19 = vpop.eup %14862  ;;  %v12766_v39 = vpack.c.bf16 %v14861_v50, %v14853_v40  ;;  %14888 = vpow2.f32 %v12301_v14  ;;  %v12230_v50 = vmul.f32 -1.442695, %v5640_v33 }
 0x76d   : > { %v14865_v58 = vpop.eup %14864  ;;  %14890 = vrcp.f32 %v8457_v12  ;;  %v8379_v49 = vadd.f32 1.0, %v14863_v19  ;;  %v5642_v12 = vadd.f32 %v19223_v5, %v18467_v57 }
 0x76e   : > { %v14867_v37 = vpop.eup %14866  ;;  %10975 = vst [vmem:[%s18458_s29 + $0x524] sm:$0xff] %v12766_v39  ;;  %v12811_v27 = vpack.c.bf16 %v14865_v58, %v14857_v17  ;;  %14892 = vpow2.f32 %v12223_v44  ;;  %v19430_v17 = vrot.slane %v19427_v16, %v5046_v43  ;;  %v6436_v43 = vpop.f32.mrf.mxu1 }
 0x76f   : > { %v14869_v18 = vpop.eup %14868  ;;  %14894 = vrcp.f32 %v8379_v49  ;;  %v8458_v40 = vadd.f32 1.0, %v14867_v37  ;;  %v19437_v49 = vpop.f32.mrf.mxu0  ;;  %v12236_v5 = vmul.f32 -1.442695, %v5642_v12 }
 0x770   : > { %v14871_v7 = vpop.eup %14870  ;;  %11020 = vst [vmem:[%s18458_s29 + $0x660] sm:$0xff] %v12811_v27  ;;  %14896 = vpow2.f32 %v12302_v9  ;;  %v6445_v58 = vadd.f32 %v13132_v3, %v19430_v17  ;;  %v13133_v42 = vpop.f32.mrf.mxu1 }
 0x771   : > { %v14873_v14 = vpop.eup %14872  ;;  %14898 = vrcp.f32 %v8458_v40  ;;  %v8385_v10 = vadd.f32 1.0, %v14871_v7  ;;  %v5644_v40 = vadd.f32 %v19230_v60, %v18475_v53  ;;  %v19444_v3 = vpop.f32.mrf.mxu0 }
 0x772   : > { %v14875_v44 = vpop.eup %14874  ;;  %14900 = vpow2.f32 %v12229_v32 }
 0x773   : > { %v14877_v13 = vpop.eup %14876  ;;  %14902 = vrcp.f32 %v8385_v10  ;;  %v8464_v6 = vadd.f32 1.0, %v14875_v44  ;;  %v6437_v10 = vadd.f32 %v6436_v43, %v19430_v17  ;;  %v20537_v44 = vld [vmem:[#allocation58_spill] sm:$0xff]  ;;  %v19451_v43 = vpop.f32.mrf.mxu0 }
 0x774   : > { %v14879_v19 = vpop.eup %14878  ;;  %v8386_v30 = vadd.f32 1.0, %v14877_v13  ;;  %14904 = vpow2.f32 %v12308_v23  ;;  %v11885_v23 = vmul.f32 -1.442695, %v6445_v58  ;;  %6382 = vmatmul.mubr.bf16.gmra.mxu0 %v20537_v44  ;;  %v6439_v58 = vpop.f32.mrf.mxu1 }
 0x775   : > { %v14881_v39 = vpop.eup %14880  ;;  %v12770_v9 = vpack.c.bf16 %v14879_v19, %v14869_v18  ;;  %14906 = vrcp.f32 %v8464_v6  ;;  %6391 = vmatprep.mubr.bf16.mxu0 %v20379_v55  ;;  %v12237_v6 = vmul.f32 -1.442695, %v5644_v40 }
 0x776   : > { %v14883_v61 = vpop.eup %14882  ;;  %14908 = vrcp.f32 %v8386_v30  ;;  %v8465_v37 = vadd.f32 1.0, %v14881_v39 }
 0x777   : > { %v14885_v27 = vpop.eup %14884  ;;  %10979 = vst [vmem:[%s18458_s29 + $0x540] sm:$0xff] %v12770_v9  ;;  %v12815_v32 = vpack.c.bf16 %v14883_v61, %v14873_v14  ;;  %14910 = vpow2.f32 %v12230_v50  ;;  %v5648_v50 = vadd.f32 %v19237_v46, %v18467_v57  ;;  %v11871_v9 = vmul.f32 -1.442695, %v6437_v10  ;;  %v19458_v10 = vpop.f32.mrf.mxu0 }
 0x778   : > { %v14887_v18 = vpop.eup %14886  ;;  %14912 = vrcp.f32 %v8465_v37  ;;  %v8392_v33 = vadd.f32 1.0, %v14885_v27  ;;  %v5650_v46 = vadd.f32 %v19244_v11, %v18475_v53 }
 0x779   : > { %v14889_v7 = vpop.eup %14888  ;;  %11024 = vst [vmem:[%s18458_s29 + $0x67c] sm:$0xff] %v12815_v32  ;;  %14914 = vpow2.f32 %v12309_v28  ;;  %v6448_v28 = vadd.f32 %v13133_v42, %v19430_v17  ;;  %v12243_v32 = vmul.f32 -1.442695, %v5648_v50 }
 0x77a   : > { %v14891_v14 = vpop.eup %14890  ;;  %14916 = vrcp.f32 %v8392_v33  ;;  %v8471_v13 = vadd.f32 1.0, %v14889_v7  ;;  %v12244_v44 = vmul.f32 -1.442695, %v5650_v46 }
 0x77b   : > { %v14893_v60 = vpop.eup %14892  ;;  %14918 = vpow2.f32 %v12236_v5  ;;  %v11892_v7 = vmul.f32 -1.442695, %v6448_v28 }
 0x77c   : > { %v14895_v12 = vpop.eup %14894  ;;  %14920 = vrcp.f32 %v8471_v13  ;;  %v8393_v19 = vadd.f32 1.0, %v14893_v60 }
 0x77d   : > { %v14897_v30 = vpop.eup %14896  ;;  %v12774_v39 = vpack.c.bf16 %v14895_v12, %v14887_v18  ;;  %14922 = vpow2.f32 %v11885_v23  ;;  %v6440_v18 = vadd.f32 %v6439_v58, %v19430_v17  ;;  %v13136_v23 = vpop.f32.mrf.mxu1 }
 0x77e   : > { %v14899_v55 = vpop.eup %14898  ;;  %14924 = vrcp.f32 %v8393_v19  ;;  %v8472_v61 = vadd.f32 1.0, %v14897_v30  ;;  %v6461_v12 = vadd.f32 %v13136_v23, %v19430_v17  ;;  %v19463_v19 = vpop.f32.mrf.mxu0 }
 0x77f   : > { %v14901_v37 = vpop.eup %14900  ;;  %10983 = vst [vmem:[%s18458_s29 + $0x55c] sm:$0xff] %v12774_v39  ;;  %v12819_v27 = vpack.c.bf16 %v14899_v55, %v14891_v14  ;;  %14926 = vpow2.f32 %v12237_v6  ;;  %v5652_v14 = vadd.f32 %v19249_v36, %v18467_v57  ;;  %v11878_v50 = vmul.f32 -1.442695, %v6440_v18 }
 0x780   : > { %v14903_v5 = vpop.eup %14902  ;;  %14928 = vrcp.f32 %v8472_v61  ;;  %v8399_v40 = vadd.f32 1.0, %v14901_v37  ;;  %v5654_v55 = vadd.f32 %v19256_v47, %v18475_v53 }
 0x781   : > { %v14905_v33 = vpop.eup %14904  ;;  %11028 = vst [vmem:[%s18458_s29 + $0x698] sm:$0xff] %v12819_v27  ;;  %14930 = vpow2.f32 %v11871_v9  ;;  %v6452_v9 = vpop.f32.mrf.mxu1  ;;  %v12250_v36 = vmul.f32 -1.442695, %v5652_v14  ;;  %v11913_v27 = vmul.f32 -1.442695, %v6461_v12 }
 0x782   : > { %v14907_v42 = vpop.eup %14906  ;;  %14932 = vrcp.f32 %v8399_v40  ;;  %v8478_v11 = vadd.f32 1.0, %v14905_v33  ;;  %v20538_v40 = vld [vmem:[#allocation59_spill] sm:$0xff]  ;;  %v12251_v47 = vmul.f32 -1.442695, %v5654_v55  ;;  %v5660_v55 = vadd.f32 %v19270_v8, %v18475_v53 }
 0x783   : > { %v14909_v13 = vpop.eup %14908  ;;  %14934 = vpow2.f32 %v12243_v32  ;;  %v6453_v32 = vadd.f32 %v6452_v9, %v19430_v17  ;;  %v5662_v8 = vadd.f32 %v19275_v45, %v18467_v57 }
 0x784   : > { %v14911_v60 = vpop.eup %14910  ;;  %v12778_v6 = vpack.c.bf16 %v14909_v13, %v14903_v5  ;;  %14936 = vrcp.f32 %v8478_v11  ;;  %v19470_v5 = vpop.f32.mrf.mxu0  ;;  %6392 = vmatmul.mubr.bf16.gmra.mxu0 %v20538_v40 }
 0x785   : > { %v14913_v30 = vpop.eup %14912  ;;  %v8400_v39 = vadd.f32 1.0, %v14911_v60  ;;  %14938 = vpow2.f32 %v11892_v7  ;;  %v13137_v7 = vpop.f32.mrf.mxu1  ;;  %v11899_v60 = vmul.f32 -1.442695, %v6453_v32  ;;  %v12264_v45 = vmul.f32 -1.442695, %v5662_v8 }
 0x786   : > { %v14915_v28 = vpop.eup %14914  ;;  %10987 = vst [vmem:[%s18458_s29 + $0x578] sm:$0xff] %v12778_v6  ;;  %v12823_v58 = vpack.c.bf16 %v14913_v30, %v14907_v42  ;;  %14940 = vpow2.f32 %v12244_v44  ;;  %v5658_v42 = vadd.f32 %v19263_v52, %v18467_v57  ;;  %v6464_v6 = vadd.f32 %v13137_v7, %v19430_v17 }
 0x787   : > { %v14917_v61 = vpop.eup %14916  ;;  %14942 = vrcp.f32 %v8400_v39  ;;  %v8479_v46 = vadd.f32 1.0, %v14915_v28  ;;  %v6455_v30 = vpop.f32.mrf.mxu1 }
 0x788   : > { %v14919_v37 = vpop.eup %14918  ;;  %11032 = vst [vmem:[%s18458_s29 + $0x6b4] sm:$0xff] %v12823_v58  ;;  %14944 = vpow2.f32 %v11878_v50  ;;  %v19476_v39 = vpop.f32.mrf.mxu0  ;;  %v12257_v52 = vmul.f32 -1.442695, %v5658_v42  ;;  %v6456_v32 = vadd.f32 %v6455_v30, %v19430_v17 }
 0x789   : > { %v14921_v18 = vpop.eup %14920  ;;  %14946 = vrcp.f32 %v8479_v46  ;;  %v8406_v33 = vadd.f32 1.0, %v14919_v37  ;;  %v11920_v46 = vmul.f32 -1.442695, %v6464_v6  ;;  %v13140_v40 = vpop.f32.mrf.mxu1 }
 0x78a   : > { %v14923_v23 = vpop.eup %14922  ;;  %14948 = vpow2.f32 %v12250_v36 }
 0x78b   : > { %v14925_v11 = vpop.eup %14924  ;;  %14950 = vrcp.f32 %v8406_v33  ;;  %v8055_v44 = vadd.f32 1.0, %v14923_v23  ;;  %v19483_v33 = vpop.f32.mrf.mxu0 }
 0x78c   : > { %v14927_v14 = vpop.eup %14926  ;;  %v12782_v13 = vpack.c.bf16 %v14925_v11, %v14917_v61  ;;  %14952 = vpow2.f32 %v11913_v27  ;;  %v6468_v6 = vpop.f32.mrf.mxu1 }
 0x78d   : > { %v14929_v50 = vpop.eup %14928  ;;  %14954 = vrcp.f32 %v8055_v44  ;;  %v8407_v12 = vadd.f32 1.0, %v14927_v14 }
 0x78e   : > { %v14931_v9 = vpop.eup %14930  ;;  %10991 = vst [vmem:[%s18458_s29 + $0x594] sm:$0xff] %v12782_v13  ;;  %v12827_v28 = vpack.c.bf16 %v14929_v50, %v14921_v18  ;;  %14956 = vpow2.f32 %v12251_v47  ;;  %v12258_v47 = vmul.f32 -1.442695, %v5660_v55  ;;  %v11906_v13 = vmul.f32 -1.442695, %v6456_v32  ;;  %v19488_v50 = vpop.f32.mrf.mxu0 }
 0x78f   : > { %v14933_v58 = vpop.eup %14932  ;;  %14958 = vrcp.f32 %v8407_v12  ;;  %v8041_v36 = vadd.f32 1.0, %v14931_v9 }
 0x790   : > { %v14935_v61 = vpop.eup %14934  ;;  %11036 = vst [vmem:[%s18458_s29 + $0x6d0] sm:$0xff] %v12827_v28  ;;  %14960 = vpow2.f32 %v11899_v60  ;;  %v6477_v60 = vadd.f32 %v13140_v40, %v19430_v17  ;;  %v19495_v32 = vpop.f32.mrf.mxu0 }
 0x791   : > { %v14937_v37 = vpop.eup %14936  ;;  %14962 = vrcp.f32 %v8041_v36  ;;  %v8413_v27 = vadd.f32 1.0, %v14935_v61 }
 0x792   : > { %v14939_v18 = vpop.eup %14938  ;;  %14964 = vpow2.f32 %v12257_v52  ;;  %v5664_v52 = vadd.f32 %v19282_v22, %v18475_v53  ;;  %v11941_v61 = vmul.f32 -1.442695, %v6477_v60  ;;  %v19501_v60 = vpop.f32.mrf.mxu0 }
 0x793   : > { %v14941_v7 = vpop.eup %14940  ;;  %14966 = vrcp.f32 %v8413_v27  ;;  %v8062_v23 = vadd.f32 1.0, %v14939_v18  ;;  %v13141_v27 = vpop.f32.mrf.mxu1 }
 0x794   : > { %v14943_v42 = vpop.eup %14942  ;;  %v8414_v11 = vadd.f32 1.0, %v14941_v7  ;;  %14968 = vpow2.f32 %v11920_v46  ;;  %v6469_v46 = vadd.f32 %v6468_v6, %v19430_v17  ;;  %v12265_v22 = vmul.f32 -1.442695, %v5664_v52 }
 0x795   : > { %v14945_v44 = vpop.eup %14944  ;;  %v12786_v14 = vpack.c.bf16 %v14943_v42, %v14933_v58  ;;  %14970 = vrcp.f32 %v8062_v23  ;;  %v5668_v23 = vadd.f32 %v19289_v35, %v18467_v57  ;;  %v5670_v35 = vadd.f32 %v19296_v0, %v18475_v53 }
 0x796   : > { %v14947_v12 = vpop.eup %14946  ;;  %14972 = vrcp.f32 %v8414_v11  ;;  %v8048_v30 = vadd.f32 1.0, %v14945_v44  ;;  %v11927_v44 = vmul.f32 -1.442695, %v6469_v46  ;;  %v19508_v46 = vpop.f32.mrf.mxu0 }
 0x797   : > { %v14949_v9 = vpop.eup %14948  ;;  %10995 = vst [vmem:[%s18458_s29 + $0x5b0] sm:$0xff] %v12786_v14  ;;  %v12831_v28 = vpack.c.bf16 %v14947_v12, %v14937_v37  ;;  %14974 = vpow2.f32 %v12258_v47  ;;  %v6480_v14 = vadd.f32 %v13141_v27, %v19430_v17 }
 0x798   : > { %v14951_v58 = vpop.eup %14950  ;;  %14976 = vrcp.f32 %v8048_v30  ;;  %v8420_v36 = vadd.f32 1.0, %v14949_v9 }
 0x799   : > { %v14953_v55 = vpop.eup %14952  ;;  %11040 = vst [vmem:[%s18458_s29 + $0x6ec] sm:$0xff] %v12831_v28  ;;  %14978 = vpow2.f32 %v11906_v13  ;;  %v6471_v13 = vpop.f32.mrf.mxu1  ;;  %v12271_v28 = vmul.f32 -1.442695, %v5668_v23 }
 0x79a   : > { %v14955_v40 = vpop.eup %14954  ;;  %14980 = vrcp.f32 %v8420_v36  ;;  %v8083_v37 = vadd.f32 1.0, %v14953_v55  ;;  %v11948_v55 = vmul.f32 -1.442695, %v6480_v14  ;;  %v19514_v14 = vpop.f32.mrf.mxu0 }
 0x79b   : > { %v14957_v18 = vpop.eup %14956  ;;  %v12589_v7 = vpack.c.bf16 %v14955_v40, %v14955_v40  ;;  %14982 = vpow2.f32 %v12264_v45  ;;  %v12272_v40 = vmul.f32 -1.442695, %v5670_v35 }
 0x79c   : > { %v14959_v47 = vpop.eup %14958  ;;  %14984 = vrcp.f32 %v8083_v37  ;;  %v8421_v8 = vadd.f32 1.0, %v14957_v18  ;;  %v5672_v37 = vadd.f32 %v19301_v4, %v18467_v57 }
 0x79d   : > { %v14961_v42 = vpop.eup %14960  ;;  %10798 = vst [vmem:[%s18458_s29 + $0x50] sm:$0xf] %v12589_v7  ;;  %v12790_v11 = vpack.c.bf16 %v14959_v47, %v14951_v58  ;;  %14986 = vpow2.f32 %v11941_v61  ;;  %v6472_v58 = vadd.f32 %v6471_v13, %v19430_v17  ;;  %v13144_v61 = vpop.f32.mrf.mxu1 }
 0x79e   : > { %v14963_v6 = vpop.eup %14962  ;;  %14988 = vrcp.f32 %v8421_v8  ;;  %v8069_v12 = vadd.f32 1.0, %v14961_v42  ;;  %v6493_v8 = vadd.f32 %v13144_v61, %v19430_v17 }
 0x79f   : > { %v14965_v30 = vpop.eup %14964  ;;  %10999 = vst [vmem:[%s18458_s29 + $0x5cc] sm:$0xff] %v12790_v11  ;;  %v12581_v9 = vpack.c.bf16 %v14963_v6, %v14963_v6  ;;  %14990 = vpow2.f32 %v12265_v22  ;;  %v11934_v47 = vmul.f32 -1.442695, %v6472_v58  ;;  %v12278_v6 = vmul.f32 -1.442695, %v5672_v37 }
 0x7a0   : > { %v14967_v45 = vpop.eup %14966  ;;  %14992 = vrcp.f32 %v8069_v12  ;;  %v8427_v52 = vadd.f32 1.0, %v14965_v30  ;;  %v5674_v12 = vadd.f32 %v19308_v24, %v18475_v53 }
 0x7a1   : > { %v14969_v36 = vpop.eup %14968  ;;  %10790 = vst [vmem:[%s18458_s29 + $0x18] sm:$0xf] %v12581_v9  ;;  %14994 = vpow2.f32 %v11927_v44  ;;  %v6484_v44 = vpop.f32.mrf.mxu1 }
 0x7a2   : > { %v14971_v27 = vpop.eup %14970  ;;  %14996 = vrcp.f32 %v8427_v52  ;;  %v8090_v0 = vadd.f32 1.0, %v14969_v36  ;;  %v12279_v24 = vmul.f32 -1.442695, %v5674_v12  ;;  %v5680_v12 = vadd.f32 %v19322_v54, %v18475_v53 }
 0x7a3   : > { %v14973_v18 = vpop.eup %14972  ;;  %v12593_v7 = vpack.c.bf16 %v14971_v27, %v14971_v27  ;;  %14998 = vpow2.f32 %v12271_v28  ;;  %v11969_v28 = vmul.f32 -1.442695, %v6493_v8  ;;  %v13145_v36 = vpop.f32.mrf.mxu1 }
 0x7a4   : > { %v14975_v22 = vpop.eup %14974  ;;  %v12794_v23 = vpack.c.bf16 %v14973_v18, %v14967_v45  ;;  %15000 = vrcp.f32 %v8090_v0  ;;  %v6485_v45 = vadd.f32 %v6484_v44, %v19430_v17  ;;  %v5678_v0 = vadd.f32 %v19315_v63, %v18467_v57 }
 0x7a5   : > { %v14977_v42 = vpop.eup %14976  ;;  %10802 = vst [vmem:[%s18458_s29 + $0x6c] sm:$0xf] %v12593_v7  ;;  %v8428_v11 = vadd.f32 1.0, %v14975_v22  ;;  %15002 = vpow2.f32 %v11948_v55  ;;  %v19521_v55 = vpop.f32.mrf.mxu0  ;;  %v12286_v54 = vmul.f32 -1.442695, %v5680_v12 }
 0x7a6   : > { %v14979_v13 = vpop.eup %14978  ;;  %11003 = vst [vmem:[%s18458_s29 + $0x5e8] sm:$0xff] %v12794_v23  ;;  %v12585_v4 = vpack.c.bf16 %v14977_v42, %v14977_v42  ;;  %15004 = vpow2.f32 %v12272_v40  ;;  %v11955_v22 = vmul.f32 -1.442695, %v6485_v45  ;;  %v6496_v23 = vadd.f32 %v13145_v36, %v19430_v17  ;;  %v6487_v42 = vpop.f32.mrf.mxu1 }
 0x7a7   : > { %v14981_v35 = vpop.eup %14980  ;;  %15006 = vrcp.f32 %v8428_v11  ;;  %v8076_v30 = vadd.f32 1.0, %v14979_v13  ;;  %v19527_v11 = vpop.f32.mrf.mxu0  ;;  %v12285_v13 = vmul.f32 -1.442695, %v5678_v0  ;;  %v6488_v45 = vadd.f32 %v6487_v42, %v19430_v17 }
 0x7a8   : > { %v14983_v9 = vpop.eup %14982  ;;  %10794 = vst [vmem:[%s18458_s29 + $0x34] sm:$0xf] %v12585_v4  ;;  %15008 = vpow2.f32 %v11934_v47  ;;  %v5682_v0 = vadd.f32 %v19327_v62, %v18467_v57 }
 0x7a9   : > { %v14985_v52 = vpop.eup %14984  ;;  %15010 = vrcp.f32 %v8076_v30  ;;  %v8434_v58 = vadd.f32 1.0, %v14983_v9  ;;  %v11976_v30 = vmul.f32 -1.442695, %v6496_v23 }
 0x7aa   : > { %v14987_v61 = vpop.eup %14986  ;;  %v12605_v27 = vpack.c.bf16 %v14985_v52, %v14985_v52  ;;  %15012 = vpow2.f32 %v12278_v6  ;;  %v13148_v52 = vpop.f32.mrf.mxu1 }
 0x7ab   : > { %v14989_v40 = vpop.eup %14988  ;;  %15014 = vrcp.f32 %v8434_v58  ;;  %v8111_v37 = vadd.f32 1.0, %v14987_v61  ;;  %v19534_v58 = vpop.f32.mrf.mxu0  ;;  %v6509_v23 = vadd.f32 %v13148_v52, %v19430_v17 }
 0x7ac   : > { %v14991_v18 = vpop.eup %14990  ;;  %10814 = vst [vmem:[%s18458_s29 + $0xc0] sm:$0xf] %v12605_v27  ;;  %v12798_v7 = vpack.c.bf16 %v14989_v40, %v14981_v35  ;;  %15016 = vpow2.f32 %v11969_v28 }
 0x7ad   : > { %v14993_v47 = vpop.eup %14992  ;;  %15018 = vrcp.f32 %v8111_v37  ;;  %v8435_v8 = vadd.f32 1.0, %v14991_v18 }
 0x7ae   : > { %v14995_v44 = vpop.eup %14994  ;;  %11007 = vst [vmem:[%s18458_s29 + $0x604] sm:$0xff] %v12798_v7  ;;  %v12597_v63 = vpack.c.bf16 %v14993_v47, %v14993_v47  ;;  %15020 = vpow2.f32 %v12279_v24  ;;  %v6500_v47 = vpop.f32.mrf.mxu1 }
 0x7af   : > { %v14997_v4 = vpop.eup %14996  ;;  %15022 = vrcp.f32 %v8435_v8  ;;  %v8097_v6 = vadd.f32 1.0, %v14995_v44  ;;  %v19540_v8 = vpop.f32.mrf.mxu0 }
 0x7b0   : > { %v14999_v35 = vpop.eup %14998  ;;  %10806 = vst [vmem:[%s18458_s29 + $0x88] sm:$0xf] %v12597_v63  ;;  %15024 = vpow2.f32 %v11955_v22  ;;  %v11962_v22 = vmul.f32 -1.442695, %v6488_v45 }
 0x7b1   : > { %v15001_v9 = vpop.eup %15000  ;;  %15026 = vrcp.f32 %v8097_v6  ;;  %v8441_v28 = vadd.f32 1.0, %v14999_v35  ;;  %v5684_v6 = vadd.f32 %v19334_v15, %v18475_v53  ;;  %v19547_v45 = vpop.f32.mrf.mxu0 }
 0x7b2   : > { %v15003_v36 = vpop.eup %15002  ;;  %v12609_v61 = vpack.c.bf16 %v15001_v9, %v15001_v9  ;;  %15028 = vpow2.f32 %v12285_v13  ;;  %v12292_v13 = vmul.f32 -1.442695, %v5682_v0  ;;  %v6501_v9 = vadd.f32 %v6500_v47, %v19430_v17 }
 0x7b3   : > { %v15005_v27 = vpop.eup %15004  ;;  %15030 = vrcp.f32 %v8441_v28  ;;  %v8118_v24 = vadd.f32 1.0, %v15003_v36  ;;  %v13149_v28 = vpop.f32.mrf.mxu1  ;;  %v12293_v15 = vmul.f32 -1.442695, %v5684_v6 }
 0x7b4   : > { %v15007_v40 = vpop.eup %15006  ;;  %10818 = vst [vmem:[%s18458_s29 + $0xdc] sm:$0xf] %v12609_v61  ;;  %v8442_v37 = vadd.f32 1.0, %v15005_v27  ;;  %15032 = vpow2.f32 %v11976_v30  ;;  %v11997_v30 = vmul.f32 -1.442695, %v6509_v23  ;;  %v19553_v23 = vpop.f32.mrf.mxu0 }
 0x7b5   : > { %v15009_v18 = vpop.eup %15008  ;;  %v12802_v7 = vpack.c.bf16 %v15007_v40, %v14997_v4  ;;  %15034 = vrcp.f32 %v8118_v24  ;;  %v5688_v24 = vadd.f32 %v19341_v56, %v18467_v57  ;;  %v5690_v56 = vadd.f32 %v19348_v1, %v18475_v53 }
 0x7b6   : > { %v15011_v42 = vpop.eup %15010  ;;  %15036 = vrcp.f32 %v8442_v37  ;;  %v8104_v44 = vadd.f32 1.0, %v15009_v18  ;;  %v11983_v18 = vmul.f32 -1.442695, %v6501_v9  ;;  %v19562_v1 = vpop.f32.mrf.mxu0 }
 0x7b7   : > { %v15013_v63 = vpop.eup %15012  ;;  %11011 = vst [vmem:[%s18458_s29 + $0x620] sm:$0xff] %v12802_v7  ;;  %v12601_v62 = vpack.c.bf16 %v15011_v42, %v15011_v42  ;;  %15038 = vpow2.f32 %v12286_v54  ;;  %v6512_v7 = vadd.f32 %v13149_v28, %v19430_v17 }
 0x7b8   : > { %v15015_v4 = vpop.eup %15014  ;;  %15040 = vrcp.f32 %v8104_v44  ;;  %v8448_v12 = vadd.f32 1.0, %v15013_v63 }
 0x7b9   : > { %v15017_v35 = vpop.eup %15016  ;;  %10810 = vst [vmem:[%s18458_s29 + $0xa4] sm:$0xf] %v12601_v62  ;;  %15042 = vpow2.f32 %v11962_v22  ;;  %v6503_v22 = vpop.f32.mrf.mxu1  ;;  %v12299_v62 = vmul.f32 -1.442695, %v5688_v24 }
 0x7ba   : > { %v15019_v52 = vpop.eup %15018  ;;  %15044 = vrcp.f32 %v8448_v12  ;;  %v8139_v36 = vadd.f32 1.0, %v15017_v35  ;;  %v12004_v35 = vmul.f32 -1.442695, %v6512_v7  ;;  %v19567_v7 = vpop.f32.mrf.mxu0 }
 0x7bb   : > { %v15021_v61 = vpop.eup %15020  ;;  %v12621_v27 = vpack.c.bf16 %v15019_v52, %v15019_v52  ;;  %15046 = vpow2.f32 %v12292_v13  ;;  %v13152_v9 = vpop.f32.mrf.mxu1  ;;  %v5038_v52 = vsub.s32 4, %v20536_v20 }
 0x7bc   : > { %v15023_v54 = vpop.eup %15022  ;;  %15048 = vrcp.f32 %v8139_v36  ;;  %v8449_v0 = vadd.f32 1.0, %v15021_v61  ;;  %v12300_v61 = vmul.f32 -1.442695, %v5690_v56 }
 0x7bd   : > { %v15025_v40 = vpop.eup %15024  ;;  %10830 = vst [vmem:[%s18458_s29 + $0x130] sm:$0xf] %v12621_v27  ;;  %v12806_v37 = vpack.c.bf16 %v15023_v54, %v15015_v4  ;;  %15050 = vpow2.f32 %v11997_v30  ;;  %v6504_v4 = vadd.f32 %v6503_v22, %v19430_v17  ;;  %v5692_v30 = vadd.f32 %v19353_v25, %v18467_v57 }
 0x7be   : > { %v15027_v47 = vpop.eup %15026  ;;  %15052 = vrcp.f32 %v8449_v0  ;;  %v8125_v42 = vadd.f32 1.0, %v15025_v40  ;;  %v6525_v57 = vadd.f32 %v13152_v9, %v19430_v17  ;;  %v19573_v56 = vrot.slane %v19427_v16, %v5038_v52 }
 0x7bf   : > { %v15029_v44 = vpop.eup %15028  ;;  %11015 = vst [vmem:[%s18458_s29 + $0x63c] sm:$0xff] %v12806_v37  ;;  %v12613_v63 = vpack.c.bf16 %v15027_v47, %v15027_v47  ;;  %15054 = vpow2.f32 %v12293_v15  ;;  %v11990_v0 = vmul.f32 -1.442695, %v6504_v4  ;;  %v12306_v37 = vmul.f32 -1.442695, %v5692_v30 }
 0x7c0   : > { %v15031_v13 = vpop.eup %15030  ;;  %15056 = vrcp.f32 %v8125_v42  ;;  %v8455_v6 = vadd.f32 1.0, %v15029_v44  ;;  %v5694_v42 = vadd.f32 %v19360_v26, %v18475_v53  ;;  %v19578_v53 = vpop.f32.mrf.mxu0 }
 0x7c1   : > { %v15033_v12 = vpop.eup %15032  ;;  %10822 = vst [vmem:[%s18458_s29 + $0xf8] sm:$0xf] %v12613_v63  ;;  %15058 = vpow2.f32 %v11983_v18  ;;  %v6516_v18 = vpop.f32.mrf.mxu1  ;;  %v5042_v63 = vsub.s32 5, %v20536_v20  ;;  %v6084_v20 = vadd.f32 %v19367_v48, %v19573_v56 }
 0x7c2   : > { %v15035_v28 = vpop.eup %15034  ;;  %15060 = vrcp.f32 %v8455_v6  ;;  %v8146_v36 = vadd.f32 1.0, %v15033_v12  ;;  %v12025_v6 = vmul.f32 -1.442695, %v6525_v57  ;;  %v6517_v4 = vadd.f32 %v6516_v18, %v19430_v17  ;;  %v19587_v48 = vpop.f32.mrf.mxu0 }
 0x7c3   : > { %v15037_v27 = vpop.eup %15036  ;;  %v12625_v15 = vpack.c.bf16 %v15035_v28, %v15035_v28  ;;  %15062 = vpow2.f32 %v12299_v62  ;;  %v13153_v30 = vpop.f32.mrf.mxu1  ;;  %v12307_v28 = vmul.f32 -1.442695, %v5694_v42 }
 0x7c4   : > { %v15039_v24 = vpop.eup %15038  ;;  %v12810_v54 = vpack.c.bf16 %v15037_v27, %v15031_v13  ;;  %15064 = vrcp.f32 %v8146_v36 }
 0x7c5   : > { %v15041_v25 = vpop.eup %15040  ;;  %10834 = vst [vmem:[%s18458_s29 + $0x14c] sm:$0xf] %v12625_v15  ;;  %v8456_v40 = vadd.f32 1.0, %v15039_v24  ;;  %15066 = vpow2.f32 %v12004_v35  ;;  %v12011_v24 = vmul.f32 -1.442695, %v6517_v4  ;;  %v19594_v4 = vpop.f32.mrf.mxu0 }
 0x7c6   : > { %v15043_v22 = vpop.eup %15042  ;;  %11019 = vst [vmem:[%s18458_s29 + $0x658] sm:$0xff] %v12810_v54  ;;  %v12617_v47 = vpack.c.bf16 %v15041_v25, %v15041_v25  ;;  %15068 = vpow2.f32 %v12300_v61  ;;  %v19583_v61 = vrot.slane %v19427_v16, %v5042_v63  ;;  %v6528_v54 = vadd.f32 %v13153_v30, %v19430_v17  ;;  %v6519_v25 = vpop.f32.mrf.mxu1 }
 0x7c7   : > { %v15045_v44 = vpop.eup %15044  ;;  %15070 = vrcp.f32 %v8456_v40  ;;  %v8132_v62 = vadd.f32 1.0, %v15043_v22  ;;  %v11869_v16 = vmul.f32 -1.442695, %v6084_v20 }
 0x7c8   : > { %v15047_v13 = vpop.eup %15046  ;;  %10826 = vst [vmem:[%s18458_s29 + $0x114] sm:$0xf] %v12617_v47  ;;  %15072 = vpow2.f32 %v11990_v0  ;;  %v6086_v47 = vadd.f32 %v19374_v29, %v19583_v61 }
 0x7c9   : > { %v15049_v12 = vpop.eup %15048  ;;  %15074 = vrcp.f32 %v8132_v62  ;;  %v8462_v35 = vadd.f32 1.0, %v15047_v13  ;;  %v6520_v13 = vadd.f32 %v6519_v25, %v19430_v17 }
 0x7ca   : > { %v15051_v26 = vpop.eup %15050  ;;  %v12637_v9 = vpack.c.bf16 %v15049_v12, %v15049_v12  ;;  %15076 = vpow2.f32 %v12306_v37  ;;  %v11870_v29 = vmul.f32 -1.442695, %v6086_v47 }
 0x7cb   : > { %v15053_v52 = vpop.eup %15052  ;;  %15078 = vrcp.f32 %v8462_v35  ;;  %v8167_v36 = vadd.f32 1.0, %v15051_v26 }
 0x7cc   : > { %v15055_v27 = vpop.eup %15054  ;;  %10846 = vst [vmem:[%s18458_s29 + $0x1a0] sm:$0xf] %v12637_v9  ;;  %v12814_v15 = vpack.c.bf16 %v15053_v52, %v15045_v44  ;;  %15080 = vpow2.f32 %v12025_v6  ;;  %v12032_v44 = vmul.f32 -1.442695, %v6528_v54  ;;  %v13156_v6 = vpop.f32.mrf.mxu1  ;;  %v6088_v9 = vadd.f32 %v19379_v21, %v19573_v56 }
 0x7cd   : > { %v15057_v0 = vpop.eup %15056  ;;  %15082 = vrcp.f32 %v8167_v36  ;;  %v8463_v57 = vadd.f32 1.0, %v15055_v27  ;;  %v12018_v27 = vmul.f32 -1.442695, %v6520_v13  ;;  %v19600_v54 = vpop.f32.mrf.mxu0 }
 0x7ce   : > { %v15059_v40 = vpop.eup %15058  ;;  %11023 = vst [vmem:[%s18458_s29 + $0x674] sm:$0xff] %v12814_v15  ;;  %v12629_v37 = vpack.c.bf16 %v15057_v0, %v15057_v0  ;;  %15084 = vpow2.f32 %v12307_v28  ;;  %v6541_v15 = vadd.f32 %v13156_v6, %v19430_v17 }
 0x7cf   : > { %v15061_v18 = vpop.eup %15060  ;;  %15086 = vrcp.f32 %v8463_v57  ;;  %v8153_v22 = vadd.f32 1.0, %v15059_v40  ;;  %v11876_v40 = vmul.f32 -1.442695, %v6088_v9 }
 0x7d0   : > { %v15063_v42 = vpop.eup %15062  ;;  %10838 = vst [vmem:[%s18458_s29 + $0x168] sm:$0xf] %v12629_v37  ;;  %15088 = vpow2.f32 %v12011_v24  ;;  %v6532_v24 = vpop.f32.mrf.mxu1  ;;  %v6090_v37 = vadd.f32 %v19386_v51, %v19583_v61  ;;  %v12053_v47 = vmul.f32 -1.442695, %v6541_v15 }
 0x7d1   : > { %v15065_v63 = vpop.eup %15064  ;;  %15090 = vrcp.f32 %v8153_v22  ;;  %v8469_v62 = vadd.f32 1.0, %v15063_v42  ;;  %v6533_v42 = vadd.f32 %v6532_v24, %v19430_v17 }
 0x7d2   : > { %v15067_v12 = vpop.eup %15066  ;;  %v12641_v35 = vpack.c.bf16 %v15065_v63, %v15065_v63  ;;  %15092 = vpow2.f32 %v11869_v16  ;;  %v19607_v63 = vpop.f32.mrf.mxu0  ;;  %v11877_v51 = vmul.f32 -1.442695, %v6090_v37 }
 0x7d3   : > { %v15069_v30 = vpop.eup %15068  ;;  %15094 = vrcp.f32 %v8469_v62  ;;  %v8174_v26 = vadd.f32 1.0, %v15067_v12 }
 0x7d4   : > { %v15071_v28 = vpop.eup %15070  ;;  %10850 = vst [vmem:[%s18458_s29 + $0x1bc] sm:$0xf] %v12641_v35  ;;  %v8470_v20 = vadd.f32 1.0, %v15069_v30  ;;  %15096 = vpow2.f32 %v12032_v44  ;;  %v13157_v44 = vpop.f32.mrf.mxu1  ;;  %v6094_v35 = vadd.f32 %v19393_v41, %v19573_v56  ;;  %v6096_v41 = vadd.f32 %v19400_v31, %v19583_v61 }
 0x7d5   : > { %v15073_v52 = vpop.eup %15072  ;;  %v12818_v36 = vpack.c.bf16 %v15071_v28, %v15061_v18  ;;  %15098 = vrcp.f32 %v8174_v26  ;;  %v12039_v28 = vmul.f32 -1.442695, %v6533_v42 }
 0x7d6   : > { %v15075_v0 = vpop.eup %15074  ;;  %15100 = vrcp.f32 %v8470_v20  ;;  %v8160_v57 = vadd.f32 1.0, %v15073_v52  ;;  %v6544_v20 = vadd.f32 %v13157_v44, %v19430_v17  ;;  %v6535_v52 = vpop.f32.mrf.mxu1  ;;  %v11884_v42 = vmul.f32 -1.442695, %v6096_v41 }
 0x7d7   : > { %v15077_v25 = vpop.eup %15076  ;;  %11027 = vst [vmem:[%s18458_s29 + $0x690] sm:$0xff] %v12818_v36  ;;  %v12633_v21 = vpack.c.bf16 %v15075_v0, %v15075_v0  ;;  %15102 = vpow2.f32 %v11870_v29  ;;  %v19613_v36 = vpop.f32.mrf.mxu0  ;;  %v6098_v44 = vadd.f32 %v19405_v38, %v19573_v56 }
 0x7d8   : > { %v15079_v16 = vpop.eup %15078  ;;  %15104 = vrcp.f32 %v8160_v57  ;;  %v8476_v18 = vadd.f32 1.0, %v15077_v25  ;;  %v11883_v57 = vmul.f32 -1.442695, %v6094_v35 }
 0x7d9   : > { %v15081_v22 = vpop.eup %15080  ;;  %10842 = vst [vmem:[%s18458_s29 + $0x184] sm:$0xf] %v12633_v21  ;;  %15106 = vpow2.f32 %v12018_v27 }
 0x7da   : > { %v15083_v62 = vpop.eup %15082  ;;  %15108 = vrcp.f32 %v8476_v18  ;;  %v8195_v13 = vadd.f32 1.0, %v15081_v22  ;;  %v13160_v18 = vpop.f32.mrf.mxu1 }
 0x7db   : > { %v15085_v6 = vpop.eup %15084  ;;  %v12653_v12 = vpack.c.bf16 %v15083_v62, %v15083_v62  ;;  %15110 = vpow2.f32 %v11876_v40  ;;  %v6536_v40 = vadd.f32 %v6535_v52, %v19430_v17  ;;  %v19620_v22 = vpop.f32.mrf.mxu0  ;;  %v6557_v35 = vadd.f32 %v13160_v18, %v19430_v17 }
 0x7dc   : > { %v15087_v30 = vpop.eup %15086  ;;  %15112 = vrcp.f32 %v8195_v13  ;;  %v8477_v26 = vadd.f32 1.0, %v15085_v6  ;;  %v6100_v52 = vadd.f32 %v19412_v34, %v19583_v61  ;;  %v6104_v18 = vadd.f32 %v19420_v2, %v19573_v56 }
 0x7dd   : > { %v15089_v29 = vpop.eup %15088  ;;  %10862 = vst [vmem:[%s18458_s29 + $0x210] sm:$0xf] %v12653_v12  ;;  %v12822_v9 = vpack.c.bf16 %v15087_v30, %v15079_v16  ;;  %15114 = vpow2.f32 %v12053_v47  ;;  %v12060_v16 = vmul.f32 -1.442695, %v6544_v20  ;;  %v11890_v20 = vmul.f32 -1.442695, %v6098_v44 }
 0x7de   : > { %v15091_v27 = vpop.eup %15090  ;;  %15116 = vrcp.f32 %v8477_v26  ;;  %v8181_v15 = vadd.f32 1.0, %v15089_v29  ;;  %v6548_v29 = vpop.f32.mrf.mxu1  ;;  %v11891_v34 = vmul.f32 -1.442695, %v6100_v52 }
 0x7df   : > { %v15093_v24 = vpop.eup %15092  ;;  %11031 = vst [vmem:[%s18458_s29 + $0x6ac] sm:$0xff] %v12822_v9  ;;  %v12645_v0 = vpack.c.bf16 %v15091_v27, %v15091_v27  ;;  %15118 = vpow2.f32 %v11877_v51  ;;  %v12046_v51 = vmul.f32 -1.442695, %v6536_v40  ;;  %v19626_v9 = vpop.f32.mrf.mxu0 }
 0x7e0   : > { %v15095_v25 = vpop.eup %15094  ;;  %15120 = vrcp.f32 %v8181_v15  ;;  %v8039_v21 = vadd.f32 1.0, %v15093_v24  ;;  %v12081_v24 = vmul.f32 -1.442695, %v6557_v35 }
 0x7e1   : > { %v15097_v37 = vpop.eup %15096  ;;  %10854 = vst [vmem:[%s18458_s29 + $0x1d8] sm:$0xf] %v12645_v0  ;;  %15122 = vpow2.f32 %v12039_v28  ;;  %v6549_v0 = vadd.f32 %v6548_v29, %v19430_v17  ;;  %v19633_v40 = vpop.f32.mrf.mxu0 }
 0x7e2   : > { %v15099_v47 = vpop.eup %15098  ;;  %15124 = vrcp.f32 %v8039_v21  ;;  %v8202_v31 = vadd.f32 1.0, %v15097_v37  ;;  %v13161_v21 = vpop.f32.mrf.mxu1 }
 0x7e3   : > { %v15101_v62 = vpop.eup %15100  ;;  %v12657_v13 = vpack.c.bf16 %v15099_v47, %v15099_v47  ;;  %15126 = vpow2.f32 %v11883_v57  ;;  %v19639_v35 = vpop.f32.mrf.mxu0 }
 0x7e4   : > { %v15103_v6 = vpop.eup %15102  ;;  %v12826_v12 = vpack.c.bf16 %v15101_v62, %v15095_v25  ;;  %15128 = vrcp.f32 %v8202_v31  ;;  %v12067_v62 = vmul.f32 -1.442695, %v6549_v0 }
 0x7e5   : > { %v15105_v30 = vpop.eup %15104  ;;  %10866 = vst [vmem:[%s18458_s29 + $0x22c] sm:$0xf] %v12657_v13  ;;  %v8040_v26 = vadd.f32 1.0, %v15103_v6  ;;  %15130 = vpow2.f32 %v12060_v16  ;;  %v6560_v13 = vadd.f32 %v13161_v21, %v19430_v17  ;;  %v19646_v0 = vpop.f32.mrf.mxu0 }
 0x7e6   : > { %v15107_v28 = vpop.eup %15106  ;;  %11035 = vst [vmem:[%s18458_s29 + $0x6c8] sm:$0xff] %v12826_v12  ;;  %v12649_v38 = vpack.c.bf16 %v15105_v30, %v15105_v30  ;;  %15132 = vpow2.f32 %v11884_v42 }
 0x7e7   : > { %v15109_v27 = vpop.eup %15108  ;;  %15134 = vrcp.f32 %v8040_v26  ;;  %v8188_v15 = vadd.f32 1.0, %v15107_v28  ;;  %v11897_v26 = vmul.f32 -1.442695, %v6104_v18  ;;  %v12088_v52 = vmul.f32 -1.442695, %v6560_v13  ;;  %v19652_v13 = vpop.f32.mrf.mxu0 }
 0x7e8   : > { %v15111_v41 = vpop.eup %15110  ;;  %10858 = vst [vmem:[%s18458_s29 + $0x1f4] sm:$0xf] %v12649_v38  ;;  %15136 = vpow2.f32 %v12046_v51  ;;  %v6551_v51 = vpop.f32.mrf.mxu1  ;;  %v6106_v38 = vadd.f32 %v19432_v59, %v19583_v61 }
 0x7e9   : > { %v15113_v57 = vpop.eup %15112  ;;  %15138 = vrcp.f32 %v8188_v15  ;;  %v8046_v25 = vadd.f32 1.0, %v15111_v41  ;;  %v6552_v41 = vadd.f32 %v6551_v51, %v19430_v17 }
 0x7ea   : > { %v15115_v37 = vpop.eup %15114  ;;  %v12669_v16 = vpack.c.bf16 %v15113_v57, %v15113_v57  ;;  %15140 = vpow2.f32 %v11890_v20  ;;  %v11898_v59 = vmul.f32 -1.442695, %v6106_v38 }
 0x7eb   : > { %v15117_v47 = vpop.eup %15116  ;;  %15142 = vrcp.f32 %v8046_v25  ;;  %v8223_v31 = vadd.f32 1.0, %v15115_v37 }
 0x7ec   : > { %v15119_v42 = vpop.eup %15118  ;;  %10878 = vst [vmem:[%s18458_s29 + $0x280] sm:$0xf] %v12669_v16  ;;  %v12830_v44 = vpack.c.bf16 %v15117_v47, %v15109_v27  ;;  %15144 = vpow2.f32 %v12081_v24  ;;  %v13164_v24 = vpop.f32.mrf.mxu1  ;;  %v6108_v16 = vadd.f32 %v19437_v49, %v19573_v56 }
 0x7ed   : > { %v15121_v6 = vpop.eup %15120  ;;  %15146 = vrcp.f32 %v8223_v31  ;;  %v8047_v12 = vadd.f32 1.0, %v15119_v42  ;;  %v12074_v42 = vmul.f32 -1.442695, %v6552_v41 }
 0x7ee   : > { %v15123_v30 = vpop.eup %15122  ;;  %11039 = vst [vmem:[%s18458_s29 + $0x6e4] sm:$0xff] %v12830_v44  ;;  %v12661_v2 = vpack.c.bf16 %v15121_v6, %v15121_v6  ;;  %15148 = vpow2.f32 %v11891_v34  ;;  %v6573_v44 = vadd.f32 %v13164_v24, %v19430_v17 }
 0x7ef   : > { %v15125_v29 = vpop.eup %15124  ;;  %15150 = vrcp.f32 %v8047_v12  ;;  %v8209_v28 = vadd.f32 1.0, %v15123_v30  ;;  %v11904_v30 = vmul.f32 -1.442695, %v6108_v16 }
 0x7f0   : > { %v15127_v20 = vpop.eup %15126  ;;  %10870 = vst [vmem:[%s18458_s29 + $0x248] sm:$0xf] %v12661_v2  ;;  %15152 = vpow2.f32 %v12067_v62  ;;  %v6564_v62 = vpop.f32.mrf.mxu1  ;;  %v6110_v2 = vadd.f32 %v19444_v3, %v19583_v61 }
 0x7f1   : > { %v15129_v27 = vpop.eup %15128  ;;  %15154 = vrcp.f32 %v8209_v28  ;;  %v8053_v15 = vadd.f32 1.0, %v15127_v20  ;;  %v19657_v28 = vpop.f32.mrf.mxu0  ;;  %v12109_v20 = vmul.f32 -1.442695, %v6573_v44 }
 0x7f2   : > { %v15131_v57 = vpop.eup %15130  ;;  %v12673_v25 = vpack.c.bf16 %v15129_v27, %v15129_v27  ;;  %15156 = vpow2.f32 %v11897_v26  ;;  %v13165_v27 = vpop.f32.mrf.mxu1 }
 0x7f3   : > { %v15133_v21 = vpop.eup %15132  ;;  %15158 = vrcp.f32 %v8053_v15  ;;  %v8230_v37 = vadd.f32 1.0, %v15131_v57  ;;  %v19661_v24 = vpop.f32.mrf.mxu0 }
 0x7f4   : > { %v15135_v34 = vpop.eup %15134  ;;  %10882 = vst [vmem:[%s18458_s29 + $0x29c] sm:$0xf] %v12673_v25  ;;  %v8054_v18 = vadd.f32 1.0, %v15133_v21  ;;  %15160 = vpow2.f32 %v12088_v52  ;;  %v6565_v52 = vadd.f32 %v6564_v62, %v19430_v17  ;;  %v11905_v25 = vmul.f32 -1.442695, %v6110_v2 }
 0x7f5   : > { %v15137_v47 = vpop.eup %15136  ;;  %v12580_v31 = vpack.c.bf16 %v15135_v34, %v15125_v29  ;;  %15162 = vrcp.f32 %v8230_v37  ;;  %v6114_v21 = vadd.f32 %v19451_v43, %v19573_v56  ;;  %v19665_v16 = vpop.f32.mrf.mxu0  ;;  %v6116_v43 = vadd.f32 %v19458_v10, %v19583_v61 }
 0x7f6   : > { %v15139_v6 = vpop.eup %15138  ;;  %15164 = vrcp.f32 %v8054_v18  ;;  %v8216_v12 = vadd.f32 1.0, %v15137_v47  ;;  %v12095_v47 = vmul.f32 -1.442695, %v6565_v52 }
 0x7f7   : > { %v15141_v51 = vpop.eup %15140  ;;  %10789 = vst [vmem:[%s18458_s29 + $0x10] sm:$0xff] %v12580_v31  ;;  %v12665_v49 = vpack.c.bf16 %v15139_v6, %v15139_v6  ;;  %15166 = vpow2.f32 %v11898_v59  ;;  %v6576_v31 = vadd.f32 %v13165_v27, %v19430_v17  ;;  %v19671_v6 = vpop.f32.mrf.mxu0 }
 0x7f8   : > { %v15143_v26 = vpop.eup %15142  ;;  %15168 = vrcp.f32 %v8216_v12  ;;  %v8060_v29 = vadd.f32 1.0, %v15141_v51 }
 0x7f9   : > { %v15145_v38 = vpop.eup %15144  ;;  %10874 = vst [vmem:[%s18458_s29 + $0x264] sm:$0xf] %v12665_v49  ;;  %15170 = vpow2.f32 %v12074_v42  ;;  %v6567_v42 = vpop.f32.mrf.mxu1  ;;  %v11911_v49 = vmul.f32 -1.442695, %v6114_v21 }
 0x7fa   : > { %v15147_v15 = vpop.eup %15146  ;;  %15172 = vrcp.f32 %v8060_v29  ;;  %v8251_v41 = vadd.f32 1.0, %v15145_v38  ;;  %v19675_v29 = vpop.f32.mrf.mxu0 }
 0x7fb   : > { %v15149_v57 = vpop.eup %15148  ;;  %v12685_v3 = vpack.c.bf16 %v15147_v15, %v15147_v15  ;;  %15174 = vpow2.f32 %v11904_v30  ;;  %v13168_v52 = vpop.f32.mrf.mxu1  ;;  %v11912_v15 = vmul.f32 -1.442695, %v6116_v43  ;;  %v6120_v43 = vadd.f32 %v19470_v5, %v19583_v61 }
 0x7fc   : > { %v15151_v37 = vpop.eup %15150  ;;  %15176 = vrcp.f32 %v8251_v41  ;;  %v8061_v59 = vadd.f32 1.0, %v15149_v57  ;;  %v6118_v41 = vadd.f32 %v19463_v19, %v19573_v56  ;;  %v19680_v57 = vpop.f32.mrf.mxu0 }
 0x7fd   : > { %v15153_v34 = vpop.eup %15152  ;;  %10894 = vst [vmem:[%s18458_s29 + $0x2f0] sm:$0xf] %v12685_v3  ;;  %v12584_v18 = vpack.c.bf16 %v15151_v37, %v15143_v26  ;;  %15178 = vpow2.f32 %v12109_v20  ;;  %v6568_v26 = vadd.f32 %v6567_v42, %v19430_v17  ;;  %v12116_v20 = vmul.f32 -1.442695, %v6576_v31  ;;  %v6580_v19 = vpop.f32.mrf.mxu1 }
 0x7fe   : > { %v15155_v44 = vpop.eup %15154  ;;  %15180 = vrcp.f32 %v8061_v59  ;;  %v8237_v62 = vadd.f32 1.0, %v15153_v34  ;;  %v6589_v34 = vadd.f32 %v13168_v52, %v19430_v17 }
 0x7ff   : > { %v15157_v12 = vpop.eup %15156  ;;  %10793 = vst [vmem:[%s18458_s29 + $0x2c] sm:$0xff] %v12584_v18  ;;  %v12677_v51 = vpack.c.bf16 %v15155_v44, %v15155_v44  ;;  %15182 = vpow2.f32 %v11905_v25  ;;  %v12102_v59 = vmul.f32 -1.442695, %v6568_v26  ;;  %v19683_v18 = vpop.f32.mrf.mxu0  ;;  %v6581_v26 = vadd.f32 %v6580_v19, %v19430_v17 }
 0x800   : > { %v15159_v30 = vpop.eup %15158  ;;  %15184 = vrcp.f32 %v8237_v62  ;;  %v8067_v2 = vadd.f32 1.0, %v15157_v12  ;;  %v11918_v62 = vmul.f32 -1.442695, %v6118_v41  ;;  %v6124_v41 = vadd.f32 %v19476_v39, %v19573_v56 }
 0x801   : > { %v15161_v38 = vpop.eup %15160  ;;  %10886 = vst [vmem:[%s18458_s29 + $0x2b8] sm:$0xf] %v12677_v51  ;;  %15186 = vpow2.f32 %v12095_v47  ;;  %v19689_v12 = vpop.f32.mrf.mxu0 }
 0x802   : > { %v15163_v10 = vpop.eup %15162  ;;  %15188 = vrcp.f32 %v8067_v2  ;;  %v8258_v27 = vadd.f32 1.0, %v15161_v38  ;;  %v12137_v2 = vmul.f32 -1.442695, %v6589_v34  ;;  %v12123_v34 = vmul.f32 -1.442695, %v6581_v26 }
 0x803   : > { %v15165_v3 = vpop.eup %15164  ;;  %v12689_v25 = vpack.c.bf16 %v15163_v10, %v15163_v10  ;;  %15190 = vpow2.f32 %v11911_v49  ;;  %v19693_v38 = vpop.f32.mrf.mxu0 }
 0x804   : > { %v15167_v21 = vpop.eup %15166  ;;  %v12588_v37 = vpack.c.bf16 %v15165_v3, %v15159_v30  ;;  %15192 = vrcp.f32 %v8258_v27  ;;  %v13169_v10 = vpop.f32.mrf.mxu1 }
 0x805   : > { %v15169_v47 = vpop.eup %15168  ;;  %10898 = vst [vmem:[%s18458_s29 + $0x30c] sm:$0xf] %v12689_v25  ;;  %v8068_v31 = vadd.f32 1.0, %v15167_v21  ;;  %15194 = vpow2.f32 %v12116_v20  ;;  %v19697_v3 = vpop.f32.mrf.mxu0 }
 0x806   : > { %v15171_v42 = vpop.eup %15170  ;;  %10797 = vst [vmem:[%s18458_s29 + $0x48] sm:$0xff] %v12588_v37  ;;  %v12681_v44 = vpack.c.bf16 %v15169_v47, %v15169_v47  ;;  %15196 = vpow2.f32 %v11912_v15  ;;  %v11919_v15 = vmul.f32 -1.442695, %v6120_v43  ;;  %v6592_v47 = vadd.f32 %v13169_v10, %v19430_v17  ;;  %v6583_v39 = vpop.f32.mrf.mxu1 }
 0x807   : > { %v15173_v51 = vpop.eup %15172  ;;  %15198 = vrcp.f32 %v8068_v31  ;;  %v8244_v49 = vadd.f32 1.0, %v15171_v42  ;;  %v19701_v31 = vpop.f32.mrf.mxu0  ;;  %v11925_v43 = vmul.f32 -1.442695, %v6124_v41 }
 0x808   : > { %v15175_v30 = vpop.eup %15174  ;;  %10890 = vst [vmem:[%s18458_s29 + $0x2d4] sm:$0xf] %v12681_v44  ;;  %15200 = vpow2.f32 %v12102_v59 }
 0x809   : > { %v15177_v20 = vpop.eup %15176  ;;  %15202 = vrcp.f32 %v8244_v49  ;;  %v8074_v52 = vadd.f32 1.0, %v15175_v30  ;;  %v19704_v49 = vpop.f32.mrf.mxu0 }
 0x80a   : > { %v15179_v27 = vpop.eup %15178  ;;  %v12701_v5 = vpack.c.bf16 %v15177_v20, %v15177_v20  ;;  %15204 = vpow2.f32 %v11918_v62  ;;  %v12144_v20 = vmul.f32 -1.442695, %v6592_v47 }
 0x80b   : > { %v15181_v25 = vpop.eup %15180  ;;  %15206 = vrcp.f32 %v8074_v52  ;;  %v8279_v21 = vadd.f32 1.0, %v15179_v27  ;;  %v19709_v52 = vpop.f32.mrf.mxu0 }
 0x80c   : > { %v15183_v37 = vpop.eup %15182  ;;  %10910 = vst [vmem:[%s18458_s29 + $0x360] sm:$0xf] %v12701_v5  ;;  %v12592_v59 = vpack.c.bf16 %v15181_v25, %v15173_v51  ;;  %15208 = vpow2.f32 %v12137_v2  ;;  %v6126_v2 = vadd.f32 %v19483_v33, %v19583_v61  ;;  %v6584_v5 = vadd.f32 %v6583_v39, %v19430_v17 }
 0x80d   : > { %v15185_v19 = vpop.eup %15184  ;;  %15210 = vrcp.f32 %v8279_v21  ;;  %v8075_v42 = vadd.f32 1.0, %v15183_v37  ;;  %v19712_v21 = vpop.f32.mrf.mxu0 }
 0x80e   : > { %v15187_v44 = vpop.eup %15186  ;;  %10801 = vst [vmem:[%s18458_s29 + $0x64] sm:$0xff] %v12592_v59  ;;  %v12693_v62 = vpack.c.bf16 %v15185_v19, %v15185_v19  ;;  %15212 = vpow2.f32 %v11919_v15  ;;  %v13172_v15 = vpop.f32.mrf.mxu1  ;;  %v11926_v59 = vmul.f32 -1.442695, %v6126_v2 }
 0x80f   : > { %v15189_v30 = vpop.eup %15188  ;;  %15214 = vrcp.f32 %v8075_v42  ;;  %v8265_v51 = vadd.f32 1.0, %v15187_v44  ;;  %v19717_v42 = vpop.f32.mrf.mxu0 }
 0x810   : > { %v15191_v26 = vpop.eup %15190  ;;  %10902 = vst [vmem:[%s18458_s29 + $0x328] sm:$0xf] %v12693_v62  ;;  %15216 = vpow2.f32 %v12123_v34  ;;  %v6128_v34 = vadd.f32 %v19488_v50, %v19573_v56  ;;  %v12130_v62 = vmul.f32 -1.442695, %v6584_v5 }
 0x811   : > { %v15193_v10 = vpop.eup %15192  ;;  %15218 = vrcp.f32 %v8265_v51  ;;  %v8081_v27 = vadd.f32 1.0, %v15191_v26  ;;  %v6596_v51 = vpop.f32.mrf.mxu1 }
 0x812   : > { %v15195_v41 = vpop.eup %15194  ;;  %v12705_v25 = vpack.c.bf16 %v15193_v10, %v15193_v10  ;;  %15220 = vpow2.f32 %v11925_v43  ;;  %v6605_v43 = vadd.f32 %v13172_v15, %v19430_v17  ;;  %v19720_v10 = vpop.f32.mrf.mxu0 }
 0x813   : > { %v15197_v37 = vpop.eup %15196  ;;  %15222 = vrcp.f32 %v8081_v27  ;;  %v8286_v33 = vadd.f32 1.0, %v15195_v41  ;;  %v6130_v41 = vadd.f32 %v19495_v32, %v19583_v61 }
 0x814   : > { %v15199_v47 = vpop.eup %15198  ;;  %10914 = vst [vmem:[%s18458_s29 + $0x37c] sm:$0xf] %v12705_v25  ;;  %v8082_v19 = vadd.f32 1.0, %v15197_v37  ;;  %15224 = vpow2.f32 %v12144_v20  ;;  %v11932_v20 = vmul.f32 -1.442695, %v6128_v34  ;;  %v19725_v25 = vpop.f32.mrf.mxu0 }
 0x815   : > { %v15201_v39 = vpop.eup %15200  ;;  %v12596_v44 = vpack.c.bf16 %v15199_v47, %v15189_v30  ;;  %15226 = vrcp.f32 %v8286_v33  ;;  %v12165_v37 = vmul.f32 -1.442695, %v6605_v43  ;;  %v6597_v33 = vadd.f32 %v6596_v51, %v19430_v17  ;;  %v13173_v47 = vpop.f32.mrf.mxu1 }
 0x816   : > { %v15203_v26 = vpop.eup %15202  ;;  %15228 = vrcp.f32 %v8082_v19  ;;  %v8272_v2 = vadd.f32 1.0, %v15201_v39  ;;  %v19729_v34 = vpop.f32.mrf.mxu0 }
 0x817   : > { %v15205_v50 = vpop.eup %15204  ;;  %10805 = vst [vmem:[%s18458_s29 + $0x80] sm:$0xff] %v12596_v44  ;;  %v12697_v27 = vpack.c.bf16 %v15203_v26, %v15203_v26  ;;  %15230 = vpow2.f32 %v11926_v59  ;;  %v11933_v44 = vmul.f32 -1.442695, %v6130_v41  ;;  %v6134_v26 = vadd.f32 %v19501_v60, %v19573_v56 }
 0x818   : > { %v15207_v30 = vpop.eup %15206  ;;  %15232 = vrcp.f32 %v8272_v2  ;;  %v8088_v5 = vadd.f32 1.0, %v15205_v50  ;;  %v19733_v43 = vpop.f32.mrf.mxu0  ;;  %v6136_v60 = vadd.f32 %v19508_v46, %v19583_v61 }
 0x819   : > { %v15209_v15 = vpop.eup %15208  ;;  %10906 = vst [vmem:[%s18458_s29 + $0x344] sm:$0xf] %v12697_v27  ;;  %15234 = vpow2.f32 %v12130_v62  ;;  %v12151_v27 = vmul.f32 -1.442695, %v6597_v33 }
 0x81a   : > { %v15211_v19 = vpop.eup %15210  ;;  %15236 = vrcp.f32 %v8088_v5  ;;  %v8307_v59 = vadd.f32 1.0, %v15209_v15  ;;  %v6608_v5 = vadd.f32 %v13173_v47, %v19430_v17  ;;  %v6599_v15 = vpop.f32.mrf.mxu1 }
 0x81b   : > { %v15213_v39 = vpop.eup %15212  ;;  %v12717_v32 = vpack.c.bf16 %v15211_v19, %v15211_v19  ;;  %15238 = vpow2.f32 %v11932_v20  ;;  %v19739_v41 = vpop.f32.mrf.mxu0  ;;  %v6600_v33 = vadd.f32 %v6599_v15, %v19430_v17 }
 0x81c   : > { %v15215_v2 = vpop.eup %15214  ;;  %15240 = vrcp.f32 %v8307_v59  ;;  %v8089_v62 = vadd.f32 1.0, %v15213_v39  ;;  %20539 = vst [vmem:[#allocation62_spill] sm:$0xff] %v19739_v41 }
 0x81d   : > { %v15217_v51 = vpop.eup %15216  ;;  %10926 = vst [vmem:[%s18458_s29 + $0x3d0] sm:$0xf] %v12717_v32  ;;  %v12600_v50 = vpack.c.bf16 %v15215_v2, %v15207_v30  ;;  %15242 = vpow2.f32 %v12165_v37  ;;  %v11939_v32 = vmul.f32 -1.442695, %v6134_v26  ;;  %v19743_v47 = vpop.f32.mrf.mxu0 }
 0x81e   : > { %v15219_v19 = vpop.eup %15218  ;;  %15244 = vrcp.f32 %v8089_v62  ;;  %v8293_v20 = vadd.f32 1.0, %v15217_v51  ;;  %v12172_v62 = vmul.f32 -1.442695, %v6608_v5  ;;  %v13176_v51 = vpop.f32.mrf.mxu1 }
 0x81f   : > { %v15221_v59 = vpop.eup %15220  ;;  %10809 = vst [vmem:[%s18458_s29 + $0x9c] sm:$0xff] %v12600_v50  ;;  %v12709_v39 = vpack.c.bf16 %v15219_v19, %v15219_v19  ;;  %15246 = vpow2.f32 %v11933_v44  ;;  %v11940_v50 = vmul.f32 -1.442695, %v6136_v60  ;;  %v6138_v44 = vadd.f32 %v19514_v14, %v19573_v56  ;;  %v19748_v26 = vpop.f32.mrf.mxu0 }
 0x820   : > { %v15223_v30 = vpop.eup %15222  ;;  %15248 = vrcp.f32 %v8293_v20  ;;  %v8095_v37 = vadd.f32 1.0, %v15221_v59  ;;  %20540 = vst [vmem:[#allocation48_spill] sm:$0xff] %v19748_v26  ;;  %v6621_v5 = vadd.f32 %v13176_v51, %v19430_v17  ;;  %v6612_v14 = vpop.f32.mrf.mxu1 }
 0x821   : > { %v15225_v2 = vpop.eup %15224  ;;  %10918 = vst [vmem:[%s18458_s29 + $0x398] sm:$0xf] %v12709_v39  ;;  %15250 = vpow2.f32 %v12151_v27  ;;  %v12158_v27 = vmul.f32 -1.442695, %v6600_v33  ;;  %v19751_v39 = vpop.f32.mrf.mxu0 }
 0x822   : > { %v15227_v46 = vpop.eup %15226  ;;  %15252 = vrcp.f32 %v8095_v37  ;;  %v8314_v41 = vadd.f32 1.0, %v15225_v2 }
 0x823   : > { %v15229_v19 = vpop.eup %15228  ;;  %v12721_v15 = vpack.c.bf16 %v15227_v46, %v15227_v46  ;;  %15254 = vpow2.f32 %v11939_v32  ;;  %v11946_v46 = vmul.f32 -1.442695, %v6138_v44  ;;  %v6140_v32 = vadd.f32 %v19521_v55, %v19583_v61 }
 0x824   : > { %v15231_v20 = vpop.eup %15230  ;;  %v12604_v59 = vpack.c.bf16 %v15229_v19, %v15223_v30  ;;  %15256 = vrcp.f32 %v8314_v41  ;;  %v19757_v41 = vpop.f32.mrf.mxu0  ;;  %v12193_v19 = vmul.f32 -1.442695, %v6621_v5 }
 0x825   : > { %v15233_v37 = vpop.eup %15232  ;;  %10930 = vst [vmem:[%s18458_s29 + $0x3ec] sm:$0xf] %v12721_v15  ;;  %v8096_v60 = vadd.f32 1.0, %v15231_v20  ;;  %15258 = vpow2.f32 %v12172_v62  ;;  %20541 = vst [vmem:[#allocation63_spill] sm:$0xff] %v19757_v41  ;;  %v6613_v62 = vadd.f32 %v6612_v14, %v19430_v17  ;;  %v11947_v55 = vmul.f32 -1.442695, %v6140_v32 }
 0x826   : > { %v15235_v2 = vpop.eup %15234  ;;  %10813 = vst [vmem:[%s18458_s29 + $0xb8] sm:$0xff] %v12604_v59  ;;  %v12713_v26 = vpack.c.bf16 %v15233_v37, %v15233_v37  ;;  %15260 = vpow2.f32 %v11940_v50  ;;  %v13177_v50 = vpop.f32.mrf.mxu1  ;;  %v6144_v37 = vadd.f32 %v19527_v11, %v19573_v56 }
 0x827   : > { %v15237_v30 = vpop.eup %15236  ;;  %15262 = vrcp.f32 %v8096_v60  ;;  %v8300_v33 = vadd.f32 1.0, %v15235_v2  ;;  %v19763_v60 = vpop.f32.mrf.mxu0  ;;  %v12179_v2 = vmul.f32 -1.442695, %v6613_v62 }
 0x828   : > { %v15239_v51 = vpop.eup %15238  ;;  %10922 = vst [vmem:[%s18458_s29 + $0x3b4] sm:$0xf] %v12713_v26  ;;  %15264 = vpow2.f32 %v12158_v27  ;;  %20542 = vst [vmem:[#allocation43_spill] sm:$0xff] %v19763_v60  ;;  %v6615_v32 = vpop.f32.mrf.mxu1  ;;  %v11953_v60 = vmul.f32 -1.442695, %v6144_v37 }
 0x829   : > { %v15241_v15 = vpop.eup %15240  ;;  %15266 = vrcp.f32 %v8300_v33  ;;  %v8102_v20 = vadd.f32 1.0, %v15239_v51  ;;  %v6624_v33 = vadd.f32 %v13177_v50, %v19430_v17  ;;  %v19768_v41 = vpop.f32.mrf.mxu0 }
 0x82a   : > { %v15243_v44 = vpop.eup %15242  ;;  %v12733_v59 = vpack.c.bf16 %v15241_v15, %v15241_v15  ;;  %15268 = vpow2.f32 %v11946_v46 }
 0x82b   : > { %v15245_v26 = vpop.eup %15244  ;;  %15270 = vrcp.f32 %v8102_v20  ;;  %v8335_v27 = vadd.f32 1.0, %v15243_v44  ;;  %v12200_v62 = vmul.f32 -1.442695, %v6624_v33 }
 0x82c   : > { %v15247_v5 = vpop.eup %15246  ;;  %10942 = vst [vmem:[%s18458_s29 + $0x440] sm:$0xf] %v12733_v59  ;;  %v12608_v14 = vpack.c.bf16 %v15245_v26, %v15237_v30  ;;  %15272 = vpow2.f32 %v12193_v19  ;;  %v6146_v30 = vadd.f32 %v19534_v58, %v19583_v61  ;;  %v6616_v26 = vadd.f32 %v6615_v32, %v19430_v17 }
 0x82d   : > { %v15249_v51 = vpop.eup %15248  ;;  %15274 = vrcp.f32 %v8335_v27  ;;  %v8103_v46 = vadd.f32 1.0, %v15247_v5  ;;  %v19774_v5 = vpop.f32.mrf.mxu0 }
 0x82e   : > { %v15251_v15 = vpop.eup %15250  ;;  %10817 = vst [vmem:[%s18458_s29 + $0xd4] sm:$0xff] %v12608_v14  ;;  %v12725_v11 = vpack.c.bf16 %v15249_v51, %v15249_v51  ;;  %15276 = vpow2.f32 %v11947_v55  ;;  %v13180_v55 = vpop.f32.mrf.mxu1  ;;  %v11954_v58 = vmul.f32 -1.442695, %v6146_v30 }
 0x82f   : > { %v15253_v20 = vpop.eup %15252  ;;  %15278 = vrcp.f32 %v8103_v46  ;;  %v8321_v44 = vadd.f32 1.0, %v15251_v15  ;;  %v19780_v30 = vpop.f32.mrf.mxu0 }
 0x830   : > { %v15255_v19 = vpop.eup %15254  ;;  %10934 = vst [vmem:[%s18458_s29 + $0x408] sm:$0xf] %v12725_v11  ;;  %15280 = vpow2.f32 %v12179_v2  ;;  %v6148_v2 = vadd.f32 %v19540_v8, %v19573_v56  ;;  %v12186_v11 = vmul.f32 -1.442695, %v6616_v26 }
 0x831   : > { %v15257_v50 = vpop.eup %15256  ;;  %15282 = vrcp.f32 %v8321_v44  ;;  %v8109_v59 = vadd.f32 1.0, %v15255_v19  ;;  %v6628_v44 = vpop.f32.mrf.mxu1 }
 0x832   : > { %v15259_v37 = vpop.eup %15258  ;;  %v12737_v27 = vpack.c.bf16 %v15257_v50, %v15257_v50  ;;  %15284 = vpow2.f32 %v11953_v60  ;;  %v6637_v60 = vadd.f32 %v13180_v55, %v19430_v17 }
 0x833   : > { %v15261_v14 = vpop.eup %15260  ;;  %15286 = vrcp.f32 %v8109_v59  ;;  %v8342_v51 = vadd.f32 1.0, %v15259_v37  ;;  %v11960_v37 = vmul.f32 -1.442695, %v6148_v2 }
 0x834   : > { %v15263_v33 = vpop.eup %15262  ;;  %10946 = vst [vmem:[%s18458_s29 + $0x45c] sm:$0xf] %v12737_v27  ;;  %v8110_v46 = vadd.f32 1.0, %v15261_v14  ;;  %15288 = vpow2.f32 %v12200_v62  ;;  %v6150_v62 = vadd.f32 %v19547_v45, %v19583_v61  ;;  %v12221_v55 = vmul.f32 -1.442695, %v6637_v60 }
 0x835   : > { %v15265_v15 = vpop.eup %15264  ;;  %v12612_v32 = vpack.c.bf16 %v15263_v33, %v15253_v20  ;;  %15290 = vrcp.f32 %v8342_v51  ;;  %v6629_v14 = vadd.f32 %v6628_v44, %v19430_v17  ;;  %v13181_v51 = vpop.f32.mrf.mxu1 }
 0x836   : > { %v15267_v19 = vpop.eup %15266  ;;  %15292 = vrcp.f32 %v8110_v46  ;;  %v8328_v50 = vadd.f32 1.0, %v15265_v15  ;;  %v19787_v15 = vpop.f32.mrf.mxu0  ;;  %v11961_v45 = vmul.f32 -1.442695, %v6150_v62  ;;  %v6156_v62 = vadd.f32 %v19562_v1, %v19583_v61 }
 0x837   : > { %v15269_v59 = vpop.eup %15268  ;;  %10821 = vst [vmem:[%s18458_s29 + $0xf0] sm:$0xff] %v12612_v32  ;;  %v12729_v8 = vpack.c.bf16 %v15267_v19, %v15267_v19  ;;  %15294 = vpow2.f32 %v11954_v58  ;;  %v6154_v32 = vadd.f32 %v19553_v23, %v19573_v56 }
 0x838   : > { %v15271_v20 = vpop.eup %15270  ;;  %15296 = vrcp.f32 %v8328_v50  ;;  %v8116_v26 = vadd.f32 1.0, %v15269_v59  ;;  %v12207_v50 = vmul.f32 -1.442695, %v6629_v14  ;;  %v6640_v59 = vadd.f32 %v13181_v51, %v19430_v17  ;;  %v19795_v23 = vpop.f32.mrf.mxu0 }
 0x839   : > { %v15273_v27 = vpop.eup %15272  ;;  %10938 = vst [vmem:[%s18458_s29 + $0x424] sm:$0xf] %v12729_v8  ;;  %15298 = vpow2.f32 %v12186_v11  ;;  %v6631_v8 = vpop.f32.mrf.mxu1 }
 0x83a   : > { %v15275_v33 = vpop.eup %15274  ;;  %15300 = vrcp.f32 %v8116_v26  ;;  %v8363_v46 = vadd.f32 1.0, %v15273_v27  ;;  %v6632_v14 = vadd.f32 %v6631_v8, %v19430_v17 }
 0x83b   : > { %v15277_v58 = vpop.eup %15276  ;;  %v12749_v2 = vpack.c.bf16 %v15275_v33, %v15275_v33  ;;  %15302 = vpow2.f32 %v11960_v37 }
 0x83c   : > { %v15279_v19 = vpop.eup %15278  ;;  %15304 = vrcp.f32 %v8363_v46  ;;  %v8117_v11 = vadd.f32 1.0, %v15277_v58  ;;  %v11967_v46 = vmul.f32 -1.442695, %v6154_v32  ;;  %v12228_v58 = vmul.f32 -1.442695, %v6640_v59 }
 0x83d   : > { %v15281_v60 = vpop.eup %15280  ;;  %10958 = vst [vmem:[%s18458_s29 + $0x4b0] sm:$0xf] %v12749_v2  ;;  %v12616_v44 = vpack.c.bf16 %v15279_v19, %v15271_v20  ;;  %15306 = vpow2.f32 %v12221_v55  ;;  %v13184_v2 = vpop.f32.mrf.mxu1 }
 0x83e   : > { %v15283_v26 = vpop.eup %15282  ;;  %15308 = vrcp.f32 %v8117_v11  ;;  %v8349_v37 = vadd.f32 1.0, %v15281_v60  ;;  %v11968_v11 = vmul.f32 -1.442695, %v6156_v62  ;;  %v6158_v60 = vadd.f32 %v19567_v7, %v19573_v56 }
 0x83f   : > { %v15285_v27 = vpop.eup %15284  ;;  %10825 = vst [vmem:[%s18458_s29 + $0x10c] sm:$0xff] %v12616_v44  ;;  %v12741_v33 = vpack.c.bf16 %v15283_v26, %v15283_v26  ;;  %15310 = vpow2.f32 %v11961_v45  ;;  %v19802_v45 = vpop.f32.mrf.mxu0  ;;  %v6653_v59 = vadd.f32 %v13184_v2, %v19430_v17 }
 0x840   : > { %v15287_v20 = vpop.eup %15286  ;;  %15312 = vrcp.f32 %v8349_v37  ;;  %v8123_v55 = vadd.f32 1.0, %v15285_v27  ;;  %v6644_v62 = vpop.f32.mrf.mxu1 }
 0x841   : > { %v15289_v51 = vpop.eup %15288  ;;  %10950 = vst [vmem:[%s18458_s29 + $0x478] sm:$0xf] %v12741_v33  ;;  %15314 = vpow2.f32 %v12207_v50  ;;  %v12214_v50 = vmul.f32 -1.442695, %v6632_v14 }
 0x842   : > { %v15291_v19 = vpop.eup %15290  ;;  %15316 = vrcp.f32 %v8123_v55  ;;  %v8370_v1 = vadd.f32 1.0, %v15289_v51  ;;  %v11974_v55 = vmul.f32 -1.442695, %v6158_v60  ;;  %v19809_v51 = vpop.f32.mrf.mxu0 }
 0x843   : > { %v15293_v32 = vpop.eup %15292  ;;  %v12753_v44 = vpack.c.bf16 %v15291_v19, %v15291_v19  ;;  %15318 = vpow2.f32 %v11967_v46  ;;  %v6160_v46 = vadd.f32 %v19578_v53, %v19583_v61  ;;  %v12249_v19 = vmul.f32 -1.442695, %v6653_v59 }
 0x844   : > { %v15295_v8 = vpop.eup %15294  ;;  %v12620_v26 = vpack.c.bf16 %v15293_v32, %v15287_v20  ;;  %15320 = vrcp.f32 %v8370_v1 }
 0x845   : > { %v15297_v37 = vpop.eup %15296  ;;  %10962 = vst [vmem:[%s18458_s29 + $0x4cc] sm:$0xf] %v12753_v44  ;;  %v8124_v27 = vadd.f32 1.0, %v15295_v8  ;;  %15322 = vpow2.f32 %v12228_v58  ;;  %v6645_v58 = vadd.f32 %v6644_v62, %v19430_v17  ;;  %v11975_v53 = vmul.f32 -1.442695, %v6160_v46 }
 0x846   : > { %v15299_v33 = vpop.eup %15298  ;;  %10829 = vst [vmem:[%s18458_s29 + $0x128] sm:$0xff] %v12620_v26  ;;  %v12745_v7 = vpack.c.bf16 %v15297_v37, %v15297_v37  ;;  %15324 = vpow2.f32 %v11968_v11  ;;  %v13185_v11 = vpop.f32.mrf.mxu1  ;;  %v6164_v8 = vadd.f32 %v19587_v48, %v19573_v56 }
 0x847   : > { %v15301_v20 = vpop.eup %15300  ;;  %15326 = vrcp.f32 %v8124_v27  ;;  %v8356_v14 = vadd.f32 1.0, %v15299_v33  ;;  %v19815_v26 = vpop.f32.mrf.mxu0  ;;  %v12235_v62 = vmul.f32 -1.442695, %v6645_v58  ;;  %v6656_v33 = vadd.f32 %v13185_v11, %v19430_v17 }
 0x848   : > { %v15303_v2 = vpop.eup %15302  ;;  %10954 = vst [vmem:[%s18458_s29 + $0x494] sm:$0xf] %v12745_v7  ;;  %15328 = vpow2.f32 %v12214_v50  ;;  %v6647_v46 = vpop.f32.mrf.mxu1 }
 0x849   : > { %v15305_v1 = vpop.eup %15304  ;;  %15330 = vrcp.f32 %v8356_v14  ;;  %v8130_v32 = vadd.f32 1.0, %v15303_v2  ;;  %v11981_v2 = vmul.f32 -1.442695, %v6164_v8  ;;  %v12256_v58 = vmul.f32 -1.442695, %v6656_v33 }
 0x84a   : > { %v15307_v60 = vpop.eup %15306  ;;  %v12765_v44 = vpack.c.bf16 %v15305_v1, %v15305_v1  ;;  %15332 = vpow2.f32 %v11974_v55  ;;  %v19820_v1 = vpop.f32.mrf.mxu0 }
 0x84b   : > { %v15309_v37 = vpop.eup %15308  ;;  %15334 = vrcp.f32 %v8130_v32  ;;  %v8391_v50 = vadd.f32 1.0, %v15307_v60 }
 0x84c   : > { %v15311_v59 = vpop.eup %15310  ;;  %10974 = vst [vmem:[%s18458_s29 + $0x520] sm:$0xf] %v12765_v44  ;;  %v12624_v27 = vpack.c.bf16 %v15309_v37, %v15301_v20  ;;  %15336 = vpow2.f32 %v12249_v19  ;;  %v6166_v20 = vadd.f32 %v19594_v4, %v19583_v61  ;;  %v6648_v37 = vadd.f32 %v6647_v46, %v19430_v17 }
 0x84d   : > { %v15313_v7 = vpop.eup %15312  ;;  %15338 = vrcp.f32 %v8391_v50  ;;  %v8131_v55 = vadd.f32 1.0, %v15311_v59  ;;  %v19826_v59 = vpop.f32.mrf.mxu0 }
 0x84e   : > { %v15315_v14 = vpop.eup %15314  ;;  %10833 = vst [vmem:[%s18458_s29 + $0x144] sm:$0xff] %v12624_v27  ;;  %v12757_v48 = vpack.c.bf16 %v15313_v7, %v15313_v7  ;;  %15340 = vpow2.f32 %v11975_v53  ;;  %v13188_v53 = vpop.f32.mrf.mxu1  ;;  %v11982_v4 = vmul.f32 -1.442695, %v6166_v20 }
 0x84f   : > { %v15317_v32 = vpop.eup %15316  ;;  %15342 = vrcp.f32 %v8131_v55  ;;  %v8377_v60 = vadd.f32 1.0, %v15315_v14  ;;  %v19832_v20 = vpop.f32.mrf.mxu0 }
 0x850   : > { %v15319_v19 = vpop.eup %15318  ;;  %10966 = vst [vmem:[%s18458_s29 + $0x4e8] sm:$0xf] %v12757_v48  ;;  %15344 = vpow2.f32 %v12235_v62  ;;  %v6168_v62 = vadd.f32 %v19600_v54, %v19573_v56  ;;  %v12242_v48 = vmul.f32 -1.442695, %v6648_v37 }
 0x851   : > { %v15321_v11 = vpop.eup %15320  ;;  %15346 = vrcp.f32 %v8377_v60  ;;  %v8137_v44 = vadd.f32 1.0, %v15319_v19  ;;  %v6660_v60 = vpop.f32.mrf.mxu1 }
 0x852   : > { %v15323_v8 = vpop.eup %15322  ;;  %v12769_v50 = vpack.c.bf16 %v15321_v11, %v15321_v11  ;;  %15348 = vpow2.f32 %v11981_v2  ;;  %v6669_v2 = vadd.f32 %v13188_v53, %v19430_v17 }
 0x853   : > { %v15325_v27 = vpop.eup %15324  ;;  %15350 = vrcp.f32 %v8137_v44  ;;  %v8398_v7 = vadd.f32 1.0, %v15323_v8  ;;  %v11988_v8 = vmul.f32 -1.442695, %v6168_v62 }
 0x854   : > { %v15327_v33 = vpop.eup %15326  ;;  %10978 = vst [vmem:[%s18458_s29 + $0x53c] sm:$0xf] %v12769_v50  ;;  %v8138_v55 = vadd.f32 1.0, %v15325_v27  ;;  %15352 = vpow2.f32 %v12256_v58  ;;  %v6170_v58 = vadd.f32 %v19607_v63, %v19583_v61  ;;  %v12277_v53 = vmul.f32 -1.442695, %v6669_v2 }
 0x855   : > { %v15329_v14 = vpop.eup %15328  ;;  %v12628_v46 = vpack.c.bf16 %v15327_v33, %v15317_v32  ;;  %15354 = vrcp.f32 %v8398_v7  ;;  %v6661_v27 = vadd.f32 %v6660_v60, %v19430_v17  ;;  %v13189_v7 = vpop.f32.mrf.mxu1 }
 0x856   : > { %v15331_v19 = vpop.eup %15330  ;;  %15356 = vrcp.f32 %v8138_v55  ;;  %v8384_v11 = vadd.f32 1.0, %v15329_v14  ;;  %v19839_v14 = vpop.f32.mrf.mxu0  ;;  %v11989_v63 = vmul.f32 -1.442695, %v6170_v58  ;;  %v6176_v58 = vadd.f32 %v19620_v22, %v19583_v61 }
 0x857   : > { %v15333_v44 = vpop.eup %15332  ;;  %10837 = vst [vmem:[%s18458_s29 + $0x160] sm:$0xff] %v12628_v46  ;;  %v12761_v54 = vpack.c.bf16 %v15331_v19, %v15331_v19  ;;  %15358 = vpow2.f32 %v11982_v4  ;;  %v6174_v46 = vadd.f32 %v19613_v36, %v19573_v56 }
 0x858   : > { %v15335_v32 = vpop.eup %15334  ;;  %15360 = vrcp.f32 %v8384_v11  ;;  %v8144_v37 = vadd.f32 1.0, %v15333_v44  ;;  %v12263_v11 = vmul.f32 -1.442695, %v6661_v27  ;;  %v6672_v44 = vadd.f32 %v13189_v7, %v19430_v17  ;;  %v19847_v36 = vpop.f32.mrf.mxu0 }
 0x859   : > { %v15337_v50 = vpop.eup %15336  ;;  %10970 = vst [vmem:[%s18458_s29 + $0x504] sm:$0xf] %v12761_v54  ;;  %15362 = vpow2.f32 %v12242_v48  ;;  %v6663_v54 = vpop.f32.mrf.mxu1 }
 0x85a   : > { %v15339_v33 = vpop.eup %15338  ;;  %15364 = vrcp.f32 %v8144_v37  ;;  %v8419_v55 = vadd.f32 1.0, %v15337_v50  ;;  %v6664_v27 = vadd.f32 %v6663_v54, %v19430_v17 }
 0x85b   : > { %v15341_v4 = vpop.eup %15340  ;;  %v12781_v62 = vpack.c.bf16 %v15339_v33, %v15339_v33  ;;  %15366 = vpow2.f32 %v11988_v8 }
 0x85c   : > { %v15343_v19 = vpop.eup %15342  ;;  %15368 = vrcp.f32 %v8419_v55  ;;  %v8145_v48 = vadd.f32 1.0, %v15341_v4  ;;  %v11995_v55 = vmul.f32 -1.442695, %v6174_v46  ;;  %v12284_v4 = vmul.f32 -1.442695, %v6672_v44 }
 0x85d   : > { %v15345_v2 = vpop.eup %15344  ;;  %10990 = vst [vmem:[%s18458_s29 + $0x590] sm:$0xf] %v12781_v62  ;;  %v12632_v60 = vpack.c.bf16 %v15343_v19, %v15335_v32  ;;  %15370 = vpow2.f32 %v12277_v53  ;;  %v13192_v62 = vpop.f32.mrf.mxu1 }
 0x85e   : > { %v15347_v37 = vpop.eup %15346  ;;  %15372 = vrcp.f32 %v8145_v48  ;;  %v8405_v8 = vadd.f32 1.0, %v15345_v2  ;;  %v11996_v48 = vmul.f32 -1.442695, %v6176_v58  ;;  %v6178_v2 = vadd.f32 %v19626_v9, %v19573_v56 }
 0x85f   : > { %v15349_v50 = vpop.eup %15348  ;;  %10841 = vst [vmem:[%s18458_s29 + $0x17c] sm:$0xff] %v12632_v60  ;;  %v12773_v33 = vpack.c.bf16 %v15347_v37, %v15347_v37  ;;  %15374 = vpow2.f32 %v11989_v63  ;;  %v19854_v63 = vpop.f32.mrf.mxu0  ;;  %v6685_v44 = vadd.f32 %v13192_v62, %v19430_v17 }
 0x860   : > { %v15351_v32 = vpop.eup %15350  ;;  %15376 = vrcp.f32 %v8405_v8  ;;  %v8151_v53 = vadd.f32 1.0, %v15349_v50  ;;  %v6676_v58 = vpop.f32.mrf.mxu1 }
 0x861   : > { %v15353_v7 = vpop.eup %15352  ;;  %10982 = vst [vmem:[%s18458_s29 + $0x558] sm:$0xf] %v12773_v33  ;;  %15378 = vpow2.f32 %v12263_v11  ;;  %v12270_v11 = vmul.f32 -1.442695, %v6664_v27 }
 0x862   : > { %v15355_v19 = vpop.eup %15354  ;;  %15380 = vrcp.f32 %v8151_v53  ;;  %v8426_v22 = vadd.f32 1.0, %v15353_v7  ;;  %v12002_v53 = vmul.f32 -1.442695, %v6178_v2  ;;  %v19861_v7 = vpop.f32.mrf.mxu0 }
 0x863   : > { %v15357_v46 = vpop.eup %15356  ;;  %v12785_v60 = vpack.c.bf16 %v15355_v19, %v15355_v19  ;;  %15382 = vpow2.f32 %v11995_v55  ;;  %v6180_v55 = vadd.f32 %v19633_v40, %v19583_v61  ;;  %v12305_v19 = vmul.f32 -1.442695, %v6685_v44 }
 0x864   : > { %v15359_v54 = vpop.eup %15358  ;;  %v12636_v37 = vpack.c.bf16 %v15357_v46, %v15351_v32  ;;  %15384 = vrcp.f32 %v8426_v22 }
 0x865   : > { %v15361_v8 = vpop.eup %15360  ;;  %10994 = vst [vmem:[%s18458_s29 + $0x5ac] sm:$0xf] %v12785_v60  ;;  %v8152_v50 = vadd.f32 1.0, %v15359_v54  ;;  %15386 = vpow2.f32 %v12284_v4  ;;  %v6677_v4 = vadd.f32 %v6676_v58, %v19430_v17  ;;  %v12003_v40 = vmul.f32 -1.442695, %v6180_v55 }
 0x866   : > { %v15363_v33 = vpop.eup %15362  ;;  %10845 = vst [vmem:[%s18458_s29 + $0x198] sm:$0xff] %v12636_v37  ;;  %v12777_v9 = vpack.c.bf16 %v15361_v8, %v15361_v8  ;;  %15388 = vpow2.f32 %v11996_v48  ;;  %v13193_v48 = vpop.f32.mrf.mxu1  ;;  %v6184_v54 = vadd.f32 %v19639_v35, %v19573_v56 }
 0x867   : > { %v15365_v32 = vpop.eup %15364  ;;  %15390 = vrcp.f32 %v8152_v50  ;;  %v8412_v27 = vadd.f32 1.0, %v15363_v33  ;;  %v19867_v37 = vpop.f32.mrf.mxu0  ;;  %v12291_v58 = vmul.f32 -1.442695, %v6677_v4  ;;  %v6688_v33 = vadd.f32 %v13193_v48, %v19430_v17 }
 0x868   : > { %v15367_v62 = vpop.eup %15366  ;;  %10986 = vst [vmem:[%s18458_s29 + $0x574] sm:$0xf] %v12777_v9  ;;  %15392 = vpow2.f32 %v12270_v11  ;;  %v12009_v35 = vmul.f32 -1.442695, %v6184_v54 }
 0x869   : > { %v15369_v22 = vpop.eup %15368  ;;  %15394 = vrcp.f32 %v8412_v27  ;;  %v8158_v46 = vadd.f32 1.0, %v15367_v62  ;;  %v6679_v62 = vpop.f32.mrf.mxu1  ;;  %v12312_v4 = vmul.f32 -1.442695, %v6688_v33 }
 0x86a   : > { %v15371_v2 = vpop.eup %15370  ;;  %v12797_v60 = vpack.c.bf16 %v15369_v22, %v15369_v22  ;;  %15396 = vpow2.f32 %v12002_v53  ;;  %v19872_v22 = vpop.f32.mrf.mxu0 }
 0x86b   : > { %v15373_v8 = vpop.eup %15372  ;;  %15398 = vrcp.f32 %v8158_v46  ;;  %v8447_v11 = vadd.f32 1.0, %v15371_v2 }
 0x86c   : > { %v15375_v44 = vpop.eup %15374  ;;  %11006 = vst [vmem:[%s18458_s29 + $0x600] sm:$0xf] %v12797_v60  ;;  %v12640_v50 = vpack.c.bf16 %v15373_v8, %v15365_v32  ;;  %15400 = vpow2.f32 %v12305_v19  ;;  %v6186_v32 = vadd.f32 %v19646_v0, %v19583_v61  ;;  %v6188_v0 = vadd.f32 %v19652_v13, %v19573_v56 }
 0x86d   : > { %v15377_v9 = vpop.eup %15376  ;;  %15402 = vrcp.f32 %v8447_v11  ;;  %v8159_v53 = vadd.f32 1.0, %v15375_v44  ;;  %v19878_v11 = vpop.f32.mrf.mxu0 }
 0x86e   : > { %v15379_v55 = vpop.eup %15378  ;;  %10849 = vst [vmem:[%s18458_s29 + $0x1b4] sm:$0xff] %v12640_v50  ;;  %v12789_v27 = vpack.c.bf16 %v15377_v9, %v15377_v9  ;;  %15404 = vpow2.f32 %v12003_v40  ;;  %v6680_v40 = vadd.f32 %v6679_v62, %v19430_v17  ;;  %v12010_v9 = vmul.f32 -1.442695, %v6186_v32 }
 0x86f   : > { %v15381_v46 = vpop.eup %15380  ;;  %15406 = vrcp.f32 %v8159_v53  ;;  %v8433_v2 = vadd.f32 1.0, %v15379_v55 }
 0x870   : > { %v15383_v19 = vpop.eup %15382  ;;  %10998 = vst [vmem:[%s18458_s29 + $0x5c8] sm:$0xf] %v12789_v27  ;;  %15408 = vpow2.f32 %v12291_v58  ;;  %v12298_v17 = vmul.f32 -1.442695, %v6680_v40  ;;  %v6190_v27 = vadd.f32 %v19657_v28, %v19583_v61  ;;  %v6196_v40 = vadd.f32 %v19665_v16, %v19583_v61 }
 0x871   : > { %v15385_v48 = vpop.eup %15384  ;;  %15410 = vrcp.f32 %v8433_v2  ;;  %v8165_v60 = vadd.f32 1.0, %v15383_v19  ;;  %v19885_v2 = vpop.f32.mrf.mxu0  ;;  %v12016_v19 = vmul.f32 -1.442695, %v6188_v0  ;;  %v6198_v0 = vadd.f32 %v19671_v6, %v19573_v56 }
 0x872   : > { %v15387_v54 = vpop.eup %15386  ;;  %v12801_v8 = vpack.c.bf16 %v15385_v48, %v15385_v48  ;;  %15412 = vpow2.f32 %v12009_v35  ;;  %v12017_v28 = vmul.f32 -1.442695, %v6190_v27  ;;  %v12024_v16 = vmul.f32 -1.442695, %v6196_v40 }
 0x873   : > { %v15389_v44 = vpop.eup %15388  ;;  %15414 = vrcp.f32 %v8165_v60  ;;  %v8454_v50 = vadd.f32 1.0, %v15387_v54 }
 0x874   : > { %v15391_v58 = vpop.eup %15390  ;;  %11010 = vst [vmem:[%s18458_s29 + $0x61c] sm:$0xf] %v12801_v8  ;;  %v8166_v33 = vadd.f32 1.0, %v15389_v44  ;;  %15416 = vpow2.f32 %v12312_v4  ;;  %v6194_v4 = vadd.f32 %v19661_v24, %v19573_v56  ;;  %v19893_v44 = vpop.f32.mrf.mxu0 }
 0x875   : > { %v15393_v53 = vpop.eup %15392  ;;  %v12644_v55 = vpack.c.bf16 %v15391_v58, %v15381_v46  ;;  %15418 = vrcp.f32 %v8454_v50 }
 0x876   : > { %v15395_v35 = vpop.eup %15394  ;;  %15420 = vrcp.f32 %v8166_v33  ;;  %v8440_v62 = vadd.f32 1.0, %v15393_v53  ;;  %v12023_v24 = vmul.f32 -1.442695, %v6194_v4  ;;  %v19902_v6 = vpop.f32.mrf.mxu0 }
 0x877   : > { %v15397_v32 = vpop.eup %15396  ;;  %10853 = vst [vmem:[%s18458_s29 + $0x1d0] sm:$0xff] %v12644_v55  ;;  %v12793_v13 = vpack.c.bf16 %v15395_v35, %v15395_v35  ;;  %15422 = vpow2.f32 %v12010_v9 }
 0x878   : > { %v15399_v46 = vpop.eup %15398  ;;  %15424 = vrcp.f32 %v8440_v62  ;;  %v8172_v48 = vadd.f32 1.0, %v15397_v32  ;;  %v6204_v62 = vadd.f32 %v19680_v57, %v19573_v56 }
 0x879   : > { %v15401_v60 = vpop.eup %15400  ;;  %11002 = vst [vmem:[%s18458_s29 + $0x5e4] sm:$0xf] %v12793_v13  ;;  %15426 = vpow2.f32 %v12298_v17  ;;  %v6200_v17 = vadd.f32 %v19675_v29, %v19583_v61  ;;  %v6206_v29 = vadd.f32 %v19683_v18, %v19583_v61 }
 0x87a   : > { %v15403_v54 = vpop.eup %15402  ;;  %15428 = vrcp.f32 %v8172_v48  ;;  %v8475_v8 = vadd.f32 1.0, %v15401_v60  ;;  %v12037_v40 = vmul.f32 -1.442695, %v6204_v62 }
 0x87b   : > { %v15405_v50 = vpop.eup %15404  ;;  %v12813_v9 = vpack.c.bf16 %v15403_v54, %v15403_v54  ;;  %15430 = vpow2.f32 %v12016_v19  ;;  %v12030_v19 = vmul.f32 -1.442695, %v6198_v0  ;;  %v12031_v60 = vmul.f32 -1.442695, %v6200_v17 }
 0x87c   : > { %v15407_v58 = vpop.eup %15406  ;;  %15432 = vrcp.f32 %v8475_v8  ;;  %v8173_v33 = vadd.f32 1.0, %v15405_v50  ;;  %v6208_v54 = vadd.f32 %v19689_v12, %v19573_v56  ;;  %v19910_v8 = vpop.f32.mrf.mxu0  ;;  %v12038_v0 = vmul.f32 -1.442695, %v6206_v29 }
 0x87d   : > { %v15409_v53 = vpop.eup %15408  ;;  %11022 = vst [vmem:[%s18458_s29 + $0x670] sm:$0xf] %v12813_v9  ;;  %v12648_v55 = vpack.c.bf16 %v15407_v58, %v15399_v46  ;;  %15434 = vpow2.f32 %v12017_v28  ;;  %v6210_v58 = vadd.f32 %v19693_v38, %v19583_v61  ;;  %v6214_v17 = vadd.f32 %v19697_v3, %v19573_v56 }
 0x87e   : > { %v15411_v27 = vpop.eup %15410  ;;  %15436 = vrcp.f32 %v8173_v33  ;;  %v8461_v35 = vadd.f32 1.0, %v15409_v53 }
 0x87f   : > { %v15413_v32 = vpop.eup %15412  ;;  %10857 = vst [vmem:[%s18458_s29 + $0x1ec] sm:$0xff] %v12648_v55  ;;  %v12805_v13 = vpack.c.bf16 %v15411_v27, %v15411_v27  ;;  %15438 = vpow2.f32 %v12023_v24  ;;  %v19918_v27 = vpop.f32.mrf.mxu0  ;;  %v12045_v38 = vmul.f32 -1.442695, %v6210_v58  ;;  %v12051_v3 = vmul.f32 -1.442695, %v6214_v17 }
 0x880   : > { %v15415_v4 = vpop.eup %15414  ;;  %15440 = vrcp.f32 %v8461_v35  ;;  %v8179_v46 = vadd.f32 1.0, %v15413_v32 }
 0x881   : > { %v15417_v48 = vpop.eup %15416  ;;  %11014 = vst [vmem:[%s18458_s29 + $0x638] sm:$0xf] %v12805_v13  ;;  %15442 = vpow2.f32 %v12024_v16  ;;  %v12044_v16 = vmul.f32 -1.442695, %v6208_v54  ;;  %v6216_v13 = vadd.f32 %v19701_v31, %v19583_v61 }
 0x882   : > { %v15419_v28 = vpop.eup %15418  ;;  %15444 = vrcp.f32 %v8179_v46  ;;  %v8482_v57 = vadd.f32 1.0, %v15417_v48  ;;  %v6218_v48 = vadd.f32 %v19704_v49, %v19573_v56 }
 0x883   : > { %v15421_v50 = vpop.eup %15420  ;;  %v12817_v9 = vpack.c.bf16 %v15419_v28, %v15419_v28  ;;  %15446 = vpow2.f32 %v12030_v19  ;;  %v12052_v31 = vmul.f32 -1.442695, %v6216_v13 }
 0x884   : > { %v15423_v24 = vpop.eup %15422  ;;  %v12652_v18 = vpack.c.bf16 %v15421_v50, %v15415_v4  ;;  %15448 = vrcp.f32 %v8482_v57  ;;  %v6220_v50 = vadd.f32 %v19709_v52, %v19583_v61 }
 0x885   : > { %v15425_v33 = vpop.eup %15424  ;;  %11026 = vst [vmem:[%s18458_s29 + $0x68c] sm:$0xf] %v12817_v9  ;;  %v8180_v53 = vadd.f32 1.0, %v15423_v24  ;;  %15450 = vpow2.f32 %v12031_v60  ;;  %v19925_v60 = vpop.f32.mrf.mxu0 }
 0x886   : > { %v15427_v55 = vpop.eup %15426  ;;  %10861 = vst [vmem:[%s18458_s29 + $0x208] sm:$0xff] %v12652_v18  ;;  %v12809_v12 = vpack.c.bf16 %v15425_v33, %v15425_v33  ;;  %15452 = vpow2.f32 %v12037_v40  ;;  %v12059_v52 = vmul.f32 -1.442695, %v6220_v50 }
 0x887   : > { %v15429_v35 = vpop.eup %15428  ;;  %15454 = vrcp.f32 %v8180_v53  ;;  %v8468_v62 = vadd.f32 1.0, %v15427_v55  ;;  %v19931_v58 = vpop.f32.mrf.mxu0  ;;  %v6224_v55 = vadd.f32 %v19712_v21, %v19573_v56 }
 0x888   : > { %v15431_v32 = vpop.eup %15430  ;;  %11018 = vst [vmem:[%s18458_s29 + $0x654] sm:$0xf] %v12809_v12  ;;  %15456 = vpow2.f32 %v12038_v0  ;;  %v12058_v0 = vmul.f32 -1.442695, %v6218_v48 }
 0x889   : > { %v15433_v19 = vpop.eup %15432  ;;  %15458 = vrcp.f32 %v8468_v62  ;;  %v8186_v4 = vadd.f32 1.0, %v15431_v32  ;;  %v12065_v21 = vmul.f32 -1.442695, %v6224_v55 }
 0x88a   : > { %v15435_v46 = vpop.eup %15434  ;;  %v12829_v29 = vpack.c.bf16 %v15433_v19, %v15433_v19  ;;  %15460 = vpow2.f32 %v12044_v16 }
 0x88b   : > { %v15437_v28 = vpop.eup %15436  ;;  %15462 = vrcp.f32 %v8186_v4  ;;  %v8187_v57 = vadd.f32 1.0, %v15435_v46  ;;  %v6228_v4 = vadd.f32 %v19720_v10, %v19573_v56 }
 0x88c   : > { %v15439_v40 = vpop.eup %15438  ;;  %11038 = vst [vmem:[%s18458_s29 + $0x6e0] sm:$0xf] %v12829_v29  ;;  %v12656_v54 = vpack.c.bf16 %v15437_v28, %v15429_v35  ;;  %15464 = vpow2.f32 %v12045_v38  ;;  %v6226_v35 = vadd.f32 %v19717_v42, %v19583_v61  ;;  %v19938_v38 = vpop.f32.mrf.mxu0  ;;  %v6230_v28 = vadd.f32 %v19725_v25, %v19583_v61 }
 0x88d   : > { %v15441_v9 = vpop.eup %15440  ;;  %15466 = vrcp.f32 %v8187_v57  ;;  %v8193_v24 = vadd.f32 1.0, %v15439_v40  ;;  %v12072_v50 = vmul.f32 -1.442695, %v6228_v4  ;;  %v20544_v4 = vld [vmem:[#allocation48_spill] sm:$0xff] }
 0x88e   : > { %v15443_v18 = vpop.eup %15442  ;;  %10865 = vst [vmem:[%s18458_s29 + $0x224] sm:$0xff] %v12656_v54  ;;  %v12821_v49 = vpack.c.bf16 %v15441_v9, %v15441_v9  ;;  %15468 = vpow2.f32 %v12051_v3  ;;  %v12066_v42 = vmul.f32 -1.442695, %v6226_v35  ;;  %v19945_v54 = vpop.f32.mrf.mxu0  ;;  %v6234_v9 = vadd.f32 %v19729_v34, %v19573_v56 }
 0x88f   : > { %v15445_v33 = vpop.eup %15444  ;;  %15470 = vrcp.f32 %v8193_v24  ;;  %v8194_v53 = vadd.f32 1.0, %v15443_v18  ;;  %v12073_v25 = vmul.f32 -1.442695, %v6230_v28 }
 0x890   : > { %v15447_v12 = vpop.eup %15446  ;;  %11030 = vst [vmem:[%s18458_s29 + $0x6a8] sm:$0xf] %v12821_v49  ;;  %15472 = vpow2.f32 %v12052_v31  ;;  %v19953_v55 = vpop.f32.mrf.mxu0  ;;  %v12079_v34 = vmul.f32 -1.442695, %v6234_v9 }
 0x891   : > { %v15449_v16 = vpop.eup %15448  ;;  %15474 = vrcp.f32 %v8194_v53  ;;  %v8200_v17 = vadd.f32 1.0, %v15447_v12 }
 0x892   : > { %v15451_v62 = vpop.eup %15450  ;;  %v12833_v32 = vpack.c.bf16 %v15449_v16, %v15449_v16  ;;  %15476 = vpow2.f32 %v12058_v0  ;;  %v6236_v0 = vadd.f32 %v19733_v43, %v19583_v61  ;;  %v20543_v16 = vld [vmem:[#allocation62_spill] sm:$0xff]  ;;  %v6240_v43 = vadd.f32 %v19743_v47, %v19583_v61 }
 0x893   : > { %v15453_v13 = vpop.eup %15452  ;;  %15478 = vrcp.f32 %v8200_v17  ;;  %v8201_v19 = vadd.f32 1.0, %v15451_v62  ;;  %v6238_v17 = vadd.f32 %v20543_v16, %v19573_v56 }
 0x894   : > { %v15455_v46 = vpop.eup %15454  ;;  %11042 = vst [vmem:[%s18458_s29 + $0x6fc] sm:$0xf] %v12833_v32  ;;  %v8207_v29 = vadd.f32 1.0, %v15453_v13  ;;  %15480 = vpow2.f32 %v12059_v52  ;;  %v12080_v13 = vmul.f32 -1.442695, %v6236_v0 }
 0x895   : > { %v15457_v3 = vpop.eup %15456  ;;  %v12660_v48 = vpack.c.bf16 %v15455_v46, %v15445_v33  ;;  %15482 = vrcp.f32 %v8201_v19  ;;  %v6244_v46 = vadd.f32 %v20544_v4, %v19573_v56  ;;  %v12087_v47 = vmul.f32 -1.442695, %v6240_v43 }
 0x896   : > { %v15459_v57 = vpop.eup %15458  ;;  %15484 = vrcp.f32 %v8207_v29  ;;  %v8208_v40 = vadd.f32 1.0, %v15457_v3  ;;  %v19962_v29 = vpop.f32.mrf.mxu0  ;;  %v6256_v4 = vadd.f32 %v19774_v5, %v19583_v61 }
 0x897   : > { %v15461_v31 = vpop.eup %15460  ;;  %10869 = vst [vmem:[%s18458_s29 + $0x240] sm:$0xff] %v12660_v48  ;;  %v12825_v10 = vpack.c.bf16 %v15459_v57, %v15459_v57  ;;  %15486 = vpow2.f32 %v12065_v21  ;;  %v12093_v9 = vmul.f32 -1.442695, %v6244_v46 }
 0x898   : > { %v15463_v24 = vpop.eup %15462  ;;  %15488 = vrcp.f32 %v8208_v40  ;;  %v8214_v18 = vadd.f32 1.0, %v15461_v31  ;;  %v6246_v40 = vadd.f32 %v19751_v39, %v19583_v61  ;;  %v12108_v5 = vmul.f32 -1.442695, %v6256_v4 }
 0x899   : > { %v15465_v49 = vpop.eup %15464  ;;  %11034 = vst [vmem:[%s18458_s29 + $0x6c4] sm:$0xf] %v12825_v10  ;;  %15490 = vpow2.f32 %v12066_v42  ;;  %v12086_v42 = vmul.f32 -1.442695, %v6238_v17 }
 0x89a   : > { %v15467_v33 = vpop.eup %15466  ;;  %15492 = vrcp.f32 %v8214_v18  ;;  %v8215_v53 = vadd.f32 1.0, %v15465_v49  ;;  %v19969_v49 = vpop.f32.mrf.mxu0  ;;  %v12094_v39 = vmul.f32 -1.442695, %v6246_v40 }
 0x89b   : > { %v15469_v12 = vpop.eup %15468  ;;  %v12664_v52 = vpack.c.bf16 %v15467_v33, %v15463_v24  ;;  %15494 = vpow2.f32 %v12072_v50  ;;  %v20545_v24 = vld [vmem:[#allocation63_spill] sm:$0xff] }
 0x89c   : > { %v15471_v35 = vpop.eup %15470  ;;  %15496 = vrcp.f32 %v8215_v53  ;;  %v8221_v62 = vadd.f32 1.0, %v15469_v12  ;;  %v6248_v18 = vadd.f32 %v20545_v24, %v19573_v56  ;;  %v20546_v53 = vld [vmem:[#allocation43_spill] sm:$0xff] }
 0x89d   : > { %v15473_v32 = vpop.eup %15472  ;;  %10873 = vst [vmem:[%s18458_s29 + $0x25c] sm:$0xff] %v12664_v52  ;;  %15498 = vpow2.f32 %v12073_v25  ;;  %v6250_v12 = vadd.f32 %v20546_v53, %v19583_v61 }
 0x89e   : > { %v15475_v19 = vpop.eup %15474  ;;  %15500 = vrcp.f32 %v8221_v62  ;;  %v8222_v21 = vadd.f32 1.0, %v15473_v32  ;;  %v6254_v62 = vadd.f32 %v19768_v41, %v19573_v56  ;;  %v19976_v32 = vpop.f32.mrf.mxu0 }
 0x89f   : > { %v15477_v3 = vpop.eup %15476  ;;  %v12668_v48 = vpack.c.bf16 %v15475_v19, %v15471_v35  ;;  %15502 = vpow2.f32 %v12079_v34  ;;  %v12100_v35 = vmul.f32 -1.442695, %v6248_v18 }
 0x8a0   : > { %v15479_v28 = vpop.eup %15478  ;;  %15504 = vrcp.f32 %v8222_v21  ;;  %v8228_v57 = vadd.f32 1.0, %v15477_v3  ;;  %v12101_v21 = vmul.f32 -1.442695, %v6250_v12  ;;  %v12107_v41 = vmul.f32 -1.442695, %v6254_v62 }
 0x8a1   : > { %v15481_v31 = vpop.eup %15480  ;;  %10877 = vst [vmem:[%s18458_s29 + $0x278] sm:$0xff] %v12668_v48  ;;  %15506 = vpow2.f32 %v12080_v13 }
 0x8a2   : > { %v15483_v10 = vpop.eup %15482  ;;  %15508 = vrcp.f32 %v8228_v57  ;;  %v8229_v50 = vadd.f32 1.0, %v15481_v31  ;;  %v19983_v57 = vpop.f32.mrf.mxu0 }
 0x8a3   : > { %v15485_v25 = vpop.eup %15484  ;;  %v12672_v0 = vpack.c.bf16 %v15483_v10, %v15479_v28  ;;  %15510 = vpow2.f32 %v12086_v42  ;;  %v6258_v28 = vadd.f32 %v19780_v30, %v19573_v56  ;;  %v6260_v10 = vadd.f32 %v19787_v15, %v19583_v61 }
 0x8a4   : > { %v15487_v33 = vpop.eup %15486  ;;  %15512 = vrcp.f32 %v8229_v50 }
 0x8a5   : > { %v15489_v52 = vpop.eup %15488  ;;  %10881 = vst [vmem:[%s18458_s29 + $0x294] sm:$0xff] %v12672_v0  ;;  %v8235_v34 = vadd.f32 1.0, %v15487_v33  ;;  %15514 = vpow2.f32 %v12087_v47  ;;  %v12114_v30 = vmul.f32 -1.442695, %v6258_v28  ;;  %v12115_v15 = vmul.f32 -1.442695, %v6260_v10 }
 0x8a6   : > { %v15491_v16 = vpop.eup %15490  ;;  %v12676_v17 = vpack.c.bf16 %v15489_v52, %v15485_v25  ;;  %15516 = vpow2.f32 %v12093_v9  ;;  %v19988_v25 = vpop.f32.mrf.mxu0  ;;  %v6276_v10 = vadd.f32 %v19826_v59, %v19583_v61  ;;  %v6280_v59 = vadd.f32 %v19839_v14, %v19583_v61 }
 0x8a7   : > { %v15493_v13 = vpop.eup %15492  ;;  %15518 = vrcp.f32 %v8235_v34  ;;  %v8236_v43 = vadd.f32 1.0, %v15491_v16  ;;  %v6266_v34 = vadd.f32 %v19802_v45, %v19583_v61 }
 0x8a8   : > { %v15495_v19 = vpop.eup %15494  ;;  %10885 = vst [vmem:[%s18458_s29 + $0x2b0] sm:$0xff] %v12676_v17  ;;  %15520 = vpow2.f32 %v12094_v39  ;;  %v6264_v39 = vadd.f32 %v19795_v23, %v19573_v56  ;;  %v12143_v14 = vmul.f32 -1.442695, %v6280_v59 }
 0x8a9   : > { %v15497_v46 = vpop.eup %15496  ;;  %15522 = vrcp.f32 %v8236_v43  ;;  %v8242_v3 = vadd.f32 1.0, %v15495_v19  ;;  %v6268_v43 = vadd.f32 %v19809_v51, %v19573_v56  ;;  %v12122_v45 = vmul.f32 -1.442695, %v6266_v34 }
 0x8aa   : > { %v15499_v48 = vpop.eup %15498  ;;  %v12680_v42 = vpack.c.bf16 %v15497_v46, %v15493_v13  ;;  %15524 = vpow2.f32 %v12100_v35  ;;  %v19995_v35 = vpop.f32.mrf.mxu0  ;;  %v12121_v23 = vmul.f32 -1.442695, %v6264_v39  ;;  %v6270_v46 = vadd.f32 %v19815_v26, %v19583_v61 }
 0x8ab   : > { %v15501_v40 = vpop.eup %15500  ;;  %15526 = vrcp.f32 %v8242_v3  ;;  %v8243_v31 = vadd.f32 1.0, %v15499_v48  ;;  %v12128_v51 = vmul.f32 -1.442695, %v6268_v43  ;;  %v6284_v34 = vadd.f32 %v19847_v36, %v19573_v56 }
 0x8ac   : > { %v15503_v47 = vpop.eup %15502  ;;  %10889 = vst [vmem:[%s18458_s29 + $0x2cc] sm:$0xff] %v12680_v42  ;;  %15528 = vpow2.f32 %v12101_v21  ;;  %v20002_v42 = vpop.f32.mrf.mxu0  ;;  %v12129_v26 = vmul.f32 -1.442695, %v6270_v46  ;;  %v6286_v43 = vadd.f32 %v19854_v63, %v19583_v61 }
 0x8ad   : > { %v15505_v50 = vpop.eup %15504  ;;  %15530 = vrcp.f32 %v8243_v31  ;;  %v8249_v9 = vadd.f32 1.0, %v15503_v47 }
 0x8ae   : > { %v15507_v24 = vpop.eup %15506  ;;  %v12684_v18 = vpack.c.bf16 %v15505_v50, %v15501_v40  ;;  %15532 = vpow2.f32 %v12107_v41  ;;  %v6274_v40 = vadd.f32 %v19820_v1, %v19573_v56  ;;  %v12150_v63 = vmul.f32 -1.442695, %v6286_v43 }
 0x8af   : > { %v15509_v0 = vpop.eup %15508  ;;  %15534 = vrcp.f32 %v8249_v9  ;;  %v8250_v33 = vadd.f32 1.0, %v15507_v24  ;;  %v20009_v24 = vpop.f32.mrf.mxu0 }
 0x8b0   : > { %v15511_v53 = vpop.eup %15510  ;;  %10893 = vst [vmem:[%s18458_s29 + $0x2e8] sm:$0xff] %v12684_v18  ;;  %15536 = vpow2.f32 %v12108_v5  ;;  %v12135_v1 = vmul.f32 -1.442695, %v6274_v40 }
 0x8b1   : > { %v15513_v12 = vpop.eup %15512  ;;  %15538 = vrcp.f32 %v8250_v33  ;;  %v8256_v52 = vadd.f32 1.0, %v15511_v53 }
 0x8b2   : > { %v15515_v16 = vpop.eup %15514  ;;  %v12688_v17 = vpack.c.bf16 %v15513_v12, %v15509_v0  ;;  %15540 = vpow2.f32 %v12114_v30  ;;  %v6278_v0 = vadd.f32 %v19832_v20, %v19573_v56 }
 0x8b3   : > { %v15517_v62 = vpop.eup %15516  ;;  %15542 = vrcp.f32 %v8256_v52  ;;  %v8257_v13 = vadd.f32 1.0, %v15515_v16  ;;  %v20018_v16 = vpop.f32.mrf.mxu0 }
 0x8b4   : > { %v15519_v19 = vpop.eup %15518  ;;  %10897 = vst [vmem:[%s18458_s29 + $0x304] sm:$0xff] %v12688_v17  ;;  %v8263_v21 = vadd.f32 1.0, %v15517_v62  ;;  %15544 = vpow2.f32 %v12115_v15  ;;  %v12136_v15 = vmul.f32 -1.442695, %v6276_v10  ;;  %v12142_v62 = vmul.f32 -1.442695, %v6278_v0 }
 0x8b5   : > { %v15521_v4 = vpop.eup %15520  ;;  %15546 = vrcp.f32 %v8257_v13  ;;  %v20025_v46 = vpop.f32.mrf.mxu0 }
 0x8b6   : > { %v15523_v3 = vpop.eup %15522  ;;  %15548 = vrcp.f32 %v8263_v21  ;;  %v8264_v48 = vadd.f32 1.0, %v15521_v4  ;;  %v12149_v4 = vmul.f32 -1.442695, %v6284_v34 }
 0x8b7   : > { %v15525_v41 = vpop.eup %15524  ;;  %v12692_v28 = vpack.c.bf16 %v15523_v3, %v15519_v19  ;;  %15550 = vpow2.f32 %v12121_v23 }
 0x8b8   : > { %v15527_v31 = vpop.eup %15526  ;;  %15552 = vrcp.f32 %v8264_v48  ;;  %v8270_v47 = vadd.f32 1.0, %v15525_v41 }
 0x8b9   : > { %v15529_v5 = vpop.eup %15528  ;;  %10901 = vst [vmem:[%s18458_s29 + $0x320] sm:$0xff] %v12692_v28  ;;  %15554 = vpow2.f32 %v12122_v45  ;;  %v6288_v45 = vadd.f32 %v19861_v7, %v19573_v56  ;;  %v6290_v28 = vadd.f32 %v19867_v37, %v19583_v61 }
 0x8ba   : > { %v15531_v50 = vpop.eup %15530  ;;  %15556 = vrcp.f32 %v8270_v47  ;;  %v8271_v9 = vadd.f32 1.0, %v15529_v5  ;;  %v6294_v5 = vadd.f32 %v19872_v22, %v19573_v56 }
 0x8bb   : > { %v15533_v18 = vpop.eup %15532  ;;  %v12696_v30 = vpack.c.bf16 %v15531_v50, %v15527_v31  ;;  %15558 = vpow2.f32 %v12128_v51  ;;  %v12156_v47 = vmul.f32 -1.442695, %v6288_v45 }
 0x8bc   : > { %v15535_v33 = vpop.eup %15534  ;;  %15560 = vrcp.f32 %v8271_v9  ;;  %v8277_v39 = vadd.f32 1.0, %v15533_v18  ;;  %v12157_v9 = vmul.f32 -1.442695, %v6290_v28  ;;  %v6296_v18 = vadd.f32 %v19878_v11, %v19583_v61 }
 0x8bd   : > { %v15537_v53 = vpop.eup %15536  ;;  %10905 = vst [vmem:[%s18458_s29 + $0x33c] sm:$0xff] %v12696_v30  ;;  %15562 = vpow2.f32 %v12129_v26  ;;  %v20033_v26 = vpop.f32.mrf.mxu0  ;;  %v12163_v11 = vmul.f32 -1.442695, %v6294_v5 }
 0x8be   : > { %v15539_v12 = vpop.eup %15538  ;;  %15564 = vrcp.f32 %v8277_v39  ;;  %v8278_v52 = vadd.f32 1.0, %v15537_v53 }
 0x8bf   : > { %v15541_v20 = vpop.eup %15540  ;;  %v12700_v17 = vpack.c.bf16 %v15539_v12, %v15535_v33  ;;  %15566 = vpow2.f32 %v12135_v1  ;;  %v6298_v33 = vadd.f32 %v19885_v2, %v19573_v56  ;;  %v20048_v39 = vpop.f32.mrf.mxu0 }
 0x8c0   : > { %v15543_v13 = vpop.eup %15542  ;;  %15568 = vrcp.f32 %v8278_v52  ;;  %v8284_v23 = vadd.f32 1.0, %v15541_v20 }
 0x8c1   : > { %v15545_v19 = vpop.eup %15544  ;;  %10909 = vst [vmem:[%s18458_s29 + $0x358] sm:$0xff] %v12700_v17  ;;  %15570 = vpow2.f32 %v12136_v15 }
 0x8c2   : > { %v15547_v21 = vpop.eup %15546  ;;  %15572 = vrcp.f32 %v8284_v23  ;;  %v8285_v36 = vadd.f32 1.0, %v15545_v19 }
 0x8c3   : > { %v15549_v3 = vpop.eup %15548  ;;  %v12704_v48 = vpack.c.bf16 %v15547_v21, %v15543_v13  ;;  %15574 = vpow2.f32 %v12142_v62 }
 0x8c4   : > { %v15551_v41 = vpop.eup %15550  ;;  %15576 = vrcp.f32 %v8285_v36 }
 0x8c5   : > { %v15553_v51 = vpop.eup %15552  ;;  %10913 = vst [vmem:[%s18458_s29 + $0x374] sm:$0xff] %v12704_v48  ;;  %v8291_v40 = vadd.f32 1.0, %v15551_v41  ;;  %15578 = vpow2.f32 %v12143_v14 }
 0x8c6   : > { %v15555_v31 = vpop.eup %15554  ;;  %v12708_v7 = vpack.c.bf16 %v15553_v51, %v15549_v3  ;;  %15580 = vpow2.f32 %v12149_v4 }
 0x8c7   : > { %v15557_v10 = vpop.eup %15556  ;;  %15582 = vrcp.f32 %v8291_v40  ;;  %v8292_v50 = vadd.f32 1.0, %v15555_v31 }
 0x8c8   : > { %v15559_v37 = vpop.eup %15558  ;;  %10917 = vst [vmem:[%s18458_s29 + $0x390] sm:$0xff] %v12708_v7  ;;  %15584 = vpow2.f32 %v12150_v63 }
 0x8c9   : > { %v15561_v22 = vpop.eup %15560  ;;  %15586 = vrcp.f32 %v8292_v50  ;;  %v8298_v30 = vadd.f32 1.0, %v15559_v37 }
 0x8ca   : > { %v15563_v1 = vpop.eup %15562  ;;  %v12712_v0 = vpack.c.bf16 %v15561_v22, %v15557_v10  ;;  %15588 = vpow2.f32 %v12156_v47 }
 0x8cb   : > { %v15565_v53 = vpop.eup %15564  ;;  %15590 = vrcp.f32 %v8298_v30  ;;  %v8299_v15 = vadd.f32 1.0, %v15563_v1 }
 0x8cc   : > { %16068 = shalt.err (!%p16065_p6)
}
 0x8cd   : > { %s16069_s26 = scalar_lea.hbm %s20041_s6, 24576  ;;  %s16073_s24 = scalar_lea.hbm %s20266_s11, 49152 }
 0x8ce   : > { %p16070_p13 = scmp.ne.s32.totalorder %s20041_s6, %s16069_s26  ;;  %p16074_p8 = scmp.lt.s32.totalorder %s20041_s6, %s20266_s11 }
 0x8cf   : > { %p16075_p10 = scmp.lt.s32.totalorder %s16073_s24, %s16069_s26 }
 0x8d0   : > { %p16071_p0 = pnand %p16070_p13, %p20547_p5 }
 0x8d1   : > { %p16076_p12 = por %p16075_p10, %p16074_p8 }
 0x8d2   : > { %p16072_p4 = pneg %p16071_p0 }
 0x8d4   : > { %p16077_p2 = pnand %p16076_p12, %p16072_p4 }
 0x8d6   : > { %16080 = shalt.err (!%p16077_p2)
}
 0x8d7   : > { %s16193_s4 = smov 384   ;;  %s16194_s15 = smov 24   ;;  %v15567_v2 = vpop.eup %15566  ;;  %10921 = vst [vmem:[%s18458_s29 + $0x3ac] sm:$0xff] %v12712_v0  ;;  %15592 = vpow2.f32 %v12157_v9  ;;  %v12164_v59 = vmul.f32 -1.442695, %v6296_v18  ;;  %v6300_v12 = vadd.f32 %v19893_v44, %v19583_v61  ;;  %v20076_v13 = vpop.f32.mrf.mxu0  ;;  %v6304_v19 = vadd.f32 %v19902_v6, %v19573_v56 }
 0x8d8   : > { %13269 = dma.vmem_to_hbm [thread:$0]  (%p20547_p5), %s20044_s22, 24576, %s20041_s6, %s11241_s25, %s16193_s4, %s16193_s4, %s16194_s15   ;;  %v15569_v52 = vpop.eup %15568  ;;  %15594 = vrcp.f32 %v8299_v15  ;;  %v8305_v34 = vadd.f32 1.0, %v15567_v2  ;;  %v12170_v62 = vmul.f32 -1.442695, %v6298_v33  ;;  %v6306_v4 = vadd.f32 %v19910_v8, %v19583_v61 }
 0x8d9   : > { %v15571_v20 = vpop.eup %15570  ;;  %v12716_v17 = vpack.c.bf16 %v15569_v52, %v15565_v53  ;;  %15596 = vpow2.f32 %v12163_v11  ;;  %v12171_v44 = vmul.f32 -1.442695, %v6300_v12  ;;  %v20083_v48 = vpop.f32.mrf.mxu0  ;;  %v12177_v6 = vmul.f32 -1.442695, %v6304_v19  ;;  %s13230_s5 = smul.u32 28672, %s16279_s23  ;;  %s11255_s7 = sshll.u32 %s18458_s29, 4  ;;  %s20211_s7 = int_to_ptr.vmem [resolvable:$true] %s11255_s7 }
 0x8da   : > { %v15573_v23 = vpop.eup %15572  ;;  %15598 = vrcp.f32 %v8305_v34  ;;  %v8306_v43 = vadd.f32 1.0, %v15571_v20  ;;  %v6308_v28 = vadd.f32 %v19918_v27, %v19573_v56  ;;  %v12178_v8 = vmul.f32 -1.442695, %v6306_v4  ;;  %s11236_s9 = scalar_lea.sflag [#allocation4], %s16495_s12  ;;  %s16081_s2 = scalar_lea.vmem %s20211_s7, 28672 }
 0x8db   : > { %v15575_v14 = vpop.eup %15574  ;;  %10925 = vst [vmem:[%s18458_s29 + $0x3c8] sm:$0xff] %v12716_v17  ;;  %15600 = vpow2.f32 %v12164_v59  ;;  %v6310_v7 = vadd.f32 %v19925_v60, %v19583_v61  ;;  %v20090_v10 = vpop.f32.mrf.mxu0  ;;  %v6314_v9 = vadd.f32 %v19931_v58, %v19573_v56  ;;  %v6316_v1 = vadd.f32 %v19938_v38, %v19583_v61  ;;  %s20209_s25 = scalar_lea.hbm %s20265_s10, %s13230_s5  ;;  %p16082_p1 = scmp.ne.s32.totalorder %s20211_s7, %s16081_s2 }
 0x8dc   : > { %v15577_v21 = vpop.eup %15576  ;;  %15602 = vrcp.f32 %v8306_v43  ;;  %v8312_v36 = vadd.f32 1.0, %v15575_v14  ;;  %v12184_v27 = vmul.f32 -1.442695, %v6308_v28  ;;  %v6318_v2 = vadd.f32 %v19945_v54, %v19573_v56  ;;  %s16195_s23 = smov [#allocation19]  }
 0x8dd   : > { %v15579_v45 = vpop.eup %15578  ;;  %v12720_v3 = vpack.c.bf16 %v15577_v21, %v15573_v23  ;;  %15604 = vpow2.f32 %v12170_v62  ;;  %v12185_v60 = vmul.f32 -1.442695, %v6310_v7  ;;  %v20097_v33 = vpop.f32.mrf.mxu0  ;;  %v12191_v58 = vmul.f32 -1.442695, %v6314_v9  ;;  %p16083_p7 = pnand %p16082_p1, %p20547_p5  ;;  %s16085_s13 = sshll.u32 %s16195_s23, 4  ;;  %s16086_s13 = int_to_ptr.vmem [resolvable:$false] %s16085_s13 }
 0x8de   : > { %v15581_v41 = vpop.eup %15580  ;;  %15606 = vrcp.f32 %v8312_v36  ;;  %v8313_v63 = vadd.f32 1.0, %v15579_v45  ;;  %v12192_v34 = vmul.f32 -1.442695, %v6316_v1  ;;  %v6320_v38 = vadd.f32 %v19953_v55, %v19583_v61  ;;  %s16087_s3 = scalar_lea.vmem %s16086_s13, 57344  ;;  %p16088_p11 = scmp.lt.s32.totalorder %s20211_s7, %s16086_s13 }
 0x8df   : > { %v15583_v51 = vpop.eup %15582  ;;  %10929 = vst [vmem:[%s18458_s29 + $0x3e4] sm:$0xff] %v12720_v3  ;;  %v8319_v40 = vadd.f32 1.0, %v15581_v41  ;;  %15608 = vpow2.f32 %v12171_v44  ;;  %v6324_v62 = vadd.f32 %v19962_v29, %v19573_v56  ;;  %v20106_v23 = vpop.f32.mrf.mxu0  ;;  %v12198_v19 = vmul.f32 -1.442695, %v6318_v2  ;;  %p16084_p9 = pneg %p16083_p7  ;;  %p16089_p3 = scmp.lt.s32.totalorder %s16087_s3, %s16081_s2 }
 0x8e0   : > { %v15585_v31 = vpop.eup %15584  ;;  %15610 = vrcp.f32 %v8313_v63  ;;  %v6326_v21 = vadd.f32 %v19969_v49, %v19583_v61  ;;  %v12199_v55 = vmul.f32 -1.442695, %v6320_v38  ;;  %v6328_v3 = vadd.f32 %v19976_v32, %v19573_v56 }
 0x8e1   : > { %v15587_v47 = vpop.eup %15586  ;;  %15612 = vrcp.f32 %v8319_v40  ;;  %v8320_v5 = vadd.f32 1.0, %v15585_v31  ;;  %v12205_v45 = vmul.f32 -1.442695, %v6324_v62  ;;  %v20113_v41 = vpop.f32.mrf.mxu0  ;;  %v6336_v9 = vadd.f32 %v19995_v35, %v19583_v61  ;;  %p16090_p6 = por %p16089_p3, %p16088_p11 }
 0x8e2   : > { %v15589_v50 = vpop.eup %15588  ;;  %v12724_v37 = vpack.c.bf16 %v15587_v47, %v15583_v51  ;;  %15614 = vpow2.f32 %v12177_v6  ;;  %v12206_v49 = vmul.f32 -1.442695, %v6326_v21  ;;  %v6330_v51 = vadd.f32 %v19983_v57, %v19583_v61 }
 0x8e3   : > { %v15591_v18 = vpop.eup %15590  ;;  %15616 = vrcp.f32 %v8320_v5  ;;  %v8326_v22 = vadd.f32 1.0, %v15589_v50  ;;  %v12212_v32 = vmul.f32 -1.442695, %v6328_v3  ;;  %v6334_v47 = vadd.f32 %v19988_v25, %v19573_v56  ;;  %v20120_v5 = vpop.f32.mrf.mxu0  ;;  %p16091_p13 = pnand %p16090_p6, %p16084_p9 }
 0x8e4   : > { %v15593_v30 = vpop.eup %15592  ;;  %10933 = vst [vmem:[%s18458_s29 + $0x400] sm:$0xff] %v12724_v37  ;;  %15618 = vpow2.f32 %v12178_v8  ;;  %v12213_v57 = vmul.f32 -1.442695, %v6330_v51  ;;  %v6338_v1 = vadd.f32 %v20002_v42, %v19573_v56  ;;  %v12220_v35 = vmul.f32 -1.442695, %v6336_v9 }
 0x8e5   : > { %v15595_v0 = vpop.eup %15594  ;;  %15620 = vrcp.f32 %v8326_v22  ;;  %v8327_v11 = vadd.f32 1.0, %v15593_v30  ;;  %v12219_v25 = vmul.f32 -1.442695, %v6334_v47  ;;  %v6356_v47 = vadd.f32 %v20083_v48, %v19583_v61 }
 0x8e6   : > { %v15597_v53 = vpop.eup %15596  ;;  %v12728_v15 = vpack.c.bf16 %v15595_v0, %v15591_v18  ;;  %15622 = vpow2.f32 %v12184_v27  ;;  %v20127_v0 = vpop.f32.mrf.mxu0  ;;  %v12226_v42 = vmul.f32 -1.442695, %v6338_v1  ;;  %v6360_v48 = vadd.f32 %v20097_v33, %v19583_v61 }
 0x8e7   : > { %v15599_v59 = vpop.eup %15598  ;;  %15624 = vrcp.f32 %v8327_v11  ;;  %v8333_v12 = vadd.f32 1.0, %v15597_v53 }
 0x8e8   : > { %v15601_v52 = vpop.eup %15600  ;;  %10937 = vst [vmem:[%s18458_s29 + $0x41c] sm:$0xff] %v12728_v15  ;;  %15626 = vpow2.f32 %v12185_v60  ;;  %v12255_v33 = vmul.f32 -1.442695, %v6360_v48 }
 0x8e9   : > { %v15603_v20 = vpop.eup %15602  ;;  %15628 = vrcp.f32 %v8333_v12  ;;  %v8334_v17 = vadd.f32 1.0, %v15601_v52 }
 0x8ea   : > { %v15605_v54 = vpop.eup %15604  ;;  %v12732_v43 = vpack.c.bf16 %v15603_v20, %v15599_v59  ;;  %15630 = vpow2.f32 %v12191_v58  ;;  %v6340_v58 = vadd.f32 %v20009_v24, %v19583_v61 }
 0x8eb   : > { %v15607_v14 = vpop.eup %15606  ;;  %15632 = vrcp.f32 %v8334_v17  ;;  %v8340_v44 = vadd.f32 1.0, %v15605_v54  ;;  %v6344_v17 = vadd.f32 %v20018_v16, %v19573_v56 }
 0x8ec   : > { %v15609_v36 = vpop.eup %15608  ;;  %10941 = vst [vmem:[%s18458_s29 + $0x438] sm:$0xff] %v12732_v43  ;;  %15634 = vpow2.f32 %v12192_v34  ;;  %v20132_v34 = vpop.f32.mrf.mxu0  ;;  %v12227_v24 = vmul.f32 -1.442695, %v6340_v58 }
 0x8ed   : > { %v15611_v4 = vpop.eup %15610  ;;  %15636 = vrcp.f32 %v8340_v44  ;;  %v8341_v29 = vadd.f32 1.0, %v15609_v36  ;;  %v12233_v16 = vmul.f32 -1.442695, %v6344_v17 }
 0x8ee   : > { %v15613_v63 = vpop.eup %15612  ;;  %v12736_v6 = vpack.c.bf16 %v15611_v4, %v15607_v14  ;;  %15638 = vpow2.f32 %v12198_v19  ;;  %v6346_v19 = vadd.f32 %v20025_v46, %v19583_v61  ;;  %v20139_v21 = vpop.f32.mrf.mxu0  ;;  %v6348_v4 = vadd.f32 %v20033_v26, %v19573_v56 }
 0x8ef   : > { %v15615_v28 = vpop.eup %15614  ;;  %15640 = vrcp.f32 %v8341_v29 }
 0x8f0   : > { %v15617_v40 = vpop.eup %15616  ;;  %10945 = vst [vmem:[%s18458_s29 + $0x454] sm:$0xff] %v12736_v6  ;;  %v8347_v31 = vadd.f32 1.0, %v15615_v28  ;;  %15642 = vpow2.f32 %v12199_v55  ;;  %v12234_v46 = vmul.f32 -1.442695, %v6346_v19  ;;  %v12240_v26 = vmul.f32 -1.442695, %v6348_v4 }
 0x8f1   : > { %v15619_v8 = vpop.eup %15618  ;;  %v12740_v7 = vpack.c.bf16 %v15617_v40, %v15613_v63  ;;  %15644 = vpow2.f32 %v12205_v45  ;;  %v6350_v63 = vadd.f32 %v20048_v39, %v19583_v61 }
 0x8f2   : > { %v15621_v50 = vpop.eup %15620  ;;  %15646 = vrcp.f32 %v8347_v31  ;;  %v8348_v37 = vadd.f32 1.0, %v15619_v8  ;;  %v6354_v31 = vadd.f32 %v20076_v13, %v19573_v56 }
 0x8f3   : > { %v15623_v27 = vpop.eup %15622  ;;  %10949 = vst [vmem:[%s18458_s29 + $0x470] sm:$0xff] %v12740_v7  ;;  %15648 = vpow2.f32 %v12206_v49  ;;  %v20146_v49 = vpop.f32.mrf.mxu0  ;;  %v12241_v39 = vmul.f32 -1.442695, %v6350_v63 }
 0x8f4   : > { %v15625_v18 = vpop.eup %15624  ;;  %15650 = vrcp.f32 %v8348_v37  ;;  %v8354_v22 = vadd.f32 1.0, %v15623_v27  ;;  %v12247_v13 = vmul.f32 -1.442695, %v6354_v31 }
 0x8f5   : > { %v15627_v30 = vpop.eup %15626  ;;  %v12744_v60 = vpack.c.bf16 %v15625_v18, %v15621_v50  ;;  %15652 = vpow2.f32 %v12212_v32  ;;  %v20153_v27 = vpop.f32.mrf.mxu0  ;;  %v6358_v18 = vadd.f32 %v20090_v10, %v19573_v56 }
 0x8f6   : > { %v15629_v11 = vpop.eup %15628  ;;  %15654 = vrcp.f32 %v8354_v22  ;;  %v8355_v53 = vadd.f32 1.0, %v15627_v30 }
 0x8f7   : > { %v15631_v15 = vpop.eup %15630  ;;  %10953 = vst [vmem:[%s18458_s29 + $0x48c] sm:$0xff] %v12744_v60  ;;  %15656 = vpow2.f32 %v12213_v57  ;;  %v12254_v58 = vmul.f32 -1.442695, %v6358_v18 }
 0x8f8   : > { %v15633_v2 = vpop.eup %15632  ;;  %15658 = vrcp.f32 %v8355_v53  ;;  %v8361_v59 = vadd.f32 1.0, %v15631_v15  ;;  %v6364_v53 = vadd.f32 %v20106_v23, %v19573_v56  ;;  %v20162_v15 = vpop.f32.mrf.mxu0 }
 0x8f9   : > { %v15635_v12 = vpop.eup %15634  ;;  %v12748_v52 = vpack.c.bf16 %v15633_v2, %v15629_v11  ;;  %15660 = vpow2.f32 %v12219_v25  ;;  %v12248_v25 = vmul.f32 -1.442695, %v6356_v47 }
 0x8fa   : > { %v15637_v38 = vpop.eup %15636  ;;  %15662 = vrcp.f32 %v8361_v59  ;;  %v8362_v20 = vadd.f32 1.0, %v15635_v12  ;;  %v6366_v12 = vadd.f32 %v20113_v41, %v19583_v61  ;;  %v6385_v17 = vpop.f32.mrf.mxu0  ;;  %v6370_v41 = vadd.f32 %v20127_v0, %v19583_v61 }
 0x8fb   : > { %v15639_v62 = vpop.eup %15638  ;;  %10957 = vst [vmem:[%s18458_s29 + $0x4a8] sm:$0xff] %v12748_v52  ;;  %15664 = vpow2.f32 %v12220_v35 }
 0x8fc   : > { %v15641_v54 = vpop.eup %15640  ;;  %15666 = vrcp.f32 %v8362_v20  ;;  %v8368_v43 = vadd.f32 1.0, %v15639_v62  ;;  %v6368_v20 = vadd.f32 %v20120_v5, %v19573_v56  ;;  %v6374_v5 = vadd.f32 %v20132_v34, %v19573_v56 }
 0x8fd   : > { %v15643_v14 = vpop.eup %15642  ;;  %v12752_v44 = vpack.c.bf16 %v15641_v54, %v15637_v38  ;;  %15668 = vpow2.f32 %v12226_v42  ;;  %v12261_v38 = vmul.f32 -1.442695, %v6364_v53  ;;  %v12269_v0 = vmul.f32 -1.442695, %v6370_v41 }
 0x8fe   : > { %v15645_v36 = vpop.eup %15644  ;;  %15670 = vrcp.f32 %v8368_v43  ;;  %v8369_v55 = vadd.f32 1.0, %v15643_v14  ;;  %v12262_v43 = vmul.f32 -1.442695, %v6366_v12  ;;  %v6378_v34 = vadd.f32 %v20146_v49, %v19573_v56 }
 0x8ff   : > { %v15647_v29 = vpop.eup %15646  ;;  %10961 = vst [vmem:[%s18458_s29 + $0x4c4] sm:$0xff] %v12752_v44  ;;  %v8375_v45 = vadd.f32 1.0, %v15645_v36  ;;  %15672 = vpow2.f32 %v12227_v24 }
 0x900   : > { %v15649_v3 = vpop.eup %15648  ;;  %15674 = vrcp.f32 %v8369_v55  ;;  %v12268_v55 = vmul.f32 -1.442695, %v6368_v20 }
 0x901   : > { %v15651_v6 = vpop.eup %15650  ;;  %15676 = vrcp.f32 %v8375_v45  ;;  %v8376_v28 = vadd.f32 1.0, %v15649_v3  ;;  %v6376_v3 = vadd.f32 %v20139_v21, %v19583_v61  ;;  %v6380_v21 = vadd.f32 %v20153_v27, %v19583_v61 }
 0x902   : > { %v15653_v51 = vpop.eup %15652  ;;  %v12756_v40 = vpack.c.bf16 %v15651_v6, %v15647_v29  ;;  %15678 = vpow2.f32 %v12233_v16  ;;  %v6387_v16 = vpop.f32.mrf.mxu0 }
 0x903   : > { %v15655_v8 = vpop.eup %15654  ;;  %15680 = vrcp.f32 %v8376_v28  ;;  %v8382_v7 = vadd.f32 1.0, %v15653_v51  ;;  %v12275_v51 = vmul.f32 -1.442695, %v6374_v5 }
 0x904   : > { %v15657_v32 = vpop.eup %15656  ;;  %10965 = vst [vmem:[%s18458_s29 + $0x4e0] sm:$0xff] %v12756_v40  ;;  %15682 = vpow2.f32 %v12234_v46  ;;  %v6389_v40 = vpop.f32.mrf.mxu0 }
 0x905   : > { %v15659_v50 = vpop.eup %15658  ;;  %15684 = vrcp.f32 %v8382_v7  ;;  %v8383_v37 = vadd.f32 1.0, %v15657_v32  ;;  %v12276_v7 = vmul.f32 -1.442695, %v6376_v3  ;;  %v6390_v12 = vadd.f32 %v6389_v40, %v19583_v61 }
 0x906   : > { %v15661_v57 = vpop.eup %15660  ;;  %v12760_v9 = vpack.c.bf16 %v15659_v50, %v15655_v8  ;;  %15686 = vpow2.f32 %v12240_v26  ;;  %v6393_v49 = vpop.f32.mrf.mxu0 }
 0x907   : > { %v15663_v22 = vpop.eup %15662  ;;  %15688 = vrcp.f32 %v8383_v37  ;;  %v8389_v30 = vadd.f32 1.0, %v15661_v57  ;;  %v12282_v37 = vmul.f32 -1.442695, %v6378_v34 }
 0x908   : > { %v15665_v60 = vpop.eup %15664  ;;  %10969 = vst [vmem:[%s18458_s29 + $0x4fc] sm:$0xff] %v12760_v9  ;;  %15690 = vpow2.f32 %v12241_v39 }
 0x909   : > { %v15667_v1 = vpop.eup %15666  ;;  %15692 = vrcp.f32 %v8389_v30  ;;  %v8390_v11 = vadd.f32 1.0, %v15665_v60  ;;  %v6386_v60 = vadd.f32 %v6385_v17, %v19583_v61  ;;  %v6394_v17 = vadd.f32 %v6393_v49, %v19573_v56 }
 0x90a   : > { %v15669_v10 = vpop.eup %15668  ;;  %v12764_v35 = vpack.c.bf16 %v15667_v1, %v15663_v22  ;;  %15694 = vpow2.f32 %v12247_v13  ;;  %v6384_v13 = vadd.f32 %v20162_v15, %v19573_v56  ;;  %v12283_v22 = vmul.f32 -1.442695, %v6380_v21  ;;  %v6395_v1 = vpop.f32.mrf.mxu0 }
 0x90b   : > { %v15671_v2 = vpop.eup %15670  ;;  %15696 = vrcp.f32 %v8390_v11  ;;  %v8396_v59 = vadd.f32 1.0, %v15669_v10  ;;  %v6388_v15 = vadd.f32 %v6387_v16, %v19573_v56  ;;  %v6396_v41 = vadd.f32 %v6395_v1, %v19583_v61 }
 0x90c   : > { %v15673_v52 = vpop.eup %15672  ;;  %10973 = vst [vmem:[%s18458_s29 + $0x518] sm:$0xff] %v12764_v35  ;;  %15698 = vpow2.f32 %v12248_v25  ;;  %v12289_v10 = vmul.f32 -1.442695, %v6384_v13  ;;  %v12303_v5 = vmul.f32 -1.442695, %v6394_v17 }
 0x90d   : > { %v15675_v42 = vpop.eup %15674  ;;  %15700 = vrcp.f32 %v8396_v59  ;;  %v8397_v23 = vadd.f32 1.0, %v15673_v52  ;;  %v12290_v59 = vmul.f32 -1.442695, %v6386_v60  ;;  %v12296_v20 = vmul.f32 -1.442695, %v6388_v15 }
 0x90e   : > { %v15677_v62 = vpop.eup %15676  ;;  %v12768_v24 = vpack.c.bf16 %v15675_v42, %v15671_v2  ;;  %15702 = vpow2.f32 %v12254_v58  ;;  %v6397_v42 = vpop.f32.mrf.mxu0 }
 0x90f   : > { %v15679_v54 = vpop.eup %15678  ;;  %15704 = vrcp.f32 %v8397_v23  ;;  %v6398_v16 = vadd.f32 %v6397_v42, %v19573_v56 }
 0x910   : > { %v15681_v19 = vpop.eup %15680  ;;  %10977 = vst [vmem:[%s18458_s29 + $0x534] sm:$0xff] %v12768_v24  ;;  %v8403_v14 = vadd.f32 1.0, %v15679_v54  ;;  %15706 = vpow2.f32 %v12255_v33 }
 0x911   : > { %v15683_v44 = vpop.eup %15682  ;;  %v12772_v36 = vpack.c.bf16 %v15681_v19, %v15677_v62  ;;  %15708 = vpow2.f32 %v12261_v38 }
 0x912   : > { %v15685_v4 = vpop.eup %15684  ;;  %15710 = vrcp.f32 %v8403_v14  ;;  %v8404_v29 = vadd.f32 1.0, %v15683_v44  ;;  %v6399_v44 = vpop.f32.mrf.mxu0 }
 0x913   : > { %v15687_v45 = vpop.eup %15686  ;;  %10981 = vst [vmem:[%s18458_s29 + $0x550] sm:$0xff] %v12772_v36  ;;  %15712 = vpow2.f32 %v12262_v43  ;;  %v12297_v43 = vmul.f32 -1.442695, %v6390_v12  ;;  %v6400_v3 = vadd.f32 %v6399_v44, %v19583_v61 }
 0x914   : > { %v15689_v46 = vpop.eup %15688  ;;  %15714 = vrcp.f32 %v8404_v29  ;;  %v8410_v63 = vadd.f32 1.0, %v15687_v45 }
 0x915   : > { %v15691_v6 = vpop.eup %15690  ;;  %v12776_v28 = vpack.c.bf16 %v15689_v46, %v15685_v4  ;;  %15716 = vpow2.f32 %v12268_v55 }
 0x916   : > { %v15693_v26 = vpop.eup %15692  ;;  %15718 = vrcp.f32 %v8410_v63  ;;  %v8411_v31 = vadd.f32 1.0, %v15691_v6 }
 0x917   : > { %v15695_v8 = vpop.eup %15694  ;;  %10985 = vst [vmem:[%s18458_s29 + $0x56c] sm:$0xff] %v12776_v28  ;;  %15720 = vpow2.f32 %v12269_v0  ;;  %v12304_v0 = vmul.f32 -1.442695, %v6396_v41 }
 0x918   : > { %v15697_v32 = vpop.eup %15696  ;;  %15722 = vrcp.f32 %v8411_v31  ;;  %v8417_v39 = vadd.f32 1.0, %v15695_v8 }
 0x919   : > { %v15699_v47 = vpop.eup %15698  ;;  %v12780_v50 = vpack.c.bf16 %v15697_v32, %v15693_v26  ;;  %15724 = vpow2.f32 %v12275_v51  ;;  %v12310_v51 = vmul.f32 -1.442695, %v6398_v16  ;;  %v12311_v26 = vmul.f32 -1.442695, %v6400_v3 }
 0x91a   : > { %v15701_v57 = vpop.eup %15700  ;;  %15726 = vrcp.f32 %v8417_v39  ;;  %v8418_v9 = vadd.f32 1.0, %v15699_v47 }
 0x91b   : > { %v15703_v18 = vpop.eup %15702  ;;  %10989 = vst [vmem:[%s18458_s29 + $0x588] sm:$0xff] %v12780_v50  ;;  %15728 = vpow2.f32 %v12276_v7 }
 0x91c   : > { %v15705_v27 = vpop.eup %15704  ;;  %15730 = vrcp.f32 %v8418_v9  ;;  %v8424_v30 = vadd.f32 1.0, %v15703_v18 }
 0x91d   : > { %v15707_v25 = vpop.eup %15706  ;;  %v12784_v48 = vpack.c.bf16 %v15705_v27, %v15701_v57  ;;  %15732 = vpow2.f32 %v12282_v37 }
 0x91e   : > { %v15709_v11 = vpop.eup %15708  ;;  %15734 = vrcp.f32 %v8424_v30  ;;  %v8425_v53 = vadd.f32 1.0, %v15707_v25 }
 0x91f   : > { %v15711_v35 = vpop.eup %15710  ;;  %10993 = vst [vmem:[%s18458_s29 + $0x5a4] sm:$0xff] %v12784_v48  ;;  %v8431_v58 = vadd.f32 1.0, %v15709_v11  ;;  %15736 = vpow2.f32 %v12283_v22 }
 0x920   : > { %v15713_v2 = vpop.eup %15712  ;;  %15738 = vrcp.f32 %v8425_v53 }
 0x921   : > { %v15715_v52 = vpop.eup %15714  ;;  %15740 = vrcp.f32 %v8431_v58  ;;  %v8432_v33 = vadd.f32 1.0, %v15713_v2 }
 0x922   : > { %v15717_v23 = vpop.eup %15716  ;;  %v12788_v38 = vpack.c.bf16 %v15715_v52, %v15711_v35  ;;  %15742 = vpow2.f32 %v12289_v10 }
 0x923   : > { %v15719_v62 = vpop.eup %15718  ;;  %15744 = vrcp.f32 %v8432_v33  ;;  %v8438_v24 = vadd.f32 1.0, %v15717_v23 }
 0x924   : > { %v15721_v54 = vpop.eup %15720  ;;  %10997 = vst [vmem:[%s18458_s29 + $0x5c0] sm:$0xff] %v12788_v38  ;;  %15746 = vpow2.f32 %v12290_v59 }
 0x925   : > { %v15723_v19 = vpop.eup %15722  ;;  %15748 = vrcp.f32 %v8438_v24  ;;  %v8439_v14 = vadd.f32 1.0, %v15721_v54 }
 0x926   : > { %v15725_v36 = vpop.eup %15724  ;;  %v12792_v55 = vpack.c.bf16 %v15723_v19, %v15719_v62  ;;  %15750 = vpow2.f32 %v12296_v20 }
 0x927   : > { %v15727_v4 = vpop.eup %15726  ;;  %15752 = vrcp.f32 %v8439_v14  ;;  %v8445_v29 = vadd.f32 1.0, %v15725_v36 }
 0x928   : > { %v15729_v45 = vpop.eup %15728  ;;  %11001 = vst [vmem:[%s18458_s29 + $0x5dc] sm:$0xff] %v12792_v55  ;;  %15754 = vpow2.f32 %v12297_v43 }
 0x929   : > { %v15731_v46 = vpop.eup %15730  ;;  %15756 = vrcp.f32 %v8445_v29  ;;  %v8446_v63 = vadd.f32 1.0, %v15729_v45 }
 0x92a   : > { %v15733_v6 = vpop.eup %15732  ;;  %v12796_v28 = vpack.c.bf16 %v15731_v46, %v15727_v4  ;;  %15758 = vpow2.f32 %v12303_v5 }
 0x92b   : > { %v15735_v34 = vpop.eup %15734  ;;  %15760 = vrcp.f32 %v8446_v63  ;;  %v8452_v56 = vadd.f32 1.0, %v15733_v6 }
 0x92c   : > { %v15737_v40 = vpop.eup %15736  ;;  %11005 = vst [vmem:[%s18458_s29 + $0x5f8] sm:$0xff] %v12796_v28  ;;  %15762 = vpow2.f32 %v12304_v0 }
 0x92d   : > { %v15739_v31 = vpop.eup %15738  ;;  %15764 = vrcp.f32 %v8452_v56  ;;  %v8453_v8 = vadd.f32 1.0, %v15737_v40 }
 0x92e   : > { %v15741_v61 = vpop.eup %15740  ;;  %v12800_v7 = vpack.c.bf16 %v15739_v31, %v15735_v34  ;;  %15766 = vpow2.f32 %v12310_v51 }
 0x92f   : > { %v15743_v21 = vpop.eup %15742  ;;  %15768 = vrcp.f32 %v8453_v8 }
 0x930   : > { %v15745_v32 = vpop.eup %15744  ;;  %11009 = vst [vmem:[%s18458_s29 + $0x614] sm:$0xff] %v12800_v7  ;;  %v8459_v39 = vadd.f32 1.0, %v15743_v21  ;;  %15770 = vpow2.f32 %v12311_v26 }
 0x931   : > { %v15747_v47 = vpop.eup %15746  ;;  %v12804_v50 = vpack.c.bf16 %v15745_v32, %v15741_v61 }
 0x932   : > { %v15749_v37 = vpop.eup %15748  ;;  %v8460_v49 = vadd.f32 1.0, %v15747_v47  ;;  %15772 = vrcp.f32 %v8459_v39 }
 0x933   : > { %v15751_v57 = vpop.eup %15750  ;;  %11013 = vst [vmem:[%s18458_s29 + $0x630] sm:$0xff] %v12804_v50 }
 0x934   : > { %v15753_v9 = vpop.eup %15752  ;;  %15774 = vrcp.f32 %v8460_v49  ;;  %v8466_v13 = vadd.f32 1.0, %v15751_v57 }
 0x935   : > { %v15755_v18 = vpop.eup %15754  ;;  %v12808_v22 = vpack.c.bf16 %v15753_v9, %v15749_v37 }
 0x936   : > { %v15757_v27 = vpop.eup %15756  ;;  %v8467_v30 = vadd.f32 1.0, %v15755_v18  ;;  %15776 = vrcp.f32 %v8466_v13 }
 0x937   : > { %v15759_v60 = vpop.eup %15758  ;;  %11017 = vst [vmem:[%s18458_s29 + $0x64c] sm:$0xff] %v12808_v22 }
 0x938   : > { %v15761_v25 = vpop.eup %15760  ;;  %15778 = vrcp.f32 %v8467_v30  ;;  %v8473_v48 = vadd.f32 1.0, %v15759_v60 }
 0x939   : > { %v15763_v1 = vpop.eup %15762  ;;  %v12812_v11 = vpack.c.bf16 %v15761_v25, %v15757_v27 }
 0x93a   : > { %v15765_v53 = vpop.eup %15764  ;;  %v8474_v10 = vadd.f32 1.0, %v15763_v1  ;;  %15780 = vrcp.f32 %v8473_v48 }
 0x93b   : > { %v15767_v15 = vpop.eup %15766  ;;  %11021 = vst [vmem:[%s18458_s29 + $0x668] sm:$0xff] %v12812_v11 }
 0x93c   : > { %v15769_v35 = vpop.eup %15768  ;;  %15782 = vrcp.f32 %v8474_v10  ;;  %v8480_v58 = vadd.f32 1.0, %v15767_v15 }
 0x93d   : > { %v15771_v2 = vpop.eup %15770  ;;  %v12816_v59 = vpack.c.bf16 %v15769_v35, %v15765_v53 }
 0x93e   : > { %v8481_v12 = vadd.f32 1.0, %v15771_v2  ;;  %15784 = vrcp.f32 %v8480_v58 }
 0x93f   : > { %11025 = vst [vmem:[%s18458_s29 + $0x684] sm:$0xff] %v12816_v59  ;;  %v15773_v52 = vpop.eup %15772 }
 0x940   : > { %15786 = vrcp.f32 %v8481_v12 }
 0x941   : > { %v15775_v33 = vpop.eup %15774 }
 0x942   : > { %v12820_v42 = vpack.c.bf16 %v15775_v33, %v15773_v52 }
 0x943   : > { %v15777_v23 = vpop.eup %15776 }
 0x944   : > { %11029 = vst [vmem:[%s18458_s29 + $0x6a0] sm:$0xff] %v12820_v42 }
 0x945   : > { %v15779_v38 = vpop.eup %15778 }
 0x946   : > { %v12824_v20 = vpack.c.bf16 %v15779_v38, %v15777_v23 }
 0x947   : > { %v15781_v17 = vpop.eup %15780 }
 0x948   : > { %11033 = vst [vmem:[%s18458_s29 + $0x6bc] sm:$0xff] %v12824_v20 }
 0x949   : > { %v15783_v62 = vpop.eup %15782 }
 0x94a   : > { %v12828_v24 = vpack.c.bf16 %v15783_v62, %v15781_v17 }
 0x94b   : > { %v15785_v54 = vpop.eup %15784 }
 0x94c   : > { %11037 = vst [vmem:[%s18458_s29 + $0x6d8] sm:$0xff] %v12828_v24 }
 0x94d   : > { %v15787_v43 = vpop.eup %15786 }
 0x94e   : > { %v12832_v41 = vpack.c.bf16 %v15787_v43, %v15785_v54 }
 0x950   : > { %11041 = vst [vmem:[%s18458_s29 + $0x6f4] sm:$0xff] %v12832_v41 }
 0x951   : > { %16094 = shalt.err (!%p16091_p13)
}
 0x952   : > { %s16095_s29 = scalar_lea.hbm %s20209_s25, 28672  ;;  %s16099_s8 = scalar_lea.hbm %s20265_s10, 57344 }
 0x953   : > { %p16096_p0 = scmp.ne.s32.totalorder %s20209_s25, %s16095_s29  ;;  %p16100_p10 = scmp.lt.s32.totalorder %s20209_s25, %s20265_s10 }
 0x954   : > { %p16101_p12 = scmp.lt.s32.totalorder %s16099_s8, %s16095_s29 }
 0x955   : > { %p16097_p4 = pnand %p16096_p0, %p20547_p5 }
 0x956   : > { %p16102_p2 = por %p16101_p12, %p16100_p10 }
 0x957   : > { %p16098_p8 = pneg %p16097_p4 }
 0x959   : > { %p16103_p1 = pnand %p16102_p2, %p16098_p8 }
 0x95b   : > { %16106 = shalt.err (!%p16103_p1)
}
 0x95c   : > { %s16196_s14 = smov 448   ;;  %s16197_s4 = smov 28  }
 0x95d   : > { %13268 = dma.vmem_to_hbm [thread:$0]  (%p20547_p5), %s20211_s7, 28672, %s20209_s25, %s11236_s9, %s16196_s14, %s16196_s14, %s16197_s4  }
 0x95e PF: > { %s11287_s15 = sand.u32 1, %s16161_s17   ;;  %p20548_p7 = scmp.ne.s32.totalorder %s20343_s28, 0 }
 0x95f   : > { %p20549_p9 = scmp.ge.s32.totalorder %s16173_s20, 2  ;;  %s11288_s5 = scalar_lea.sflag [#allocation4], %s11287_s15 }
 0x961   : > { %p13305_p11 = pnand %p20549_p9, %p20548_p7 }
 0x963   : > { %p13306_p3 = pneg %p13305_p11 }
 0x965   : > { %16152 = dma.done.wait (%p13306_p3), %s11288_s5, 28672  }
 0x966   : > { %16154 = vsyncadd (%p13306_p3), %s11288_s5, 4294938624  ;;  %s11297_s6 = scalar_lea.sflag [#allocation21], %s11287_s15 }
 0x967   : > { %16156 = dma.done.wait (%p13306_p3), %s11297_s6, 24576  }
 0x968   : > { %16158 = vsyncadd (%p13306_p3), %s11297_s6, 4294942720  ;;  %p35_p5 = scmp.ge.s32.totalorder %s16380_s27, 4   ;;  %s20550_s17 = smov %s16165_s18 }
 0x969   : > { %s20551_s18 = smov %s16169_s19  ;;  %s20552_s19 = smov %s16391_s16 }
 0x96a   : > { %s20553_s20 = smov %s16380_s27  ;;  %37 = sbr.rel (!%p35_p5) target bundleno = 23 (0x17), region = 167 }
 0x96f   :  { %11302 = vsyncpa [#allocation3], 1 }
 0x970   :  { %11304 = vsyncpa [#allocation3 + $0x1], 1 }
 0x971   :  { %11305 = vsyncpa [#allocation6], 1 }
 0x972   :  { %11307 = vsyncpa [#allocation6 + $0x1], 1 }
 0x973   :  { %11308 = vsyncpa [#allocation9], 1 }
 0x974   :  { %11309 = vsyncpa [#allocation12], 1 }
 0x975   :  { %11310 = vsyncpa [#allocation15], 1 }
 0x976   :  { %11311 = vsyncpa [#allocation18], 1 }
 0x977   :  { %11312 = vsyncpa [#allocation4], 1 }
 0x978   :  { %11314 = vsyncpa [#allocation4 + $0x1], 1 }
 0x979   :  { %11315 = vsyncpa [#allocation21], 1 }
 0x97a   :  { %11317 = vsyncpa [#allocation21 + $0x1], 1 }

</bundles_post_ra>
